<compile_context>
chip_gen: v7x
topology: tpu7x:2x2x1
jax: 0.10.0
libtpu: 0.0.40
codegen_flags: <defaults>
</compile_context>

<pallas_src>
import jax
import jax.numpy as jnp
from jax.experimental import pallas as pl
from jax.experimental.pallas import tpu as pltpu

# --- config (small, consistent with the module) ---
B = 2               # batch
T = 8               # sequence length
HIDDEN = 32         # config.hidden_size
HEADS = 4           # config.num_attention_heads
HEAD_DIM = HIDDEN // HEADS
INTERMEDIATE = 64   # config.intermediate_size
EPS = 1e-5          # config.layer_norm_eps
SCALING = HEAD_DIM ** -0.5
N_LAYERS = 4        # attention layers per stream


# ----------------------------- in-kernel math helpers -----------------------------
def _erf(x):
    # Abramowitz & Stegun 7.1.26 (|err| < 1.5e-7); mul/add/exp/where only, with the
    # divide routed to the EUP via pl.reciprocal.
    a1, a2, a3, a4, a5 = 0.254829592, -0.284496736, 1.421413741, -1.453152027, 1.061405429
    pp = 0.3275911
    sign = jnp.where(x >= 0.0, 1.0, -1.0)
    ax = jnp.abs(x)
    t = pl.reciprocal(1.0 + pp * ax, approx=False)
    poly = ((((a5 * t + a4) * t + a3) * t + a2) * t + a1) * t
    return sign * (1.0 - poly * jnp.exp(-ax * ax))


def _gelu_exact(x):
    # matches torch.nn.functional.gelu (erf-based) to ~1.5e-7
    return 0.5 * x * (1.0 + _erf(x * 0.7071067811865476))


# ----------------------------------- kernel ---------------------------------------
def _make_kernel(bsz):
    R = bsz * T
    H = HIDDEN

    def kernel(x_ref, qkv_w_ref, qkv_b_ref, ow_ref, ob_ref, ln_ref,
               ffw1_ref, ffb1_ref, ffw2_ref, ffb2_ref, o_ref):
        x = x_ref[...]                             # (bsz, 2, T, H)
        h1 = x[:, 0].reshape(R, H)                 # stream 1, rows = batch*time
        h2 = x[:, 1].reshape(R, H)                 # stream 2
        res1, res2 = h1, h2

        def layer_norm(y, s, which):
            # which: 0 = layer_norm{s+1}, 1 = final_layer_norm{s+1}
            g = ln_ref[(s * 2 + which) * 2 + 0]    # (1, H)
            b = ln_ref[(s * 2 + which) * 2 + 1]    # (1, H)
            mu = jnp.mean(y, axis=-1, keepdims=True)
            var = jnp.mean((y - mu) ** 2, axis=-1, keepdims=True)
            return (y - mu) * jax.lax.rsqrt(var + EPS) * g + b

        def proj(y, idx):
            # packed QKV projection: (R, H) @ (H, 3H) + (1, 3H); columns = [Q*scale|K|V]
            return jnp.dot(y, qkv_w_ref[idx],
                           preferred_element_type=jnp.float32) + qkv_b_ref[idx]

        def heads(y):
            # (R, H) -> (HEADS*bsz, T, HEAD_DIM); n = h*bsz + b
            hs = [y[:, h * HEAD_DIM:(h + 1) * HEAD_DIM].reshape(bsz, T, HEAD_DIM)
                  for h in range(HEADS)]
            return jnp.stack(hs, axis=0).reshape(HEADS * bsz, T, HEAD_DIM)

        def attn_core(q, k, v, idx):
            qh, kh, vh = heads(q), heads(k), heads(v)
            sc = jnp.einsum('nqd,nkd->nqk', qh, kh, preferred_element_type=jnp.float32)
            sc = sc - jnp.max(sc, axis=-1, keepdims=True)
            p = jnp.exp(sc)
            p = p * pl.reciprocal(jnp.sum(p, axis=-1, keepdims=True), approx=False)
            oh = jnp.einsum('nqk,nkd->nqd', p, vh, preferred_element_type=jnp.float32)
            o4 = oh.reshape(HEADS, bsz, T, HEAD_DIM)
            o = jnp.concatenate([o4[h] for h in range(HEADS)], axis=-1).reshape(R, H)
            return jnp.dot(o, ow_ref[idx],
                           preferred_element_type=jnp.float32) + ob_ref[idx]

        def feed_forward(y, s):
            z = jnp.dot(y, ffw1_ref[s], preferred_element_type=jnp.float32) + ffb1_ref[s]
            z = _gelu_exact(z)
            return jnp.dot(z, ffw2_ref[s], preferred_element_type=jnp.float32) + ffb2_ref[s]

        def qs(p_): return p_[:, 0:H]
        def ks(p_): return p_[:, H:2 * H]
        def vs(p_): return p_[:, 2 * H:3 * H]

        # --- SelfDocLayer.forward sequencing (dropouts identity in eval mode) ---
        x1n = layer_norm(h1, 0, 0)                       # layer_norm1
        x2n = layer_norm(h2, 1, 0)                       # layer_norm2

        # layer 0 (selfdoc): stream1 Q=x1n K=x2n V=x1n; stream2 Q=x2n K=new h1 V=x2n
        pa = proj(x1n, 0); pb = proj(x2n, 0)
        h1 = attn_core(qs(pa), ks(pb), vs(pa), 0)
        pa = proj(x2n, 4); pb = proj(h1, 4)
        h2 = attn_core(qs(pa), ks(pb), vs(pa), 4)

        # layer 1 (self)
        pa = proj(h1, 1); h1 = attn_core(qs(pa), ks(pa), vs(pa), 1)
        pa = proj(h2, 5); h2 = attn_core(qs(pa), ks(pa), vs(pa), 5)

        # layer 2 (selfdoc): stream1 Q=h1 K=h1 V=h2; stream2 Q=h2 K=h2 V=new h1
        pa = proj(h1, 2); pb = proj(h2, 2)
        h1 = attn_core(qs(pa), ks(pa), vs(pb), 2)
        pa = proj(h2, 6); pb = proj(h1, 6)
        h2 = attn_core(qs(pa), ks(pa), vs(pb), 6)

        # layer 3 (self)
        pa = proj(h1, 3); h1 = attn_core(qs(pa), ks(pa), vs(pa), 3)
        pa = proj(h2, 7); h2 = attn_core(qs(pa), ks(pa), vs(pa), 7)

        # residual + final LN + FF + residual
        h1 = res1 + h1
        h2 = res2 + h2
        h1 = h1 + feed_forward(layer_norm(h1, 0, 1), 0)
        h2 = h2 + feed_forward(layer_norm(h2, 1, 1), 1)

        o_ref[:, 0] = h1.reshape(bsz, T, H)
        o_ref[:, 1] = h2.reshape(bsz, T, H)

    return kernel


# ------------------------------ host-side packing ----------------------------------
def pack_params(P):
    """Pack all 80 PyTorch-convention parameters into 9 arrays (few DMAs)."""
    qkv_w, qkv_b, out_w, out_b = [], [], [], []
    for skey in ('attn1', 'attn2'):
        for layer in P[skey]:
            wq = layer['wq'].T * SCALING     # scaling folded into Q weights/bias
            bq = layer['bq'] * SCALING
            wk, bk = layer['wk'].T, layer['bk']
            wv, bv = layer['wv'].T, layer['bv']
            qkv_w.append(jnp.concatenate([wq, wk, wv], axis=1))   # (H, 3H)
            qkv_b.append(jnp.concatenate([bq, bk, bv], axis=0))   # (3H,)
            out_w.append(layer['wo'].T)                           # (H, H)
            out_b.append(layer['bo'])                             # (H,)
    qkv_w = jnp.stack(qkv_w, axis=0)                 # (8, H, 3H)
    qkv_b = jnp.stack(qkv_b, axis=0)[:, None, :]     # (8, 1, 3H)
    out_w = jnp.stack(out_w, axis=0)                 # (8, H, H)
    out_b = jnp.stack(out_b, axis=0)[:, None, :]     # (8, 1, H)

    ln = []
    for s in ('1', '2'):
        ln += [P['ln' + s + '_g'], P['ln' + s + '_b'],
               P['fln' + s + '_g'], P['fln' + s + '_b']]
    ln_p = jnp.stack(ln, axis=0)[:, None, :]         # (8, 1, H)

    ffw1 = jnp.stack([P['ff1_w1'].T, P['ff2_w1'].T], axis=0)            # (2, H, I)
    ffb1 = jnp.stack([P['ff1_b1'], P['ff2_b1']], axis=0)[:, None, :]    # (2, 1, I)
    ffw2 = jnp.stack([P['ff1_w2'].T, P['ff2_w2'].T], axis=0)            # (2, I, H)
    ffb2 = jnp.stack([P['ff1_b2'], P['ff2_b2']], axis=0)[:, None, :]    # (2, 1, H)
    return (qkv_w, qkv_b, out_w, out_b, ln_p, ffw1, ffb1, ffw2, ffb2)


def selfdoc_forward(hidden_states, params):
    """hidden_states: (B, 2, T, H) float32. Returns (B, 2, T, H), like SelfDocLayer."""
    bsz, two, t, h = hidden_states.shape
    assert two == 2 and t == T and h == HIDDEN
    packed = pack_params(params)
    # Everything (activations + packed weights, ~60 KiB) fits in VMEM: no grid,
    # full-array refs, single invocation covering both streams and the full batch.
    return pl.pallas_call(
        _make_kernel(bsz),
        out_shape=jax.ShapeDtypeStruct((bsz, 2, T, HIDDEN), jnp.float32),
    )(hidden_states, *packed)


# ---------------- pure-JAX reference (mirrors the PyTorch module) ------------------
def ref_layer_norm(x, g, b):
    mu = x.mean(-1, keepdims=True)
    var = ((x - mu) ** 2).mean(-1, keepdims=True)
    return (x - mu) / jnp.sqrt(var + EPS) * g + b


def ref_mha(p, q_in, k_in, v_in):
    bsz, tgt, _ = q_in.shape
    q = (q_in @ p['wq'].T + p['bq']) * SCALING
    k = k_in @ p['wk'].T + p['bk']
    v = v_in @ p['wv'].T + p['bv']

    def shp(t):
        return t.reshape(bsz, -1, HEADS, HEAD_DIM).transpose(0, 2, 1, 3)

    q, k, v = shp(q), shp(k), shp(v)
    s = jnp.einsum('bhqd,bhkd->bhqk', q, k)
    w = jax.nn.softmax(s, axis=-1)
    o = jnp.einsum('bhqk,bhkd->bhqd', w, v).transpose(0, 2, 1, 3).reshape(bsz, tgt, HIDDEN)
    return o @ p['wo'].T + p['bo']


def ref_ff(x, w1, b1, w2, b2):
    y = jax.nn.gelu(x @ w1.T + b1, approximate=False)
    return y @ w2.T + b2


def ref_selfdoc(x, P):
    h1, h2 = x[:, 0], x[:, 1]
    r1, r2 = h1, h2
    h1 = ref_layer_norm(h1, P['ln1_g'], P['ln1_b'])
    h2 = ref_layer_norm(h2, P['ln2_g'], P['ln2_b'])
    A1, A2 = P['attn1'], P['attn2']
    h1 = ref_mha(A1[0], h1, h2, h1)
    h2 = ref_mha(A2[0], h2, h1, h2)
    h1 = ref_mha(A1[1], h1, h1, h1)
    h2 = ref_mha(A2[1], h2, h2, h2)
    h1 = ref_mha(A1[2], h1, h1, h2)
    h2 = ref_mha(A2[2], h2, h2, h1)
    h1 = ref_mha(A1[3], h1, h1, h1)
    h2 = ref_mha(A2[3], h2, h2, h2)
    h1 = r1 + h1
    h2 = r2 + h2
    h1 = h1 + ref_ff(ref_layer_norm(h1, P['fln1_g'], P['fln1_b']),
                     P['ff1_w1'], P['ff1_b1'], P['ff1_w2'], P['ff1_b2'])
    h2 = h2 + ref_ff(ref_layer_norm(h2, P['fln2_g'], P['fln2_b']),
                     P['ff2_w1'], P['ff2_b1'], P['ff2_w2'], P['ff2_b2'])
    return jnp.stack([h1, h2], axis=1)


# --------------------------------- params / main ------------------------------------
def make_params(key):
    keys = iter(jax.random.split(key, 96))
    f = jnp.float32

    def mat(o, i):
        return 0.1 * jax.random.normal(next(keys), (o, i), f)

    def vec(d, scale=0.1):
        return scale * jax.random.normal(next(keys), (d,), f)

    def mha_params():
        return dict(wq=mat(HIDDEN, HIDDEN), bq=vec(HIDDEN),
                    wk=mat(HIDDEN, HIDDEN), bk=vec(HIDDEN),
                    wv=mat(HIDDEN, HIDDEN), bv=vec(HIDDEN),
                    wo=mat(HIDDEN, HIDDEN), bo=vec(HIDDEN))

    P = {'attn1': [mha_params() for _ in range(N_LAYERS)],
         'attn2': [mha_params() for _ in range(N_LAYERS)]}
    for s in ('1', '2'):
        P['ln' + s + '_g'] = 1.0 + vec(HIDDEN)
        P['ln' + s + '_b'] = vec(HIDDEN)
        P['fln' + s + '_g'] = 1.0 + vec(HIDDEN)
        P['fln' + s + '_b'] = vec(HIDDEN)
        P['ff' + s + '_w1'] = mat(INTERMEDIATE, HIDDEN)
        P['ff' + s + '_b1'] = vec(INTERMEDIATE)
        P['ff' + s + '_w2'] = mat(HIDDEN, INTERMEDIATE)
        P['ff' + s + '_b2'] = vec(HIDDEN)
    return P


if __name__ == "__main__":
    key = jax.random.PRNGKey(0)
    kx, kp = jax.random.split(key)
    x = jax.random.normal(kx, (B, 2, T, HIDDEN), jnp.float32)
    params = make_params(kp)

    out = selfdoc_forward(x, params)
    out = jax.block_until_ready(out)

    ref = ref_selfdoc(x, params)
    assert out.shape == (B, 2, T, HIDDEN)
    max_err = float(jnp.max(jnp.abs(out - ref)))
    assert jnp.allclose(out, ref, rtol=1e-3, atol=2e-4), max_err

    print("KERNEL_OK")
</pallas_src>

<mosaic_0001>
module attributes {stable_mosaic.version = 11 : i64} {
  func.func @kernel(%arg0: memref<2x2x8x32xf32, #tpu.memory_space<vmem>>, %arg1: memref<8x32x96xf32, #tpu.memory_space<vmem>>, %arg2: memref<8x1x96xf32, #tpu.memory_space<vmem>>, %arg3: memref<8x32x32xf32, #tpu.memory_space<vmem>>, %arg4: memref<8x1x32xf32, #tpu.memory_space<vmem>>, %arg5: memref<8x1x32xf32, #tpu.memory_space<vmem>>, %arg6: memref<2x32x64xf32, #tpu.memory_space<vmem>>, %arg7: memref<2x1x64xf32, #tpu.memory_space<vmem>>, %arg8: memref<2x64x32xf32, #tpu.memory_space<vmem>>, %arg9: memref<2x1x32xf32, #tpu.memory_space<vmem>>, %arg10: memref<2x2x8x32xf32, #tpu.memory_space<vmem>>) attributes {dimension_semantics = [], scalar_prefetch = 0 : i64, scratch_operands = 0 : i64, tpu.core_type = #tpu.core_type<tc>} {
    %c0 = arith.constant 0 : index
    %c0_0 = arith.constant 0 : index
    %c0_1 = arith.constant 0 : index
    %c0_2 = arith.constant 0 : index
    %0 = vector.load %arg0[%c0, %c0_0, %c0_1, %c0_2] : memref<2x2x8x32xf32, #tpu.memory_space<vmem>>, vector<2x2x8x32xf32>
    %1 = vector.extract_strided_slice %0 {offsets = [0, 0, 0, 0], sizes = [2, 1, 8, 32], strides = [1, 1, 1, 1]} : vector<2x2x8x32xf32> to vector<2x1x8x32xf32>
    %2 = vector.shape_cast %1 : vector<2x1x8x32xf32> to vector<2x8x32xf32>
    %3 = vector.shape_cast %2 : vector<2x8x32xf32> to vector<16x32xf32>
    %4 = vector.extract_strided_slice %0 {offsets = [0, 1, 0, 0], sizes = [2, 1, 8, 32], strides = [1, 1, 1, 1]} : vector<2x2x8x32xf32> to vector<2x1x8x32xf32>
    %5 = vector.shape_cast %4 : vector<2x1x8x32xf32> to vector<2x8x32xf32>
    %6 = vector.shape_cast %5 : vector<2x8x32xf32> to vector<16x32xf32>
    %c0_3 = arith.constant 0 : index
    %c0_4 = arith.constant 0 : index
    %c0_5 = arith.constant 0 : index
    %7 = vector.load %arg5[%c0_3, %c0_4, %c0_5] : memref<8x1x32xf32, #tpu.memory_space<vmem>>, vector<1x1x32xf32>
    %8 = vector.shape_cast %7 : vector<1x1x32xf32> to vector<1x32xf32>
    %c1 = arith.constant 1 : index
    %c0_6 = arith.constant 0 : index
    %c0_7 = arith.constant 0 : index
    %9 = vector.load %arg5[%c1, %c0_6, %c0_7] : memref<8x1x32xf32, #tpu.memory_space<vmem>>, vector<1x1x32xf32>
    %10 = vector.shape_cast %9 : vector<1x1x32xf32> to vector<1x32xf32>
    %cst = arith.constant dense<0.000000e+00> : vector<16xf32>
    %11 = vector.multi_reduction <add>, %3, %cst [1] : vector<16x32xf32> to vector<16xf32>
    %12 = vector.shape_cast %11 : vector<16xf32> to vector<16x1xf32>
    %cst_8 = arith.constant 3.200000e+01 : f32
    %13 = vector.broadcast %cst_8 : f32 to vector<16x1xf32>
    %14 = arith.divf %12, %13 : vector<16x1xf32>
    %15 = vector.broadcast %14 : vector<16x1xf32> to vector<16x32xf32>
    %16 = arith.subf %3, %15 : vector<16x32xf32>
    %17 = arith.mulf %16, %16 : vector<16x32xf32>
    %cst_9 = arith.constant dense<0.000000e+00> : vector<16xf32>
    %18 = vector.multi_reduction <add>, %17, %cst_9 [1] : vector<16x32xf32> to vector<16xf32>
    %19 = vector.shape_cast %18 : vector<16xf32> to vector<16x1xf32>
    %cst_10 = arith.constant 3.200000e+01 : f32
    %20 = vector.broadcast %cst_10 : f32 to vector<16x1xf32>
    %21 = arith.divf %19, %20 : vector<16x1xf32>
    %22 = vector.broadcast %14 : vector<16x1xf32> to vector<16x32xf32>
    %23 = arith.subf %3, %22 : vector<16x32xf32>
    %cst_11 = arith.constant 9.99999974E-6 : f32
    %24 = vector.broadcast %cst_11 : f32 to vector<16x1xf32>
    %25 = arith.addf %21, %24 : vector<16x1xf32>
    %26 = math.rsqrt %25 : vector<16x1xf32>
    %27 = vector.broadcast %26 : vector<16x1xf32> to vector<16x32xf32>
    %28 = arith.mulf %23, %27 : vector<16x32xf32>
    %29 = vector.broadcast %8 : vector<1x32xf32> to vector<16x32xf32>
    %30 = arith.mulf %28, %29 : vector<16x32xf32>
    %31 = vector.broadcast %10 : vector<1x32xf32> to vector<16x32xf32>
    %32 = arith.addf %30, %31 : vector<16x32xf32>
    %c4 = arith.constant 4 : index
    %c0_12 = arith.constant 0 : index
    %c0_13 = arith.constant 0 : index
    %33 = vector.load %arg5[%c4, %c0_12, %c0_13] : memref<8x1x32xf32, #tpu.memory_space<vmem>>, vector<1x1x32xf32>
    %34 = vector.shape_cast %33 : vector<1x1x32xf32> to vector<1x32xf32>
    %c5 = arith.constant 5 : index
    %c0_14 = arith.constant 0 : index
    %c0_15 = arith.constant 0 : index
    %35 = vector.load %arg5[%c5, %c0_14, %c0_15] : memref<8x1x32xf32, #tpu.memory_space<vmem>>, vector<1x1x32xf32>
    %36 = vector.shape_cast %35 : vector<1x1x32xf32> to vector<1x32xf32>
    %cst_16 = arith.constant dense<0.000000e+00> : vector<16xf32>
    %37 = vector.multi_reduction <add>, %6, %cst_16 [1] : vector<16x32xf32> to vector<16xf32>
    %38 = vector.shape_cast %37 : vector<16xf32> to vector<16x1xf32>
    %cst_17 = arith.constant 3.200000e+01 : f32
    %39 = vector.broadcast %cst_17 : f32 to vector<16x1xf32>
    %40 = arith.divf %38, %39 : vector<16x1xf32>
    %41 = vector.broadcast %40 : vector<16x1xf32> to vector<16x32xf32>
    %42 = arith.subf %6, %41 : vector<16x32xf32>
    %43 = arith.mulf %42, %42 : vector<16x32xf32>
    %cst_18 = arith.constant dense<0.000000e+00> : vector<16xf32>
    %44 = vector.multi_reduction <add>, %43, %cst_18 [1] : vector<16x32xf32> to vector<16xf32>
    %45 = vector.shape_cast %44 : vector<16xf32> to vector<16x1xf32>
    %cst_19 = arith.constant 3.200000e+01 : f32
    %46 = vector.broadcast %cst_19 : f32 to vector<16x1xf32>
    %47 = arith.divf %45, %46 : vector<16x1xf32>
    %48 = vector.broadcast %40 : vector<16x1xf32> to vector<16x32xf32>
    %49 = arith.subf %6, %48 : vector<16x32xf32>
    %cst_20 = arith.constant 9.99999974E-6 : f32
    %50 = vector.broadcast %cst_20 : f32 to vector<16x1xf32>
    %51 = arith.addf %47, %50 : vector<16x1xf32>
    %52 = math.rsqrt %51 : vector<16x1xf32>
    %53 = vector.broadcast %52 : vector<16x1xf32> to vector<16x32xf32>
    %54 = arith.mulf %49, %53 : vector<16x32xf32>
    %55 = vector.broadcast %34 : vector<1x32xf32> to vector<16x32xf32>
    %56 = arith.mulf %54, %55 : vector<16x32xf32>
    %57 = vector.broadcast %36 : vector<1x32xf32> to vector<16x32xf32>
    %58 = arith.addf %56, %57 : vector<16x32xf32>
    %c0_21 = arith.constant 0 : index
    %c0_22 = arith.constant 0 : index
    %c0_23 = arith.constant 0 : index
    %59 = vector.load %arg1[%c0_21, %c0_22, %c0_23] : memref<8x32x96xf32, #tpu.memory_space<vmem>>, vector<1x32x96xf32>
    %60 = vector.shape_cast %59 : vector<1x32x96xf32> to vector<32x96xf32>
    %cst_24 = arith.constant dense<0.000000e+00> : vector<16x96xf32>
    %61 = tpu.matmul %32, %60, %cst_24 {dimension_numbers = #tpu.dot_dimension_numbers<[1], [0], [0], [1], [0, 0, 1, 1], [], []>} : vector<16x32xf32>, vector<32x96xf32>, vector<16x96xf32> -> vector<16x96xf32>
    %c0_25 = arith.constant 0 : index
    %c0_26 = arith.constant 0 : index
    %c0_27 = arith.constant 0 : index
    %62 = vector.load %arg2[%c0_25, %c0_26, %c0_27] : memref<8x1x96xf32, #tpu.memory_space<vmem>>, vector<1x1x96xf32>
    %63 = vector.shape_cast %62 : vector<1x1x96xf32> to vector<1x96xf32>
    %64 = vector.broadcast %63 : vector<1x96xf32> to vector<16x96xf32>
    %65 = arith.addf %61, %64 : vector<16x96xf32>
    %c0_28 = arith.constant 0 : index
    %c0_29 = arith.constant 0 : index
    %c0_30 = arith.constant 0 : index
    %66 = vector.load %arg1[%c0_28, %c0_29, %c0_30] : memref<8x32x96xf32, #tpu.memory_space<vmem>>, vector<1x32x96xf32>
    %67 = vector.shape_cast %66 : vector<1x32x96xf32> to vector<32x96xf32>
    %cst_31 = arith.constant dense<0.000000e+00> : vector<16x96xf32>
    %68 = tpu.matmul %58, %67, %cst_31 {dimension_numbers = #tpu.dot_dimension_numbers<[1], [0], [0], [1], [0, 0, 1, 1], [], []>} : vector<16x32xf32>, vector<32x96xf32>, vector<16x96xf32> -> vector<16x96xf32>
    %c0_32 = arith.constant 0 : index
    %c0_33 = arith.constant 0 : index
    %c0_34 = arith.constant 0 : index
    %69 = vector.load %arg2[%c0_32, %c0_33, %c0_34] : memref<8x1x96xf32, #tpu.memory_space<vmem>>, vector<1x1x96xf32>
    %70 = vector.shape_cast %69 : vector<1x1x96xf32> to vector<1x96xf32>
    %71 = vector.broadcast %70 : vector<1x96xf32> to vector<16x96xf32>
    %72 = arith.addf %68, %71 : vector<16x96xf32>
    %73 = vector.extract_strided_slice %65 {offsets = [0, 0], sizes = [16, 32], strides = [1, 1]} : vector<16x96xf32> to vector<16x32xf32>
    %74 = vector.extract_strided_slice %72 {offsets = [0, 32], sizes = [16, 32], strides = [1, 1]} : vector<16x96xf32> to vector<16x32xf32>
    %75 = vector.extract_strided_slice %65 {offsets = [0, 64], sizes = [16, 32], strides = [1, 1]} : vector<16x96xf32> to vector<16x32xf32>
    %76 = vector.extract_strided_slice %73 {offsets = [0, 0], sizes = [16, 8], strides = [1, 1]} : vector<16x32xf32> to vector<16x8xf32>
    %77 = vector.shape_cast %76 : vector<16x8xf32> to vector<2x8x8xf32>
    %78 = vector.extract_strided_slice %73 {offsets = [0, 8], sizes = [16, 8], strides = [1, 1]} : vector<16x32xf32> to vector<16x8xf32>
    %79 = vector.shape_cast %78 : vector<16x8xf32> to vector<2x8x8xf32>
    %80 = vector.extract_strided_slice %73 {offsets = [0, 16], sizes = [16, 8], strides = [1, 1]} : vector<16x32xf32> to vector<16x8xf32>
    %81 = vector.shape_cast %80 : vector<16x8xf32> to vector<2x8x8xf32>
    %82 = vector.extract_strided_slice %73 {offsets = [0, 24], sizes = [16, 8], strides = [1, 1]} : vector<16x32xf32> to vector<16x8xf32>
    %83 = vector.shape_cast %82 : vector<16x8xf32> to vector<2x8x8xf32>
    %84 = vector.shape_cast %77 : vector<2x8x8xf32> to vector<1x2x8x8xf32>
    %85 = vector.shape_cast %79 : vector<2x8x8xf32> to vector<1x2x8x8xf32>
    %86 = vector.shape_cast %81 : vector<2x8x8xf32> to vector<1x2x8x8xf32>
    %87 = vector.shape_cast %83 : vector<2x8x8xf32> to vector<1x2x8x8xf32>
    %88 = tpu.concatenate %84, %85, %86, %87 in 0 : vector<1x2x8x8xf32>, vector<1x2x8x8xf32>, vector<1x2x8x8xf32>, vector<1x2x8x8xf32> -> vector<4x2x8x8xf32>
    %89 = vector.shape_cast %88 : vector<4x2x8x8xf32> to vector<8x8x8xf32>
    %90 = vector.extract_strided_slice %74 {offsets = [0, 0], sizes = [16, 8], strides = [1, 1]} : vector<16x32xf32> to vector<16x8xf32>
    %91 = vector.shape_cast %90 : vector<16x8xf32> to vector<2x8x8xf32>
    %92 = vector.extract_strided_slice %74 {offsets = [0, 8], sizes = [16, 8], strides = [1, 1]} : vector<16x32xf32> to vector<16x8xf32>
    %93 = vector.shape_cast %92 : vector<16x8xf32> to vector<2x8x8xf32>
    %94 = vector.extract_strided_slice %74 {offsets = [0, 16], sizes = [16, 8], strides = [1, 1]} : vector<16x32xf32> to vector<16x8xf32>
    %95 = vector.shape_cast %94 : vector<16x8xf32> to vector<2x8x8xf32>
    %96 = vector.extract_strided_slice %74 {offsets = [0, 24], sizes = [16, 8], strides = [1, 1]} : vector<16x32xf32> to vector<16x8xf32>
    %97 = vector.shape_cast %96 : vector<16x8xf32> to vector<2x8x8xf32>
    %98 = vector.shape_cast %91 : vector<2x8x8xf32> to vector<1x2x8x8xf32>
    %99 = vector.shape_cast %93 : vector<2x8x8xf32> to vector<1x2x8x8xf32>
    %100 = vector.shape_cast %95 : vector<2x8x8xf32> to vector<1x2x8x8xf32>
    %101 = vector.shape_cast %97 : vector<2x8x8xf32> to vector<1x2x8x8xf32>
    %102 = tpu.concatenate %98, %99, %100, %101 in 0 : vector<1x2x8x8xf32>, vector<1x2x8x8xf32>, vector<1x2x8x8xf32>, vector<1x2x8x8xf32> -> vector<4x2x8x8xf32>
    %103 = vector.shape_cast %102 : vector<4x2x8x8xf32> to vector<8x8x8xf32>
    %104 = vector.extract_strided_slice %75 {offsets = [0, 0], sizes = [16, 8], strides = [1, 1]} : vector<16x32xf32> to vector<16x8xf32>
    %105 = vector.shape_cast %104 : vector<16x8xf32> to vector<2x8x8xf32>
    %106 = vector.extract_strided_slice %75 {offsets = [0, 8], sizes = [16, 8], strides = [1, 1]} : vector<16x32xf32> to vector<16x8xf32>
    %107 = vector.shape_cast %106 : vector<16x8xf32> to vector<2x8x8xf32>
    %108 = vector.extract_strided_slice %75 {offsets = [0, 16], sizes = [16, 8], strides = [1, 1]} : vector<16x32xf32> to vector<16x8xf32>
    %109 = vector.shape_cast %108 : vector<16x8xf32> to vector<2x8x8xf32>
    %110 = vector.extract_strided_slice %75 {offsets = [0, 24], sizes = [16, 8], strides = [1, 1]} : vector<16x32xf32> to vector<16x8xf32>
    %111 = vector.shape_cast %110 : vector<16x8xf32> to vector<2x8x8xf32>
    %112 = vector.shape_cast %105 : vector<2x8x8xf32> to vector<1x2x8x8xf32>
    %113 = vector.shape_cast %107 : vector<2x8x8xf32> to vector<1x2x8x8xf32>
    %114 = vector.shape_cast %109 : vector<2x8x8xf32> to vector<1x2x8x8xf32>
    %115 = vector.shape_cast %111 : vector<2x8x8xf32> to vector<1x2x8x8xf32>
    %116 = tpu.concatenate %112, %113, %114, %115 in 0 : vector<1x2x8x8xf32>, vector<1x2x8x8xf32>, vector<1x2x8x8xf32>, vector<1x2x8x8xf32> -> vector<4x2x8x8xf32>
    %117 = vector.shape_cast %116 : vector<4x2x8x8xf32> to vector<8x8x8xf32>
    "tpu.trace_start"() <{level = 10 : i32, message = "nqd,nkd->nqk"}> : () -> ()
    %cst_35 = arith.constant dense<0.000000e+00> : vector<8x8x8xf32>
    %118 = tpu.matmul %89, %103, %cst_35 {dimension_numbers = #tpu.dot_dimension_numbers<[2], [2], [1], [1], [0, 0, 0, 1, 1, 1], [0], [0]>} : vector<8x8x8xf32>, vector<8x8x8xf32>, vector<8x8x8xf32> -> vector<8x8x8xf32>
    "tpu.trace_stop"() : () -> ()
    %cst_36 = arith.constant dense<0xFF800000> : vector<8x8xf32>
    %119 = vector.multi_reduction <maximumf>, %118, %cst_36 [2] : vector<8x8x8xf32> to vector<8x8xf32>
    %120 = vector.shape_cast %119 : vector<8x8xf32> to vector<8x8x1xf32>
    %121 = vector.broadcast %120 : vector<8x8x1xf32> to vector<8x8x8xf32>
    %122 = arith.subf %118, %121 : vector<8x8x8xf32>
    %123 = math.exp %122 : vector<8x8x8xf32>
    %cst_37 = arith.constant dense<0.000000e+00> : vector<8x8xf32>
    %124 = vector.multi_reduction <add>, %123, %cst_37 [2] : vector<8x8x8xf32> to vector<8x8xf32>
    %125 = vector.shape_cast %124 : vector<8x8xf32> to vector<8x8x1xf32>
    %126 = tpu.reciprocal %125 : vector<8x8x1xf32> -> vector<8x8x1xf32>
    %127 = vector.broadcast %126 : vector<8x8x1xf32> to vector<8x8x8xf32>
    %128 = arith.mulf %123, %127 : vector<8x8x8xf32>
    "tpu.trace_start"() <{level = 10 : i32, message = "nqk,nkd->nqd"}> : () -> ()
    %cst_38 = arith.constant dense<0.000000e+00> : vector<8x8x8xf32>
    %129 = tpu.matmul %128, %117, %cst_38 {dimension_numbers = #tpu.dot_dimension_numbers<[2], [1], [1], [2], [0, 0, 0, 1, 1, 2], [0], [0]>} : vector<8x8x8xf32>, vector<8x8x8xf32>, vector<8x8x8xf32> -> vector<8x8x8xf32>
    "tpu.trace_stop"() : () -> ()
    %130 = vector.shape_cast %129 : vector<8x8x8xf32> to vector<4x2x8x8xf32>
    %131 = vector.extract_strided_slice %130 {offsets = [0, 0, 0, 0], sizes = [1, 2, 8, 8], strides = [1, 1, 1, 1]} : vector<4x2x8x8xf32> to vector<1x2x8x8xf32>
    %132 = vector.shape_cast %131 : vector<1x2x8x8xf32> to vector<2x8x8xf32>
    %133 = vector.extract_strided_slice %130 {offsets = [1, 0, 0, 0], sizes = [1, 2, 8, 8], strides = [1, 1, 1, 1]} : vector<4x2x8x8xf32> to vector<1x2x8x8xf32>
    %134 = vector.shape_cast %133 : vector<1x2x8x8xf32> to vector<2x8x8xf32>
    %135 = vector.extract_strided_slice %130 {offsets = [2, 0, 0, 0], sizes = [1, 2, 8, 8], strides = [1, 1, 1, 1]} : vector<4x2x8x8xf32> to vector<1x2x8x8xf32>
    %136 = vector.shape_cast %135 : vector<1x2x8x8xf32> to vector<2x8x8xf32>
    %137 = vector.extract_strided_slice %130 {offsets = [3, 0, 0, 0], sizes = [1, 2, 8, 8], strides = [1, 1, 1, 1]} : vector<4x2x8x8xf32> to vector<1x2x8x8xf32>
    %138 = vector.shape_cast %137 : vector<1x2x8x8xf32> to vector<2x8x8xf32>
    %139 = tpu.concatenate %132, %134, %136, %138 in 2 : vector<2x8x8xf32>, vector<2x8x8xf32>, vector<2x8x8xf32>, vector<2x8x8xf32> -> vector<2x8x32xf32>
    %140 = vector.shape_cast %139 : vector<2x8x32xf32> to vector<16x32xf32>
    %c0_39 = arith.constant 0 : index
    %c0_40 = arith.constant 0 : index
    %c0_41 = arith.constant 0 : index
    %141 = vector.load %arg3[%c0_39, %c0_40, %c0_41] : memref<8x32x32xf32, #tpu.memory_space<vmem>>, vector<1x32x32xf32>
    %142 = vector.shape_cast %141 : vector<1x32x32xf32> to vector<32x32xf32>
    %cst_42 = arith.constant dense<0.000000e+00> : vector<16x32xf32>
    %143 = tpu.matmul %140, %142, %cst_42 {dimension_numbers = #tpu.dot_dimension_numbers<[1], [0], [0], [1], [0, 0, 1, 1], [], []>} : vector<16x32xf32>, vector<32x32xf32>, vector<16x32xf32> -> vector<16x32xf32>
    %c0_43 = arith.constant 0 : index
    %c0_44 = arith.constant 0 : index
    %c0_45 = arith.constant 0 : index
    %144 = vector.load %arg4[%c0_43, %c0_44, %c0_45] : memref<8x1x32xf32, #tpu.memory_space<vmem>>, vector<1x1x32xf32>
    %145 = vector.shape_cast %144 : vector<1x1x32xf32> to vector<1x32xf32>
    %146 = vector.broadcast %145 : vector<1x32xf32> to vector<16x32xf32>
    %147 = arith.addf %143, %146 : vector<16x32xf32>
    %c4_46 = arith.constant 4 : index
    %c0_47 = arith.constant 0 : index
    %c0_48 = arith.constant 0 : index
    %148 = vector.load %arg1[%c4_46, %c0_47, %c0_48] : memref<8x32x96xf32, #tpu.memory_space<vmem>>, vector<1x32x96xf32>
    %149 = vector.shape_cast %148 : vector<1x32x96xf32> to vector<32x96xf32>
    %cst_49 = arith.constant dense<0.000000e+00> : vector<16x96xf32>
    %150 = tpu.matmul %58, %149, %cst_49 {dimension_numbers = #tpu.dot_dimension_numbers<[1], [0], [0], [1], [0, 0, 1, 1], [], []>} : vector<16x32xf32>, vector<32x96xf32>, vector<16x96xf32> -> vector<16x96xf32>
    %c4_50 = arith.constant 4 : index
    %c0_51 = arith.constant 0 : index
    %c0_52 = arith.constant 0 : index
    %151 = vector.load %arg2[%c4_50, %c0_51, %c0_52] : memref<8x1x96xf32, #tpu.memory_space<vmem>>, vector<1x1x96xf32>
    %152 = vector.shape_cast %151 : vector<1x1x96xf32> to vector<1x96xf32>
    %153 = vector.broadcast %152 : vector<1x96xf32> to vector<16x96xf32>
    %154 = arith.addf %150, %153 : vector<16x96xf32>
    %c4_53 = arith.constant 4 : index
    %c0_54 = arith.constant 0 : index
    %c0_55 = arith.constant 0 : index
    %155 = vector.load %arg1[%c4_53, %c0_54, %c0_55] : memref<8x32x96xf32, #tpu.memory_space<vmem>>, vector<1x32x96xf32>
    %156 = vector.shape_cast %155 : vector<1x32x96xf32> to vector<32x96xf32>
    %cst_56 = arith.constant dense<0.000000e+00> : vector<16x96xf32>
    %157 = tpu.matmul %147, %156, %cst_56 {dimension_numbers = #tpu.dot_dimension_numbers<[1], [0], [0], [1], [0, 0, 1, 1], [], []>} : vector<16x32xf32>, vector<32x96xf32>, vector<16x96xf32> -> vector<16x96xf32>
    %c4_57 = arith.constant 4 : index
    %c0_58 = arith.constant 0 : index
    %c0_59 = arith.constant 0 : index
    %158 = vector.load %arg2[%c4_57, %c0_58, %c0_59] : memref<8x1x96xf32, #tpu.memory_space<vmem>>, vector<1x1x96xf32>
    %159 = vector.shape_cast %158 : vector<1x1x96xf32> to vector<1x96xf32>
    %160 = vector.broadcast %159 : vector<1x96xf32> to vector<16x96xf32>
    %161 = arith.addf %157, %160 : vector<16x96xf32>
    %162 = vector.extract_strided_slice %154 {offsets = [0, 0], sizes = [16, 32], strides = [1, 1]} : vector<16x96xf32> to vector<16x32xf32>
    %163 = vector.extract_strided_slice %161 {offsets = [0, 32], sizes = [16, 32], strides = [1, 1]} : vector<16x96xf32> to vector<16x32xf32>
    %164 = vector.extract_strided_slice %154 {offsets = [0, 64], sizes = [16, 32], strides = [1, 1]} : vector<16x96xf32> to vector<16x32xf32>
    %165 = vector.extract_strided_slice %162 {offsets = [0, 0], sizes = [16, 8], strides = [1, 1]} : vector<16x32xf32> to vector<16x8xf32>
    %166 = vector.shape_cast %165 : vector<16x8xf32> to vector<2x8x8xf32>
    %167 = vector.extract_strided_slice %162 {offsets = [0, 8], sizes = [16, 8], strides = [1, 1]} : vector<16x32xf32> to vector<16x8xf32>
    %168 = vector.shape_cast %167 : vector<16x8xf32> to vector<2x8x8xf32>
    %169 = vector.extract_strided_slice %162 {offsets = [0, 16], sizes = [16, 8], strides = [1, 1]} : vector<16x32xf32> to vector<16x8xf32>
    %170 = vector.shape_cast %169 : vector<16x8xf32> to vector<2x8x8xf32>
    %171 = vector.extract_strided_slice %162 {offsets = [0, 24], sizes = [16, 8], strides = [1, 1]} : vector<16x32xf32> to vector<16x8xf32>
    %172 = vector.shape_cast %171 : vector<16x8xf32> to vector<2x8x8xf32>
    %173 = vector.shape_cast %166 : vector<2x8x8xf32> to vector<1x2x8x8xf32>
    %174 = vector.shape_cast %168 : vector<2x8x8xf32> to vector<1x2x8x8xf32>
    %175 = vector.shape_cast %170 : vector<2x8x8xf32> to vector<1x2x8x8xf32>
    %176 = vector.shape_cast %172 : vector<2x8x8xf32> to vector<1x2x8x8xf32>
    %177 = tpu.concatenate %173, %174, %175, %176 in 0 : vector<1x2x8x8xf32>, vector<1x2x8x8xf32>, vector<1x2x8x8xf32>, vector<1x2x8x8xf32> -> vector<4x2x8x8xf32>
    %178 = vector.shape_cast %177 : vector<4x2x8x8xf32> to vector<8x8x8xf32>
    %179 = vector.extract_strided_slice %163 {offsets = [0, 0], sizes = [16, 8], strides = [1, 1]} : vector<16x32xf32> to vector<16x8xf32>
    %180 = vector.shape_cast %179 : vector<16x8xf32> to vector<2x8x8xf32>
    %181 = vector.extract_strided_slice %163 {offsets = [0, 8], sizes = [16, 8], strides = [1, 1]} : vector<16x32xf32> to vector<16x8xf32>
    %182 = vector.shape_cast %181 : vector<16x8xf32> to vector<2x8x8xf32>
    %183 = vector.extract_strided_slice %163 {offsets = [0, 16], sizes = [16, 8], strides = [1, 1]} : vector<16x32xf32> to vector<16x8xf32>
    %184 = vector.shape_cast %183 : vector<16x8xf32> to vector<2x8x8xf32>
    %185 = vector.extract_strided_slice %163 {offsets = [0, 24], sizes = [16, 8], strides = [1, 1]} : vector<16x32xf32> to vector<16x8xf32>
    %186 = vector.shape_cast %185 : vector<16x8xf32> to vector<2x8x8xf32>
    %187 = vector.shape_cast %180 : vector<2x8x8xf32> to vector<1x2x8x8xf32>
    %188 = vector.shape_cast %182 : vector<2x8x8xf32> to vector<1x2x8x8xf32>
    %189 = vector.shape_cast %184 : vector<2x8x8xf32> to vector<1x2x8x8xf32>
    %190 = vector.shape_cast %186 : vector<2x8x8xf32> to vector<1x2x8x8xf32>
    %191 = tpu.concatenate %187, %188, %189, %190 in 0 : vector<1x2x8x8xf32>, vector<1x2x8x8xf32>, vector<1x2x8x8xf32>, vector<1x2x8x8xf32> -> vector<4x2x8x8xf32>
    %192 = vector.shape_cast %191 : vector<4x2x8x8xf32> to vector<8x8x8xf32>
    %193 = vector.extract_strided_slice %164 {offsets = [0, 0], sizes = [16, 8], strides = [1, 1]} : vector<16x32xf32> to vector<16x8xf32>
    %194 = vector.shape_cast %193 : vector<16x8xf32> to vector<2x8x8xf32>
    %195 = vector.extract_strided_slice %164 {offsets = [0, 8], sizes = [16, 8], strides = [1, 1]} : vector<16x32xf32> to vector<16x8xf32>
    %196 = vector.shape_cast %195 : vector<16x8xf32> to vector<2x8x8xf32>
    %197 = vector.extract_strided_slice %164 {offsets = [0, 16], sizes = [16, 8], strides = [1, 1]} : vector<16x32xf32> to vector<16x8xf32>
    %198 = vector.shape_cast %197 : vector<16x8xf32> to vector<2x8x8xf32>
    %199 = vector.extract_strided_slice %164 {offsets = [0, 24], sizes = [16, 8], strides = [1, 1]} : vector<16x32xf32> to vector<16x8xf32>
    %200 = vector.shape_cast %199 : vector<16x8xf32> to vector<2x8x8xf32>
    %201 = vector.shape_cast %194 : vector<2x8x8xf32> to vector<1x2x8x8xf32>
    %202 = vector.shape_cast %196 : vector<2x8x8xf32> to vector<1x2x8x8xf32>
    %203 = vector.shape_cast %198 : vector<2x8x8xf32> to vector<1x2x8x8xf32>
    %204 = vector.shape_cast %200 : vector<2x8x8xf32> to vector<1x2x8x8xf32>
    %205 = tpu.concatenate %201, %202, %203, %204 in 0 : vector<1x2x8x8xf32>, vector<1x2x8x8xf32>, vector<1x2x8x8xf32>, vector<1x2x8x8xf32> -> vector<4x2x8x8xf32>
    %206 = vector.shape_cast %205 : vector<4x2x8x8xf32> to vector<8x8x8xf32>
    "tpu.trace_start"() <{level = 10 : i32, message = "nqd,nkd->nqk"}> : () -> ()
    %cst_60 = arith.constant dense<0.000000e+00> : vector<8x8x8xf32>
    %207 = tpu.matmul %178, %192, %cst_60 {dimension_numbers = #tpu.dot_dimension_numbers<[2], [2], [1], [1], [0, 0, 0, 1, 1, 1], [0], [0]>} : vector<8x8x8xf32>, vector<8x8x8xf32>, vector<8x8x8xf32> -> vector<8x8x8xf32>
    "tpu.trace_stop"() : () -> ()
    %cst_61 = arith.constant dense<0xFF800000> : vector<8x8xf32>
    %208 = vector.multi_reduction <maximumf>, %207, %cst_61 [2] : vector<8x8x8xf32> to vector<8x8xf32>
    %209 = vector.shape_cast %208 : vector<8x8xf32> to vector<8x8x1xf32>
    %210 = vector.broadcast %209 : vector<8x8x1xf32> to vector<8x8x8xf32>
    %211 = arith.subf %207, %210 : vector<8x8x8xf32>
    %212 = math.exp %211 : vector<8x8x8xf32>
    %cst_62 = arith.constant dense<0.000000e+00> : vector<8x8xf32>
    %213 = vector.multi_reduction <add>, %212, %cst_62 [2] : vector<8x8x8xf32> to vector<8x8xf32>
    %214 = vector.shape_cast %213 : vector<8x8xf32> to vector<8x8x1xf32>
    %215 = tpu.reciprocal %214 : vector<8x8x1xf32> -> vector<8x8x1xf32>
    %216 = vector.broadcast %215 : vector<8x8x1xf32> to vector<8x8x8xf32>
    %217 = arith.mulf %212, %216 : vector<8x8x8xf32>
    "tpu.trace_start"() <{level = 10 : i32, message = "nqk,nkd->nqd"}> : () -> ()
    %cst_63 = arith.constant dense<0.000000e+00> : vector<8x8x8xf32>
    %218 = tpu.matmul %217, %206, %cst_63 {dimension_numbers = #tpu.dot_dimension_numbers<[2], [1], [1], [2], [0, 0, 0, 1, 1, 2], [0], [0]>} : vector<8x8x8xf32>, vector<8x8x8xf32>, vector<8x8x8xf32> -> vector<8x8x8xf32>
    "tpu.trace_stop"() : () -> ()
    %219 = vector.shape_cast %218 : vector<8x8x8xf32> to vector<4x2x8x8xf32>
    %220 = vector.extract_strided_slice %219 {offsets = [0, 0, 0, 0], sizes = [1, 2, 8, 8], strides = [1, 1, 1, 1]} : vector<4x2x8x8xf32> to vector<1x2x8x8xf32>
    %221 = vector.shape_cast %220 : vector<1x2x8x8xf32> to vector<2x8x8xf32>
    %222 = vector.extract_strided_slice %219 {offsets = [1, 0, 0, 0], sizes = [1, 2, 8, 8], strides = [1, 1, 1, 1]} : vector<4x2x8x8xf32> to vector<1x2x8x8xf32>
    %223 = vector.shape_cast %222 : vector<1x2x8x8xf32> to vector<2x8x8xf32>
    %224 = vector.extract_strided_slice %219 {offsets = [2, 0, 0, 0], sizes = [1, 2, 8, 8], strides = [1, 1, 1, 1]} : vector<4x2x8x8xf32> to vector<1x2x8x8xf32>
    %225 = vector.shape_cast %224 : vector<1x2x8x8xf32> to vector<2x8x8xf32>
    %226 = vector.extract_strided_slice %219 {offsets = [3, 0, 0, 0], sizes = [1, 2, 8, 8], strides = [1, 1, 1, 1]} : vector<4x2x8x8xf32> to vector<1x2x8x8xf32>
    %227 = vector.shape_cast %226 : vector<1x2x8x8xf32> to vector<2x8x8xf32>
    %228 = tpu.concatenate %221, %223, %225, %227 in 2 : vector<2x8x8xf32>, vector<2x8x8xf32>, vector<2x8x8xf32>, vector<2x8x8xf32> -> vector<2x8x32xf32>
    %229 = vector.shape_cast %228 : vector<2x8x32xf32> to vector<16x32xf32>
    %c4_64 = arith.constant 4 : index
    %c0_65 = arith.constant 0 : index
    %c0_66 = arith.constant 0 : index
    %230 = vector.load %arg3[%c4_64, %c0_65, %c0_66] : memref<8x32x32xf32, #tpu.memory_space<vmem>>, vector<1x32x32xf32>
    %231 = vector.shape_cast %230 : vector<1x32x32xf32> to vector<32x32xf32>
    %cst_67 = arith.constant dense<0.000000e+00> : vector<16x32xf32>
    %232 = tpu.matmul %229, %231, %cst_67 {dimension_numbers = #tpu.dot_dimension_numbers<[1], [0], [0], [1], [0, 0, 1, 1], [], []>} : vector<16x32xf32>, vector<32x32xf32>, vector<16x32xf32> -> vector<16x32xf32>
    %c4_68 = arith.constant 4 : index
    %c0_69 = arith.constant 0 : index
    %c0_70 = arith.constant 0 : index
    %233 = vector.load %arg4[%c4_68, %c0_69, %c0_70] : memref<8x1x32xf32, #tpu.memory_space<vmem>>, vector<1x1x32xf32>
    %234 = vector.shape_cast %233 : vector<1x1x32xf32> to vector<1x32xf32>
    %235 = vector.broadcast %234 : vector<1x32xf32> to vector<16x32xf32>
    %236 = arith.addf %232, %235 : vector<16x32xf32>
    %c1_71 = arith.constant 1 : index
    %c0_72 = arith.constant 0 : index
    %c0_73 = arith.constant 0 : index
    %237 = vector.load %arg1[%c1_71, %c0_72, %c0_73] : memref<8x32x96xf32, #tpu.memory_space<vmem>>, vector<1x32x96xf32>
    %238 = vector.shape_cast %237 : vector<1x32x96xf32> to vector<32x96xf32>
    %cst_74 = arith.constant dense<0.000000e+00> : vector<16x96xf32>
    %239 = tpu.matmul %147, %238, %cst_74 {dimension_numbers = #tpu.dot_dimension_numbers<[1], [0], [0], [1], [0, 0, 1, 1], [], []>} : vector<16x32xf32>, vector<32x96xf32>, vector<16x96xf32> -> vector<16x96xf32>
    %c1_75 = arith.constant 1 : index
    %c0_76 = arith.constant 0 : index
    %c0_77 = arith.constant 0 : index
    %240 = vector.load %arg2[%c1_75, %c0_76, %c0_77] : memref<8x1x96xf32, #tpu.memory_space<vmem>>, vector<1x1x96xf32>
    %241 = vector.shape_cast %240 : vector<1x1x96xf32> to vector<1x96xf32>
    %242 = vector.broadcast %241 : vector<1x96xf32> to vector<16x96xf32>
    %243 = arith.addf %239, %242 : vector<16x96xf32>
    %244 = vector.extract_strided_slice %243 {offsets = [0, 0], sizes = [16, 32], strides = [1, 1]} : vector<16x96xf32> to vector<16x32xf32>
    %245 = vector.extract_strided_slice %243 {offsets = [0, 32], sizes = [16, 32], strides = [1, 1]} : vector<16x96xf32> to vector<16x32xf32>
    %246 = vector.extract_strided_slice %243 {offsets = [0, 64], sizes = [16, 32], strides = [1, 1]} : vector<16x96xf32> to vector<16x32xf32>
    %247 = vector.extract_strided_slice %244 {offsets = [0, 0], sizes = [16, 8], strides = [1, 1]} : vector<16x32xf32> to vector<16x8xf32>
    %248 = vector.shape_cast %247 : vector<16x8xf32> to vector<2x8x8xf32>
    %249 = vector.extract_strided_slice %244 {offsets = [0, 8], sizes = [16, 8], strides = [1, 1]} : vector<16x32xf32> to vector<16x8xf32>
    %250 = vector.shape_cast %249 : vector<16x8xf32> to vector<2x8x8xf32>
    %251 = vector.extract_strided_slice %244 {offsets = [0, 16], sizes = [16, 8], strides = [1, 1]} : vector<16x32xf32> to vector<16x8xf32>
    %252 = vector.shape_cast %251 : vector<16x8xf32> to vector<2x8x8xf32>
    %253 = vector.extract_strided_slice %244 {offsets = [0, 24], sizes = [16, 8], strides = [1, 1]} : vector<16x32xf32> to vector<16x8xf32>
    %254 = vector.shape_cast %253 : vector<16x8xf32> to vector<2x8x8xf32>
    %255 = vector.shape_cast %248 : vector<2x8x8xf32> to vector<1x2x8x8xf32>
    %256 = vector.shape_cast %250 : vector<2x8x8xf32> to vector<1x2x8x8xf32>
    %257 = vector.shape_cast %252 : vector<2x8x8xf32> to vector<1x2x8x8xf32>
    %258 = vector.shape_cast %254 : vector<2x8x8xf32> to vector<1x2x8x8xf32>
    %259 = tpu.concatenate %255, %256, %257, %258 in 0 : vector<1x2x8x8xf32>, vector<1x2x8x8xf32>, vector<1x2x8x8xf32>, vector<1x2x8x8xf32> -> vector<4x2x8x8xf32>
    %260 = vector.shape_cast %259 : vector<4x2x8x8xf32> to vector<8x8x8xf32>
    %261 = vector.extract_strided_slice %245 {offsets = [0, 0], sizes = [16, 8], strides = [1, 1]} : vector<16x32xf32> to vector<16x8xf32>
    %262 = vector.shape_cast %261 : vector<16x8xf32> to vector<2x8x8xf32>
    %263 = vector.extract_strided_slice %245 {offsets = [0, 8], sizes = [16, 8], strides = [1, 1]} : vector<16x32xf32> to vector<16x8xf32>
    %264 = vector.shape_cast %263 : vector<16x8xf32> to vector<2x8x8xf32>
    %265 = vector.extract_strided_slice %245 {offsets = [0, 16], sizes = [16, 8], strides = [1, 1]} : vector<16x32xf32> to vector<16x8xf32>
    %266 = vector.shape_cast %265 : vector<16x8xf32> to vector<2x8x8xf32>
    %267 = vector.extract_strided_slice %245 {offsets = [0, 24], sizes = [16, 8], strides = [1, 1]} : vector<16x32xf32> to vector<16x8xf32>
    %268 = vector.shape_cast %267 : vector<16x8xf32> to vector<2x8x8xf32>
    %269 = vector.shape_cast %262 : vector<2x8x8xf32> to vector<1x2x8x8xf32>
    %270 = vector.shape_cast %264 : vector<2x8x8xf32> to vector<1x2x8x8xf32>
    %271 = vector.shape_cast %266 : vector<2x8x8xf32> to vector<1x2x8x8xf32>
    %272 = vector.shape_cast %268 : vector<2x8x8xf32> to vector<1x2x8x8xf32>
    %273 = tpu.concatenate %269, %270, %271, %272 in 0 : vector<1x2x8x8xf32>, vector<1x2x8x8xf32>, vector<1x2x8x8xf32>, vector<1x2x8x8xf32> -> vector<4x2x8x8xf32>
    %274 = vector.shape_cast %273 : vector<4x2x8x8xf32> to vector<8x8x8xf32>
    %275 = vector.extract_strided_slice %246 {offsets = [0, 0], sizes = [16, 8], strides = [1, 1]} : vector<16x32xf32> to vector<16x8xf32>
    %276 = vector.shape_cast %275 : vector<16x8xf32> to vector<2x8x8xf32>
    %277 = vector.extract_strided_slice %246 {offsets = [0, 8], sizes = [16, 8], strides = [1, 1]} : vector<16x32xf32> to vector<16x8xf32>
    %278 = vector.shape_cast %277 : vector<16x8xf32> to vector<2x8x8xf32>
    %279 = vector.extract_strided_slice %246 {offsets = [0, 16], sizes = [16, 8], strides = [1, 1]} : vector<16x32xf32> to vector<16x8xf32>
    %280 = vector.shape_cast %279 : vector<16x8xf32> to vector<2x8x8xf32>
    %281 = vector.extract_strided_slice %246 {offsets = [0, 24], sizes = [16, 8], strides = [1, 1]} : vector<16x32xf32> to vector<16x8xf32>
    %282 = vector.shape_cast %281 : vector<16x8xf32> to vector<2x8x8xf32>
    %283 = vector.shape_cast %276 : vector<2x8x8xf32> to vector<1x2x8x8xf32>
    %284 = vector.shape_cast %278 : vector<2x8x8xf32> to vector<1x2x8x8xf32>
    %285 = vector.shape_cast %280 : vector<2x8x8xf32> to vector<1x2x8x8xf32>
    %286 = vector.shape_cast %282 : vector<2x8x8xf32> to vector<1x2x8x8xf32>
    %287 = tpu.concatenate %283, %284, %285, %286 in 0 : vector<1x2x8x8xf32>, vector<1x2x8x8xf32>, vector<1x2x8x8xf32>, vector<1x2x8x8xf32> -> vector<4x2x8x8xf32>
    %288 = vector.shape_cast %287 : vector<4x2x8x8xf32> to vector<8x8x8xf32>
    "tpu.trace_start"() <{level = 10 : i32, message = "nqd,nkd->nqk"}> : () -> ()
    %cst_78 = arith.constant dense<0.000000e+00> : vector<8x8x8xf32>
    %289 = tpu.matmul %260, %274, %cst_78 {dimension_numbers = #tpu.dot_dimension_numbers<[2], [2], [1], [1], [0, 0, 0, 1, 1, 1], [0], [0]>} : vector<8x8x8xf32>, vector<8x8x8xf32>, vector<8x8x8xf32> -> vector<8x8x8xf32>
    "tpu.trace_stop"() : () -> ()
    %cst_79 = arith.constant dense<0xFF800000> : vector<8x8xf32>
    %290 = vector.multi_reduction <maximumf>, %289, %cst_79 [2] : vector<8x8x8xf32> to vector<8x8xf32>
    %291 = vector.shape_cast %290 : vector<8x8xf32> to vector<8x8x1xf32>
    %292 = vector.broadcast %291 : vector<8x8x1xf32> to vector<8x8x8xf32>
    %293 = arith.subf %289, %292 : vector<8x8x8xf32>
    %294 = math.exp %293 : vector<8x8x8xf32>
    %cst_80 = arith.constant dense<0.000000e+00> : vector<8x8xf32>
    %295 = vector.multi_reduction <add>, %294, %cst_80 [2] : vector<8x8x8xf32> to vector<8x8xf32>
    %296 = vector.shape_cast %295 : vector<8x8xf32> to vector<8x8x1xf32>
    %297 = tpu.reciprocal %296 : vector<8x8x1xf32> -> vector<8x8x1xf32>
    %298 = vector.broadcast %297 : vector<8x8x1xf32> to vector<8x8x8xf32>
    %299 = arith.mulf %294, %298 : vector<8x8x8xf32>
    "tpu.trace_start"() <{level = 10 : i32, message = "nqk,nkd->nqd"}> : () -> ()
    %cst_81 = arith.constant dense<0.000000e+00> : vector<8x8x8xf32>
    %300 = tpu.matmul %299, %288, %cst_81 {dimension_numbers = #tpu.dot_dimension_numbers<[2], [1], [1], [2], [0, 0, 0, 1, 1, 2], [0], [0]>} : vector<8x8x8xf32>, vector<8x8x8xf32>, vector<8x8x8xf32> -> vector<8x8x8xf32>
    "tpu.trace_stop"() : () -> ()
    %301 = vector.shape_cast %300 : vector<8x8x8xf32> to vector<4x2x8x8xf32>
    %302 = vector.extract_strided_slice %301 {offsets = [0, 0, 0, 0], sizes = [1, 2, 8, 8], strides = [1, 1, 1, 1]} : vector<4x2x8x8xf32> to vector<1x2x8x8xf32>
    %303 = vector.shape_cast %302 : vector<1x2x8x8xf32> to vector<2x8x8xf32>
    %304 = vector.extract_strided_slice %301 {offsets = [1, 0, 0, 0], sizes = [1, 2, 8, 8], strides = [1, 1, 1, 1]} : vector<4x2x8x8xf32> to vector<1x2x8x8xf32>
    %305 = vector.shape_cast %304 : vector<1x2x8x8xf32> to vector<2x8x8xf32>
    %306 = vector.extract_strided_slice %301 {offsets = [2, 0, 0, 0], sizes = [1, 2, 8, 8], strides = [1, 1, 1, 1]} : vector<4x2x8x8xf32> to vector<1x2x8x8xf32>
    %307 = vector.shape_cast %306 : vector<1x2x8x8xf32> to vector<2x8x8xf32>
    %308 = vector.extract_strided_slice %301 {offsets = [3, 0, 0, 0], sizes = [1, 2, 8, 8], strides = [1, 1, 1, 1]} : vector<4x2x8x8xf32> to vector<1x2x8x8xf32>
    %309 = vector.shape_cast %308 : vector<1x2x8x8xf32> to vector<2x8x8xf32>
    %310 = tpu.concatenate %303, %305, %307, %309 in 2 : vector<2x8x8xf32>, vector<2x8x8xf32>, vector<2x8x8xf32>, vector<2x8x8xf32> -> vector<2x8x32xf32>
    %311 = vector.shape_cast %310 : vector<2x8x32xf32> to vector<16x32xf32>
    %c1_82 = arith.constant 1 : index
    %c0_83 = arith.constant 0 : index
    %c0_84 = arith.constant 0 : index
    %312 = vector.load %arg3[%c1_82, %c0_83, %c0_84] : memref<8x32x32xf32, #tpu.memory_space<vmem>>, vector<1x32x32xf32>
    %313 = vector.shape_cast %312 : vector<1x32x32xf32> to vector<32x32xf32>
    %cst_85 = arith.constant dense<0.000000e+00> : vector<16x32xf32>
    %314 = tpu.matmul %311, %313, %cst_85 {dimension_numbers = #tpu.dot_dimension_numbers<[1], [0], [0], [1], [0, 0, 1, 1], [], []>} : vector<16x32xf32>, vector<32x32xf32>, vector<16x32xf32> -> vector<16x32xf32>
    %c1_86 = arith.constant 1 : index
    %c0_87 = arith.constant 0 : index
    %c0_88 = arith.constant 0 : index
    %315 = vector.load %arg4[%c1_86, %c0_87, %c0_88] : memref<8x1x32xf32, #tpu.memory_space<vmem>>, vector<1x1x32xf32>
    %316 = vector.shape_cast %315 : vector<1x1x32xf32> to vector<1x32xf32>
    %317 = vector.broadcast %316 : vector<1x32xf32> to vector<16x32xf32>
    %318 = arith.addf %314, %317 : vector<16x32xf32>
    %c5_89 = arith.constant 5 : index
    %c0_90 = arith.constant 0 : index
    %c0_91 = arith.constant 0 : index
    %319 = vector.load %arg1[%c5_89, %c0_90, %c0_91] : memref<8x32x96xf32, #tpu.memory_space<vmem>>, vector<1x32x96xf32>
    %320 = vector.shape_cast %319 : vector<1x32x96xf32> to vector<32x96xf32>
    %cst_92 = arith.constant dense<0.000000e+00> : vector<16x96xf32>
    %321 = tpu.matmul %236, %320, %cst_92 {dimension_numbers = #tpu.dot_dimension_numbers<[1], [0], [0], [1], [0, 0, 1, 1], [], []>} : vector<16x32xf32>, vector<32x96xf32>, vector<16x96xf32> -> vector<16x96xf32>
    %c5_93 = arith.constant 5 : index
    %c0_94 = arith.constant 0 : index
    %c0_95 = arith.constant 0 : index
    %322 = vector.load %arg2[%c5_93, %c0_94, %c0_95] : memref<8x1x96xf32, #tpu.memory_space<vmem>>, vector<1x1x96xf32>
    %323 = vector.shape_cast %322 : vector<1x1x96xf32> to vector<1x96xf32>
    %324 = vector.broadcast %323 : vector<1x96xf32> to vector<16x96xf32>
    %325 = arith.addf %321, %324 : vector<16x96xf32>
    %326 = vector.extract_strided_slice %325 {offsets = [0, 0], sizes = [16, 32], strides = [1, 1]} : vector<16x96xf32> to vector<16x32xf32>
    %327 = vector.extract_strided_slice %325 {offsets = [0, 32], sizes = [16, 32], strides = [1, 1]} : vector<16x96xf32> to vector<16x32xf32>
    %328 = vector.extract_strided_slice %325 {offsets = [0, 64], sizes = [16, 32], strides = [1, 1]} : vector<16x96xf32> to vector<16x32xf32>
    %329 = vector.extract_strided_slice %326 {offsets = [0, 0], sizes = [16, 8], strides = [1, 1]} : vector<16x32xf32> to vector<16x8xf32>
    %330 = vector.shape_cast %329 : vector<16x8xf32> to vector<2x8x8xf32>
    %331 = vector.extract_strided_slice %326 {offsets = [0, 8], sizes = [16, 8], strides = [1, 1]} : vector<16x32xf32> to vector<16x8xf32>
    %332 = vector.shape_cast %331 : vector<16x8xf32> to vector<2x8x8xf32>
    %333 = vector.extract_strided_slice %326 {offsets = [0, 16], sizes = [16, 8], strides = [1, 1]} : vector<16x32xf32> to vector<16x8xf32>
    %334 = vector.shape_cast %333 : vector<16x8xf32> to vector<2x8x8xf32>
    %335 = vector.extract_strided_slice %326 {offsets = [0, 24], sizes = [16, 8], strides = [1, 1]} : vector<16x32xf32> to vector<16x8xf32>
    %336 = vector.shape_cast %335 : vector<16x8xf32> to vector<2x8x8xf32>
    %337 = vector.shape_cast %330 : vector<2x8x8xf32> to vector<1x2x8x8xf32>
    %338 = vector.shape_cast %332 : vector<2x8x8xf32> to vector<1x2x8x8xf32>
    %339 = vector.shape_cast %334 : vector<2x8x8xf32> to vector<1x2x8x8xf32>
    %340 = vector.shape_cast %336 : vector<2x8x8xf32> to vector<1x2x8x8xf32>
    %341 = tpu.concatenate %337, %338, %339, %340 in 0 : vector<1x2x8x8xf32>, vector<1x2x8x8xf32>, vector<1x2x8x8xf32>, vector<1x2x8x8xf32> -> vector<4x2x8x8xf32>
    %342 = vector.shape_cast %341 : vector<4x2x8x8xf32> to vector<8x8x8xf32>
    %343 = vector.extract_strided_slice %327 {offsets = [0, 0], sizes = [16, 8], strides = [1, 1]} : vector<16x32xf32> to vector<16x8xf32>
    %344 = vector.shape_cast %343 : vector<16x8xf32> to vector<2x8x8xf32>
    %345 = vector.extract_strided_slice %327 {offsets = [0, 8], sizes = [16, 8], strides = [1, 1]} : vector<16x32xf32> to vector<16x8xf32>
    %346 = vector.shape_cast %345 : vector<16x8xf32> to vector<2x8x8xf32>
    %347 = vector.extract_strided_slice %327 {offsets = [0, 16], sizes = [16, 8], strides = [1, 1]} : vector<16x32xf32> to vector<16x8xf32>
    %348 = vector.shape_cast %347 : vector<16x8xf32> to vector<2x8x8xf32>
    %349 = vector.extract_strided_slice %327 {offsets = [0, 24], sizes = [16, 8], strides = [1, 1]} : vector<16x32xf32> to vector<16x8xf32>
    %350 = vector.shape_cast %349 : vector<16x8xf32> to vector<2x8x8xf32>
    %351 = vector.shape_cast %344 : vector<2x8x8xf32> to vector<1x2x8x8xf32>
    %352 = vector.shape_cast %346 : vector<2x8x8xf32> to vector<1x2x8x8xf32>
    %353 = vector.shape_cast %348 : vector<2x8x8xf32> to vector<1x2x8x8xf32>
    %354 = vector.shape_cast %350 : vector<2x8x8xf32> to vector<1x2x8x8xf32>
    %355 = tpu.concatenate %351, %352, %353, %354 in 0 : vector<1x2x8x8xf32>, vector<1x2x8x8xf32>, vector<1x2x8x8xf32>, vector<1x2x8x8xf32> -> vector<4x2x8x8xf32>
    %356 = vector.shape_cast %355 : vector<4x2x8x8xf32> to vector<8x8x8xf32>
    %357 = vector.extract_strided_slice %328 {offsets = [0, 0], sizes = [16, 8], strides = [1, 1]} : vector<16x32xf32> to vector<16x8xf32>
    %358 = vector.shape_cast %357 : vector<16x8xf32> to vector<2x8x8xf32>
    %359 = vector.extract_strided_slice %328 {offsets = [0, 8], sizes = [16, 8], strides = [1, 1]} : vector<16x32xf32> to vector<16x8xf32>
    %360 = vector.shape_cast %359 : vector<16x8xf32> to vector<2x8x8xf32>
    %361 = vector.extract_strided_slice %328 {offsets = [0, 16], sizes = [16, 8], strides = [1, 1]} : vector<16x32xf32> to vector<16x8xf32>
    %362 = vector.shape_cast %361 : vector<16x8xf32> to vector<2x8x8xf32>
    %363 = vector.extract_strided_slice %328 {offsets = [0, 24], sizes = [16, 8], strides = [1, 1]} : vector<16x32xf32> to vector<16x8xf32>
    %364 = vector.shape_cast %363 : vector<16x8xf32> to vector<2x8x8xf32>
    %365 = vector.shape_cast %358 : vector<2x8x8xf32> to vector<1x2x8x8xf32>
    %366 = vector.shape_cast %360 : vector<2x8x8xf32> to vector<1x2x8x8xf32>
    %367 = vector.shape_cast %362 : vector<2x8x8xf32> to vector<1x2x8x8xf32>
    %368 = vector.shape_cast %364 : vector<2x8x8xf32> to vector<1x2x8x8xf32>
    %369 = tpu.concatenate %365, %366, %367, %368 in 0 : vector<1x2x8x8xf32>, vector<1x2x8x8xf32>, vector<1x2x8x8xf32>, vector<1x2x8x8xf32> -> vector<4x2x8x8xf32>
    %370 = vector.shape_cast %369 : vector<4x2x8x8xf32> to vector<8x8x8xf32>
    "tpu.trace_start"() <{level = 10 : i32, message = "nqd,nkd->nqk"}> : () -> ()
    %cst_96 = arith.constant dense<0.000000e+00> : vector<8x8x8xf32>
    %371 = tpu.matmul %342, %356, %cst_96 {dimension_numbers = #tpu.dot_dimension_numbers<[2], [2], [1], [1], [0, 0, 0, 1, 1, 1], [0], [0]>} : vector<8x8x8xf32>, vector<8x8x8xf32>, vector<8x8x8xf32> -> vector<8x8x8xf32>
    "tpu.trace_stop"() : () -> ()
    %cst_97 = arith.constant dense<0xFF800000> : vector<8x8xf32>
    %372 = vector.multi_reduction <maximumf>, %371, %cst_97 [2] : vector<8x8x8xf32> to vector<8x8xf32>
    %373 = vector.shape_cast %372 : vector<8x8xf32> to vector<8x8x1xf32>
    %374 = vector.broadcast %373 : vector<8x8x1xf32> to vector<8x8x8xf32>
    %375 = arith.subf %371, %374 : vector<8x8x8xf32>
    %376 = math.exp %375 : vector<8x8x8xf32>
    %cst_98 = arith.constant dense<0.000000e+00> : vector<8x8xf32>
    %377 = vector.multi_reduction <add>, %376, %cst_98 [2] : vector<8x8x8xf32> to vector<8x8xf32>
    %378 = vector.shape_cast %377 : vector<8x8xf32> to vector<8x8x1xf32>
    %379 = tpu.reciprocal %378 : vector<8x8x1xf32> -> vector<8x8x1xf32>
    %380 = vector.broadcast %379 : vector<8x8x1xf32> to vector<8x8x8xf32>
    %381 = arith.mulf %376, %380 : vector<8x8x8xf32>
    "tpu.trace_start"() <{level = 10 : i32, message = "nqk,nkd->nqd"}> : () -> ()
    %cst_99 = arith.constant dense<0.000000e+00> : vector<8x8x8xf32>
    %382 = tpu.matmul %381, %370, %cst_99 {dimension_numbers = #tpu.dot_dimension_numbers<[2], [1], [1], [2], [0, 0, 0, 1, 1, 2], [0], [0]>} : vector<8x8x8xf32>, vector<8x8x8xf32>, vector<8x8x8xf32> -> vector<8x8x8xf32>
    "tpu.trace_stop"() : () -> ()
    %383 = vector.shape_cast %382 : vector<8x8x8xf32> to vector<4x2x8x8xf32>
    %384 = vector.extract_strided_slice %383 {offsets = [0, 0, 0, 0], sizes = [1, 2, 8, 8], strides = [1, 1, 1, 1]} : vector<4x2x8x8xf32> to vector<1x2x8x8xf32>
    %385 = vector.shape_cast %384 : vector<1x2x8x8xf32> to vector<2x8x8xf32>
    %386 = vector.extract_strided_slice %383 {offsets = [1, 0, 0, 0], sizes = [1, 2, 8, 8], strides = [1, 1, 1, 1]} : vector<4x2x8x8xf32> to vector<1x2x8x8xf32>
    %387 = vector.shape_cast %386 : vector<1x2x8x8xf32> to vector<2x8x8xf32>
    %388 = vector.extract_strided_slice %383 {offsets = [2, 0, 0, 0], sizes = [1, 2, 8, 8], strides = [1, 1, 1, 1]} : vector<4x2x8x8xf32> to vector<1x2x8x8xf32>
    %389 = vector.shape_cast %388 : vector<1x2x8x8xf32> to vector<2x8x8xf32>
    %390 = vector.extract_strided_slice %383 {offsets = [3, 0, 0, 0], sizes = [1, 2, 8, 8], strides = [1, 1, 1, 1]} : vector<4x2x8x8xf32> to vector<1x2x8x8xf32>
    %391 = vector.shape_cast %390 : vector<1x2x8x8xf32> to vector<2x8x8xf32>
    %392 = tpu.concatenate %385, %387, %389, %391 in 2 : vector<2x8x8xf32>, vector<2x8x8xf32>, vector<2x8x8xf32>, vector<2x8x8xf32> -> vector<2x8x32xf32>
    %393 = vector.shape_cast %392 : vector<2x8x32xf32> to vector<16x32xf32>
    %c5_100 = arith.constant 5 : index
    %c0_101 = arith.constant 0 : index
    %c0_102 = arith.constant 0 : index
    %394 = vector.load %arg3[%c5_100, %c0_101, %c0_102] : memref<8x32x32xf32, #tpu.memory_space<vmem>>, vector<1x32x32xf32>
    %395 = vector.shape_cast %394 : vector<1x32x32xf32> to vector<32x32xf32>
    %cst_103 = arith.constant dense<0.000000e+00> : vector<16x32xf32>
    %396 = tpu.matmul %393, %395, %cst_103 {dimension_numbers = #tpu.dot_dimension_numbers<[1], [0], [0], [1], [0, 0, 1, 1], [], []>} : vector<16x32xf32>, vector<32x32xf32>, vector<16x32xf32> -> vector<16x32xf32>
    %c5_104 = arith.constant 5 : index
    %c0_105 = arith.constant 0 : index
    %c0_106 = arith.constant 0 : index
    %397 = vector.load %arg4[%c5_104, %c0_105, %c0_106] : memref<8x1x32xf32, #tpu.memory_space<vmem>>, vector<1x1x32xf32>
    %398 = vector.shape_cast %397 : vector<1x1x32xf32> to vector<1x32xf32>
    %399 = vector.broadcast %398 : vector<1x32xf32> to vector<16x32xf32>
    %400 = arith.addf %396, %399 : vector<16x32xf32>
    %c2 = arith.constant 2 : index
    %c0_107 = arith.constant 0 : index
    %c0_108 = arith.constant 0 : index
    %401 = vector.load %arg1[%c2, %c0_107, %c0_108] : memref<8x32x96xf32, #tpu.memory_space<vmem>>, vector<1x32x96xf32>
    %402 = vector.shape_cast %401 : vector<1x32x96xf32> to vector<32x96xf32>
    %cst_109 = arith.constant dense<0.000000e+00> : vector<16x96xf32>
    %403 = tpu.matmul %318, %402, %cst_109 {dimension_numbers = #tpu.dot_dimension_numbers<[1], [0], [0], [1], [0, 0, 1, 1], [], []>} : vector<16x32xf32>, vector<32x96xf32>, vector<16x96xf32> -> vector<16x96xf32>
    %c2_110 = arith.constant 2 : index
    %c0_111 = arith.constant 0 : index
    %c0_112 = arith.constant 0 : index
    %404 = vector.load %arg2[%c2_110, %c0_111, %c0_112] : memref<8x1x96xf32, #tpu.memory_space<vmem>>, vector<1x1x96xf32>
    %405 = vector.shape_cast %404 : vector<1x1x96xf32> to vector<1x96xf32>
    %406 = vector.broadcast %405 : vector<1x96xf32> to vector<16x96xf32>
    %407 = arith.addf %403, %406 : vector<16x96xf32>
    %c2_113 = arith.constant 2 : index
    %c0_114 = arith.constant 0 : index
    %c0_115 = arith.constant 0 : index
    %408 = vector.load %arg1[%c2_113, %c0_114, %c0_115] : memref<8x32x96xf32, #tpu.memory_space<vmem>>, vector<1x32x96xf32>
    %409 = vector.shape_cast %408 : vector<1x32x96xf32> to vector<32x96xf32>
    %cst_116 = arith.constant dense<0.000000e+00> : vector<16x96xf32>
    %410 = tpu.matmul %400, %409, %cst_116 {dimension_numbers = #tpu.dot_dimension_numbers<[1], [0], [0], [1], [0, 0, 1, 1], [], []>} : vector<16x32xf32>, vector<32x96xf32>, vector<16x96xf32> -> vector<16x96xf32>
    %c2_117 = arith.constant 2 : index
    %c0_118 = arith.constant 0 : index
    %c0_119 = arith.constant 0 : index
    %411 = vector.load %arg2[%c2_117, %c0_118, %c0_119] : memref<8x1x96xf32, #tpu.memory_space<vmem>>, vector<1x1x96xf32>
    %412 = vector.shape_cast %411 : vector<1x1x96xf32> to vector<1x96xf32>
    %413 = vector.broadcast %412 : vector<1x96xf32> to vector<16x96xf32>
    %414 = arith.addf %410, %413 : vector<16x96xf32>
    %415 = vector.extract_strided_slice %407 {offsets = [0, 0], sizes = [16, 32], strides = [1, 1]} : vector<16x96xf32> to vector<16x32xf32>
    %416 = vector.extract_strided_slice %407 {offsets = [0, 32], sizes = [16, 32], strides = [1, 1]} : vector<16x96xf32> to vector<16x32xf32>
    %417 = vector.extract_strided_slice %414 {offsets = [0, 64], sizes = [16, 32], strides = [1, 1]} : vector<16x96xf32> to vector<16x32xf32>
    %418 = vector.extract_strided_slice %415 {offsets = [0, 0], sizes = [16, 8], strides = [1, 1]} : vector<16x32xf32> to vector<16x8xf32>
    %419 = vector.shape_cast %418 : vector<16x8xf32> to vector<2x8x8xf32>
    %420 = vector.extract_strided_slice %415 {offsets = [0, 8], sizes = [16, 8], strides = [1, 1]} : vector<16x32xf32> to vector<16x8xf32>
    %421 = vector.shape_cast %420 : vector<16x8xf32> to vector<2x8x8xf32>
    %422 = vector.extract_strided_slice %415 {offsets = [0, 16], sizes = [16, 8], strides = [1, 1]} : vector<16x32xf32> to vector<16x8xf32>
    %423 = vector.shape_cast %422 : vector<16x8xf32> to vector<2x8x8xf32>
    %424 = vector.extract_strided_slice %415 {offsets = [0, 24], sizes = [16, 8], strides = [1, 1]} : vector<16x32xf32> to vector<16x8xf32>
    %425 = vector.shape_cast %424 : vector<16x8xf32> to vector<2x8x8xf32>
    %426 = vector.shape_cast %419 : vector<2x8x8xf32> to vector<1x2x8x8xf32>
    %427 = vector.shape_cast %421 : vector<2x8x8xf32> to vector<1x2x8x8xf32>
    %428 = vector.shape_cast %423 : vector<2x8x8xf32> to vector<1x2x8x8xf32>
    %429 = vector.shape_cast %425 : vector<2x8x8xf32> to vector<1x2x8x8xf32>
    %430 = tpu.concatenate %426, %427, %428, %429 in 0 : vector<1x2x8x8xf32>, vector<1x2x8x8xf32>, vector<1x2x8x8xf32>, vector<1x2x8x8xf32> -> vector<4x2x8x8xf32>
    %431 = vector.shape_cast %430 : vector<4x2x8x8xf32> to vector<8x8x8xf32>
    %432 = vector.extract_strided_slice %416 {offsets = [0, 0], sizes = [16, 8], strides = [1, 1]} : vector<16x32xf32> to vector<16x8xf32>
    %433 = vector.shape_cast %432 : vector<16x8xf32> to vector<2x8x8xf32>
    %434 = vector.extract_strided_slice %416 {offsets = [0, 8], sizes = [16, 8], strides = [1, 1]} : vector<16x32xf32> to vector<16x8xf32>
    %435 = vector.shape_cast %434 : vector<16x8xf32> to vector<2x8x8xf32>
    %436 = vector.extract_strided_slice %416 {offsets = [0, 16], sizes = [16, 8], strides = [1, 1]} : vector<16x32xf32> to vector<16x8xf32>
    %437 = vector.shape_cast %436 : vector<16x8xf32> to vector<2x8x8xf32>
    %438 = vector.extract_strided_slice %416 {offsets = [0, 24], sizes = [16, 8], strides = [1, 1]} : vector<16x32xf32> to vector<16x8xf32>
    %439 = vector.shape_cast %438 : vector<16x8xf32> to vector<2x8x8xf32>
    %440 = vector.shape_cast %433 : vector<2x8x8xf32> to vector<1x2x8x8xf32>
    %441 = vector.shape_cast %435 : vector<2x8x8xf32> to vector<1x2x8x8xf32>
    %442 = vector.shape_cast %437 : vector<2x8x8xf32> to vector<1x2x8x8xf32>
    %443 = vector.shape_cast %439 : vector<2x8x8xf32> to vector<1x2x8x8xf32>
    %444 = tpu.concatenate %440, %441, %442, %443 in 0 : vector<1x2x8x8xf32>, vector<1x2x8x8xf32>, vector<1x2x8x8xf32>, vector<1x2x8x8xf32> -> vector<4x2x8x8xf32>
    %445 = vector.shape_cast %444 : vector<4x2x8x8xf32> to vector<8x8x8xf32>
    %446 = vector.extract_strided_slice %417 {offsets = [0, 0], sizes = [16, 8], strides = [1, 1]} : vector<16x32xf32> to vector<16x8xf32>
    %447 = vector.shape_cast %446 : vector<16x8xf32> to vector<2x8x8xf32>
    %448 = vector.extract_strided_slice %417 {offsets = [0, 8], sizes = [16, 8], strides = [1, 1]} : vector<16x32xf32> to vector<16x8xf32>
    %449 = vector.shape_cast %448 : vector<16x8xf32> to vector<2x8x8xf32>
    %450 = vector.extract_strided_slice %417 {offsets = [0, 16], sizes = [16, 8], strides = [1, 1]} : vector<16x32xf32> to vector<16x8xf32>
    %451 = vector.shape_cast %450 : vector<16x8xf32> to vector<2x8x8xf32>
    %452 = vector.extract_strided_slice %417 {offsets = [0, 24], sizes = [16, 8], strides = [1, 1]} : vector<16x32xf32> to vector<16x8xf32>
    %453 = vector.shape_cast %452 : vector<16x8xf32> to vector<2x8x8xf32>
    %454 = vector.shape_cast %447 : vector<2x8x8xf32> to vector<1x2x8x8xf32>
    %455 = vector.shape_cast %449 : vector<2x8x8xf32> to vector<1x2x8x8xf32>
    %456 = vector.shape_cast %451 : vector<2x8x8xf32> to vector<1x2x8x8xf32>
    %457 = vector.shape_cast %453 : vector<2x8x8xf32> to vector<1x2x8x8xf32>
    %458 = tpu.concatenate %454, %455, %456, %457 in 0 : vector<1x2x8x8xf32>, vector<1x2x8x8xf32>, vector<1x2x8x8xf32>, vector<1x2x8x8xf32> -> vector<4x2x8x8xf32>
    %459 = vector.shape_cast %458 : vector<4x2x8x8xf32> to vector<8x8x8xf32>
    "tpu.trace_start"() <{level = 10 : i32, message = "nqd,nkd->nqk"}> : () -> ()
    %cst_120 = arith.constant dense<0.000000e+00> : vector<8x8x8xf32>
    %460 = tpu.matmul %431, %445, %cst_120 {dimension_numbers = #tpu.dot_dimension_numbers<[2], [2], [1], [1], [0, 0, 0, 1, 1, 1], [0], [0]>} : vector<8x8x8xf32>, vector<8x8x8xf32>, vector<8x8x8xf32> -> vector<8x8x8xf32>
    "tpu.trace_stop"() : () -> ()
    %cst_121 = arith.constant dense<0xFF800000> : vector<8x8xf32>
    %461 = vector.multi_reduction <maximumf>, %460, %cst_121 [2] : vector<8x8x8xf32> to vector<8x8xf32>
    %462 = vector.shape_cast %461 : vector<8x8xf32> to vector<8x8x1xf32>
    %463 = vector.broadcast %462 : vector<8x8x1xf32> to vector<8x8x8xf32>
    %464 = arith.subf %460, %463 : vector<8x8x8xf32>
    %465 = math.exp %464 : vector<8x8x8xf32>
    %cst_122 = arith.constant dense<0.000000e+00> : vector<8x8xf32>
    %466 = vector.multi_reduction <add>, %465, %cst_122 [2] : vector<8x8x8xf32> to vector<8x8xf32>
    %467 = vector.shape_cast %466 : vector<8x8xf32> to vector<8x8x1xf32>
    %468 = tpu.reciprocal %467 : vector<8x8x1xf32> -> vector<8x8x1xf32>
    %469 = vector.broadcast %468 : vector<8x8x1xf32> to vector<8x8x8xf32>
    %470 = arith.mulf %465, %469 : vector<8x8x8xf32>
    "tpu.trace_start"() <{level = 10 : i32, message = "nqk,nkd->nqd"}> : () -> ()
    %cst_123 = arith.constant dense<0.000000e+00> : vector<8x8x8xf32>
    %471 = tpu.matmul %470, %459, %cst_123 {dimension_numbers = #tpu.dot_dimension_numbers<[2], [1], [1], [2], [0, 0, 0, 1, 1, 2], [0], [0]>} : vector<8x8x8xf32>, vector<8x8x8xf32>, vector<8x8x8xf32> -> vector<8x8x8xf32>
    "tpu.trace_stop"() : () -> ()
    %472 = vector.shape_cast %471 : vector<8x8x8xf32> to vector<4x2x8x8xf32>
    %473 = vector.extract_strided_slice %472 {offsets = [0, 0, 0, 0], sizes = [1, 2, 8, 8], strides = [1, 1, 1, 1]} : vector<4x2x8x8xf32> to vector<1x2x8x8xf32>
    %474 = vector.shape_cast %473 : vector<1x2x8x8xf32> to vector<2x8x8xf32>
    %475 = vector.extract_strided_slice %472 {offsets = [1, 0, 0, 0], sizes = [1, 2, 8, 8], strides = [1, 1, 1, 1]} : vector<4x2x8x8xf32> to vector<1x2x8x8xf32>
    %476 = vector.shape_cast %475 : vector<1x2x8x8xf32> to vector<2x8x8xf32>
    %477 = vector.extract_strided_slice %472 {offsets = [2, 0, 0, 0], sizes = [1, 2, 8, 8], strides = [1, 1, 1, 1]} : vector<4x2x8x8xf32> to vector<1x2x8x8xf32>
    %478 = vector.shape_cast %477 : vector<1x2x8x8xf32> to vector<2x8x8xf32>
    %479 = vector.extract_strided_slice %472 {offsets = [3, 0, 0, 0], sizes = [1, 2, 8, 8], strides = [1, 1, 1, 1]} : vector<4x2x8x8xf32> to vector<1x2x8x8xf32>
    %480 = vector.shape_cast %479 : vector<1x2x8x8xf32> to vector<2x8x8xf32>
    %481 = tpu.concatenate %474, %476, %478, %480 in 2 : vector<2x8x8xf32>, vector<2x8x8xf32>, vector<2x8x8xf32>, vector<2x8x8xf32> -> vector<2x8x32xf32>
    %482 = vector.shape_cast %481 : vector<2x8x32xf32> to vector<16x32xf32>
    %c2_124 = arith.constant 2 : index
    %c0_125 = arith.constant 0 : index
    %c0_126 = arith.constant 0 : index
    %483 = vector.load %arg3[%c2_124, %c0_125, %c0_126] : memref<8x32x32xf32, #tpu.memory_space<vmem>>, vector<1x32x32xf32>
    %484 = vector.shape_cast %483 : vector<1x32x32xf32> to vector<32x32xf32>
    %cst_127 = arith.constant dense<0.000000e+00> : vector<16x32xf32>
    %485 = tpu.matmul %482, %484, %cst_127 {dimension_numbers = #tpu.dot_dimension_numbers<[1], [0], [0], [1], [0, 0, 1, 1], [], []>} : vector<16x32xf32>, vector<32x32xf32>, vector<16x32xf32> -> vector<16x32xf32>
    %c2_128 = arith.constant 2 : index
    %c0_129 = arith.constant 0 : index
    %c0_130 = arith.constant 0 : index
    %486 = vector.load %arg4[%c2_128, %c0_129, %c0_130] : memref<8x1x32xf32, #tpu.memory_space<vmem>>, vector<1x1x32xf32>
    %487 = vector.shape_cast %486 : vector<1x1x32xf32> to vector<1x32xf32>
    %488 = vector.broadcast %487 : vector<1x32xf32> to vector<16x32xf32>
    %489 = arith.addf %485, %488 : vector<16x32xf32>
    %c6 = arith.constant 6 : index
    %c0_131 = arith.constant 0 : index
    %c0_132 = arith.constant 0 : index
    %490 = vector.load %arg1[%c6, %c0_131, %c0_132] : memref<8x32x96xf32, #tpu.memory_space<vmem>>, vector<1x32x96xf32>
    %491 = vector.shape_cast %490 : vector<1x32x96xf32> to vector<32x96xf32>
    %cst_133 = arith.constant dense<0.000000e+00> : vector<16x96xf32>
    %492 = tpu.matmul %400, %491, %cst_133 {dimension_numbers = #tpu.dot_dimension_numbers<[1], [0], [0], [1], [0, 0, 1, 1], [], []>} : vector<16x32xf32>, vector<32x96xf32>, vector<16x96xf32> -> vector<16x96xf32>
    %c6_134 = arith.constant 6 : index
    %c0_135 = arith.constant 0 : index
    %c0_136 = arith.constant 0 : index
    %493 = vector.load %arg2[%c6_134, %c0_135, %c0_136] : memref<8x1x96xf32, #tpu.memory_space<vmem>>, vector<1x1x96xf32>
    %494 = vector.shape_cast %493 : vector<1x1x96xf32> to vector<1x96xf32>
    %495 = vector.broadcast %494 : vector<1x96xf32> to vector<16x96xf32>
    %496 = arith.addf %492, %495 : vector<16x96xf32>
    %c6_137 = arith.constant 6 : index
    %c0_138 = arith.constant 0 : index
    %c0_139 = arith.constant 0 : index
    %497 = vector.load %arg1[%c6_137, %c0_138, %c0_139] : memref<8x32x96xf32, #tpu.memory_space<vmem>>, vector<1x32x96xf32>
    %498 = vector.shape_cast %497 : vector<1x32x96xf32> to vector<32x96xf32>
    %cst_140 = arith.constant dense<0.000000e+00> : vector<16x96xf32>
    %499 = tpu.matmul %489, %498, %cst_140 {dimension_numbers = #tpu.dot_dimension_numbers<[1], [0], [0], [1], [0, 0, 1, 1], [], []>} : vector<16x32xf32>, vector<32x96xf32>, vector<16x96xf32> -> vector<16x96xf32>
    %c6_141 = arith.constant 6 : index
    %c0_142 = arith.constant 0 : index
    %c0_143 = arith.constant 0 : index
    %500 = vector.load %arg2[%c6_141, %c0_142, %c0_143] : memref<8x1x96xf32, #tpu.memory_space<vmem>>, vector<1x1x96xf32>
    %501 = vector.shape_cast %500 : vector<1x1x96xf32> to vector<1x96xf32>
    %502 = vector.broadcast %501 : vector<1x96xf32> to vector<16x96xf32>
    %503 = arith.addf %499, %502 : vector<16x96xf32>
    %504 = vector.extract_strided_slice %496 {offsets = [0, 0], sizes = [16, 32], strides = [1, 1]} : vector<16x96xf32> to vector<16x32xf32>
    %505 = vector.extract_strided_slice %496 {offsets = [0, 32], sizes = [16, 32], strides = [1, 1]} : vector<16x96xf32> to vector<16x32xf32>
    %506 = vector.extract_strided_slice %503 {offsets = [0, 64], sizes = [16, 32], strides = [1, 1]} : vector<16x96xf32> to vector<16x32xf32>
    %507 = vector.extract_strided_slice %504 {offsets = [0, 0], sizes = [16, 8], strides = [1, 1]} : vector<16x32xf32> to vector<16x8xf32>
    %508 = vector.shape_cast %507 : vector<16x8xf32> to vector<2x8x8xf32>
    %509 = vector.extract_strided_slice %504 {offsets = [0, 8], sizes = [16, 8], strides = [1, 1]} : vector<16x32xf32> to vector<16x8xf32>
    %510 = vector.shape_cast %509 : vector<16x8xf32> to vector<2x8x8xf32>
    %511 = vector.extract_strided_slice %504 {offsets = [0, 16], sizes = [16, 8], strides = [1, 1]} : vector<16x32xf32> to vector<16x8xf32>
    %512 = vector.shape_cast %511 : vector<16x8xf32> to vector<2x8x8xf32>
    %513 = vector.extract_strided_slice %504 {offsets = [0, 24], sizes = [16, 8], strides = [1, 1]} : vector<16x32xf32> to vector<16x8xf32>
    %514 = vector.shape_cast %513 : vector<16x8xf32> to vector<2x8x8xf32>
    %515 = vector.shape_cast %508 : vector<2x8x8xf32> to vector<1x2x8x8xf32>
    %516 = vector.shape_cast %510 : vector<2x8x8xf32> to vector<1x2x8x8xf32>
    %517 = vector.shape_cast %512 : vector<2x8x8xf32> to vector<1x2x8x8xf32>
    %518 = vector.shape_cast %514 : vector<2x8x8xf32> to vector<1x2x8x8xf32>
    %519 = tpu.concatenate %515, %516, %517, %518 in 0 : vector<1x2x8x8xf32>, vector<1x2x8x8xf32>, vector<1x2x8x8xf32>, vector<1x2x8x8xf32> -> vector<4x2x8x8xf32>
    %520 = vector.shape_cast %519 : vector<4x2x8x8xf32> to vector<8x8x8xf32>
    %521 = vector.extract_strided_slice %505 {offsets = [0, 0], sizes = [16, 8], strides = [1, 1]} : vector<16x32xf32> to vector<16x8xf32>
    %522 = vector.shape_cast %521 : vector<16x8xf32> to vector<2x8x8xf32>
    %523 = vector.extract_strided_slice %505 {offsets = [0, 8], sizes = [16, 8], strides = [1, 1]} : vector<16x32xf32> to vector<16x8xf32>
    %524 = vector.shape_cast %523 : vector<16x8xf32> to vector<2x8x8xf32>
    %525 = vector.extract_strided_slice %505 {offsets = [0, 16], sizes = [16, 8], strides = [1, 1]} : vector<16x32xf32> to vector<16x8xf32>
    %526 = vector.shape_cast %525 : vector<16x8xf32> to vector<2x8x8xf32>
    %527 = vector.extract_strided_slice %505 {offsets = [0, 24], sizes = [16, 8], strides = [1, 1]} : vector<16x32xf32> to vector<16x8xf32>
    %528 = vector.shape_cast %527 : vector<16x8xf32> to vector<2x8x8xf32>
    %529 = vector.shape_cast %522 : vector<2x8x8xf32> to vector<1x2x8x8xf32>
    %530 = vector.shape_cast %524 : vector<2x8x8xf32> to vector<1x2x8x8xf32>
    %531 = vector.shape_cast %526 : vector<2x8x8xf32> to vector<1x2x8x8xf32>
    %532 = vector.shape_cast %528 : vector<2x8x8xf32> to vector<1x2x8x8xf32>
    %533 = tpu.concatenate %529, %530, %531, %532 in 0 : vector<1x2x8x8xf32>, vector<1x2x8x8xf32>, vector<1x2x8x8xf32>, vector<1x2x8x8xf32> -> vector<4x2x8x8xf32>
    %534 = vector.shape_cast %533 : vector<4x2x8x8xf32> to vector<8x8x8xf32>
    %535 = vector.extract_strided_slice %506 {offsets = [0, 0], sizes = [16, 8], strides = [1, 1]} : vector<16x32xf32> to vector<16x8xf32>
    %536 = vector.shape_cast %535 : vector<16x8xf32> to vector<2x8x8xf32>
    %537 = vector.extract_strided_slice %506 {offsets = [0, 8], sizes = [16, 8], strides = [1, 1]} : vector<16x32xf32> to vector<16x8xf32>
    %538 = vector.shape_cast %537 : vector<16x8xf32> to vector<2x8x8xf32>
    %539 = vector.extract_strided_slice %506 {offsets = [0, 16], sizes = [16, 8], strides = [1, 1]} : vector<16x32xf32> to vector<16x8xf32>
    %540 = vector.shape_cast %539 : vector<16x8xf32> to vector<2x8x8xf32>
    %541 = vector.extract_strided_slice %506 {offsets = [0, 24], sizes = [16, 8], strides = [1, 1]} : vector<16x32xf32> to vector<16x8xf32>
    %542 = vector.shape_cast %541 : vector<16x8xf32> to vector<2x8x8xf32>
    %543 = vector.shape_cast %536 : vector<2x8x8xf32> to vector<1x2x8x8xf32>
    %544 = vector.shape_cast %538 : vector<2x8x8xf32> to vector<1x2x8x8xf32>
    %545 = vector.shape_cast %540 : vector<2x8x8xf32> to vector<1x2x8x8xf32>
    %546 = vector.shape_cast %542 : vector<2x8x8xf32> to vector<1x2x8x8xf32>
    %547 = tpu.concatenate %543, %544, %545, %546 in 0 : vector<1x2x8x8xf32>, vector<1x2x8x8xf32>, vector<1x2x8x8xf32>, vector<1x2x8x8xf32> -> vector<4x2x8x8xf32>
    %548 = vector.shape_cast %547 : vector<4x2x8x8xf32> to vector<8x8x8xf32>
    "tpu.trace_start"() <{level = 10 : i32, message = "nqd,nkd->nqk"}> : () -> ()
    %cst_144 = arith.constant dense<0.000000e+00> : vector<8x8x8xf32>
    %549 = tpu.matmul %520, %534, %cst_144 {dimension_numbers = #tpu.dot_dimension_numbers<[2], [2], [1], [1], [0, 0, 0, 1, 1, 1], [0], [0]>} : vector<8x8x8xf32>, vector<8x8x8xf32>, vector<8x8x8xf32> -> vector<8x8x8xf32>
    "tpu.trace_stop"() : () -> ()
    %cst_145 = arith.constant dense<0xFF800000> : vector<8x8xf32>
    %550 = vector.multi_reduction <maximumf>, %549, %cst_145 [2] : vector<8x8x8xf32> to vector<8x8xf32>
    %551 = vector.shape_cast %550 : vector<8x8xf32> to vector<8x8x1xf32>
    %552 = vector.broadcast %551 : vector<8x8x1xf32> to vector<8x8x8xf32>
    %553 = arith.subf %549, %552 : vector<8x8x8xf32>
    %554 = math.exp %553 : vector<8x8x8xf32>
    %cst_146 = arith.constant dense<0.000000e+00> : vector<8x8xf32>
    %555 = vector.multi_reduction <add>, %554, %cst_146 [2] : vector<8x8x8xf32> to vector<8x8xf32>
    %556 = vector.shape_cast %555 : vector<8x8xf32> to vector<8x8x1xf32>
    %557 = tpu.reciprocal %556 : vector<8x8x1xf32> -> vector<8x8x1xf32>
    %558 = vector.broadcast %557 : vector<8x8x1xf32> to vector<8x8x8xf32>
    %559 = arith.mulf %554, %558 : vector<8x8x8xf32>
    "tpu.trace_start"() <{level = 10 : i32, message = "nqk,nkd->nqd"}> : () -> ()
    %cst_147 = arith.constant dense<0.000000e+00> : vector<8x8x8xf32>
    %560 = tpu.matmul %559, %548, %cst_147 {dimension_numbers = #tpu.dot_dimension_numbers<[2], [1], [1], [2], [0, 0, 0, 1, 1, 2], [0], [0]>} : vector<8x8x8xf32>, vector<8x8x8xf32>, vector<8x8x8xf32> -> vector<8x8x8xf32>
    "tpu.trace_stop"() : () -> ()
    %561 = vector.shape_cast %560 : vector<8x8x8xf32> to vector<4x2x8x8xf32>
    %562 = vector.extract_strided_slice %561 {offsets = [0, 0, 0, 0], sizes = [1, 2, 8, 8], strides = [1, 1, 1, 1]} : vector<4x2x8x8xf32> to vector<1x2x8x8xf32>
    %563 = vector.shape_cast %562 : vector<1x2x8x8xf32> to vector<2x8x8xf32>
    %564 = vector.extract_strided_slice %561 {offsets = [1, 0, 0, 0], sizes = [1, 2, 8, 8], strides = [1, 1, 1, 1]} : vector<4x2x8x8xf32> to vector<1x2x8x8xf32>
    %565 = vector.shape_cast %564 : vector<1x2x8x8xf32> to vector<2x8x8xf32>
    %566 = vector.extract_strided_slice %561 {offsets = [2, 0, 0, 0], sizes = [1, 2, 8, 8], strides = [1, 1, 1, 1]} : vector<4x2x8x8xf32> to vector<1x2x8x8xf32>
    %567 = vector.shape_cast %566 : vector<1x2x8x8xf32> to vector<2x8x8xf32>
    %568 = vector.extract_strided_slice %561 {offsets = [3, 0, 0, 0], sizes = [1, 2, 8, 8], strides = [1, 1, 1, 1]} : vector<4x2x8x8xf32> to vector<1x2x8x8xf32>
    %569 = vector.shape_cast %568 : vector<1x2x8x8xf32> to vector<2x8x8xf32>
    %570 = tpu.concatenate %563, %565, %567, %569 in 2 : vector<2x8x8xf32>, vector<2x8x8xf32>, vector<2x8x8xf32>, vector<2x8x8xf32> -> vector<2x8x32xf32>
    %571 = vector.shape_cast %570 : vector<2x8x32xf32> to vector<16x32xf32>
    %c6_148 = arith.constant 6 : index
    %c0_149 = arith.constant 0 : index
    %c0_150 = arith.constant 0 : index
    %572 = vector.load %arg3[%c6_148, %c0_149, %c0_150] : memref<8x32x32xf32, #tpu.memory_space<vmem>>, vector<1x32x32xf32>
    %573 = vector.shape_cast %572 : vector<1x32x32xf32> to vector<32x32xf32>
    %cst_151 = arith.constant dense<0.000000e+00> : vector<16x32xf32>
    %574 = tpu.matmul %571, %573, %cst_151 {dimension_numbers = #tpu.dot_dimension_numbers<[1], [0], [0], [1], [0, 0, 1, 1], [], []>} : vector<16x32xf32>, vector<32x32xf32>, vector<16x32xf32> -> vector<16x32xf32>
    %c6_152 = arith.constant 6 : index
    %c0_153 = arith.constant 0 : index
    %c0_154 = arith.constant 0 : index
    %575 = vector.load %arg4[%c6_152, %c0_153, %c0_154] : memref<8x1x32xf32, #tpu.memory_space<vmem>>, vector<1x1x32xf32>
    %576 = vector.shape_cast %575 : vector<1x1x32xf32> to vector<1x32xf32>
    %577 = vector.broadcast %576 : vector<1x32xf32> to vector<16x32xf32>
    %578 = arith.addf %574, %577 : vector<16x32xf32>
    %c3 = arith.constant 3 : index
    %c0_155 = arith.constant 0 : index
    %c0_156 = arith.constant 0 : index
    %579 = vector.load %arg1[%c3, %c0_155, %c0_156] : memref<8x32x96xf32, #tpu.memory_space<vmem>>, vector<1x32x96xf32>
    %580 = vector.shape_cast %579 : vector<1x32x96xf32> to vector<32x96xf32>
    %cst_157 = arith.constant dense<0.000000e+00> : vector<16x96xf32>
    %581 = tpu.matmul %489, %580, %cst_157 {dimension_numbers = #tpu.dot_dimension_numbers<[1], [0], [0], [1], [0, 0, 1, 1], [], []>} : vector<16x32xf32>, vector<32x96xf32>, vector<16x96xf32> -> vector<16x96xf32>
    %c3_158 = arith.constant 3 : index
    %c0_159 = arith.constant 0 : index
    %c0_160 = arith.constant 0 : index
    %582 = vector.load %arg2[%c3_158, %c0_159, %c0_160] : memref<8x1x96xf32, #tpu.memory_space<vmem>>, vector<1x1x96xf32>
    %583 = vector.shape_cast %582 : vector<1x1x96xf32> to vector<1x96xf32>
    %584 = vector.broadcast %583 : vector<1x96xf32> to vector<16x96xf32>
    %585 = arith.addf %581, %584 : vector<16x96xf32>
    %586 = vector.extract_strided_slice %585 {offsets = [0, 0], sizes = [16, 32], strides = [1, 1]} : vector<16x96xf32> to vector<16x32xf32>
    %587 = vector.extract_strided_slice %585 {offsets = [0, 32], sizes = [16, 32], strides = [1, 1]} : vector<16x96xf32> to vector<16x32xf32>
    %588 = vector.extract_strided_slice %585 {offsets = [0, 64], sizes = [16, 32], strides = [1, 1]} : vector<16x96xf32> to vector<16x32xf32>
    %589 = vector.extract_strided_slice %586 {offsets = [0, 0], sizes = [16, 8], strides = [1, 1]} : vector<16x32xf32> to vector<16x8xf32>
    %590 = vector.shape_cast %589 : vector<16x8xf32> to vector<2x8x8xf32>
    %591 = vector.extract_strided_slice %586 {offsets = [0, 8], sizes = [16, 8], strides = [1, 1]} : vector<16x32xf32> to vector<16x8xf32>
    %592 = vector.shape_cast %591 : vector<16x8xf32> to vector<2x8x8xf32>
    %593 = vector.extract_strided_slice %586 {offsets = [0, 16], sizes = [16, 8], strides = [1, 1]} : vector<16x32xf32> to vector<16x8xf32>
    %594 = vector.shape_cast %593 : vector<16x8xf32> to vector<2x8x8xf32>
    %595 = vector.extract_strided_slice %586 {offsets = [0, 24], sizes = [16, 8], strides = [1, 1]} : vector<16x32xf32> to vector<16x8xf32>
    %596 = vector.shape_cast %595 : vector<16x8xf32> to vector<2x8x8xf32>
    %597 = vector.shape_cast %590 : vector<2x8x8xf32> to vector<1x2x8x8xf32>
    %598 = vector.shape_cast %592 : vector<2x8x8xf32> to vector<1x2x8x8xf32>
    %599 = vector.shape_cast %594 : vector<2x8x8xf32> to vector<1x2x8x8xf32>
    %600 = vector.shape_cast %596 : vector<2x8x8xf32> to vector<1x2x8x8xf32>
    %601 = tpu.concatenate %597, %598, %599, %600 in 0 : vector<1x2x8x8xf32>, vector<1x2x8x8xf32>, vector<1x2x8x8xf32>, vector<1x2x8x8xf32> -> vector<4x2x8x8xf32>
    %602 = vector.shape_cast %601 : vector<4x2x8x8xf32> to vector<8x8x8xf32>
    %603 = vector.extract_strided_slice %587 {offsets = [0, 0], sizes = [16, 8], strides = [1, 1]} : vector<16x32xf32> to vector<16x8xf32>
    %604 = vector.shape_cast %603 : vector<16x8xf32> to vector<2x8x8xf32>
    %605 = vector.extract_strided_slice %587 {offsets = [0, 8], sizes = [16, 8], strides = [1, 1]} : vector<16x32xf32> to vector<16x8xf32>
    %606 = vector.shape_cast %605 : vector<16x8xf32> to vector<2x8x8xf32>
    %607 = vector.extract_strided_slice %587 {offsets = [0, 16], sizes = [16, 8], strides = [1, 1]} : vector<16x32xf32> to vector<16x8xf32>
    %608 = vector.shape_cast %607 : vector<16x8xf32> to vector<2x8x8xf32>
    %609 = vector.extract_strided_slice %587 {offsets = [0, 24], sizes = [16, 8], strides = [1, 1]} : vector<16x32xf32> to vector<16x8xf32>
    %610 = vector.shape_cast %609 : vector<16x8xf32> to vector<2x8x8xf32>
    %611 = vector.shape_cast %604 : vector<2x8x8xf32> to vector<1x2x8x8xf32>
    %612 = vector.shape_cast %606 : vector<2x8x8xf32> to vector<1x2x8x8xf32>
    %613 = vector.shape_cast %608 : vector<2x8x8xf32> to vector<1x2x8x8xf32>
    %614 = vector.shape_cast %610 : vector<2x8x8xf32> to vector<1x2x8x8xf32>
    %615 = tpu.concatenate %611, %612, %613, %614 in 0 : vector<1x2x8x8xf32>, vector<1x2x8x8xf32>, vector<1x2x8x8xf32>, vector<1x2x8x8xf32> -> vector<4x2x8x8xf32>
    %616 = vector.shape_cast %615 : vector<4x2x8x8xf32> to vector<8x8x8xf32>
    %617 = vector.extract_strided_slice %588 {offsets = [0, 0], sizes = [16, 8], strides = [1, 1]} : vector<16x32xf32> to vector<16x8xf32>
    %618 = vector.shape_cast %617 : vector<16x8xf32> to vector<2x8x8xf32>
    %619 = vector.extract_strided_slice %588 {offsets = [0, 8], sizes = [16, 8], strides = [1, 1]} : vector<16x32xf32> to vector<16x8xf32>
    %620 = vector.shape_cast %619 : vector<16x8xf32> to vector<2x8x8xf32>
    %621 = vector.extract_strided_slice %588 {offsets = [0, 16], sizes = [16, 8], strides = [1, 1]} : vector<16x32xf32> to vector<16x8xf32>
    %622 = vector.shape_cast %621 : vector<16x8xf32> to vector<2x8x8xf32>
    %623 = vector.extract_strided_slice %588 {offsets = [0, 24], sizes = [16, 8], strides = [1, 1]} : vector<16x32xf32> to vector<16x8xf32>
    %624 = vector.shape_cast %623 : vector<16x8xf32> to vector<2x8x8xf32>
    %625 = vector.shape_cast %618 : vector<2x8x8xf32> to vector<1x2x8x8xf32>
    %626 = vector.shape_cast %620 : vector<2x8x8xf32> to vector<1x2x8x8xf32>
    %627 = vector.shape_cast %622 : vector<2x8x8xf32> to vector<1x2x8x8xf32>
    %628 = vector.shape_cast %624 : vector<2x8x8xf32> to vector<1x2x8x8xf32>
    %629 = tpu.concatenate %625, %626, %627, %628 in 0 : vector<1x2x8x8xf32>, vector<1x2x8x8xf32>, vector<1x2x8x8xf32>, vector<1x2x8x8xf32> -> vector<4x2x8x8xf32>
    %630 = vector.shape_cast %629 : vector<4x2x8x8xf32> to vector<8x8x8xf32>
    "tpu.trace_start"() <{level = 10 : i32, message = "nqd,nkd->nqk"}> : () -> ()
    %cst_161 = arith.constant dense<0.000000e+00> : vector<8x8x8xf32>
    %631 = tpu.matmul %602, %616, %cst_161 {dimension_numbers = #tpu.dot_dimension_numbers<[2], [2], [1], [1], [0, 0, 0, 1, 1, 1], [0], [0]>} : vector<8x8x8xf32>, vector<8x8x8xf32>, vector<8x8x8xf32> -> vector<8x8x8xf32>
    "tpu.trace_stop"() : () -> ()
    %cst_162 = arith.constant dense<0xFF800000> : vector<8x8xf32>
    %632 = vector.multi_reduction <maximumf>, %631, %cst_162 [2] : vector<8x8x8xf32> to vector<8x8xf32>
    %633 = vector.shape_cast %632 : vector<8x8xf32> to vector<8x8x1xf32>
    %634 = vector.broadcast %633 : vector<8x8x1xf32> to vector<8x8x8xf32>
    %635 = arith.subf %631, %634 : vector<8x8x8xf32>
    %636 = math.exp %635 : vector<8x8x8xf32>
    %cst_163 = arith.constant dense<0.000000e+00> : vector<8x8xf32>
    %637 = vector.multi_reduction <add>, %636, %cst_163 [2] : vector<8x8x8xf32> to vector<8x8xf32>
    %638 = vector.shape_cast %637 : vector<8x8xf32> to vector<8x8x1xf32>
    %639 = tpu.reciprocal %638 : vector<8x8x1xf32> -> vector<8x8x1xf32>
    %640 = vector.broadcast %639 : vector<8x8x1xf32> to vector<8x8x8xf32>
    %641 = arith.mulf %636, %640 : vector<8x8x8xf32>
    "tpu.trace_start"() <{level = 10 : i32, message = "nqk,nkd->nqd"}> : () -> ()
    %cst_164 = arith.constant dense<0.000000e+00> : vector<8x8x8xf32>
    %642 = tpu.matmul %641, %630, %cst_164 {dimension_numbers = #tpu.dot_dimension_numbers<[2], [1], [1], [2], [0, 0, 0, 1, 1, 2], [0], [0]>} : vector<8x8x8xf32>, vector<8x8x8xf32>, vector<8x8x8xf32> -> vector<8x8x8xf32>
    "tpu.trace_stop"() : () -> ()
    %643 = vector.shape_cast %642 : vector<8x8x8xf32> to vector<4x2x8x8xf32>
    %644 = vector.extract_strided_slice %643 {offsets = [0, 0, 0, 0], sizes = [1, 2, 8, 8], strides = [1, 1, 1, 1]} : vector<4x2x8x8xf32> to vector<1x2x8x8xf32>
    %645 = vector.shape_cast %644 : vector<1x2x8x8xf32> to vector<2x8x8xf32>
    %646 = vector.extract_strided_slice %643 {offsets = [1, 0, 0, 0], sizes = [1, 2, 8, 8], strides = [1, 1, 1, 1]} : vector<4x2x8x8xf32> to vector<1x2x8x8xf32>
    %647 = vector.shape_cast %646 : vector<1x2x8x8xf32> to vector<2x8x8xf32>
    %648 = vector.extract_strided_slice %643 {offsets = [2, 0, 0, 0], sizes = [1, 2, 8, 8], strides = [1, 1, 1, 1]} : vector<4x2x8x8xf32> to vector<1x2x8x8xf32>
    %649 = vector.shape_cast %648 : vector<1x2x8x8xf32> to vector<2x8x8xf32>
    %650 = vector.extract_strided_slice %643 {offsets = [3, 0, 0, 0], sizes = [1, 2, 8, 8], strides = [1, 1, 1, 1]} : vector<4x2x8x8xf32> to vector<1x2x8x8xf32>
    %651 = vector.shape_cast %650 : vector<1x2x8x8xf32> to vector<2x8x8xf32>
    %652 = tpu.concatenate %645, %647, %649, %651 in 2 : vector<2x8x8xf32>, vector<2x8x8xf32>, vector<2x8x8xf32>, vector<2x8x8xf32> -> vector<2x8x32xf32>
    %653 = vector.shape_cast %652 : vector<2x8x32xf32> to vector<16x32xf32>
    %c3_165 = arith.constant 3 : index
    %c0_166 = arith.constant 0 : index
    %c0_167 = arith.constant 0 : index
    %654 = vector.load %arg3[%c3_165, %c0_166, %c0_167] : memref<8x32x32xf32, #tpu.memory_space<vmem>>, vector<1x32x32xf32>
    %655 = vector.shape_cast %654 : vector<1x32x32xf32> to vector<32x32xf32>
    %cst_168 = arith.constant dense<0.000000e+00> : vector<16x32xf32>
    %656 = tpu.matmul %653, %655, %cst_168 {dimension_numbers = #tpu.dot_dimension_numbers<[1], [0], [0], [1], [0, 0, 1, 1], [], []>} : vector<16x32xf32>, vector<32x32xf32>, vector<16x32xf32> -> vector<16x32xf32>
    %c3_169 = arith.constant 3 : index
    %c0_170 = arith.constant 0 : index
    %c0_171 = arith.constant 0 : index
    %657 = vector.load %arg4[%c3_169, %c0_170, %c0_171] : memref<8x1x32xf32, #tpu.memory_space<vmem>>, vector<1x1x32xf32>
    %658 = vector.shape_cast %657 : vector<1x1x32xf32> to vector<1x32xf32>
    %659 = vector.broadcast %658 : vector<1x32xf32> to vector<16x32xf32>
    %660 = arith.addf %656, %659 : vector<16x32xf32>
    %c7 = arith.constant 7 : index
    %c0_172 = arith.constant 0 : index
    %c0_173 = arith.constant 0 : index
    %661 = vector.load %arg1[%c7, %c0_172, %c0_173] : memref<8x32x96xf32, #tpu.memory_space<vmem>>, vector<1x32x96xf32>
    %662 = vector.shape_cast %661 : vector<1x32x96xf32> to vector<32x96xf32>
    %cst_174 = arith.constant dense<0.000000e+00> : vector<16x96xf32>
    %663 = tpu.matmul %578, %662, %cst_174 {dimension_numbers = #tpu.dot_dimension_numbers<[1], [0], [0], [1], [0, 0, 1, 1], [], []>} : vector<16x32xf32>, vector<32x96xf32>, vector<16x96xf32> -> vector<16x96xf32>
    %c7_175 = arith.constant 7 : index
    %c0_176 = arith.constant 0 : index
    %c0_177 = arith.constant 0 : index
    %664 = vector.load %arg2[%c7_175, %c0_176, %c0_177] : memref<8x1x96xf32, #tpu.memory_space<vmem>>, vector<1x1x96xf32>
    %665 = vector.shape_cast %664 : vector<1x1x96xf32> to vector<1x96xf32>
    %666 = vector.broadcast %665 : vector<1x96xf32> to vector<16x96xf32>
    %667 = arith.addf %663, %666 : vector<16x96xf32>
    %668 = vector.extract_strided_slice %667 {offsets = [0, 0], sizes = [16, 32], strides = [1, 1]} : vector<16x96xf32> to vector<16x32xf32>
    %669 = vector.extract_strided_slice %667 {offsets = [0, 32], sizes = [16, 32], strides = [1, 1]} : vector<16x96xf32> to vector<16x32xf32>
    %670 = vector.extract_strided_slice %667 {offsets = [0, 64], sizes = [16, 32], strides = [1, 1]} : vector<16x96xf32> to vector<16x32xf32>
    %671 = vector.extract_strided_slice %668 {offsets = [0, 0], sizes = [16, 8], strides = [1, 1]} : vector<16x32xf32> to vector<16x8xf32>
    %672 = vector.shape_cast %671 : vector<16x8xf32> to vector<2x8x8xf32>
    %673 = vector.extract_strided_slice %668 {offsets = [0, 8], sizes = [16, 8], strides = [1, 1]} : vector<16x32xf32> to vector<16x8xf32>
    %674 = vector.shape_cast %673 : vector<16x8xf32> to vector<2x8x8xf32>
    %675 = vector.extract_strided_slice %668 {offsets = [0, 16], sizes = [16, 8], strides = [1, 1]} : vector<16x32xf32> to vector<16x8xf32>
    %676 = vector.shape_cast %675 : vector<16x8xf32> to vector<2x8x8xf32>
    %677 = vector.extract_strided_slice %668 {offsets = [0, 24], sizes = [16, 8], strides = [1, 1]} : vector<16x32xf32> to vector<16x8xf32>
    %678 = vector.shape_cast %677 : vector<16x8xf32> to vector<2x8x8xf32>
    %679 = vector.shape_cast %672 : vector<2x8x8xf32> to vector<1x2x8x8xf32>
    %680 = vector.shape_cast %674 : vector<2x8x8xf32> to vector<1x2x8x8xf32>
    %681 = vector.shape_cast %676 : vector<2x8x8xf32> to vector<1x2x8x8xf32>
    %682 = vector.shape_cast %678 : vector<2x8x8xf32> to vector<1x2x8x8xf32>
    %683 = tpu.concatenate %679, %680, %681, %682 in 0 : vector<1x2x8x8xf32>, vector<1x2x8x8xf32>, vector<1x2x8x8xf32>, vector<1x2x8x8xf32> -> vector<4x2x8x8xf32>
    %684 = vector.shape_cast %683 : vector<4x2x8x8xf32> to vector<8x8x8xf32>
    %685 = vector.extract_strided_slice %669 {offsets = [0, 0], sizes = [16, 8], strides = [1, 1]} : vector<16x32xf32> to vector<16x8xf32>
    %686 = vector.shape_cast %685 : vector<16x8xf32> to vector<2x8x8xf32>
    %687 = vector.extract_strided_slice %669 {offsets = [0, 8], sizes = [16, 8], strides = [1, 1]} : vector<16x32xf32> to vector<16x8xf32>
    %688 = vector.shape_cast %687 : vector<16x8xf32> to vector<2x8x8xf32>
    %689 = vector.extract_strided_slice %669 {offsets = [0, 16], sizes = [16, 8], strides = [1, 1]} : vector<16x32xf32> to vector<16x8xf32>
    %690 = vector.shape_cast %689 : vector<16x8xf32> to vector<2x8x8xf32>
    %691 = vector.extract_strided_slice %669 {offsets = [0, 24], sizes = [16, 8], strides = [1, 1]} : vector<16x32xf32> to vector<16x8xf32>
    %692 = vector.shape_cast %691 : vector<16x8xf32> to vector<2x8x8xf32>
    %693 = vector.shape_cast %686 : vector<2x8x8xf32> to vector<1x2x8x8xf32>
    %694 = vector.shape_cast %688 : vector<2x8x8xf32> to vector<1x2x8x8xf32>
    %695 = vector.shape_cast %690 : vector<2x8x8xf32> to vector<1x2x8x8xf32>
    %696 = vector.shape_cast %692 : vector<2x8x8xf32> to vector<1x2x8x8xf32>
    %697 = tpu.concatenate %693, %694, %695, %696 in 0 : vector<1x2x8x8xf32>, vector<1x2x8x8xf32>, vector<1x2x8x8xf32>, vector<1x2x8x8xf32> -> vector<4x2x8x8xf32>
    %698 = vector.shape_cast %697 : vector<4x2x8x8xf32> to vector<8x8x8xf32>
    %699 = vector.extract_strided_slice %670 {offsets = [0, 0], sizes = [16, 8], strides = [1, 1]} : vector<16x32xf32> to vector<16x8xf32>
    %700 = vector.shape_cast %699 : vector<16x8xf32> to vector<2x8x8xf32>
    %701 = vector.extract_strided_slice %670 {offsets = [0, 8], sizes = [16, 8], strides = [1, 1]} : vector<16x32xf32> to vector<16x8xf32>
    %702 = vector.shape_cast %701 : vector<16x8xf32> to vector<2x8x8xf32>
    %703 = vector.extract_strided_slice %670 {offsets = [0, 16], sizes = [16, 8], strides = [1, 1]} : vector<16x32xf32> to vector<16x8xf32>
    %704 = vector.shape_cast %703 : vector<16x8xf32> to vector<2x8x8xf32>
    %705 = vector.extract_strided_slice %670 {offsets = [0, 24], sizes = [16, 8], strides = [1, 1]} : vector<16x32xf32> to vector<16x8xf32>
    %706 = vector.shape_cast %705 : vector<16x8xf32> to vector<2x8x8xf32>
    %707 = vector.shape_cast %700 : vector<2x8x8xf32> to vector<1x2x8x8xf32>
    %708 = vector.shape_cast %702 : vector<2x8x8xf32> to vector<1x2x8x8xf32>
    %709 = vector.shape_cast %704 : vector<2x8x8xf32> to vector<1x2x8x8xf32>
    %710 = vector.shape_cast %706 : vector<2x8x8xf32> to vector<1x2x8x8xf32>
    %711 = tpu.concatenate %707, %708, %709, %710 in 0 : vector<1x2x8x8xf32>, vector<1x2x8x8xf32>, vector<1x2x8x8xf32>, vector<1x2x8x8xf32> -> vector<4x2x8x8xf32>
    %712 = vector.shape_cast %711 : vector<4x2x8x8xf32> to vector<8x8x8xf32>
    "tpu.trace_start"() <{level = 10 : i32, message = "nqd,nkd->nqk"}> : () -> ()
    %cst_178 = arith.constant dense<0.000000e+00> : vector<8x8x8xf32>
    %713 = tpu.matmul %684, %698, %cst_178 {dimension_numbers = #tpu.dot_dimension_numbers<[2], [2], [1], [1], [0, 0, 0, 1, 1, 1], [0], [0]>} : vector<8x8x8xf32>, vector<8x8x8xf32>, vector<8x8x8xf32> -> vector<8x8x8xf32>
    "tpu.trace_stop"() : () -> ()
    %cst_179 = arith.constant dense<0xFF800000> : vector<8x8xf32>
    %714 = vector.multi_reduction <maximumf>, %713, %cst_179 [2] : vector<8x8x8xf32> to vector<8x8xf32>
    %715 = vector.shape_cast %714 : vector<8x8xf32> to vector<8x8x1xf32>
    %716 = vector.broadcast %715 : vector<8x8x1xf32> to vector<8x8x8xf32>
    %717 = arith.subf %713, %716 : vector<8x8x8xf32>
    %718 = math.exp %717 : vector<8x8x8xf32>
    %cst_180 = arith.constant dense<0.000000e+00> : vector<8x8xf32>
    %719 = vector.multi_reduction <add>, %718, %cst_180 [2] : vector<8x8x8xf32> to vector<8x8xf32>
    %720 = vector.shape_cast %719 : vector<8x8xf32> to vector<8x8x1xf32>
    %721 = tpu.reciprocal %720 : vector<8x8x1xf32> -> vector<8x8x1xf32>
    %722 = vector.broadcast %721 : vector<8x8x1xf32> to vector<8x8x8xf32>
    %723 = arith.mulf %718, %722 : vector<8x8x8xf32>
    "tpu.trace_start"() <{level = 10 : i32, message = "nqk,nkd->nqd"}> : () -> ()
    %cst_181 = arith.constant dense<0.000000e+00> : vector<8x8x8xf32>
    %724 = tpu.matmul %723, %712, %cst_181 {dimension_numbers = #tpu.dot_dimension_numbers<[2], [1], [1], [2], [0, 0, 0, 1, 1, 2], [0], [0]>} : vector<8x8x8xf32>, vector<8x8x8xf32>, vector<8x8x8xf32> -> vector<8x8x8xf32>
    "tpu.trace_stop"() : () -> ()
    %725 = vector.shape_cast %724 : vector<8x8x8xf32> to vector<4x2x8x8xf32>
    %726 = vector.extract_strided_slice %725 {offsets = [0, 0, 0, 0], sizes = [1, 2, 8, 8], strides = [1, 1, 1, 1]} : vector<4x2x8x8xf32> to vector<1x2x8x8xf32>
    %727 = vector.shape_cast %726 : vector<1x2x8x8xf32> to vector<2x8x8xf32>
    %728 = vector.extract_strided_slice %725 {offsets = [1, 0, 0, 0], sizes = [1, 2, 8, 8], strides = [1, 1, 1, 1]} : vector<4x2x8x8xf32> to vector<1x2x8x8xf32>
    %729 = vector.shape_cast %728 : vector<1x2x8x8xf32> to vector<2x8x8xf32>
    %730 = vector.extract_strided_slice %725 {offsets = [2, 0, 0, 0], sizes = [1, 2, 8, 8], strides = [1, 1, 1, 1]} : vector<4x2x8x8xf32> to vector<1x2x8x8xf32>
    %731 = vector.shape_cast %730 : vector<1x2x8x8xf32> to vector<2x8x8xf32>
    %732 = vector.extract_strided_slice %725 {offsets = [3, 0, 0, 0], sizes = [1, 2, 8, 8], strides = [1, 1, 1, 1]} : vector<4x2x8x8xf32> to vector<1x2x8x8xf32>
    %733 = vector.shape_cast %732 : vector<1x2x8x8xf32> to vector<2x8x8xf32>
    %734 = tpu.concatenate %727, %729, %731, %733 in 2 : vector<2x8x8xf32>, vector<2x8x8xf32>, vector<2x8x8xf32>, vector<2x8x8xf32> -> vector<2x8x32xf32>
    %735 = vector.shape_cast %734 : vector<2x8x32xf32> to vector<16x32xf32>
    %c7_182 = arith.constant 7 : index
    %c0_183 = arith.constant 0 : index
    %c0_184 = arith.constant 0 : index
    %736 = vector.load %arg3[%c7_182, %c0_183, %c0_184] : memref<8x32x32xf32, #tpu.memory_space<vmem>>, vector<1x32x32xf32>
    %737 = vector.shape_cast %736 : vector<1x32x32xf32> to vector<32x32xf32>
    %cst_185 = arith.constant dense<0.000000e+00> : vector<16x32xf32>
    %738 = tpu.matmul %735, %737, %cst_185 {dimension_numbers = #tpu.dot_dimension_numbers<[1], [0], [0], [1], [0, 0, 1, 1], [], []>} : vector<16x32xf32>, vector<32x32xf32>, vector<16x32xf32> -> vector<16x32xf32>
    %c7_186 = arith.constant 7 : index
    %c0_187 = arith.constant 0 : index
    %c0_188 = arith.constant 0 : index
    %739 = vector.load %arg4[%c7_186, %c0_187, %c0_188] : memref<8x1x32xf32, #tpu.memory_space<vmem>>, vector<1x1x32xf32>
    %740 = vector.shape_cast %739 : vector<1x1x32xf32> to vector<1x32xf32>
    %741 = vector.broadcast %740 : vector<1x32xf32> to vector<16x32xf32>
    %742 = arith.addf %738, %741 : vector<16x32xf32>
    %743 = arith.addf %3, %660 : vector<16x32xf32>
    %744 = arith.addf %6, %742 : vector<16x32xf32>
    %c2_189 = arith.constant 2 : index
    %c0_190 = arith.constant 0 : index
    %c0_191 = arith.constant 0 : index
    %745 = vector.load %arg5[%c2_189, %c0_190, %c0_191] : memref<8x1x32xf32, #tpu.memory_space<vmem>>, vector<1x1x32xf32>
    %746 = vector.shape_cast %745 : vector<1x1x32xf32> to vector<1x32xf32>
    %c3_192 = arith.constant 3 : index
    %c0_193 = arith.constant 0 : index
    %c0_194 = arith.constant 0 : index
    %747 = vector.load %arg5[%c3_192, %c0_193, %c0_194] : memref<8x1x32xf32, #tpu.memory_space<vmem>>, vector<1x1x32xf32>
    %748 = vector.shape_cast %747 : vector<1x1x32xf32> to vector<1x32xf32>
    %cst_195 = arith.constant dense<0.000000e+00> : vector<16xf32>
    %749 = vector.multi_reduction <add>, %743, %cst_195 [1] : vector<16x32xf32> to vector<16xf32>
    %750 = vector.shape_cast %749 : vector<16xf32> to vector<16x1xf32>
    %cst_196 = arith.constant 3.200000e+01 : f32
    %751 = vector.broadcast %cst_196 : f32 to vector<16x1xf32>
    %752 = arith.divf %750, %751 : vector<16x1xf32>
    %753 = vector.broadcast %752 : vector<16x1xf32> to vector<16x32xf32>
    %754 = arith.subf %743, %753 : vector<16x32xf32>
    %755 = arith.mulf %754, %754 : vector<16x32xf32>
    %cst_197 = arith.constant dense<0.000000e+00> : vector<16xf32>
    %756 = vector.multi_reduction <add>, %755, %cst_197 [1] : vector<16x32xf32> to vector<16xf32>
    %757 = vector.shape_cast %756 : vector<16xf32> to vector<16x1xf32>
    %cst_198 = arith.constant 3.200000e+01 : f32
    %758 = vector.broadcast %cst_198 : f32 to vector<16x1xf32>
    %759 = arith.divf %757, %758 : vector<16x1xf32>
    %760 = vector.broadcast %752 : vector<16x1xf32> to vector<16x32xf32>
    %761 = arith.subf %743, %760 : vector<16x32xf32>
    %cst_199 = arith.constant 9.99999974E-6 : f32
    %762 = vector.broadcast %cst_199 : f32 to vector<16x1xf32>
    %763 = arith.addf %759, %762 : vector<16x1xf32>
    %764 = math.rsqrt %763 : vector<16x1xf32>
    %765 = vector.broadcast %764 : vector<16x1xf32> to vector<16x32xf32>
    %766 = arith.mulf %761, %765 : vector<16x32xf32>
    %767 = vector.broadcast %746 : vector<1x32xf32> to vector<16x32xf32>
    %768 = arith.mulf %766, %767 : vector<16x32xf32>
    %769 = vector.broadcast %748 : vector<1x32xf32> to vector<16x32xf32>
    %770 = arith.addf %768, %769 : vector<16x32xf32>
    %c0_200 = arith.constant 0 : index
    %c0_201 = arith.constant 0 : index
    %c0_202 = arith.constant 0 : index
    %771 = vector.load %arg6[%c0_200, %c0_201, %c0_202] : memref<2x32x64xf32, #tpu.memory_space<vmem>>, vector<1x32x64xf32>
    %772 = vector.shape_cast %771 : vector<1x32x64xf32> to vector<32x64xf32>
    %cst_203 = arith.constant dense<0.000000e+00> : vector<16x64xf32>
    %773 = tpu.matmul %770, %772, %cst_203 {dimension_numbers = #tpu.dot_dimension_numbers<[1], [0], [0], [1], [0, 0, 1, 1], [], []>} : vector<16x32xf32>, vector<32x64xf32>, vector<16x64xf32> -> vector<16x64xf32>
    %c0_204 = arith.constant 0 : index
    %c0_205 = arith.constant 0 : index
    %c0_206 = arith.constant 0 : index
    %774 = vector.load %arg7[%c0_204, %c0_205, %c0_206] : memref<2x1x64xf32, #tpu.memory_space<vmem>>, vector<1x1x64xf32>
    %775 = vector.shape_cast %774 : vector<1x1x64xf32> to vector<1x64xf32>
    %776 = vector.broadcast %775 : vector<1x64xf32> to vector<16x64xf32>
    %777 = arith.addf %773, %776 : vector<16x64xf32>
    %cst_207 = arith.constant 5.000000e-01 : f32
    %778 = vector.broadcast %cst_207 : f32 to vector<16x64xf32>
    %779 = arith.mulf %778, %777 : vector<16x64xf32>
    %cst_208 = arith.constant 0.707106769 : f32
    %780 = vector.broadcast %cst_208 : f32 to vector<16x64xf32>
    %781 = arith.mulf %777, %780 : vector<16x64xf32>
    %cst_209 = arith.constant 0.000000e+00 : f32
    %782 = vector.broadcast %cst_209 : f32 to vector<16x64xf32>
    %783 = arith.cmpf oge, %781, %782 : vector<16x64xf32>
    %cst_210 = arith.constant 1.000000e+00 : f32
    %cst_211 = arith.constant -1.000000e+00 : f32
    %784 = vector.broadcast %cst_210 : f32 to vector<16x64xf32>
    %785 = vector.broadcast %cst_211 : f32 to vector<16x64xf32>
    %786 = arith.select %783, %784, %785 : vector<16x64xi1>, vector<16x64xf32>
    %787 = math.absf %781 : vector<16x64xf32>
    %cst_212 = arith.constant 0.327591091 : f32
    %788 = vector.broadcast %cst_212 : f32 to vector<16x64xf32>
    %789 = arith.mulf %788, %787 : vector<16x64xf32>
    %cst_213 = arith.constant 1.000000e+00 : f32
    %790 = vector.broadcast %cst_213 : f32 to vector<16x64xf32>
    %791 = arith.addf %790, %789 : vector<16x64xf32>
    %792 = tpu.reciprocal %791 : vector<16x64xf32> -> vector<16x64xf32>
    %cst_214 = arith.constant 1.06140542 : f32
    %793 = vector.broadcast %cst_214 : f32 to vector<16x64xf32>
    %794 = arith.mulf %793, %792 : vector<16x64xf32>
    %cst_215 = arith.constant -1.45315206 : f32
    %795 = vector.broadcast %cst_215 : f32 to vector<16x64xf32>
    %796 = arith.addf %794, %795 : vector<16x64xf32>
    %797 = arith.mulf %796, %792 : vector<16x64xf32>
    %cst_216 = arith.constant 1.42141378 : f32
    %798 = vector.broadcast %cst_216 : f32 to vector<16x64xf32>
    %799 = arith.addf %797, %798 : vector<16x64xf32>
    %800 = arith.mulf %799, %792 : vector<16x64xf32>
    %cst_217 = arith.constant -0.284496725 : f32
    %801 = vector.broadcast %cst_217 : f32 to vector<16x64xf32>
    %802 = arith.addf %800, %801 : vector<16x64xf32>
    %803 = arith.mulf %802, %792 : vector<16x64xf32>
    %cst_218 = arith.constant 0.254829586 : f32
    %804 = vector.broadcast %cst_218 : f32 to vector<16x64xf32>
    %805 = arith.addf %803, %804 : vector<16x64xf32>
    %806 = arith.mulf %805, %792 : vector<16x64xf32>
    %cst_219 = arith.constant 0.000000e+00 : f32
    %807 = vector.broadcast %cst_219 : f32 to vector<16x64xf32>
    %808 = arith.subf %807, %787 : vector<16x64xf32>
    %809 = arith.mulf %808, %787 : vector<16x64xf32>
    %810 = math.exp %809 : vector<16x64xf32>
    %811 = arith.mulf %806, %810 : vector<16x64xf32>
    %cst_220 = arith.constant 1.000000e+00 : f32
    %812 = vector.broadcast %cst_220 : f32 to vector<16x64xf32>
    %813 = arith.subf %812, %811 : vector<16x64xf32>
    %814 = arith.mulf %786, %813 : vector<16x64xf32>
    %cst_221 = arith.constant 1.000000e+00 : f32
    %815 = vector.broadcast %cst_221 : f32 to vector<16x64xf32>
    %816 = arith.addf %815, %814 : vector<16x64xf32>
    %817 = arith.mulf %779, %816 : vector<16x64xf32>
    %c0_222 = arith.constant 0 : index
    %c0_223 = arith.constant 0 : index
    %c0_224 = arith.constant 0 : index
    %818 = vector.load %arg8[%c0_222, %c0_223, %c0_224] : memref<2x64x32xf32, #tpu.memory_space<vmem>>, vector<1x64x32xf32>
    %819 = vector.shape_cast %818 : vector<1x64x32xf32> to vector<64x32xf32>
    %cst_225 = arith.constant dense<0.000000e+00> : vector<16x32xf32>
    %820 = tpu.matmul %817, %819, %cst_225 {dimension_numbers = #tpu.dot_dimension_numbers<[1], [0], [0], [1], [0, 0, 1, 1], [], []>} : vector<16x64xf32>, vector<64x32xf32>, vector<16x32xf32> -> vector<16x32xf32>
    %c0_226 = arith.constant 0 : index
    %c0_227 = arith.constant 0 : index
    %c0_228 = arith.constant 0 : index
    %821 = vector.load %arg9[%c0_226, %c0_227, %c0_228] : memref<2x1x32xf32, #tpu.memory_space<vmem>>, vector<1x1x32xf32>
    %822 = vector.shape_cast %821 : vector<1x1x32xf32> to vector<1x32xf32>
    %823 = vector.broadcast %822 : vector<1x32xf32> to vector<16x32xf32>
    %824 = arith.addf %820, %823 : vector<16x32xf32>
    %825 = arith.addf %743, %824 : vector<16x32xf32>
    %c6_229 = arith.constant 6 : index
    %c0_230 = arith.constant 0 : index
    %c0_231 = arith.constant 0 : index
    %826 = vector.load %arg5[%c6_229, %c0_230, %c0_231] : memref<8x1x32xf32, #tpu.memory_space<vmem>>, vector<1x1x32xf32>
    %827 = vector.shape_cast %826 : vector<1x1x32xf32> to vector<1x32xf32>
    %c7_232 = arith.constant 7 : index
    %c0_233 = arith.constant 0 : index
    %c0_234 = arith.constant 0 : index
    %828 = vector.load %arg5[%c7_232, %c0_233, %c0_234] : memref<8x1x32xf32, #tpu.memory_space<vmem>>, vector<1x1x32xf32>
    %829 = vector.shape_cast %828 : vector<1x1x32xf32> to vector<1x32xf32>
    %cst_235 = arith.constant dense<0.000000e+00> : vector<16xf32>
    %830 = vector.multi_reduction <add>, %744, %cst_235 [1] : vector<16x32xf32> to vector<16xf32>
    %831 = vector.shape_cast %830 : vector<16xf32> to vector<16x1xf32>
    %cst_236 = arith.constant 3.200000e+01 : f32
    %832 = vector.broadcast %cst_236 : f32 to vector<16x1xf32>
    %833 = arith.divf %831, %832 : vector<16x1xf32>
    %834 = vector.broadcast %833 : vector<16x1xf32> to vector<16x32xf32>
    %835 = arith.subf %744, %834 : vector<16x32xf32>
    %836 = arith.mulf %835, %835 : vector<16x32xf32>
    %cst_237 = arith.constant dense<0.000000e+00> : vector<16xf32>
    %837 = vector.multi_reduction <add>, %836, %cst_237 [1] : vector<16x32xf32> to vector<16xf32>
    %838 = vector.shape_cast %837 : vector<16xf32> to vector<16x1xf32>
    %cst_238 = arith.constant 3.200000e+01 : f32
    %839 = vector.broadcast %cst_238 : f32 to vector<16x1xf32>
    %840 = arith.divf %838, %839 : vector<16x1xf32>
    %841 = vector.broadcast %833 : vector<16x1xf32> to vector<16x32xf32>
    %842 = arith.subf %744, %841 : vector<16x32xf32>
    %cst_239 = arith.constant 9.99999974E-6 : f32
    %843 = vector.broadcast %cst_239 : f32 to vector<16x1xf32>
    %844 = arith.addf %840, %843 : vector<16x1xf32>
    %845 = math.rsqrt %844 : vector<16x1xf32>
    %846 = vector.broadcast %845 : vector<16x1xf32> to vector<16x32xf32>
    %847 = arith.mulf %842, %846 : vector<16x32xf32>
    %848 = vector.broadcast %827 : vector<1x32xf32> to vector<16x32xf32>
    %849 = arith.mulf %847, %848 : vector<16x32xf32>
    %850 = vector.broadcast %829 : vector<1x32xf32> to vector<16x32xf32>
    %851 = arith.addf %849, %850 : vector<16x32xf32>
    %c1_240 = arith.constant 1 : index
    %c0_241 = arith.constant 0 : index
    %c0_242 = arith.constant 0 : index
    %852 = vector.load %arg6[%c1_240, %c0_241, %c0_242] : memref<2x32x64xf32, #tpu.memory_space<vmem>>, vector<1x32x64xf32>
    %853 = vector.shape_cast %852 : vector<1x32x64xf32> to vector<32x64xf32>
    %cst_243 = arith.constant dense<0.000000e+00> : vector<16x64xf32>
    %854 = tpu.matmul %851, %853, %cst_243 {dimension_numbers = #tpu.dot_dimension_numbers<[1], [0], [0], [1], [0, 0, 1, 1], [], []>} : vector<16x32xf32>, vector<32x64xf32>, vector<16x64xf32> -> vector<16x64xf32>
    %c1_244 = arith.constant 1 : index
    %c0_245 = arith.constant 0 : index
    %c0_246 = arith.constant 0 : index
    %855 = vector.load %arg7[%c1_244, %c0_245, %c0_246] : memref<2x1x64xf32, #tpu.memory_space<vmem>>, vector<1x1x64xf32>
    %856 = vector.shape_cast %855 : vector<1x1x64xf32> to vector<1x64xf32>
    %857 = vector.broadcast %856 : vector<1x64xf32> to vector<16x64xf32>
    %858 = arith.addf %854, %857 : vector<16x64xf32>
    %cst_247 = arith.constant 5.000000e-01 : f32
    %859 = vector.broadcast %cst_247 : f32 to vector<16x64xf32>
    %860 = arith.mulf %859, %858 : vector<16x64xf32>
    %cst_248 = arith.constant 0.707106769 : f32
    %861 = vector.broadcast %cst_248 : f32 to vector<16x64xf32>
    %862 = arith.mulf %858, %861 : vector<16x64xf32>
    %cst_249 = arith.constant 0.000000e+00 : f32
    %863 = vector.broadcast %cst_249 : f32 to vector<16x64xf32>
    %864 = arith.cmpf oge, %862, %863 : vector<16x64xf32>
    %cst_250 = arith.constant 1.000000e+00 : f32
    %cst_251 = arith.constant -1.000000e+00 : f32
    %865 = vector.broadcast %cst_250 : f32 to vector<16x64xf32>
    %866 = vector.broadcast %cst_251 : f32 to vector<16x64xf32>
    %867 = arith.select %864, %865, %866 : vector<16x64xi1>, vector<16x64xf32>
    %868 = math.absf %862 : vector<16x64xf32>
    %cst_252 = arith.constant 0.327591091 : f32
    %869 = vector.broadcast %cst_252 : f32 to vector<16x64xf32>
    %870 = arith.mulf %869, %868 : vector<16x64xf32>
    %cst_253 = arith.constant 1.000000e+00 : f32
    %871 = vector.broadcast %cst_253 : f32 to vector<16x64xf32>
    %872 = arith.addf %871, %870 : vector<16x64xf32>
    %873 = tpu.reciprocal %872 : vector<16x64xf32> -> vector<16x64xf32>
    %cst_254 = arith.constant 1.06140542 : f32
    %874 = vector.broadcast %cst_254 : f32 to vector<16x64xf32>
    %875 = arith.mulf %874, %873 : vector<16x64xf32>
    %cst_255 = arith.constant -1.45315206 : f32
    %876 = vector.broadcast %cst_255 : f32 to vector<16x64xf32>
    %877 = arith.addf %875, %876 : vector<16x64xf32>
    %878 = arith.mulf %877, %873 : vector<16x64xf32>
    %cst_256 = arith.constant 1.42141378 : f32
    %879 = vector.broadcast %cst_256 : f32 to vector<16x64xf32>
    %880 = arith.addf %878, %879 : vector<16x64xf32>
    %881 = arith.mulf %880, %873 : vector<16x64xf32>
    %cst_257 = arith.constant -0.284496725 : f32
    %882 = vector.broadcast %cst_257 : f32 to vector<16x64xf32>
    %883 = arith.addf %881, %882 : vector<16x64xf32>
    %884 = arith.mulf %883, %873 : vector<16x64xf32>
    %cst_258 = arith.constant 0.254829586 : f32
    %885 = vector.broadcast %cst_258 : f32 to vector<16x64xf32>
    %886 = arith.addf %884, %885 : vector<16x64xf32>
    %887 = arith.mulf %886, %873 : vector<16x64xf32>
    %cst_259 = arith.constant 0.000000e+00 : f32
    %888 = vector.broadcast %cst_259 : f32 to vector<16x64xf32>
    %889 = arith.subf %888, %868 : vector<16x64xf32>
    %890 = arith.mulf %889, %868 : vector<16x64xf32>
    %891 = math.exp %890 : vector<16x64xf32>
    %892 = arith.mulf %887, %891 : vector<16x64xf32>
    %cst_260 = arith.constant 1.000000e+00 : f32
    %893 = vector.broadcast %cst_260 : f32 to vector<16x64xf32>
    %894 = arith.subf %893, %892 : vector<16x64xf32>
    %895 = arith.mulf %867, %894 : vector<16x64xf32>
    %cst_261 = arith.constant 1.000000e+00 : f32
    %896 = vector.broadcast %cst_261 : f32 to vector<16x64xf32>
    %897 = arith.addf %896, %895 : vector<16x64xf32>
    %898 = arith.mulf %860, %897 : vector<16x64xf32>
    %c1_262 = arith.constant 1 : index
    %c0_263 = arith.constant 0 : index
    %c0_264 = arith.constant 0 : index
    %899 = vector.load %arg8[%c1_262, %c0_263, %c0_264] : memref<2x64x32xf32, #tpu.memory_space<vmem>>, vector<1x64x32xf32>
    %900 = vector.shape_cast %899 : vector<1x64x32xf32> to vector<64x32xf32>
    %cst_265 = arith.constant dense<0.000000e+00> : vector<16x32xf32>
    %901 = tpu.matmul %898, %900, %cst_265 {dimension_numbers = #tpu.dot_dimension_numbers<[1], [0], [0], [1], [0, 0, 1, 1], [], []>} : vector<16x64xf32>, vector<64x32xf32>, vector<16x32xf32> -> vector<16x32xf32>
    %c1_266 = arith.constant 1 : index
    %c0_267 = arith.constant 0 : index
    %c0_268 = arith.constant 0 : index
    %902 = vector.load %arg9[%c1_266, %c0_267, %c0_268] : memref<2x1x32xf32, #tpu.memory_space<vmem>>, vector<1x1x32xf32>
    %903 = vector.shape_cast %902 : vector<1x1x32xf32> to vector<1x32xf32>
    %904 = vector.broadcast %903 : vector<1x32xf32> to vector<16x32xf32>
    %905 = arith.addf %901, %904 : vector<16x32xf32>
    %906 = arith.addf %744, %905 : vector<16x32xf32>
    %907 = vector.shape_cast %825 : vector<16x32xf32> to vector<2x8x32xf32>
    %c0_269 = arith.constant 0 : index
    %c0_270 = arith.constant 0 : index
    %c0_271 = arith.constant 0 : index
    %c0_272 = arith.constant 0 : index
    %908 = vector.load %arg10[%c0_269, %c0_270, %c0_271, %c0_272] : memref<2x2x8x32xf32, #tpu.memory_space<vmem>>, vector<2x1x8x32xf32>
    %909 = vector.shape_cast %908 : vector<2x1x8x32xf32> to vector<2x8x32xf32>
    %910 = vector.shape_cast %907 : vector<2x8x32xf32> to vector<2x1x8x32xf32>
    tpu.vector_store %arg10[%c0_269, %c0_270, %c0_271, %c0_272], %910 {strides = array<i32>} : memref<2x2x8x32xf32, #tpu.memory_space<vmem>>, vector<2x1x8x32xf32>,
    %911 = vector.shape_cast %906 : vector<16x32xf32> to vector<2x8x32xf32>
    %c0_273 = arith.constant 0 : index
    %c1_274 = arith.constant 1 : index
    %c0_275 = arith.constant 0 : index
    %c0_276 = arith.constant 0 : index
    %912 = vector.load %arg10[%c0_273, %c1_274, %c0_275, %c0_276] : memref<2x2x8x32xf32, #tpu.memory_space<vmem>>, vector<2x1x8x32xf32>
    %913 = vector.shape_cast %912 : vector<2x1x8x32xf32> to vector<2x8x32xf32>
    %914 = vector.shape_cast %911 : vector<2x8x32xf32> to vector<2x1x8x32xf32>
    tpu.vector_store %arg10[%c0_273, %c1_274, %c0_275, %c0_276], %914 {strides = array<i32>} : memref<2x2x8x32xf32, #tpu.memory_space<vmem>>, vector<2x1x8x32xf32>,
    return
  }
}

</mosaic_0001>

<bundles_post_ra>
// kernel: tpu_custom_call.1
= control target key start
LH: loop header
LB: loop body
LE: loop exit
PB: predicated region body
PF: predicated region fallthrough
CT: control target
= control target key end

     0   :  { %15 = vsyncpa [#allocation3], 0  ;;  %s17586_s0 = inlined_call_operand.vmem [shape: f32[2,2,8,32], index: 0, kind: input, shape index: {}]   ;;  %s17587_s1 = inlined_call_operand.hbm [shape: f32[8,32,96], index: 1, kind: input, shape index: {}]   ;;  %s17588_s2 = inlined_call_operand.vmem [shape: f32[8,1,96], index: 2, kind: input, shape index: {}]   ;;  %s17589_s3 = inlined_call_operand.hbm [shape: f32[8,32,32], index: 3, kind: input, shape index: {}]   ;;  %s17590_s4 = inlined_call_operand.vmem [shape: f32[8,1,32], index: 4, kind: input, shape index: {}]   ;;  %s17591_s5 = inlined_call_operand.vmem [shape: f32[8,1,32], index: 5, kind: input, shape index: {}]   ;;  %s17592_s6 = inlined_call_operand.vmem [shape: f32[2,32,64], index: 6, kind: input, shape index: {}]   ;;  %s17593_s7 = inlined_call_operand.vmem [shape: f32[2,1,64], index: 7, kind: input, shape index: {}]   ;;  %s17594_s8 = inlined_call_operand.vmem [shape: f32[2,64,32], index: 8, kind: input, shape index: {}]   ;;  %s17595_s9 = inlined_call_operand.vmem [shape: f32[2,1,32], index: 9, kind: input, shape index: {}]   ;;  %s17596_s10 = inlined_call_operand.hbm [shape: f32[2,2,8,32], index: 10, kind: output, shape index: {}]  }
   0x1   :  { %16 = vsyncpa [#allocation6], 0 }
   0x2   :  { %17 = vsyncpa [#allocation4], 0  ;;  %s15630_s13 = smov [#allocation2]   ;;  %s15558_s17 = scalar_lea.hbm %s17587_s1, 4096 }
   0x3   :  { %s25_s14 = sshll.u32 %s15630_s13, 4  ;;  %p15559_p0 = scmp.ne.s32.totalorder %s17587_s1, %s15558_s17  ;;  %s26_s14 = int_to_ptr.vmem [resolvable:$true] %s25_s14 }
   0x4   :  { %p15562_p1 = scmp.lt.u32.totalorder %s15558_s17, %s17587_s1 }
   0x6   :  { %p15564_p2 = pnand %p15562_p1, %p15559_p0 }
   0x8   :  { %15567 = shalt.err (!%p15564_p2)
}
   0x9   :  { %s15568_s22 = scalar_lea.vmem %s26_s14, 4096  ;;  %p15573_p4 = scmp.lt.s32.totalorder %s26_s14, %s26_s14 }
   0xa   :  { %p15569_p3 = scmp.ne.s32.totalorder %s26_s14, %s15568_s22  ;;  %p15574_p5 = scmp.lt.s32.totalorder %s15568_s22, %s15568_s22 }
   0xc   :  { %p15575_p6 = por %p15574_p5, %p15573_p4 }
   0xe   :  { %p15576_p7 = pnand %p15575_p6, %p15569_p3 }
  0x10   :  { %15579 = shalt.err (!%p15576_p7)
}
  0x11   :  { %s15631_s23 = smov 128   ;;  %s15632_s24 = smov 8  }
  0x12   :  { %31 = dma.hbm_to_vmem [thread:$0]  %s17587_s1, 4096, %s26_s14, [#allocation3], %s15631_s23, %s15631_s23, %s15632_s24  }
  0x13   :  { %s15633_s27 = smov [#allocation5]   ;;  %s15580_s11 = scalar_lea.hbm %s17589_s3, 4096 }
  0x14   :  { %s39_s28 = sshll.u32 %s15633_s27, 4  ;;  %p15581_p8 = scmp.ne.s32.totalorder %s17589_s3, %s15580_s11  ;;  %s40_s28 = int_to_ptr.vmem [resolvable:$true] %s39_s28 }
  0x15   :  { %p15584_p9 = scmp.lt.u32.totalorder %s15580_s11, %s17589_s3 }
  0x17   :  { %p15586_p10 = pnand %p15584_p9, %p15581_p8 }
  0x19   :  { %15589 = shalt.err (!%p15586_p10)
}
  0x1a   :  { %s15590_s17 = scalar_lea.vmem %s40_s28, 4096  ;;  %p15595_p12 = scmp.lt.s32.totalorder %s40_s28, %s40_s28 }
  0x1b   :  { %p15591_p11 = scmp.ne.s32.totalorder %s40_s28, %s15590_s17  ;;  %p15596_p13 = scmp.lt.s32.totalorder %s15590_s17, %s15590_s17 }
  0x1d   :  { %p15597_p0 = por %p15596_p13, %p15595_p12 }
  0x1f   :  { %p15598_p1 = pnand %p15597_p0, %p15591_p11 }
  0x21   :  { %15601 = shalt.err (!%p15598_p1)
}
  0x22   :  { %45 = dma.hbm_to_vmem [thread:$0]  %s17589_s3, 4096, %s40_s28, [#allocation6], %s15631_s23, %s15631_s23, %s15632_s24  }
  0x23   :  { %15624 = dma.done.wait [#allocation3], 4096  }
  0x24   :  { %15625 = vsyncadd [#allocation3], 4294963200 }
  0x25   :  { %15626 = dma.done.wait [#allocation6], 4096  }
  0x26   :  { %15627 = vsyncadd [#allocation6], 4294963200  ;;  %vm71_vm0 = vcmask 261120   ;;  %v65_v0 = vld [vmem:[%s17586_s0 + $0x8] sm:$0xff]  ;;  %v67_v1 = vld [vmem:[%s17586_s0 + $0x18] sm:$0xff]  ;;  %vm15635_vm1 = vmmov 0  }
  0x27   :  { %v64_v2 = vld [vmem:[%s17586_s0] sm:$0xff]  ;;  %v119_v3 = vsel %vm71_vm0, %v65_v0, 0.0  ;;  %v66_v5 = vld [vmem:[%s17586_s0 + $0x10] sm:$0xff]  ;;  %v122_v6 = vsel %vm71_vm0, %v67_v1, 0.0  ;;  %v162_v29 = vld [vmem:[#allocation2 + $0x8] sm:$0xff]  ;;  %s15636_s1 = smov 120  }
  0x28   :  { %v72_v4 = vsel %vm71_vm0, %v64_v2, 0.0  ;;  %120 = vadd.xlane.f32.xlu0 %v119_v3  ;;  %v75_v7 = vsel %vm71_vm0, %v66_v5, 0.0  ;;  %v161_v28 = vld [vmem:[#allocation2] sm:$0xff]  ;;  %v163_v30 = vld [vmem:[#allocation2 + $0x10] sm:$0xff]  ;;  %v164_v32 = vld [vmem:[#allocation2 + $0x18] sm:$0xff]  ;;  %v15634_v3 = vmov 0.0  }
  0x29   :  { %73 = vadd.xlane.f32.xlu1 %v72_v4  ;;  %v15043_v31 = vpack.c.bf16 %v162_v29, %v161_v28  ;;  %v15047_v33 = vpack.c.bf16 %v164_v32, %v163_v30  ;;  %v13417_v47 = vld [vmem:[%s17591_s5 + $0x4] ss:$0 sm:$0xff]  ;;  %v13418_v49 = vld [vmem:[%s17591_s5 + $0x5] ss:$0 sm:$0xff]  ;;  %v13413_v52 = vld [vmem:[%s17591_s5] ss:$0 sm:$0xff] }
  0x2a   :  { %v13414_v57 = vld [vmem:[%s17591_s5 + $0x1] ss:$0 sm:$0xff]  ;;  %s15637_s14 = smov 112   ;;  %s15638_s18 = smov 104   ;;  %vm364_vm2 = vcmask 64512   ;;  %vm1693_vm3 = vcmask 130048  }
  0x2b   :  { %15052 = vmatprep.subr.bf16.mxu1 %v15043_v31  ;;  %15044 = vmatprep.subr.bf16.mxu0 %v15043_v31  ;;  %s15639_s19 = smov 96   ;;  %s15640_s20 = smov 64   ;;  %vm1696_vm4 = vcmask 195584   ;;  %vm13013_vm7 = vcmask 523264  }
  0x2c   :  { %123 = vadd.xlane.f32.xlu0 %v122_v6  ;;  %15054 = vmatpush3.bf16.msra.mxu1 %v15043_v31  ;;  %s15641_s21 = smov 16   ;;  %s15642_s22 = smov 24  }
  0x2d   :  { %76 = vadd.xlane.f32.xlu1 %v75_v7  ;;  %15046 = vmatpush3.bf16.msra.mxu0 %v15043_v31 }
  0x2e   :  { %15056 = vmatprep.subr.bf16.mxu1 %v15047_v33  ;;  %15048 = vmatprep.subr.bf16.mxu0 %v15047_v33 }
  0x30   :  { %15058 = vmatpush3.bf16.msra.mxu1 %v15047_v33 }
  0x31   :  { %15050 = vmatpush3.bf16.msra.mxu0 %v15047_v33  ;;  %14160 = vmatprep.subr.mxu1 %v15634_v3 }
  0x32   :  { %14145 = vmatprep.subr.mxu0 %v15634_v3 }
  0xb5   :  { %v121_v8 = vpop.xlane.xlu0 %120 }
  0xb6   :  { %v74_v9 = vpop.xlane.xlu1 %73  ;;  %v125_v10 = vmul.f32 0.03125, %v121_v8 }
  0xb7   :  { %v79_v11 = vmul.f32 0.03125, %v74_v9 }
  0xb8   :  { %v127_v12 = vsub.f32 %v65_v0, %v125_v10 }
  0xb9   :  { %v81_v13 = vsub.f32 %v64_v2, %v79_v11  ;;  %v124_v14 = vpop.xlane.xlu0 %123  ;;  %v13419_v2 = vld [vmem:[%s17588_s2] ss:$0 sm:$0xff] }
  0xba   :  { %v77_v15 = vpop.xlane.xlu1 %76  ;;  %v126_v16 = vmul.f32 0.03125, %v124_v14  ;;  %v129_v17 = vmul.f32 %v127_v12, %v127_v12 }
  0xbb   :  { %v80_v18 = vmul.f32 0.03125, %v77_v15  ;;  %v83_v19 = vmul.f32 %v81_v13, %v81_v13 }
  0xbc   :  { %v128_v20 = vsub.f32 %v67_v1, %v126_v16  ;;  %v131_v21 = vsel %vm71_vm0, %v129_v17, 0.0 }
  0xbd   :  { %v82_v22 = vsub.f32 %v66_v5, %v80_v18  ;;  %132 = vadd.xlane.f32.xlu0 %v131_v21  ;;  %v85_v24 = vsel %vm71_vm0, %v83_v19, 0.0 }
  0xbe   :  { %v130_v23 = vmul.f32 %v128_v20, %v128_v20 }
  0xbf   :  { %v84_v25 = vmul.f32 %v82_v22, %v82_v22 }
  0xc0   :  { %v134_v26 = vsel %vm71_vm0, %v130_v23, 0.0 }
  0xc1   :  { %135 = vadd.xlane.f32.xlu1 %v134_v26  ;;  %86 = vadd.xlane.f32.xlu0 %v85_v24  ;;  %v88_v27 = vsel %vm71_vm0, %v84_v25, 0.0 }
  0xc5   :  { %89 = vadd.xlane.f32.xlu1 %v88_v27 }
 0x14a   :  { %v133_v34 = vpop.xlane.xlu0 %132 }
 0x14b   :  { %v137_v35 = vmul.f32 0.03125, %v133_v34 }
 0x14d   :  { %v139_v36 = vadd.f32 1e-05, %v137_v35 }
 0x14e   :  { %v87_v37 = vpop.xlane.xlu0 %86  ;;  %v136_v38 = vpop.xlane.xlu1 %135 }
 0x14f   :  { %15266 = vrsqrt.f32 %v139_v36  ;;  %v91_v39 = vmul.f32 0.03125, %v87_v37  ;;  %v138_v40 = vmul.f32 0.03125, %v136_v38 }
 0x151   :  { %v93_v41 = vadd.f32 1e-05, %v91_v39  ;;  %v140_v42 = vadd.f32 1e-05, %v138_v40 }
 0x152   :  { %v90_v43 = vpop.xlane.xlu1 %89 }
 0x153   :  { %15268 = vrsqrt.f32 %v93_v41  ;;  %v92_v44 = vmul.f32 0.03125, %v90_v43 }
 0x154   :  { %15270 = vrsqrt.f32 %v140_v42 }
 0x155   :  { %v94_v45 = vadd.f32 1e-05, %v92_v44 }
 0x157   :  { %15272 = vrsqrt.f32 %v94_v45 }
 0x159   :  { %v15267_v46 = vpop.eup %15266 }
 0x15a   :  { %v143_v48 = vmul.f32 %v15267_v46, %v127_v12 }
 0x15c   :  { %v151_v50 = vmul.f32 %v13417_v47, %v143_v48 }
 0x15d   :  { %v15269_v51 = vpop.eup %15268 }
 0x15e   :  { %v15271_v53 = vpop.eup %15270  ;;  %v15759_v54 = vadd.f32 %v13418_v49, %v151_v50  ;;  %v97_v55 = vmul.f32 %v15269_v51, %v81_v13 }
 0x15f   :  { %v144_v56 = vmul.f32 %v15271_v53, %v128_v20 }
 0x160   :  { %14142 = vmatprep.mubr.msk.f32.mxu1 %vm71_vm0, %v15759_v54  ;;  %v105_v58 = vmul.f32 %v13413_v52, %v97_v55 }
 0x161   :  { %v15273_v59 = vpop.eup %15272  ;;  %v152_v60 = vmul.f32 %v13417_v47, %v144_v56 }
 0x162   :  { %v98_v61 = vmul.f32 %v15273_v59, %v82_v22  ;;  %v113_v62 = vadd.f32 %v13414_v57, %v105_v58 }
 0x163   :  { %v15766_v63 = vadd.f32 %v13418_v49, %v152_v60 }
 0x164   :  { %v106_v0 = vmul.f32 %v13413_v52, %v98_v61  ;;  %14131 = vmatprep.mubr.msk.f32.mxu0 %vm71_vm0, %v113_v62 }
 0x165   :  { %14143 = vmatmul.mubr.msk.f32.vlgmr.msra.gmra.mrb[0].mxu1 %vm71_vm0, %v15766_v63 }
 0x166   :  { %v114_v1 = vadd.f32 %v13414_v57, %v106_v0  ;;  %14162 = vmatprep.mubr.msk.f32.mxu1 %vm15635_vm1, %v15634_v3 }
 0x168   :  { %14132 = vmatmul.mubr.msk.f32.vlgmr.msra.gmra.mrb[0].mxu0 %vm71_vm0, %v114_v1 }
 0x169   :  { %14147 = vmatprep.mubr.msk.f32.mxu0 %vm15635_vm1, %v15634_v3 }
 0x238   :  { %v14144_v4 = vpop.f32.mrb[0].mxu1 }
 0x239   :  { %v331_v5 = vadd.f32 %v14144_v4, %v13419_v2  ;;  %v325_v6 = vpop.f32.mrb[1].mxu1 }
 0x23a   :  { %v326_v7 = vadd.f32 %v13419_v2, %v325_v6 }
 0x23b   :  { %352 = vrot.lane.b32.xlu1 %v331_v5, %s15636_s1  ;;  %v14133_v8 = vpop.f32.mrb[0].mxu0 }
 0x23c   :  { %350 = vrot.lane.b32.xlu0 %v326_v7, %s15636_s1  ;;  %v244_v9 = vpop.f32.mrb[1].mxu0  ;;  %v15795_v11 = vadd.f32 %v14133_v8, %v13419_v2 }
 0x23d   :  { %v15787_v10 = vadd.f32 %v13419_v2, %v244_v9 }
 0x23f   :  { %354 = vrot.lane.b32.xlu1 %v326_v7, %s15637_s14 }
 0x240   :  { %358 = vrot.lane.b32.xlu0 %v326_v7, %s15638_s18 }
 0x243   :  { %356 = vrot.lane.b32.xlu1 %v331_v5, %s15637_s14 }
 0x244   :  { %362 = vrot.lane.b32.xlu0 %v326_v7, %s15639_s19 }
 0x247   :  { %360 = vrot.lane.b32.xlu1 %v331_v5, %s15638_s18 }
 0x248   :  { %336 = vrot.lane.b32.xlu0 %v15787_v10, %s15636_s1 }
 0x24b   :  { %439 = vrot.lane.b32.xlu1 %v331_v5, %s15639_s19 }
 0x24c   :  { %340 = vrot.lane.b32.xlu0 %v15787_v10, %s15637_s14 }
 0x24f   :  { %338 = vrot.lane.b32.xlu1 %v15795_v11, %s15636_s1 }
 0x253   :  { %342 = vrot.lane.b32.xlu1 %v15795_v11, %s15637_s14 }
 0x2ad   :  { %v353_v12 = vpop.permute.xlu1 %352 }
 0x2ae   :  { %v351_v13 = vpop.permute.xlu0 %350  ;;  %591 = vrot.lane.b32.xlu1 %v353_v12, %s15639_s19 }
 0x2af   :  { %515 = vrot.lane.b32.xlu0 %v351_v13, %s15639_s19 }
 0x2b1   :  { %v355_v14 = vpop.permute.xlu1 %354 }
 0x2b2   :  { %v359_v15 = vpop.permute.xlu0 %358 }
 0x2b3   :  { %667 = vrot.lane.b32.xlu0 %v355_v14, %s15639_s19 }
 0x2b5   :  { %v357_v16 = vpop.permute.xlu1 %356 }
 0x2b6   :  { %v363_v17 = vpop.permute.xlu0 %362  ;;  %743 = vrot.lane.b32.xlu1 %v357_v16, %s15639_s19 }
 0x2b7   :  { %14146 = vmatpush3.xpose.msk.msra.mxu0 %vm364_vm2, %v363_v17  ;;  %819 = vrot.lane.b32.xlu0 %v359_v15, %s15639_s19 }
 0x2b8   :  { %14150 = vmatprep.subr.mxu0 %v15634_v3 }
 0x2b9   :  { %v361_v18 = vpop.permute.xlu1 %360 }
 0x2ba   :  { %14148 = vmatmul.mubr.msk.f32.vlgmr.msra.gmra.mrb[2].mxu0 %vm364_vm2, %v15787_v10  ;;  %895 = vrot.lane.b32.xlu1 %v361_v18, %s15639_s19  ;;  %v15825_v21 = vpop.permute.xlu0 %336 }
 0x2bb   :  { %344 = vrot.lane.b32.xlu0 %v15787_v10, %s15638_s18  ;;  %14152 = vmatprep.mubr.msk.f32.mxu0 %vm15635_vm1, %v15634_v3 }
 0x2bd   :  { %v440_v19 = vpop.permute.xlu1 %439 }
 0x2be   :  { %346 = vrot.lane.b32.xlu1 %v15795_v11, %s15638_s18  ;;  %14151 = vmatpush3.xpose.msk.msra.mxu0 %vm364_vm2, %v440_v19  ;;  %v15829_v23 = vpop.permute.xlu0 %340 }
 0x2bf   :  { %14155 = vmatprep.subr.mxu0 %v15634_v3 }
 0x2c1   :  { %14153 = vmatmul.mubr.msk.f32.vlgmr.msra.gmra.mrb[4].mxu0 %vm364_vm2, %v15795_v11  ;;  %v15823_v20 = vpop.permute.xlu1 %338 }
 0x2c2   :  { %14157 = vmatprep.mubr.msk.f32.mxu0 %vm15635_vm1, %v15634_v3 }
 0x2c5   :  { %v15827_v22 = vpop.permute.xlu1 %342 }
 0x320   :  { %v592_v24 = vpop.permute.xlu1 %591 }
 0x321   :  { %v516_v25 = vpop.permute.xlu0 %515  ;;  %14161 = vmatpush3.xpose.msk.msra.mxu1 %vm364_vm2, %v592_v24 }
 0x322   :  { %14156 = vmatpush3.xpose.msk.msra.mxu0 %vm364_vm2, %v516_v25  ;;  %14170 = vmatprep.subr.mxu1 %v15634_v3 }
 0x323   :  { %14165 = vmatprep.subr.mxu0 %v15634_v3 }
 0x324   :  { %14163 = vmatmul.mubr.msk.f32.vlgmr.msra.gmra.mrb[2].mxu1 %vm364_vm2, %v15823_v20 }
 0x325   :  { %v668_v26 = vpop.permute.xlu0 %667  ;;  %14158 = vmatmul.mubr.msk.f32.vlgmr.msra.gmra.mrb[6].mxu0 %vm364_vm2, %v15825_v21  ;;  %14172 = vmatprep.mubr.msk.f32.mxu1 %vm15635_vm1, %v15634_v3 }
 0x326   :  { %14166 = vmatpush3.xpose.msk.msra.mxu0 %vm364_vm2, %v668_v26  ;;  %14167 = vmatprep.mubr.msk.f32.mxu0 %vm15635_vm1, %v15634_v3 }
 0x327   :  { %14175 = vmatprep.subr.mxu0 %v15634_v3 }
 0x328   :  { %v744_v27 = vpop.permute.xlu1 %743 }
 0x329   :  { %v820_v28 = vpop.permute.xlu0 %819  ;;  %14168 = vmatmul.mubr.msk.f32.vlgmr.msra.gmra.mrb[8].mxu0 %vm364_vm2, %v15829_v23  ;;  %14171 = vmatpush3.xpose.msk.msra.mxu1 %vm364_vm2, %v744_v27 }
 0x32a   :  { %14176 = vmatpush3.xpose.msk.msra.mxu0 %vm364_vm2, %v820_v28  ;;  %14180 = vmatprep.subr.mxu1 %v15634_v3 }
 0x32b   :  { %14177 = vmatprep.mubr.msk.f32.mxu0 %vm15635_vm1, %v15634_v3  ;;  %14185 = vmatprep.subr.mxu0 %v15634_v3 }
 0x32c   :  { %14173 = vmatmul.mubr.msk.f32.vlgmr.msra.gmra.mrb[4].mxu1 %vm364_vm2, %v15827_v22  ;;  %v896_v29 = vpop.permute.xlu1 %895 }
 0x32d   :  { %v15855_v30 = vpop.permute.xlu0 %344  ;;  %14181 = vmatpush3.xpose.msk.msra.mxu1 %vm364_vm2, %v896_v29  ;;  %14182 = vmatprep.mubr.msk.f32.mxu1 %vm15635_vm1, %v15634_v3 }
 0x32e   :  { %14178 = vmatmul.mubr.msk.f32.vlgmr.msra.gmra.mrb[10].mxu0 %vm364_vm2, %v15855_v30  ;;  %14190 = vmatprep.subr.mxu1 %v15634_v3 }
 0x32f   :  { %14187 = vmatprep.mubr.msk.f32.mxu0 %vm15635_vm1, %v15634_v3 }
 0x330   :  { %v15865_v31 = vpop.permute.xlu1 %346 }
 0x331   :  { %14183 = vmatmul.mubr.msk.f32.vlgmr.msra.gmra.mrb[6].mxu1 %vm364_vm2, %v15865_v31 }
 0x332   :  { %14192 = vmatprep.mubr.msk.f32.mxu1 %vm15635_vm1, %v15634_v3 }
 0x38d   :  { %v435_v32 = vpop.f32.mrb[2].mxu0 }
 0x38e   :  { %v14149_v33 = vpop.f32.mrb[3].mxu0  ;;  %v971_v34 = vsel %vm364_vm2, %v435_v32, -inf }
 0x38f   :  { %972 = vmax.xlane.f32.xlu0 %v971_v34 }
 0x394   :  { %v511_v35 = vpop.f32.mrb[4].mxu0 }
 0x395   :  { %v14154_v36 = vpop.f32.mrb[5].mxu0  ;;  %v974_v37 = vsel %vm364_vm2, %v511_v35, -inf }
 0x396   :  { %975 = vmax.xlane.f32.xlu1 %v974_v37 }
 0x3f7   :  { %v663_v38 = vpop.f32.mrb[2].mxu1 }
 0x3f8   :  { %v587_v39 = vpop.f32.mrb[6].mxu0  ;;  %v14164_v40 = vpop.f32.mrb[3].mxu1  ;;  %v980_v41 = vsel %vm364_vm2, %v663_v38, -inf }
 0x3f9   :  { %v14159_v42 = vpop.f32.mrb[7].mxu0  ;;  %981 = vmax.xlane.f32.xlu0 %v980_v41  ;;  %v977_v44 = vsel %vm364_vm2, %v587_v39, -inf }
 0x3fc   :  { %v739_v43 = vpop.f32.mrb[8].mxu0 }
 0x3fd   :  { %v14169_v45 = vpop.f32.mrb[9].mxu0  ;;  %978 = vmax.xlane.f32.xlu0 %v977_v44  ;;  %v983_v48 = vsel %vm364_vm2, %v739_v43, -inf }
 0x3ff   :  { %v815_v46 = vpop.f32.mrb[4].mxu1 }
 0x400   :  { %v14174_v47 = vpop.f32.mrb[5].mxu1  ;;  %v986_v49 = vsel %vm364_vm2, %v815_v46, -inf }
 0x401   :  { %v891_v50 = vpop.f32.mrb[10].mxu0  ;;  %984 = vmax.xlane.f32.xlu0 %v983_v48  ;;  %987 = vmax.xlane.f32.xlu1 %v986_v49 }
 0x402   :  { %v14179_v51 = vpop.f32.mrb[11].mxu0  ;;  %v989_v53 = vsel %vm364_vm2, %v891_v50, -inf }
 0x404   :  { %v967_v52 = vpop.f32.mrb[6].mxu1 }
 0x405   :  { %990 = vmax.xlane.f32.xlu0 %v989_v53  ;;  %v14184_v55 = vpop.f32.mrb[7].mxu1  ;;  %v992_v56 = vsel %vm364_vm2, %v967_v52, -inf }
 0x406   :  { %993 = vmax.xlane.f32.xlu1 %v992_v56 }
 0x417   :  { %1135 = vrot.lane.b32.xlu1 %v15795_v11, %s15640_s20 }
 0x41b   :  { %1059 = vrot.lane.b32.xlu0 %v15787_v10, %s15640_s20  ;;  %1211 = vrot.lane.b32.xlu1 %v15825_v21, %s15640_s20 }
 0x41c   :  { %v973_v57 = vpop.xlane.xlu0 %972 }
 0x41d   :  { %v995_v58 = vsub.f32 %v435_v32, %v973_v57 }
 0x41f   :  { %1363 = vrot.lane.b32.xlu0 %v15829_v23, %s15640_s20  ;;  %1287 = vrot.lane.b32.xlu1 %v15823_v20, %s15640_s20  ;;  %v1003_v59 = vmul.f32 1.442695, %v995_v58  ;;  %v1792_v58 = vld [vmem:[#allocation2 + $0x80] sm:$0xff] }
 0x421   :  { %15274 = vpow2.f32 %v1003_v59  ;;  %v1793_v59 = vld [vmem:[#allocation2 + $0x88] sm:$0xff] }
 0x423   :  { %1439 = vrot.lane.b32.xlu1 %v15827_v22, %s15640_s20  ;;  %v976_v60 = vpop.xlane.xlu1 %975 }
 0x424   :  { %v996_v61 = vsub.f32 %v511_v35, %v976_v60 }
 0x426   :  { %v1005_v62 = vmul.f32 1.442695, %v996_v61 }
 0x428   :  { %15276 = vpow2.f32 %v1005_v62 }
 0x42b   :  { %v15891_v0 = vpop.eup %15274 }
 0x42c   :  { %v1019_v1 = vsel %vm364_vm2, %v15891_v0, 0.0 }
 0x432   :  { %v15895_v2 = vpop.eup %15276 }
 0x433   :  { %v1022_v4 = vsel %vm364_vm2, %v15895_v2, 0.0 }
 0x43e   :  { %1020 = vadd.xlane.f32.xlu0 %v1019_v1  ;;  %v15935_v1 = vpack.c.bf16 %v1793_v59, %v1792_v58 }
 0x447   :  { %1023 = vadd.xlane.f32.xlu1 %v1022_v4  ;;  %v1794_v4 = vld [vmem:[#allocation2 + $0x90] sm:$0xff] }
 0x486   :  { %v982_v5 = vpop.xlane.xlu0 %981 }
 0x487   :  { %v998_v6 = vsub.f32 %v663_v38, %v982_v5  ;;  %v1795_v5 = vld [vmem:[#allocation2 + $0x98] sm:$0xff] }
 0x489   :  { %v1009_v7 = vmul.f32 1.442695, %v998_v6 }
 0x48a   :  { %v979_v8 = vpop.xlane.xlu0 %978 }
 0x48b   :  { %15278 = vpow2.f32 %v1009_v7  ;;  %v997_v9 = vsub.f32 %v587_v39, %v979_v8 }
 0x48d   :  { %v1007_v10 = vmul.f32 1.442695, %v997_v9 }
 0x48e   :  { %v985_v11 = vpop.xlane.xlu0 %984  ;;  %v988_v12 = vpop.xlane.xlu1 %987 }
 0x48f   :  { %15280 = vpow2.f32 %v1007_v10  ;;  %v999_v13 = vsub.f32 %v739_v43, %v985_v11  ;;  %v1000_v14 = vsub.f32 %v815_v46, %v988_v12  ;;  %v15946_v11 = vpack.c.bf16 %v1795_v5, %v1794_v4 }
 0x491   :  { %v1011_v15 = vmul.f32 1.442695, %v999_v13  ;;  %v1013_v16 = vmul.f32 1.442695, %v1000_v14 }
 0x492   :  { %v991_v17 = vpop.xlane.xlu0 %990 }
 0x493   :  { %15282 = vpow2.f32 %v1011_v15  ;;  %v1001_v18 = vsub.f32 %v891_v50, %v991_v17  ;;  %v994_v19 = vpop.xlane.xlu1 %993  ;;  %v1700_v17 = vld [vmem:[#allocation5 + $0x8] sm:$0xff] }
 0x494   :  { %15284 = vpow2.f32 %v1013_v16  ;;  %v1002_v20 = vsub.f32 %v967_v52, %v994_v19  ;;  %v1699_v16 = vld [vmem:[#allocation5] sm:$0xff]  ;;  %v1702_v19 = vld [vmem:[#allocation5 + $0x18] sm:$0xff] }
 0x495   :  { %v15279_v21 = vpop.eup %15278  ;;  %v1015_v22 = vmul.f32 1.442695, %v1001_v18  ;;  %v15059_v18 = vpack.c.bf16 %v1700_v17, %v1699_v16 }
 0x496   :  { %v1017_v23 = vmul.f32 1.442695, %v1002_v20  ;;  %v1060_v24 = vpop.permute.xlu0 %1059  ;;  %v1028_v25 = vsel %vm364_vm2, %v15279_v21, 0.0 }
 0x497   :  { %15286 = vpow2.f32 %v1015_v22  ;;  %14186 = vmatpush3.msra.mxu0 %v1060_v24  ;;  %1029 = vadd.xlane.f32.xlu1 %v1028_v25  ;;  %v1136_v26 = vpop.permute.xlu1 %1135 }
 0x498   :  { %15288 = vpow2.f32 %v1017_v23  ;;  %14191 = vmatpush3.msra.mxu1 %v1136_v26  ;;  %14195 = vmatprep.subr.mxu0 %v15634_v3 }
 0x499   :  { %v15281_v27 = vpop.eup %15280  ;;  %14200 = vmatprep.subr.mxu1 %v15634_v3 }
 0x49a   :  { %v1025_v28 = vsel %vm364_vm2, %v15281_v27, 0.0  ;;  %v1364_v40 = vpop.permute.xlu0 %1363 }
 0x49b   :  { %1026 = vadd.xlane.f32.xlu0 %v1025_v28  ;;  %v1212_v39 = vpop.permute.xlu1 %1211 }
 0x49d   :  { %v15283_v29 = vpop.eup %15282 }
 0x49e   :  { %v15285_v32 = vpop.eup %15284  ;;  %v1031_v33 = vsel %vm364_vm2, %v15283_v29, 0.0 }
 0x49f   :  { %1032 = vadd.xlane.f32.xlu0 %v1031_v33  ;;  %v1034_v34 = vsel %vm364_vm2, %v15285_v32, 0.0  ;;  %v1288_v41 = vpop.permute.xlu1 %1287 }
 0x4a0   :  { %1035 = vadd.xlane.f32.xlu1 %v1034_v34 }
 0x4a1   :  { %v15905_v35 = vpop.eup %15286 }
 0x4a2   :  { %v15907_v36 = vpop.eup %15288  ;;  %v1037_v37 = vsel %vm364_vm2, %v15905_v35, 0.0 }
 0x4a3   :  { %1038 = vadd.xlane.f32.xlu0 %v1037_v37  ;;  %v1040_v38 = vsel %vm364_vm2, %v15907_v36, 0.0  ;;  %v1440_v43 = vpop.permute.xlu1 %1439 }
 0x4a4   :  { %1041 = vadd.xlane.f32.xlu1 %v1040_v38 }
 0x4b5   :  { %1591 = vrot.lane.b32.xlu1 %v15865_v31, %s15640_s20 }
 0x4b9   :  { %1515 = vrot.lane.b32.xlu0 %v15855_v30, %s15640_s20 }
 0x4cb   :  { %v1021_v42 = vpop.xlane.xlu0 %1020 }
 0x4cc   :  { %15290 = vrcp.f32 %v1021_v42 }
 0x4d4   :  { %v1024_v44 = vpop.xlane.xlu1 %1023 }
 0x4d5   :  { %15292 = vrcp.f32 %v1024_v44 }
 0x4d6   :  { %v15291_v45 = vpop.eup %15290 }
 0x4d7   :  { %v1051_v46 = vmul.f32 %v15291_v45, %v15891_v0 }
 0x4d9   :  { %14188 = vmatmul.mubr.msk.f32.vlgmr.msra.gmra.mrb[12].mxu0 %vm364_vm2, %v1051_v46 }
 0x4da   :  { %14196 = vmatpush3.msra.mxu0 %v1212_v39  ;;  %14197 = vmatprep.mubr.msk.f32.mxu0 %vm15635_vm1, %v15634_v3 }
 0x4db   :  { %14205 = vmatprep.subr.mxu0 %v15634_v3 }
 0x4df   :  { %v15293_v30 = vpop.eup %15292 }
 0x4e0   :  { %v1052_v31 = vmul.f32 %v15293_v30, %v15895_v2 }
 0x4e2   :  { %14193 = vmatmul.mubr.msk.f32.vlgmr.msra.gmra.mrb[8].mxu1 %vm364_vm2, %v1052_v31  ;;  %v13448_v31 = vld [vmem:[%s17590_s4] ss:$0 sm:$0xff] }
 0x4e3   :  { %14201 = vmatpush3.msra.mxu1 %v1288_v41  ;;  %14202 = vmatprep.mubr.msk.f32.mxu1 %vm15635_vm1, %v15634_v3 }
 0x4e4   :  { %14210 = vmatprep.subr.mxu1 %v15634_v3 }
 0x524   :  { %v1030_v47 = vpop.xlane.xlu1 %1029 }
 0x525   :  { %15294 = vrcp.f32 %v1030_v47 }
 0x528   :  { %v1027_v48 = vpop.xlane.xlu0 %1026 }
 0x529   :  { %15296 = vrcp.f32 %v1027_v48 }
 0x52c   :  { %v1033_v49 = vpop.xlane.xlu0 %1032 }
 0x52d   :  { %15298 = vrcp.f32 %v1033_v49  ;;  %v1036_v50 = vpop.xlane.xlu1 %1035 }
 0x52e   :  { %15300 = vrcp.f32 %v1036_v50 }
 0x52f   :  { %v15295_v51 = vpop.eup %15294 }
 0x530   :  { %v1039_v52 = vpop.xlane.xlu0 %1038  ;;  %v1054_v53 = vmul.f32 %v15295_v51, %v15279_v21  ;;  %v13452_v51 = vld [vmem:[%s17588_s2 + $0x4] ss:$0 sm:$0xff] }
 0x531   :  { %15302 = vrcp.f32 %v1039_v52  ;;  %v1042_v55 = vpop.xlane.xlu1 %1041 }
 0x532   :  { %15304 = vrcp.f32 %v1042_v55  ;;  %14203 = vmatmul.mubr.msk.f32.vlgmr.msra.gmra.mrb[10].mxu1 %vm364_vm2, %v1054_v53 }
 0x533   :  { %v15297_v56 = vpop.eup %15296  ;;  %14211 = vmatpush3.msra.mxu1 %v1440_v43  ;;  %14212 = vmatprep.mubr.msk.f32.mxu1 %vm15635_vm1, %v15634_v3 }
 0x534   :  { %v1053_v57 = vmul.f32 %v15297_v56, %v15281_v27  ;;  %14220 = vmatprep.subr.mxu1 %v15634_v3  ;;  %v1516_v2 = vpop.permute.xlu0 %1515 }
 0x535   :  { %v1592_v7 = vpop.permute.xlu1 %1591 }
 0x536   :  { %14198 = vmatmul.mubr.msk.f32.vlgmr.msra.gmra.mrb[14].mxu0 %vm364_vm2, %v1053_v57 }
 0x537   :  { %v15299_v60 = vpop.eup %15298  ;;  %14206 = vmatpush3.msra.mxu0 %v1364_v40  ;;  %14207 = vmatprep.mubr.msk.f32.mxu0 %vm15635_vm1, %v15634_v3 }
 0x538   :  { %v15301_v61 = vpop.eup %15300  ;;  %14215 = vmatprep.subr.mxu0 %v15634_v3  ;;  %v1055_v62 = vmul.f32 %v15299_v60, %v15283_v29 }
 0x539   :  { %v1056_v0 = vmul.f32 %v15301_v61, %v15285_v32 }
 0x53a   :  { %14208 = vmatmul.mubr.msk.f32.vlgmr.msra.gmra.mrb[16].mxu0 %vm364_vm2, %v1055_v62 }
 0x53b   :  { %v15303_v6 = vpop.eup %15302  ;;  %14213 = vmatmul.mubr.msk.f32.vlgmr.msra.gmra.mrb[12].mxu1 %vm364_vm2, %v1056_v0  ;;  %14216 = vmatpush3.msra.mxu0 %v1516_v2 }
 0x53c   :  { %v15305_v8 = vpop.eup %15304  ;;  %14221 = vmatpush3.msra.mxu1 %v1592_v7  ;;  %14217 = vmatprep.mubr.msk.f32.mxu0 %vm15635_vm1, %v15634_v3  ;;  %v1057_v9 = vmul.f32 %v15303_v6, %v15905_v35 }
 0x53d   :  { %14222 = vmatprep.mubr.msk.f32.mxu1 %vm15635_vm1, %v15634_v3  ;;  %15068 = vmatprep.subr.bf16.mxu1 %v15935_v1  ;;  %v1058_v10 = vmul.f32 %v15305_v8, %v15907_v36 }
 0x53e   :  { %14218 = vmatmul.mubr.msk.f32.vlgmr.msra.gmra.mrb[18].mxu0 %vm364_vm2, %v1057_v9  ;;  %15060 = vmatprep.subr.bf16.mxu0 %v15059_v18 }
 0x53f   :  { %14223 = vmatmul.mubr.msk.f32.vlgmr.msra.gmra.mrb[14].mxu1 %vm364_vm2, %v1058_v10  ;;  %15062 = vmatpush3.bf16.msra.mxu0 %v15059_v18 }
 0x540   :  { %15070 = vmatpush3.bf16.msra.mxu1 %v15935_v1  ;;  %14244 = vmatprep.mubr.msk.f32.mxu1 %vm71_vm0, %v15759_v54  ;;  %v1701_v54 = vld [vmem:[#allocation5 + $0x10] sm:$0xff] }
 0x541   :  { %15072 = vmatprep.subr.bf16.mxu1 %v15946_v11  ;;  %v15063_v20 = vpack.c.bf16 %v1702_v19, %v1701_v54 }
 0x543   :  { %15064 = vmatprep.subr.bf16.mxu0 %v15063_v20 }
 0x544   :  { %15074 = vmatpush3.bf16.msra.mxu1 %v15946_v11  ;;  %15066 = vmatpush3.bf16.msra.mxu0 %v15063_v20 }
 0x545   :  { %14258 = vmatprep.subr.mxu1 %v15634_v3  ;;  %15076 = vmatprep.subr.bf16.mxu0 %v15935_v1 }
 0x547   :  { %14245 = vmatmul.mubr.msk.f32.vlgmr.msra.gmra.mrb[16].mxu1 %vm71_vm0, %v15766_v63 }
 0x548   :  { %14260 = vmatprep.mubr.msk.f32.mxu1 %vm15635_vm1, %v15634_v3 }
 0x5ac   :  { %v1131_v12 = vpop.f32.mrb[12].mxu0 }
 0x5ad   :  { %v14189_v13 = vpop.f32.mrb[13].mxu0 }
 0x5b5   :  { %v1207_v14 = vpop.f32.mrb[8].mxu1 }
 0x5b6   :  { %v14194_v15 = vpop.f32.mrb[9].mxu1 }
 0x605   :  { %v1359_v21 = vpop.f32.mrb[10].mxu1 }
 0x606   :  { %1671 = vrot.lane.b32.xlu1 %v1359_v21, %s15632_s24  ;;  %v14204_v63 = vpop.f32.mrb[11].mxu1 }
 0x609   :  { %v1283_v22 = vpop.f32.mrb[14].mxu0 }
 0x60a   :  { %1669 = vrot.lane.b32.xlu0 %v1283_v22, %s15632_s24  ;;  %v14199_v23 = vpop.f32.mrb[15].mxu0 }
 0x60d   :  { %v1435_v24 = vpop.f32.mrb[16].mxu0 }
 0x60e   :  { %v1511_v25 = vpop.f32.mrb[12].mxu1  ;;  %1677 = vrot.lane.b32.xlu0 %v1435_v24, %s15641_s21  ;;  %v14209_v26 = vpop.f32.mrb[17].mxu0 }
 0x60f   :  { %1679 = vrot.lane.b32.xlu1 %v1511_v25, %s15641_s21  ;;  %v14214_v27 = vpop.f32.mrb[13].mxu1 }
 0x611   :  { %v1587_v28 = vpop.f32.mrb[18].mxu0 }
 0x612   :  { %1685 = vrot.lane.b32.xlu0 %v1587_v28, %s15642_s22  ;;  %v14219_v29 = vpop.f32.mrb[19].mxu0  ;;  %v1663_v32 = vpop.f32.mrb[14].mxu1 }
 0x613   :  { %1687 = vrot.lane.b32.xlu1 %v1663_v32, %s15642_s22  ;;  %v14224_v33 = vpop.f32.mrb[15].mxu1 }
 0x61a   :  { %v14246_v34 = vpop.f32.mrb[16].mxu1 }
 0x61b   :  { %v1870_v35 = vpop.f32.mrb[17].mxu1  ;;  %v16000_v57 = vadd.f32 %v14246_v34, %v13452_v51 }
 0x61c   :  { %v16012_v62 = vadd.f32 %v13452_v51, %v1870_v35 }
 0x678   :  { %v1672_v37 = vpop.permute.xlu1 %1671 }
 0x679   :  { %v1692_v41 = vsel %vm364_vm2, %v1207_v14, %v1672_v37 }
 0x67c   :  { %v1670_v36 = vpop.permute.xlu0 %1669 }
 0x67d   :  { %v1691_v40 = vsel %vm364_vm2, %v1131_v12, %v1670_v36 }
 0x680   :  { %v1678_v38 = vpop.permute.xlu0 %1677 }
 0x681   :  { %v1680_v39 = vpop.permute.xlu1 %1679  ;;  %v1694_v42 = vsel %vm1693_vm3, %v1691_v40, %v1678_v38 }
 0x682   :  { %v1695_v44 = vsel %vm1693_vm3, %v1692_v41, %v1680_v39 }
 0x684   :  { %v1686_v43 = vpop.permute.xlu0 %1685 }
 0x685   :  { %v1697_v45 = vsel %vm1696_vm4, %v1694_v42, %v1686_v43  ;;  %v1688_v46 = vpop.permute.xlu1 %1687 }
 0x686   :  { %v1698_v30 = vsel %vm1696_vm4, %v1695_v44, %v1688_v46  ;;  %14233 = vmatprep.mubr.msk.f32.mxu0 %vm71_vm0, %v1697_v45 }
 0x687   :  { %14234 = vmatmul.mubr.msk.f32.vlgmr.msra.gmra.mrb[20].mxu0 %vm71_vm0, %v1698_v30 }
 0x688   :  { %15078 = vmatpush3.bf16.msra.mxu0 %v15935_v1 }
 0x689   :  { %15080 = vmatprep.subr.bf16.mxu0 %v15946_v11 }
 0x68c   :  { %15082 = vmatpush3.bf16.msra.mxu0 %v15946_v11 }
 0x68d   :  { %14268 = vmatprep.subr.mxu0 %v15634_v3 }
 0x75a   :  { %v14235_v47 = vpop.f32.mrb[20].mxu0 }
 0x75b   :  { %v1782_v48 = vpop.f32.mrb[21].mxu0  ;;  %v15984_v50 = vadd.f32 %v14235_v47, %v13448_v31 }
 0x75c   :  { %v15982_v49 = vadd.f32 %v13448_v31, %v1782_v48 }
 0x75e   :  { %14255 = vmatprep.mubr.msk.f32.mxu0 %vm71_vm0, %v15982_v49 }
 0x75f   :  { %14256 = vmatmul.mubr.msk.f32.vlgmr.msra.gmra.mrb[22].mxu0 %vm71_vm0, %v15984_v50 }
 0x760   :  { %14270 = vmatprep.mubr.msk.f32.mxu0 %vm15635_vm1, %v15634_v3 }
 0x832   :  { %v14257_v52 = vpop.f32.mrb[22].mxu0 }
 0x833   :  { %v1957_v53 = vadd.f32 %v14257_v52, %v13452_v51  ;;  %v1951_v55 = vpop.f32.mrb[23].mxu0 }
 0x834   :  { %v1952_v56 = vadd.f32 %v13452_v51, %v1951_v55 }
 0x835   :  { %1982 = vrot.lane.b32.xlu1 %v1957_v53, %s15637_s14  ;;  %1978 = vrot.lane.b32.xlu0 %v1957_v53, %s15636_s1 }
 0x839   :  { %1986 = vrot.lane.b32.xlu0 %v1957_v53, %s15638_s18  ;;  %1988 = vrot.lane.b32.xlu1 %v1952_v56, %s15639_s19 }
 0x83d   :  { %2064 = vrot.lane.b32.xlu0 %v1957_v53, %s15639_s19 }
 0x841   :  { %1964 = vrot.lane.b32.xlu0 %v16000_v57, %s15636_s1 }
 0x845   :  { %1968 = vrot.lane.b32.xlu0 %v16000_v57, %s15637_s14 }
 0x849   :  { %1972 = vrot.lane.b32.xlu0 %v16000_v57, %s15638_s18 }
 0x84d   :  { %1980 = vrot.lane.b32.xlu0 %v1952_v56, %s15637_s14 }
 0x8a7   :  { %v1983_v58 = vpop.permute.xlu1 %1982  ;;  %v1979_v59 = vpop.permute.xlu0 %1978 }
 0x8a8   :  { %2216 = vrot.lane.b32.xlu1 %v1979_v59, %s15639_s19 }
 0x8ab   :  { %v1987_v60 = vpop.permute.xlu0 %1986  ;;  %v1989_v61 = vpop.permute.xlu1 %1988 }
 0x8ac   :  { %2368 = vrot.lane.b32.xlu1 %v1983_v58, %s15639_s19  ;;  %14259 = vmatpush3.xpose.msk.msra.mxu1 %vm364_vm2, %v1989_v61 }
 0x8ad   :  { %14263 = vmatprep.subr.mxu1 %v15634_v3 }
 0x8af   :  { %v2065_v0 = vpop.permute.xlu0 %2064  ;;  %14261 = vmatmul.mubr.msk.f32.vlgmr.msra.gmra.mrb[18].mxu1 %vm364_vm2, %v16012_v62 }
 0x8b0   :  { %2520 = vrot.lane.b32.xlu1 %v1987_v60, %s15639_s19  ;;  %14264 = vmatpush3.xpose.msk.msra.mxu1 %vm364_vm2, %v2065_v0 }
 0x8b1   :  { %14265 = vmatprep.mubr.msk.f32.mxu1 %vm15635_vm1, %v15634_v3  ;;  %14273 = vmatprep.subr.mxu1 %v15634_v3 }
 0x8b3   :  { %14266 = vmatmul.mubr.msk.f32.vlgmr.msra.gmra.mrb[20].mxu1 %vm364_vm2, %v16000_v57  ;;  %v1965_v1 = vpop.permute.xlu0 %1964 }
 0x8b4   :  { %1976 = vrot.lane.b32.xlu1 %v1952_v56, %s15636_s1  ;;  %14275 = vmatprep.mubr.msk.f32.mxu1 %vm15635_vm1, %v15634_v3 }
 0x8b7   :  { %v16036_v4 = vpop.permute.xlu0 %1968 }
 0x8b8   :  { %1984 = vrot.lane.b32.xlu1 %v1952_v56, %s15638_s18 }
 0x8bb   :  { %v16048_v7 = vpop.permute.xlu0 %1972 }
 0x8bc   :  { %1962 = vrot.lane.b32.xlu1 %v16012_v62, %s15636_s1 }
 0x8bf   :  { %v1981_v9 = vpop.permute.xlu0 %1980 }
 0x8c0   :  { %1966 = vrot.lane.b32.xlu1 %v16012_v62, %s15637_s14 }
 0x8c4   :  { %1970 = vrot.lane.b32.xlu1 %v16012_v62, %s15638_s18 }
 0x91a   :  { %v2217_v2 = vpop.permute.xlu1 %2216 }
 0x91b   :  { %14274 = vmatpush3.xpose.msk.msra.mxu1 %vm364_vm2, %v2217_v2 }
 0x91c   :  { %14283 = vmatprep.subr.mxu1 %v15634_v3 }
 0x91e   :  { %14276 = vmatmul.mubr.msk.f32.vlgmr.msra.gmra.mrb[22].mxu1 %vm364_vm2, %v1965_v1  ;;  %v2369_v5 = vpop.permute.xlu1 %2368 }
 0x91f   :  { %14284 = vmatpush3.xpose.msk.msra.mxu1 %vm364_vm2, %v2369_v5  ;;  %14285 = vmatprep.mubr.msk.f32.mxu1 %vm15635_vm1, %v15634_v3 }
 0x920   :  { %14293 = vmatprep.subr.mxu1 %v15634_v3 }
 0x922   :  { %14286 = vmatmul.mubr.msk.f32.vlgmr.msra.gmra.mrb[24].mxu1 %vm364_vm2, %v16036_v4  ;;  %v2521_v6 = vpop.permute.xlu1 %2520 }
 0x923   :  { %14294 = vmatpush3.xpose.msk.msra.mxu1 %vm364_vm2, %v2521_v6  ;;  %14295 = vmatprep.mubr.msk.f32.mxu1 %vm15635_vm1, %v15634_v3 }
 0x924   :  { %14303 = vmatprep.subr.mxu1 %v15634_v3 }
 0x926   :  { %14296 = vmatmul.mubr.msk.f32.vlgmr.msra.gmra.mrb[26].mxu1 %vm364_vm2, %v16048_v7  ;;  %v1977_v8 = vpop.permute.xlu1 %1976 }
 0x927   :  { %2140 = vrot.lane.b32.xlu0 %v1977_v8, %s15639_s19  ;;  %14305 = vmatprep.mubr.msk.f32.mxu1 %vm15635_vm1, %v15634_v3 }
 0x92a   :  { %v1985_v10 = vpop.permute.xlu1 %1984 }
 0x92b   :  { %2292 = vrot.lane.b32.xlu0 %v1981_v9, %s15639_s19 }
 0x92e   :  { %v16061_v16 = vpop.permute.xlu1 %1962 }
 0x92f   :  { %2444 = vrot.lane.b32.xlu0 %v1985_v10, %s15639_s19 }
 0x932   :  { %v16067_v54 = vpop.permute.xlu1 %1966 }
 0x936   :  { %v16079_v20 = vpop.permute.xlu1 %1970 }
 0x982   :  { %v16058_v11 = vpop.f32.mrb[18].mxu1 }
 0x983   :  { %v14262_v12 = vpop.f32.mrb[19].mxu1  ;;  %v2596_v34 = vsel %vm364_vm2, %v16058_v11, -inf }
 0x986   :  { %v2136_v13 = vpop.f32.mrb[20].mxu1 }
 0x987   :  { %v14267_v14 = vpop.f32.mrb[21].mxu1  ;;  %v2599_v15 = vsel %vm364_vm2, %v2136_v13, -inf }
 0x988   :  { %2600 = vmax.xlane.f32.xlu0 %v2599_v15 }
 0x999   :  { %v2141_v17 = vpop.permute.xlu0 %2140 }
 0x99a   :  { %14269 = vmatpush3.xpose.msk.msra.mxu0 %vm364_vm2, %v2141_v17  ;;  %v3417_v17 = vld [vmem:[#allocation2 + $0x20] sm:$0xff] }
 0x99b   :  { %14278 = vmatprep.subr.mxu0 %v15634_v3 }
 0x99d   :  { %v2293_v18 = vpop.permute.xlu0 %2292  ;;  %14271 = vmatmul.mubr.msk.f32.vlgmr.msra.gmra.mrb[24].mxu0 %vm364_vm2, %v16061_v16 }
 0x99e   :  { %14279 = vmatpush3.xpose.msk.msra.mxu0 %vm364_vm2, %v2293_v18  ;;  %14280 = vmatprep.mubr.msk.f32.mxu0 %vm15635_vm1, %v15634_v3  ;;  %v3418_v18 = vld [vmem:[#allocation2 + $0x28] sm:$0xff] }
 0x99f   :  { %14288 = vmatprep.subr.mxu0 %v15634_v3 }
 0x9a1   :  { %v2445_v19 = vpop.permute.xlu0 %2444  ;;  %14281 = vmatmul.mubr.msk.f32.vlgmr.msra.gmra.mrb[26].mxu0 %vm364_vm2, %v16067_v54 }
 0x9a2   :  { %14289 = vmatpush3.xpose.msk.msra.mxu0 %vm364_vm2, %v2445_v19  ;;  %14290 = vmatprep.mubr.msk.f32.mxu0 %vm15635_vm1, %v15634_v3 }
 0x9a3   :  { %14298 = vmatprep.subr.mxu0 %v15634_v3 }
 0x9a5   :  { %14291 = vmatmul.mubr.msk.f32.vlgmr.msra.gmra.mrb[28].mxu0 %vm364_vm2, %v16079_v20 }
 0x9a6   :  { %14300 = vmatprep.mubr.msk.f32.mxu0 %vm15635_vm1, %v15634_v3 }
 0x9f1   :  { %v2288_v21 = vpop.f32.mrb[22].mxu1 }
 0x9f2   :  { %v14277_v63 = vpop.f32.mrb[23].mxu1  ;;  %v2605_v22 = vsel %vm364_vm2, %v2288_v21, -inf }
 0x9f3   :  { %2606 = vmax.xlane.f32.xlu1 %v2605_v22  ;;  %v15091_v22 = vpack.c.bf16 %v3418_v18, %v3417_v17 }
 0x9f5   :  { %v2440_v23 = vpop.f32.mrb[24].mxu1 }
 0x9f6   :  { %v14287_v24 = vpop.f32.mrb[25].mxu1  ;;  %v2611_v25 = vsel %vm364_vm2, %v2440_v23, -inf }
 0x9f7   :  { %2612 = vmax.xlane.f32.xlu0 %v2611_v25  ;;  %v3420_v24 = vld [vmem:[#allocation2 + $0x38] sm:$0xff] }
 0x9f9   :  { %v2592_v26 = vpop.f32.mrb[26].mxu1 }
 0x9fa   :  { %v14297_v27 = vpop.f32.mrb[27].mxu1  ;;  %v2617_v28 = vsel %vm364_vm2, %v2592_v26, -inf }
 0x9fb   :  { %2618 = vmax.xlane.f32.xlu0 %v2617_v28 }
 0xa04   :  { %2912 = vrot.lane.b32.xlu1 %v1965_v1, %s15640_s20 }
 0xa11   :  { %2760 = vrot.lane.b32.xlu0 %v16000_v57, %s15640_s20 }
 0xa15   :  { %v2601_v29 = vpop.xlane.xlu0 %2600 }
 0xa16   :  { %v2621_v32 = vsub.f32 %v2136_v13, %v2601_v29 }
 0xa18   :  { %v2630_v33 = vmul.f32 1.442695, %v2621_v32 }
 0xa1a   :  { %15306 = vpow2.f32 %v2630_v33 }
 0xa24   :  { %v15307_v35 = vpop.eup %15306 }
 0xa25   :  { %v2647_v36 = vsel %vm364_vm2, %v15307_v35, 0.0 }
 0xa28   :  { %2597 = vmax.xlane.f32.xlu1 %v2596_v34 }
 0xa30   :  { %2648 = vadd.xlane.f32.xlu0 %v2647_v36 }
 0xa70   :  { %v16094_v37 = vpop.f32.mrb[24].mxu0 }
 0xa71   :  { %v14272_v38 = vpop.f32.mrb[25].mxu0  ;;  %v2602_v6 = vsel %vm364_vm2, %v16094_v37, -inf }
 0xa74   :  { %v16096_v39 = vpop.f32.mrb[26].mxu0 }
 0xa75   :  { %v14282_v40 = vpop.f32.mrb[27].mxu0 }
 0xa78   :  { %v16098_v41 = vpop.f32.mrb[28].mxu0 }
 0xa79   :  { %v14292_v42 = vpop.f32.mrb[29].mxu0 }
 0xa80   :  { %v2607_v43 = vpop.xlane.xlu1 %2606 }
 0xa81   :  { %v2623_v44 = vsub.f32 %v2288_v21, %v2607_v43 }
 0xa83   :  { %v2634_v45 = vmul.f32 1.442695, %v2623_v44 }
 0xa84   :  { %v2613_v46 = vpop.xlane.xlu0 %2612  ;;  %v2913_v60 = vpop.permute.xlu1 %2912 }
 0xa85   :  { %15308 = vpow2.f32 %v2634_v45  ;;  %v2625_v30 = vsub.f32 %v2440_v23, %v2613_v46  ;;  %v3419_v23 = vld [vmem:[#allocation2 + $0x30] sm:$0xff] }
 0xa86   :  { %v15095_v28 = vpack.c.bf16 %v3420_v24, %v3419_v23 }
 0xa87   :  { %v2638_v31 = vmul.f32 1.442695, %v2625_v30 }
 0xa88   :  { %v2619_v47 = vpop.xlane.xlu0 %2618 }
 0xa89   :  { %15310 = vpow2.f32 %v2638_v31  ;;  %v2627_v48 = vsub.f32 %v2592_v26, %v2619_v47 }
 0xa8b   :  { %v2642_v51 = vmul.f32 1.442695, %v2627_v48 }
 0xa8c   :  { %v2761_v52 = vpop.permute.xlu0 %2760 }
 0xa8d   :  { %15312 = vpow2.f32 %v2642_v51  ;;  %14304 = vmatpush3.msra.mxu1 %v2761_v52 }
 0xa8e   :  { %14313 = vmatprep.subr.mxu1 %v15634_v3 }
 0xa8f   :  { %v15309_v53 = vpop.eup %15308 }
 0xa90   :  { %v2653_v55 = vsel %vm364_vm2, %v15309_v53, 0.0 }
 0xa91   :  { %2654 = vadd.xlane.f32.xlu1 %v2653_v55 }
 0xa93   :  { %v15311_v56 = vpop.eup %15310 }
 0xa94   :  { %v2659_v57 = vsel %vm364_vm2, %v15311_v56, 0.0 }
 0xa95   :  { %2660 = vadd.xlane.f32.xlu0 %v2659_v57  ;;  %v13486_v57 = vld [vmem:[%s17588_s2 + $0x1] ss:$0 sm:$0xff] }
 0xa97   :  { %v15313_v58 = vpop.eup %15312 }
 0xa98   :  { %v2665_v59 = vsel %vm364_vm2, %v15313_v58, 0.0 }
 0xa99   :  { %2666 = vadd.xlane.f32.xlu1 %v2665_v59 }
 0xaaa   :  { %3216 = vrot.lane.b32.xlu1 %v16048_v7, %s15640_s20  ;;  %v2614_v7 = vsel %vm364_vm2, %v16098_v41, -inf }
 0xaab   :  { %3064 = vrot.lane.b32.xlu0 %v16036_v4, %s15640_s20  ;;  %v2608_v4 = vsel %vm364_vm2, %v16096_v39, -inf }
 0xab5   :  { %v2598_v61 = vpop.xlane.xlu1 %2597 }
 0xab6   :  { %v2620_v1 = vsub.f32 %v16058_v11, %v2598_v61 }
 0xab8   :  { %v2628_v2 = vmul.f32 1.442695, %v2620_v1 }
 0xabd   :  { %v2649_v0 = vpop.xlane.xlu0 %2648 }
 0xabe   :  { %15314 = vrcp.f32 %v2649_v0 }
 0xabf   :  { %15316 = vpow2.f32 %v2628_v2 }
 0xac8   :  { %v15315_v5 = vpop.eup %15314 }
 0xac9   :  { %v2677_v8 = vmul.f32 %v15315_v5, %v15307_v35  ;;  %v16119_v9 = vpop.eup %15316 }
 0xaca   :  { %2603 = vmax.xlane.f32.xlu0 %v2602_v6  ;;  %v2644_v10 = vsel %vm364_vm2, %v16119_v9, 0.0 }
 0xacb   :  { %14306 = vmatmul.mubr.msk.f32.vlgmr.msra.gmra.mrb[28].mxu1 %vm364_vm2, %v2677_v8 }
 0xacc   :  { %14314 = vmatpush3.msra.mxu1 %v2913_v60  ;;  %14315 = vmatprep.mubr.msk.f32.mxu1 %vm15635_vm1, %v15634_v3 }
 0xacd   :  { %14323 = vmatprep.subr.mxu1 %v15634_v3 }
 0xace   :  { %2609 = vmax.xlane.f32.xlu0 %v2608_v4 }
 0xad2   :  { %2615 = vmax.xlane.f32.xlu0 %v2614_v7 }
 0xad6   :  { %2645 = vadd.xlane.f32.xlu0 %v2644_v10 }
 0xb1e   :  { %v2655_v11 = vpop.xlane.xlu1 %2654 }
 0xb1f   :  { %15318 = vrcp.f32 %v2655_v11 }
 0xb22   :  { %v2661_v12 = vpop.xlane.xlu0 %2660 }
 0xb23   :  { %15320 = vrcp.f32 %v2661_v12 }
 0xb26   :  { %v2667_v13 = vpop.xlane.xlu1 %2666  ;;  %v3065_v19 = vpop.permute.xlu0 %3064 }
 0xb27   :  { %15322 = vrcp.f32 %v2667_v13 }
 0xb29   :  { %v15319_v14 = vpop.eup %15318 }
 0xb2a   :  { %v2679_v15 = vmul.f32 %v15319_v14, %v15309_v53  ;;  %v3217_v25 = vpop.permute.xlu1 %3216 }
 0xb2c   :  { %14316 = vmatmul.mubr.msk.f32.vlgmr.msra.gmra.mrb[30].mxu1 %vm364_vm2, %v2679_v15 }
 0xb2d   :  { %v15321_v21 = vpop.eup %15320  ;;  %14324 = vmatpush3.msra.mxu1 %v3065_v19  ;;  %14325 = vmatprep.mubr.msk.f32.mxu1 %vm15635_vm1, %v15634_v3 }
 0xb2e   :  { %14333 = vmatprep.subr.mxu1 %v15634_v3  ;;  %v2681_v63 = vmul.f32 %v15321_v21, %v15311_v56 }
 0xb30   :  { %14326 = vmatmul.mubr.msk.f32.vlgmr.msra.gmra.mrb[32].mxu1 %vm364_vm2, %v2681_v63  ;;  %v3323_v63 = vld [vmem:[#allocation5 + $0x80] sm:$0xff] }
 0xb31   :  { %v15323_v26 = vpop.eup %15322  ;;  %14334 = vmatpush3.msra.mxu1 %v3217_v25  ;;  %14335 = vmatprep.mubr.msk.f32.mxu1 %vm15635_vm1, %v15634_v3 }
 0xb32   :  { %15092 = vmatprep.subr.bf16.mxu1 %v15091_v22  ;;  %v2683_v27 = vmul.f32 %v15323_v26, %v15313_v58  ;;  %v3325_v26 = vld [vmem:[#allocation5 + $0x90] sm:$0xff] }
 0xb34   :  { %14336 = vmatmul.mubr.msk.f32.vlgmr.msra.gmra.mrb[34].mxu1 %vm364_vm2, %v2683_v27  ;;  %v3326_v27 = vld [vmem:[#allocation5 + $0x98] sm:$0xff] }
 0xb35   :  { %15094 = vmatpush3.bf16.msra.mxu1 %v15091_v22  ;;  %14357 = vmatprep.mubr.msk.f32.mxu1 %vm71_vm0, %v15982_v49  ;;  %v3324_v22 = vld [vmem:[#allocation5 + $0x88] sm:$0xff] }
 0xb36   :  { %15096 = vmatprep.subr.bf16.mxu1 %v15095_v28  ;;  %v15083_v23 = vpack.c.bf16 %v3324_v22, %v3323_v63 }
 0xb39   :  { %15098 = vmatpush3.bf16.msra.mxu1 %v15095_v28  ;;  %v15087_v28 = vpack.c.bf16 %v3326_v27, %v3325_v26 }
 0xb3a   :  { %14365 = vmatprep.subr.mxu1 %v15634_v3 }
 0xb3c   :  { %14358 = vmatmul.mubr.msk.f32.vlgmr.msra.gmra.mrb[36].mxu1 %vm71_vm0, %v15984_v50 }
 0xb3d   :  { %14367 = vmatprep.mubr.msk.f32.mxu1 %vm15635_vm1, %v15634_v3 }
 0xb57   :  { %v2604_v29 = vpop.xlane.xlu0 %2603 }
 0xb58   :  { %v2622_v32 = vsub.f32 %v16094_v37, %v2604_v29 }
 0xb5a   :  { %v2632_v33 = vmul.f32 1.442695, %v2622_v32 }
 0xb5b   :  { %v2610_v34 = vpop.xlane.xlu0 %2609 }
 0xb5c   :  { %15324 = vpow2.f32 %v2632_v33  ;;  %v2624_v35 = vsub.f32 %v16096_v39, %v2610_v34 }
 0xb5e   :  { %v2636_v36 = vmul.f32 1.442695, %v2624_v35 }
 0xb5f   :  { %v2616_v37 = vpop.xlane.xlu0 %2615 }
 0xb60   :  { %15326 = vpow2.f32 %v2636_v36  ;;  %v2626_v39 = vsub.f32 %v16098_v41, %v2616_v37 }
 0xb62   :  { %v2640_v42 = vmul.f32 1.442695, %v2626_v39 }
 0xb64   :  { %15328 = vpow2.f32 %v2640_v42 }
 0xb66   :  { %v15325_v49 = vpop.eup %15324 }
 0xb67   :  { %v2650_v38 = vsel %vm364_vm2, %v15325_v49, 0.0 }
 0xb68   :  { %2651 = vadd.xlane.f32.xlu0 %v2650_v38 }
 0xb6a   :  { %v15327_v40 = vpop.eup %15326 }
 0xb6b   :  { %v2656_v50 = vsel %vm364_vm2, %v15327_v40, 0.0 }
 0xb6c   :  { %2657 = vadd.xlane.f32.xlu1 %v2656_v50 }
 0xb6e   :  { %v15329_v43 = vpop.eup %15328 }
 0xb6f   :  { %v2662_v46 = vsel %vm364_vm2, %v15329_v43, 0.0 }
 0xb7d   :  { %3140 = vrot.lane.b32.xlu1 %v16079_v20, %s15640_s20  ;;  %v2646_v20 = vpop.xlane.xlu0 %2645 }
 0xb7e   :  { %2684 = vrot.lane.b32.xlu0 %v16012_v62, %s15640_s20  ;;  %15330 = vrcp.f32 %v2646_v20 }
 0xb82   :  { %2836 = vrot.lane.b32.xlu0 %v16061_v16, %s15640_s20 }
 0xb88   :  { %v15331_v30 = vpop.eup %15330 }
 0xb89   :  { %v2676_v41 = vmul.f32 %v15331_v30, %v16119_v9 }
 0xb9e   :  { %v16149_v44 = vpop.f32.mrb[28].mxu1 }
 0xb9f   :  { %v14307_v45 = vpop.f32.mrb[29].mxu1 }
 0xba1   :  { %2663 = vadd.xlane.f32.xlu0 %v2662_v46 }
 0xbb7   :  { %2988 = vrot.lane.b32.xlu0 %v16067_v54, %s15640_s20 }
 0xbf5   :  { %v2652_v62 = vpop.xlane.xlu0 %2651 }
 0xbf6   :  { %15332 = vrcp.f32 %v2652_v62 }
 0xbf9   :  { %v2685_v16 = vpop.permute.xlu0 %2684  ;;  %v2658_v0 = vpop.xlane.xlu1 %2657 }
 0xbfa   :  { %14299 = vmatpush3.msra.mxu0 %v2685_v16  ;;  %15334 = vrcp.f32 %v2658_v0 }
 0xbfb   :  { %14301 = vmatmul.mubr.msk.f32.vlgmr.msra.gmra.mrb[30].mxu0 %vm364_vm2, %v2676_v41  ;;  %14308 = vmatprep.subr.mxu0 %v15634_v3 }
 0xbfc   :  { %14310 = vmatprep.mubr.msk.f32.mxu0 %vm15635_vm1, %v15634_v3 }
 0xbfd   :  { %v2837_v31 = vpop.permute.xlu0 %2836  ;;  %v3141_v8 = vpop.permute.xlu1 %3140 }
 0xbfe   :  { %14309 = vmatpush3.msra.mxu0 %v2837_v31 }
 0xbff   :  { %v2984_v47 = vpop.f32.mrb[30].mxu1  ;;  %14318 = vmatprep.subr.mxu0 %v15634_v3 }
 0xc00   :  { %v15333_v54 = vpop.eup %15332  ;;  %v14317_v48 = vpop.f32.mrb[31].mxu1 }
 0xc01   :  { %v2678_v51 = vmul.f32 %v15333_v54, %v15325_v49 }
 0xc03   :  { %14311 = vmatmul.mubr.msk.f32.vlgmr.msra.gmra.mrb[32].mxu0 %vm364_vm2, %v2678_v51  ;;  %v3136_v52 = vpop.f32.mrb[32].mxu1 }
 0xc04   :  { %v14327_v53 = vpop.f32.mrb[33].mxu1  ;;  %14320 = vmatprep.mubr.msk.f32.mxu0 %vm15635_vm1, %v15634_v3  ;;  %v15335_v2 = vpop.eup %15334 }
 0xc05   :  { %v2680_v6 = vmul.f32 %v15335_v2, %v15327_v40 }
 0xc07   :  { %v3288_v55 = vpop.f32.mrb[34].mxu1 }
 0xc08   :  { %v14337_v56 = vpop.f32.mrb[35].mxu1 }
 0xc0f   :  { %v14359_v58 = vpop.f32.mrb[36].mxu1 }
 0xc10   :  { %v16166_v59 = vadd.f32 %v14359_v58, %v13486_v57  ;;  %v3495_v60 = vpop.f32.mrb[37].mxu1 }
 0xc11   :  { %v16168_v61 = vadd.f32 %v13486_v57, %v3495_v60 }
 0xc12   :  { %3508 = vrot.lane.b32.xlu0 %v16166_v59, %s15636_s1 }
 0xc13   :  { %3506 = vrot.lane.b32.xlu1 %v16168_v61, %s15636_s1 }
 0xc16   :  { %3512 = vrot.lane.b32.xlu0 %v16166_v59, %s15637_s14 }
 0xc17   :  { %3510 = vrot.lane.b32.xlu1 %v16168_v61, %s15637_s14 }
 0xc1a   :  { %3516 = vrot.lane.b32.xlu0 %v16166_v59, %s15638_s18 }
 0xc1b   :  { %3514 = vrot.lane.b32.xlu1 %v16168_v61, %s15638_s18 }
 0xc1e   :  { %3594 = vrot.lane.b32.xlu0 %v16166_v59, %s15639_s19 }
 0xc1f   :  { %3296 = vrot.lane.b32.xlu1 %v2984_v47, %s15632_s24 }
 0xc23   :  { %3304 = vrot.lane.b32.xlu1 %v3136_v52, %s15641_s21 }
 0xc27   :  { %3312 = vrot.lane.b32.xlu1 %v3288_v55, %s15642_s22 }
 0xc2e   :  { %v2664_v1 = vpop.xlane.xlu0 %2663 }
 0xc2f   :  { %15336 = vrcp.f32 %v2664_v1 }
 0xc32   :  { %v2989_v5 = vpop.permute.xlu0 %2988 }
 0xc33   :  { %14319 = vmatpush3.msra.mxu0 %v2989_v5 }
 0xc34   :  { %14321 = vmatmul.mubr.msk.f32.vlgmr.msra.gmra.mrb[34].mxu0 %vm364_vm2, %v2680_v6  ;;  %14328 = vmatprep.subr.mxu0 %v15634_v3 }
 0xc35   :  { %14329 = vmatpush3.msra.mxu0 %v3141_v8  ;;  %14330 = vmatprep.mubr.msk.f32.mxu0 %vm15635_vm1, %v15634_v3 }
 0xc36   :  { %15084 = vmatprep.subr.bf16.mxu0 %v15083_v23 }
 0xc39   :  { %v15337_v4 = vpop.eup %15336 }
 0xc3a   :  { %v2682_v7 = vmul.f32 %v15337_v4, %v15329_v43 }
 0xc3c   :  { %14331 = vmatmul.mubr.msk.f32.vlgmr.msra.gmra.mrb[36].mxu0 %vm364_vm2, %v2682_v7 }
 0xc3d   :  { %15086 = vmatpush3.bf16.msra.mxu0 %v15083_v23 }
 0xc3e   :  { %15088 = vmatprep.subr.bf16.mxu0 %v15087_v28 }
 0xc41   :  { %15090 = vmatpush3.bf16.msra.mxu0 %v15087_v28 }
 0xc42   :  { %14360 = vmatprep.subr.mxu0 %v15634_v3 }
 0xc84   :  { %v16192_v9 = vpop.permute.xlu0 %3508 }
 0xc85   :  { %3746 = vrot.lane.b32.xlu0 %v16192_v9, %s15639_s19  ;;  %v16196_v10 = vpop.permute.xlu1 %3506 }
 0xc86   :  { %3670 = vrot.lane.b32.xlu1 %v16196_v10, %s15639_s19 }
 0xc88   :  { %v16200_v11 = vpop.permute.xlu0 %3512 }
 0xc89   :  { %3898 = vrot.lane.b32.xlu0 %v16200_v11, %s15639_s19  ;;  %v16204_v12 = vpop.permute.xlu1 %3510 }
 0xc8c   :  { %v16206_v13 = vpop.permute.xlu0 %3516 }
 0xc8d   :  { %4050 = vrot.lane.b32.xlu0 %v16206_v13, %s15639_s19  ;;  %v16210_v14 = vpop.permute.xlu1 %3514 }
 0xc8e   :  { %3974 = vrot.lane.b32.xlu1 %v16210_v14, %s15639_s19 }
 0xc90   :  { %v3595_v15 = vpop.permute.xlu0 %3594 }
 0xc91   :  { %14366 = vmatpush3.xpose.msk.msra.mxu1 %vm364_vm2, %v3595_v15  ;;  %v3297_v40 = vpop.permute.xlu1 %3296 }
 0xc92   :  { %14375 = vmatprep.subr.mxu1 %v15634_v3  ;;  %v3317_v45 = vsel %vm364_vm2, %v16149_v44, %v3297_v40 }
 0xc94   :  { %14368 = vmatmul.mubr.msk.f32.vlgmr.msra.gmra.mrb[38].mxu1 %vm364_vm2, %v16166_v59 }
 0xc95   :  { %14377 = vmatprep.mubr.msk.f32.mxu1 %vm15635_vm1, %v15634_v3  ;;  %v3305_v37 = vpop.permute.xlu1 %3304 }
 0xc96   :  { %v3319_v62 = vsel %vm1693_vm3, %v3317_v45, %v3305_v37 }
 0xc99   :  { %v3313_v42 = vpop.permute.xlu1 %3312 }
 0xc9a   :  { %v3321_v16 = vsel %vm1696_vm4, %v3319_v62, %v3313_v42 }
 0xcce   :  { %v2756_v17 = vpop.f32.mrb[30].mxu0 }
 0xccf   :  { %v14302_v18 = vpop.f32.mrb[31].mxu0 }
 0xcd6   :  { %v2908_v19 = vpop.f32.mrb[32].mxu0 }
 0xcd7   :  { %v14312_v21 = vpop.f32.mrb[33].mxu0  ;;  %3294 = vrot.lane.b32.xlu0 %v2908_v19, %s15632_s24 }
 0xcf7   :  { %v3747_v24 = vpop.permute.xlu0 %3746 }
 0xcf8   :  { %14376 = vmatpush3.xpose.msk.msra.mxu1 %vm364_vm2, %v3747_v24  ;;  %v3671_v44 = vpop.permute.xlu1 %3670 }
 0xcf9   :  { %14385 = vmatprep.subr.mxu1 %v15634_v3 }
 0xcfb   :  { %14378 = vmatmul.mubr.msk.f32.vlgmr.msra.gmra.mrb[40].mxu1 %vm364_vm2, %v16192_v9  ;;  %v3899_v25 = vpop.permute.xlu0 %3898 }
 0xcfc   :  { %14386 = vmatpush3.xpose.msk.msra.mxu1 %vm364_vm2, %v3899_v25  ;;  %14387 = vmatprep.mubr.msk.f32.mxu1 %vm15635_vm1, %v15634_v3 }
 0xcfd   :  { %14395 = vmatprep.subr.mxu1 %v15634_v3 }
 0xcff   :  { %14388 = vmatmul.mubr.msk.f32.vlgmr.msra.gmra.mrb[42].mxu1 %vm364_vm2, %v16200_v11  ;;  %v4051_v29 = vpop.permute.xlu0 %4050 }
 0xd00   :  { %14396 = vmatpush3.xpose.msk.msra.mxu1 %vm364_vm2, %v4051_v29  ;;  %14397 = vmatprep.mubr.msk.f32.mxu1 %vm15635_vm1, %v15634_v3  ;;  %v3975_v47 = vpop.permute.xlu1 %3974 }
 0xd01   :  { %14405 = vmatprep.subr.mxu1 %v15634_v3 }
 0xd03   :  { %14398 = vmatmul.mubr.msk.f32.vlgmr.msra.gmra.mrb[44].mxu1 %vm364_vm2, %v16206_v13 }
 0xd04   :  { %14407 = vmatprep.mubr.msk.f32.mxu1 %vm15635_vm1, %v15634_v3 }
 0xd07   :  { %v3060_v32 = vpop.f32.mrb[34].mxu0 }
 0xd08   :  { %3302 = vrot.lane.b32.xlu0 %v3060_v32, %s15641_s21  ;;  %v14322_v33 = vpop.f32.mrb[35].mxu0 }
 0xd0f   :  { %v3212_v34 = vpop.f32.mrb[36].mxu0 }
 0xd10   :  { %3310 = vrot.lane.b32.xlu0 %v3212_v34, %s15642_s22  ;;  %v14332_v35 = vpop.f32.mrb[37].mxu0 }
 0xd14   :  { %3518 = vrot.lane.b32.xlu0 %v16168_v61, %s15639_s19 }
 0xd18   :  { %3822 = vrot.lane.b32.xlu0 %v16204_v12, %s15639_s19 }
 0xd49   :  { %v3295_v50 = vpop.permute.xlu0 %3294 }
 0xd4a   :  { %v3316_v43 = vsel %vm364_vm2, %v2756_v17, %v3295_v50 }
 0xd67   :  { %v16246_v36 = vpop.f32.mrb[38].mxu1 }
 0xd68   :  { %v14369_v49 = vpop.f32.mrb[39].mxu1  ;;  %v4129_v38 = vsel %vm364_vm2, %v16246_v36, -inf }
 0xd69   :  { %4130 = vmax.xlane.f32.xlu0 %v4129_v38 }
 0xd7a   :  { %v3303_v39 = vpop.permute.xlu0 %3302 }
 0xd7b   :  { %v3318_v46 = vsel %vm1693_vm3, %v3316_v43, %v3303_v39 }
 0xd82   :  { %v3311_v20 = vpop.permute.xlu0 %3310 }
 0xd83   :  { %v3320_v30 = vsel %vm1696_vm4, %v3318_v46, %v3311_v20 }
 0xd84   :  { %14346 = vmatprep.mubr.msk.f32.mxu0 %vm71_vm0, %v3320_v30 }
 0xd85   :  { %14347 = vmatmul.mubr.msk.f32.vlgmr.msra.gmra.mrb[38].mxu0 %vm71_vm0, %v3321_v16 }
 0xd86   :  { %v3519_v41 = vpop.permute.xlu0 %3518  ;;  %14362 = vmatprep.mubr.msk.f32.mxu0 %vm15635_vm1, %v15634_v3 }
 0xd87   :  { %14361 = vmatpush3.xpose.msk.msra.mxu0 %vm364_vm2, %v3519_v41 }
 0xd88   :  { %14370 = vmatprep.subr.mxu0 %v15634_v3 }
 0xd8a   :  { %14363 = vmatmul.mubr.msk.f32.vlgmr.msra.gmra.mrb[40].mxu0 %vm364_vm2, %v16168_v61  ;;  %v3823_v31 = vpop.permute.xlu0 %3822 }
 0xd8b   :  { %14371 = vmatpush3.xpose.msk.msra.mxu0 %vm364_vm2, %v3671_v44  ;;  %14372 = vmatprep.mubr.msk.f32.mxu0 %vm15635_vm1, %v15634_v3 }
 0xd8c   :  { %14380 = vmatprep.subr.mxu0 %v15634_v3 }
 0xd8e   :  { %14373 = vmatmul.mubr.msk.f32.vlgmr.msra.gmra.mrb[42].mxu0 %vm364_vm2, %v16196_v10 }
 0xd8f   :  { %14381 = vmatpush3.xpose.msk.msra.mxu0 %vm364_vm2, %v3823_v31  ;;  %14382 = vmatprep.mubr.msk.f32.mxu0 %vm15635_vm1, %v15634_v3 }
 0xd90   :  { %14390 = vmatprep.subr.mxu0 %v15634_v3 }
 0xd92   :  { %14383 = vmatmul.mubr.msk.f32.vlgmr.msra.gmra.mrb[44].mxu0 %vm364_vm2, %v16204_v12 }
 0xd93   :  { %14391 = vmatpush3.xpose.msk.msra.mxu0 %vm364_vm2, %v3975_v47  ;;  %14392 = vmatprep.mubr.msk.f32.mxu0 %vm15635_vm1, %v15634_v3 }
 0xd94   :  { %14400 = vmatprep.subr.mxu0 %v15634_v3 }
 0xd96   :  { %14393 = vmatmul.mubr.msk.f32.vlgmr.msra.gmra.mrb[46].mxu0 %vm364_vm2, %v16210_v14 }
 0xd97   :  { %14402 = vmatprep.mubr.msk.f32.mxu0 %vm15635_vm1, %v15634_v3 }
 0xdce   :  { %v3818_v54 = vpop.f32.mrb[40].mxu1 }
 0xdcf   :  { %v14379_v48 = vpop.f32.mrb[41].mxu1  ;;  %v4135_v51 = vsel %vm364_vm2, %v3818_v54, -inf }
 0xdd0   :  { %4136 = vmax.xlane.f32.xlu1 %v4135_v51 }
 0xdd2   :  { %v3970_v52 = vpop.f32.mrb[42].mxu1 }
 0xdd3   :  { %v14389_v53 = vpop.f32.mrb[43].mxu1  ;;  %v4141_v55 = vsel %vm364_vm2, %v3970_v52, -inf }
 0xdd4   :  { %4142 = vmax.xlane.f32.xlu0 %v4141_v55 }
 0xdd6   :  { %v4122_v56 = vpop.f32.mrb[44].mxu1 }
 0xdd7   :  { %v14399_v57 = vpop.f32.mrb[45].mxu1  ;;  %v4147_v58 = vsel %vm364_vm2, %v4122_v56, -inf }
 0xdd8   :  { %4148 = vmax.xlane.f32.xlu0 %v4147_v58 }
 0xdf6   :  { %v4131_v1 = vpop.xlane.xlu0 %4130 }
 0xdf7   :  { %v4151_v35 = vsub.f32 %v16246_v36, %v4131_v1 }
 0xdf9   :  { %v4160_v49 = vmul.f32 1.442695, %v4151_v35 }
 0xe58   :  { %v16288_v60 = vpop.f32.mrb[38].mxu0 }
 0xe59   :  { %v16290_v0 = vpop.f32.mrb[39].mxu0 }
 0xe5d   :  { %v4137_v2 = vpop.xlane.xlu1 %4136  ;;  %v3590_v5 = vpop.f32.mrb[40].mxu0 }
 0xe5e   :  { %v4153_v6 = vsub.f32 %v3818_v54, %v4137_v2  ;;  %v14364_v8 = vpop.f32.mrb[41].mxu0  ;;  %v4126_v4 = vsel %vm364_vm2, %v3590_v5, -inf }
 0xe5f   :  { %4127 = vmax.xlane.f32.xlu1 %v4126_v4  ;;  %v4948_v8 = vld [vmem:[#allocation2 + $0xa8] sm:$0xff] }
 0xe60   :  { %v4164_v7 = vmul.f32 1.442695, %v4153_v6  ;;  %v4947_v6 = vld [vmem:[#allocation2 + $0xa0] sm:$0xff] }
 0xe61   :  { %v4143_v15 = vpop.xlane.xlu0 %4142  ;;  %v3742_v17 = vpop.f32.mrb[42].mxu0 }
 0xe62   :  { %15338 = vpow2.f32 %v4164_v7  ;;  %v14374_v18 = vpop.f32.mrb[43].mxu0  ;;  %v4132_v19 = vsel %vm364_vm2, %v3742_v17, -inf  ;;  %v4155_v38 = vsub.f32 %v3970_v52, %v4143_v15  ;;  %v15107_v7 = vpack.c.bf16 %v4948_v8, %v4947_v6 }
 0xe63   :  { %4133 = vmax.xlane.f32.xlu0 %v4132_v19  ;;  %v4950_v18 = vld [vmem:[#allocation2 + $0xb8] sm:$0xff]  ;;  %v13482_v19 = vld [vmem:[%s17590_s4 + $0x4] ss:$0 sm:$0xff] }
 0xe64   :  { %v4168_v40 = vmul.f32 1.442695, %v4155_v38 }
 0xe65   :  { %v4149_v21 = vpop.xlane.xlu0 %4148  ;;  %v3894_v63 = vpop.f32.mrb[44].mxu0 }
 0xe66   :  { %v4157_v22 = vsub.f32 %v4122_v56, %v4149_v21  ;;  %v14384_v23 = vpop.f32.mrb[45].mxu0  ;;  %v4138_v24 = vsel %vm364_vm2, %v3894_v63, -inf }
 0xe67   :  { %4139 = vmax.xlane.f32.xlu1 %v4138_v24  ;;  %v3408_v23 = vadd.f32 %v13482_v19, %v16290_v0  ;;  %v3413_v24 = vadd.f32 %v16288_v60, %v13482_v19 }
 0xe68   :  { %v4172_v25 = vmul.f32 1.442695, %v4157_v22 }
 0xe69   :  { %v4046_v26 = vpop.f32.mrb[46].mxu0 }
 0xe6a   :  { %15340 = vpow2.f32 %v4172_v25  ;;  %v14394_v27 = vpop.f32.mrb[47].mxu0  ;;  %v4144_v28 = vsel %vm364_vm2, %v4046_v26, -inf }
 0xe6b   :  { %4145 = vmax.xlane.f32.xlu0 %v4144_v28  ;;  %15342 = vpow2.f32 %v4160_v49 }
 0xe6c   :  { %v16296_v29 = vpop.eup %15338  ;;  %15344 = vpow2.f32 %v4168_v40 }
 0xe6d   :  { %v4183_v32 = vsel %vm364_vm2, %v16296_v29, 0.0 }
 0xe6f   :  { %4184 = vadd.xlane.f32.xlu0 %v4183_v32 }
 0xe74   :  { %v16300_v33 = vpop.eup %15340 }
 0xe75   :  { %v4195_v34 = vsel %vm364_vm2, %v16300_v33, 0.0  ;;  %v15343_v50 = vpop.eup %15342 }
 0xe76   :  { %4196 = vadd.xlane.f32.xlu0 %v4195_v34  ;;  %v4177_v37 = vsel %vm364_vm2, %v15343_v50, 0.0  ;;  %v16310_v39 = vpop.eup %15344 }
 0xe77   :  { %v4189_v42 = vsel %vm364_vm2, %v16310_v39, 0.0 }
 0xe78   :  { %4290 = vrot.lane.b32.xlu1 %v16166_v59, %s15640_s20 }
 0xe8c   :  { %4442 = vrot.lane.b32.xlu0 %v16192_v9, %s15640_s20 }
 0xe9c   :  { %4178 = vadd.xlane.f32.xlu1 %v4177_v37 }
 0xea0   :  { %4190 = vadd.xlane.f32.xlu1 %v4189_v42 }
 0xeb1   :  { %4594 = vrot.lane.b32.xlu1 %v16200_v11, %s15640_s20 }
 0xeb5   :  { %4746 = vrot.lane.b32.xlu1 %v16206_v13, %s15640_s20 }
 0xeec   :  { %v4128_v59 = vpop.xlane.xlu1 %4127 }
 0xeed   :  { %v4150_v9 = vsub.f32 %v3590_v5, %v4128_v59 }
 0xeef   :  { %v4158_v36 = vmul.f32 1.442695, %v4150_v9 }
 0xef0   :  { %v4134_v43 = vpop.xlane.xlu0 %4133 }
 0xef1   :  { %15346 = vpow2.f32 %v4158_v36  ;;  %v4152_v45 = vsub.f32 %v3742_v17, %v4134_v43  ;;  %v4949_v17 = vld [vmem:[#allocation2 + $0xb0] sm:$0xff] }
 0xef2   :  { %v15111_v22 = vpack.c.bf16 %v4950_v18, %v4949_v17 }
 0xef3   :  { %v4162_v46 = vmul.f32 1.442695, %v4152_v45 }
 0xef4   :  { %v4140_v20 = vpop.xlane.xlu1 %4139 }
 0xef5   :  { %15348 = vpow2.f32 %v4162_v46  ;;  %v4154_v62 = vsub.f32 %v3894_v63, %v4140_v20  ;;  %v13518_v20 = vld [vmem:[%s17588_s2 + $0x5] ss:$0 sm:$0xff] }
 0xef7   :  { %v4166_v30 = vmul.f32 1.442695, %v4154_v62 }
 0xef8   :  { %v4146_v16 = vpop.xlane.xlu0 %4145  ;;  %v4291_v41 = vpop.permute.xlu1 %4290 }
 0xef9   :  { %15350 = vpow2.f32 %v4166_v30  ;;  %v4156_v44 = vsub.f32 %v4046_v26, %v4146_v16  ;;  %14406 = vmatpush3.msra.mxu1 %v4291_v41 }
 0xefa   :  { %14415 = vmatprep.subr.mxu1 %v15634_v3 }
 0xefb   :  { %v16319_v11 = vpop.eup %15346  ;;  %v4170_v13 = vmul.f32 1.442695, %v4156_v44  ;;  %v4853_v44 = vld [vmem:[#allocation5 + $0x20] sm:$0xff] }
 0xefc   :  { %v4174_v31 = vsel %vm364_vm2, %v16319_v11, 0.0  ;;  %v4185_v55 = vpop.xlane.xlu0 %4184 }
 0xefd   :  { %15352 = vpow2.f32 %v4170_v13  ;;  %4175 = vadd.xlane.f32.xlu0 %v4174_v31  ;;  %v4855_v31 = vld [vmem:[#allocation5 + $0x30] sm:$0xff] }
 0xeff   :  { %v16323_v47 = vpop.eup %15348 }
 0xf00   :  { %v4180_v54 = vsel %vm364_vm2, %v16323_v47, 0.0 }
 0xf01   :  { %4181 = vadd.xlane.f32.xlu1 %v4180_v54 }
 0xf03   :  { %v16327_v48 = vpop.eup %15350  ;;  %v4197_v58 = vpop.xlane.xlu0 %4196 }
 0xf04   :  { %v4186_v51 = vsel %vm364_vm2, %v16327_v48, 0.0 }
 0xf05   :  { %4187 = vadd.xlane.f32.xlu0 %v4186_v51 }
 0xf07   :  { %v16331_v52 = vpop.eup %15352  ;;  %v4443_v5 = vpop.permute.xlu0 %4442 }
 0xf08   :  { %v4192_v53 = vsel %vm364_vm2, %v16331_v52, 0.0 }
 0xf09   :  { %4193 = vadd.xlane.f32.xlu0 %v4192_v53 }
 0xf12   :  { %4214 = vrot.lane.b32.xlu1 %v16168_v61, %s15640_s20 }
 0xf16   :  { %4518 = vrot.lane.b32.xlu1 %v16204_v12, %s15640_s20 }
 0xf1a   :  { %4670 = vrot.lane.b32.xlu1 %v16210_v14, %s15640_s20 }
 0xf1f   :  { %4366 = vrot.lane.b32.xlu0 %v16196_v10, %s15640_s20 }
 0xf29   :  { %v4179_v56 = vpop.xlane.xlu1 %4178 }
 0xf2a   :  { %15354 = vrcp.f32 %v4179_v56 }
 0xf2b   :  { %15356 = vrcp.f32 %v4185_v55 }
 0xf2d   :  { %v4191_v57 = vpop.xlane.xlu1 %4190 }
 0xf2e   :  { %15358 = vrcp.f32 %v4191_v57 }
 0xf2f   :  { %15360 = vrcp.f32 %v4197_v58 }
 0xf31   :  { %v4595_v12 = vpop.permute.xlu1 %4594 }
 0xf34   :  { %v15355_v1 = vpop.eup %15354 }
 0xf35   :  { %v4207_v2 = vmul.f32 %v15355_v1, %v15343_v50  ;;  %v15357_v61 = vpop.eup %15356  ;;  %v4747_v21 = vpop.permute.xlu1 %4746 }
 0xf36   :  { %v4209_v10 = vmul.f32 %v15357_v61, %v16296_v29 }
 0xf37   :  { %14408 = vmatmul.mubr.msk.f32.vlgmr.msra.gmra.mrb[46].mxu1 %vm364_vm2, %v4207_v2 }
 0xf38   :  { %14416 = vmatpush3.msra.mxu1 %v4443_v5  ;;  %14417 = vmatprep.mubr.msk.f32.mxu1 %vm15635_vm1, %v15634_v3  ;;  %v15359_v14 = vpop.eup %15358 }
 0xf39   :  { %14425 = vmatprep.subr.mxu1 %v15634_v3  ;;  %v4211_v4 = vmul.f32 %v15359_v14, %v16310_v39  ;;  %v15361_v15 = vpop.eup %15360 }
 0xf3a   :  { %v4213_v63 = vmul.f32 %v15361_v15, %v16300_v33 }
 0xf3b   :  { %14418 = vmatmul.mubr.msk.f32.vlgmr.msra.gmra.mrb[48].mxu1 %vm364_vm2, %v4209_v10 }
 0xf3c   :  { %14426 = vmatpush3.msra.mxu1 %v4595_v12  ;;  %14427 = vmatprep.mubr.msk.f32.mxu1 %vm15635_vm1, %v15634_v3 }
 0xf3d   :  { %14435 = vmatprep.subr.mxu1 %v15634_v3 }
 0xf3f   :  { %14428 = vmatmul.mubr.msk.f32.vlgmr.msra.gmra.mrb[50].mxu1 %vm364_vm2, %v4211_v4 }
 0xf40   :  { %14436 = vmatpush3.msra.mxu1 %v4747_v21  ;;  %14437 = vmatprep.mubr.msk.f32.mxu1 %vm15635_vm1, %v15634_v3 }
 0xf41   :  { %15108 = vmatprep.subr.bf16.mxu1 %v15107_v7 }
 0xf43   :  { %14438 = vmatmul.mubr.msk.f32.vlgmr.msra.gmra.mrb[52].mxu1 %vm364_vm2, %v4213_v63 }
 0xf44   :  { %15110 = vmatpush3.bf16.msra.mxu1 %v15107_v7  ;;  %14459 = vmatprep.mubr.msk.f32.mxu1 %vm71_vm0, %v3408_v23 }
 0xf45   :  { %15112 = vmatprep.subr.bf16.mxu1 %v15111_v22 }
 0xf48   :  { %15114 = vmatpush3.bf16.msra.mxu1 %v15111_v22 }
 0xf49   :  { %14467 = vmatprep.subr.mxu1 %v15634_v3 }
 0xf4b   :  { %14460 = vmatmul.mubr.msk.f32.vlgmr.msra.gmra.mrb[54].mxu1 %vm71_vm0, %v3413_v24 }
 0xf4c   :  { %14469 = vmatprep.mubr.msk.f32.mxu1 %vm15635_vm1, %v15634_v3 }
 0xf8a   :  { %v4176_v25 = vpop.xlane.xlu0 %4175 }
 0xf8b   :  { %15362 = vrcp.f32 %v4176_v25 }
 0xf8e   :  { %v4182_v26 = vpop.xlane.xlu1 %4181 }
 0xf8f   :  { %15364 = vrcp.f32 %v4182_v26 }
 0xf92   :  { %v4188_v0 = vpop.xlane.xlu0 %4187  ;;  %v4215_v27 = vpop.permute.xlu1 %4214 }
 0xf93   :  { %15366 = vrcp.f32 %v4188_v0  ;;  %14401 = vmatpush3.msra.mxu0 %v4215_v27 }
 0xf94   :  { %14410 = vmatprep.subr.mxu0 %v15634_v3 }
 0xf95   :  { %v15363_v28 = vpop.eup %15362 }
 0xf96   :  { %v4194_v29 = vpop.xlane.xlu0 %4193  ;;  %v4206_v60 = vmul.f32 %v15363_v28, %v16319_v11  ;;  %v4519_v33 = vpop.permute.xlu1 %4518  ;;  %v4854_v11 = vld [vmem:[#allocation5 + $0x28] sm:$0xff] }
 0xf97   :  { %15368 = vrcp.f32 %v4194_v29  ;;  %v15099_v13 = vpack.c.bf16 %v4854_v11, %v4853_v44 }
 0xf98   :  { %14403 = vmatmul.mubr.msk.f32.vlgmr.msra.gmra.mrb[48].mxu0 %vm364_vm2, %v4206_v60 }
 0xf99   :  { %v15365_v32 = vpop.eup %15364  ;;  %14412 = vmatprep.mubr.msk.f32.mxu0 %vm15635_vm1, %v15634_v3 }
 0xf9a   :  { %v4367_v34 = vpop.permute.xlu0 %4366  ;;  %v4208_v35 = vmul.f32 %v15365_v32, %v16323_v47  ;;  %v4671_v40 = vpop.permute.xlu1 %4670  ;;  %v4856_v47 = vld [vmem:[#allocation5 + $0x38] sm:$0xff] }
 0xf9b   :  { %14411 = vmatpush3.msra.mxu0 %v4367_v34  ;;  %v15103_v54 = vpack.c.bf16 %v4856_v47, %v4855_v31 }
 0xf9c   :  { %14413 = vmatmul.mubr.msk.f32.vlgmr.msra.gmra.mrb[50].mxu0 %vm364_vm2, %v4208_v35  ;;  %14420 = vmatprep.subr.mxu0 %v15634_v3 }
 0xf9d   :  { %v15367_v49 = vpop.eup %15366  ;;  %14421 = vmatpush3.msra.mxu0 %v4519_v33  ;;  %14422 = vmatprep.mubr.msk.f32.mxu0 %vm15635_vm1, %v15634_v3 }
 0xf9e   :  { %14430 = vmatprep.subr.mxu0 %v15634_v3  ;;  %v4210_v38 = vmul.f32 %v15367_v49, %v16327_v48 }
 0xfa0   :  { %14423 = vmatmul.mubr.msk.f32.vlgmr.msra.gmra.mrb[52].mxu0 %vm364_vm2, %v4210_v38 }
 0xfa1   :  { %v15369_v50 = vpop.eup %15368  ;;  %14431 = vmatpush3.msra.mxu0 %v4671_v40  ;;  %14432 = vmatprep.mubr.msk.f32.mxu0 %vm15635_vm1, %v15634_v3 }
 0xfa2   :  { %v4212_v37 = vmul.f32 %v15369_v50, %v16331_v52  ;;  %15100 = vmatprep.subr.bf16.mxu0 %v15099_v13 }
 0xfa4   :  { %14433 = vmatmul.mubr.msk.f32.vlgmr.msra.gmra.mrb[54].mxu0 %vm364_vm2, %v4212_v37 }
 0xfa5   :  { %15102 = vmatpush3.bf16.msra.mxu0 %v15099_v13 }
 0xfa6   :  { %15104 = vmatprep.subr.bf16.mxu0 %v15103_v54 }
 0xfa9   :  { %15106 = vmatpush3.bf16.msra.mxu0 %v15103_v54 }
 0xfaa   :  { %14462 = vmatprep.subr.mxu0 %v15634_v3 }
0x100a   :  { %v16385_v39 = vpop.f32.mrb[46].mxu1 }
0x100b   :  { %v14409_v42 = vpop.f32.mrb[47].mxu1 }
0x100e   :  { %v4514_v59 = vpop.f32.mrb[48].mxu1 }
0x100f   :  { %v14419_v9 = vpop.f32.mrb[49].mxu1 }
0x1012   :  { %v4666_v36 = vpop.f32.mrb[50].mxu1 }
0x1013   :  { %v14429_v43 = vpop.f32.mrb[51].mxu1 }
0x1016   :  { %v4818_v45 = vpop.f32.mrb[52].mxu1 }
0x1017   :  { %v14439_v46 = vpop.f32.mrb[53].mxu1 }
0x101e   :  { %v14461_v62 = vpop.f32.mrb[54].mxu1 }
0x101f   :  { %v16390_v30 = vadd.f32 %v14461_v62, %v13518_v20  ;;  %v5031_v16 = vpop.f32.mrb[55].mxu1 }
0x1020   :  { %v16392_v41 = vadd.f32 %v13518_v20, %v5031_v16 }
0x1021   :  { %5044 = vrot.lane.b32.xlu1 %v16390_v30, %s15636_s1 }
0x1022   :  { %5042 = vrot.lane.b32.xlu0 %v16392_v41, %s15636_s1 }
0x1025   :  { %5048 = vrot.lane.b32.xlu1 %v16390_v30, %s15637_s14 }
0x1026   :  { %5046 = vrot.lane.b32.xlu0 %v16392_v41, %s15637_s14 }
0x1029   :  { %5052 = vrot.lane.b32.xlu1 %v16390_v30, %s15638_s18 }
0x102a   :  { %5050 = vrot.lane.b32.xlu0 %v16392_v41, %s15638_s18 }
0x102d   :  { %4826 = vrot.lane.b32.xlu1 %v4514_v59, %s15632_s24 }
0x1031   :  { %4834 = vrot.lane.b32.xlu1 %v4666_v36, %s15641_s21 }
0x1035   :  { %4842 = vrot.lane.b32.xlu1 %v4818_v45, %s15642_s22 }
0x1039   :  { %5130 = vrot.lane.b32.xlu1 %v16390_v30, %s15639_s19 }
0x106b   :  { %v4286_v48 = vpop.f32.mrb[48].mxu0 }
0x106c   :  { %v14404_v51 = vpop.f32.mrb[49].mxu0 }
0x106f   :  { %v4438_v52 = vpop.f32.mrb[50].mxu0 }
0x1070   :  { %4824 = vrot.lane.b32.xlu0 %v4438_v52, %s15632_s24  ;;  %v14414_v53 = vpop.f32.mrb[51].mxu0 }
0x1073   :  { %v4590_v55 = vpop.f32.mrb[52].mxu0 }
0x1074   :  { %4832 = vrot.lane.b32.xlu0 %v4590_v55, %s15641_s21  ;;  %v14424_v56 = vpop.f32.mrb[53].mxu0 }
0x1077   :  { %v4742_v57 = vpop.f32.mrb[54].mxu0 }
0x1078   :  { %4840 = vrot.lane.b32.xlu0 %v4742_v57, %s15642_s22  ;;  %v14434_v58 = vpop.f32.mrb[55].mxu0 }
0x107c   :  { %5054 = vrot.lane.b32.xlu0 %v16392_v41, %s15639_s19 }
0x1093   :  { %v16417_v1 = vpop.permute.xlu1 %5044 }
0x1094   :  { %v16419_v2 = vpop.permute.xlu0 %5042  ;;  %5282 = vrot.lane.b32.xlu1 %v16417_v1, %s15639_s19 }
0x1095   :  { %5206 = vrot.lane.b32.xlu0 %v16419_v2, %s15639_s19 }
0x1097   :  { %v16425_v61 = vpop.permute.xlu1 %5048 }
0x1098   :  { %v16427_v5 = vpop.permute.xlu0 %5046  ;;  %5434 = vrot.lane.b32.xlu1 %v16425_v61, %s15639_s19 }
0x1099   :  { %5358 = vrot.lane.b32.xlu0 %v16427_v5, %s15639_s19 }
0x109b   :  { %v16433_v12 = vpop.permute.xlu1 %5052 }
0x109c   :  { %v16435_v10 = vpop.permute.xlu0 %5050  ;;  %5586 = vrot.lane.b32.xlu1 %v16433_v12, %s15639_s19 }
0x109d   :  { %5510 = vrot.lane.b32.xlu0 %v16435_v10, %s15639_s19 }
0x109f   :  { %v4827_v14 = vpop.permute.xlu1 %4826 }
0x10a0   :  { %v4847_v18 = vsel %vm364_vm2, %v16385_v39, %v4827_v14 }
0x10a3   :  { %v4835_v6 = vpop.permute.xlu1 %4834 }
0x10a4   :  { %v4849_v63 = vsel %vm1693_vm3, %v4847_v18, %v4835_v6 }
0x10a7   :  { %v4843_v8 = vpop.permute.xlu1 %4842 }
0x10a8   :  { %v4851_v23 = vsel %vm1696_vm4, %v4849_v63, %v4843_v8 }
0x10ab   :  { %v5131_v4 = vpop.permute.xlu1 %5130 }
0x10ac   :  { %14468 = vmatpush3.xpose.msk.msra.mxu1 %vm364_vm2, %v5131_v4 }
0x10ad   :  { %14477 = vmatprep.subr.mxu1 %v15634_v3 }
0x10af   :  { %14470 = vmatmul.mubr.msk.f32.vlgmr.msra.gmra.mrb[56].mxu1 %vm364_vm2, %v16390_v30 }
0x10b0   :  { %14479 = vmatprep.mubr.msk.f32.mxu1 %vm15635_vm1, %v15634_v3 }
0x10e2   :  { %v4825_v7 = vpop.permute.xlu0 %4824 }
0x10e3   :  { %v4846_v17 = vsel %vm364_vm2, %v4286_v48, %v4825_v7 }
0x10e6   :  { %v4833_v15 = vpop.permute.xlu0 %4832 }
0x10e7   :  { %v4848_v19 = vsel %vm1693_vm3, %v4846_v17, %v4833_v15 }
0x10ea   :  { %v4841_v21 = vpop.permute.xlu0 %4840 }
0x10eb   :  { %v4850_v22 = vsel %vm1696_vm4, %v4848_v19, %v4841_v21 }
0x10ec   :  { %14448 = vmatprep.mubr.msk.f32.mxu0 %vm71_vm0, %v4850_v22 }
0x10ed   :  { %14449 = vmatmul.mubr.msk.f32.vlgmr.msra.gmra.mrb[56].mxu0 %vm71_vm0, %v4851_v23 }
0x10ee   :  { %v5055_v24 = vpop.permute.xlu0 %5054  ;;  %14464 = vmatprep.mubr.msk.f32.mxu0 %vm15635_vm1, %v15634_v3 }
0x10ef   :  { %14463 = vmatpush3.xpose.msk.msra.mxu0 %vm364_vm2, %v5055_v24 }
0x10f0   :  { %14472 = vmatprep.subr.mxu0 %v15634_v3 }
0x10f2   :  { %14465 = vmatmul.mubr.msk.f32.vlgmr.msra.gmra.mrb[58].mxu0 %vm364_vm2, %v16392_v41 }
0x10f3   :  { %14474 = vmatprep.mubr.msk.f32.mxu0 %vm15635_vm1, %v15634_v3 }
0x1106   :  { %v5283_v25 = vpop.permute.xlu1 %5282 }
0x1107   :  { %v5207_v26 = vpop.permute.xlu0 %5206  ;;  %14478 = vmatpush3.xpose.msk.msra.mxu1 %vm364_vm2, %v5283_v25 }
0x1108   :  { %14473 = vmatpush3.xpose.msk.msra.mxu0 %vm364_vm2, %v5207_v26  ;;  %14487 = vmatprep.subr.mxu1 %v15634_v3 }
0x1109   :  { %14482 = vmatprep.subr.mxu0 %v15634_v3 }
0x110a   :  { %14480 = vmatmul.mubr.msk.f32.vlgmr.msra.gmra.mrb[58].mxu1 %vm364_vm2, %v16417_v1  ;;  %v5435_v0 = vpop.permute.xlu1 %5434 }
0x110b   :  { %v5359_v27 = vpop.permute.xlu0 %5358  ;;  %14475 = vmatmul.mubr.msk.f32.vlgmr.msra.gmra.mrb[60].mxu0 %vm364_vm2, %v16419_v2  ;;  %14488 = vmatpush3.xpose.msk.msra.mxu1 %vm364_vm2, %v5435_v0 }
0x110c   :  { %14483 = vmatpush3.xpose.msk.msra.mxu0 %vm364_vm2, %v5359_v27  ;;  %14489 = vmatprep.mubr.msk.f32.mxu1 %vm15635_vm1, %v15634_v3 }
0x110d   :  { %14484 = vmatprep.mubr.msk.f32.mxu0 %vm15635_vm1, %v15634_v3  ;;  %14497 = vmatprep.subr.mxu1 %v15634_v3 }
0x110e   :  { %14490 = vmatmul.mubr.msk.f32.vlgmr.msra.gmra.mrb[60].mxu1 %vm364_vm2, %v16425_v61  ;;  %v5587_v28 = vpop.permute.xlu1 %5586  ;;  %14492 = vmatprep.subr.mxu0 %v15634_v3 }
0x110f   :  { %v5511_v29 = vpop.permute.xlu0 %5510  ;;  %14485 = vmatmul.mubr.msk.f32.vlgmr.msra.gmra.mrb[62].mxu0 %vm364_vm2, %v16427_v5  ;;  %14498 = vmatpush3.xpose.msk.msra.mxu1 %vm364_vm2, %v5587_v28 }
0x1110   :  { %14493 = vmatpush3.xpose.msk.msra.mxu0 %vm364_vm2, %v5511_v29  ;;  %14499 = vmatprep.mubr.msk.f32.mxu1 %vm15635_vm1, %v15634_v3 }
0x1111   :  { %14494 = vmatprep.mubr.msk.f32.mxu0 %vm15635_vm1, %v15634_v3  ;;  %14502 = vmatprep.subr.mxu0 %v15634_v3 }
0x1112   :  { %14500 = vmatmul.mubr.msk.f32.vlgmr.msra.gmra.mrb[62].mxu1 %vm364_vm2, %v16433_v12  ;;  %14507 = vmatprep.subr.mxu1 %v15634_v3 }
0x1113   :  { %14495 = vmatmul.mubr.msk.f32.vlgmr.msra.gmra.mrb[64].mxu0 %vm364_vm2, %v16435_v10  ;;  %14509 = vmatprep.mubr.msk.f32.mxu1 %vm15635_vm1, %v15634_v3 }
0x1114   :  { %14504 = vmatprep.mubr.msk.f32.mxu0 %vm15635_vm1, %v15634_v3 }
0x1182   :  { %v5202_v60 = vpop.f32.mrb[56].mxu1 }
0x1183   :  { %v14471_v32 = vpop.f32.mrb[57].mxu1  ;;  %v5665_v33 = vsel %vm364_vm2, %v5202_v60, -inf }
0x1184   :  { %5666 = vmax.xlane.f32.xlu1 %v5665_v33 }
0x11c0   :  { %v16501_v34 = vpop.f32.mrb[56].mxu0 }
0x11c1   :  { %v16503_v35 = vpop.f32.mrb[57].mxu0 }
0x11c5   :  { %v5126_v49 = vpop.f32.mrb[58].mxu0 }
0x11c6   :  { %v14466_v38 = vpop.f32.mrb[59].mxu0  ;;  %v5662_v40 = vsel %vm364_vm2, %v5126_v49, -inf }
0x11c7   :  { %5663 = vmax.xlane.f32.xlu0 %v5662_v40 }
0x11dd   :  { %v5354_v50 = vpop.f32.mrb[58].mxu1 }
0x11de   :  { %v5278_v37 = vpop.f32.mrb[60].mxu0  ;;  %v14481_v39 = vpop.f32.mrb[59].mxu1  ;;  %v5671_v20 = vsel %vm364_vm2, %v5354_v50, -inf }
0x11df   :  { %v14476_v42 = vpop.f32.mrb[61].mxu0  ;;  %v5668_v59 = vsel %vm364_vm2, %v5278_v37, -inf }
0x11e0   :  { %5669 = vmax.xlane.f32.xlu0 %v5668_v59 }
0x11e1   :  { %v5506_v9 = vpop.f32.mrb[60].mxu1 }
0x11e2   :  { %v5430_v36 = vpop.f32.mrb[62].mxu0  ;;  %v14491_v43 = vpop.f32.mrb[61].mxu1  ;;  %v5677_v31 = vsel %vm364_vm2, %v5506_v9, -inf }
0x11e3   :  { %v14486_v45 = vpop.f32.mrb[63].mxu0  ;;  %v5674_v46 = vsel %vm364_vm2, %v5430_v36, -inf }
0x11e4   :  { %5675 = vmax.xlane.f32.xlu1 %v5674_v46  ;;  %5672 = vmax.xlane.f32.xlu0 %v5671_v20 }
0x11e5   :  { %v5658_v62 = vpop.f32.mrb[62].mxu1 }
0x11e6   :  { %v5582_v16 = vpop.f32.mrb[64].mxu0  ;;  %v14501_v44 = vpop.f32.mrb[63].mxu1  ;;  %v5683_v47 = vsel %vm364_vm2, %v5658_v62, -inf }
0x11e7   :  { %v14496_v11 = vpop.f32.mrb[65].mxu0  ;;  %v5680_v13 = vsel %vm364_vm2, %v5582_v16, -inf }
0x11e8   :  { %5681 = vmax.xlane.f32.xlu1 %v5680_v13  ;;  %5678 = vmax.xlane.f32.xlu0 %v5677_v31 }
0x11ec   :  { %5684 = vmax.xlane.f32.xlu0 %v5683_v47 }
0x11f9   :  { %5750 = vrot.lane.b32.xlu1 %v16392_v41, %s15640_s20 }
0x11fd   :  { %5902 = vrot.lane.b32.xlu1 %v16419_v2, %s15640_s20 }
0x1201   :  { %5978 = vrot.lane.b32.xlu1 %v16417_v1, %s15640_s20 }
0x1202   :  { %5826 = vrot.lane.b32.xlu0 %v16390_v30, %s15640_s20 }
0x1205   :  { %6130 = vrot.lane.b32.xlu1 %v16425_v61, %s15640_s20 }
0x1206   :  { %6054 = vrot.lane.b32.xlu0 %v16427_v5, %s15640_s20 }
0x1211   :  { %v5667_v54 = vpop.xlane.xlu1 %5666 }
0x1212   :  { %v5687_v48 = vsub.f32 %v5202_v60, %v5667_v54 }
0x1214   :  { %v5696_v51 = vmul.f32 1.442695, %v5687_v48 }
0x1216   :  { %15370 = vpow2.f32 %v5696_v51 }
0x1220   :  { %v16524_v41 = vpop.eup %15370 }
0x1221   :  { %v5713_v52 = vsel %vm364_vm2, %v16524_v41, 0.0 }
0x1225   :  { %5714 = vadd.xlane.f32.xlu0 %v5713_v52  ;;  %v6483_v52 = vld [vmem:[#allocation2 + $0x40] sm:$0xff] }
0x1254   :  { %v5664_v53 = vpop.xlane.xlu0 %5663 }
0x1255   :  { %v5686_v55 = vsub.f32 %v5126_v49, %v5664_v53  ;;  %v6484_v53 = vld [vmem:[#allocation2 + $0x48] sm:$0xff] }
0x1257   :  { %v5694_v56 = vmul.f32 1.442695, %v5686_v55 }
0x1259   :  { %15372 = vpow2.f32 %v5694_v56 }
0x1263   :  { %v16528_v30 = vpop.eup %15372 }
0x1264   :  { %v5710_v57 = vsel %vm364_vm2, %v16528_v30, 0.0 }
0x1265   :  { %5711 = vadd.xlane.f32.xlu1 %v5710_v57  ;;  %v16572_v57 = vpack.c.bf16 %v6484_v53, %v6483_v52 }
0x126d   :  { %v5670_v58 = vpop.xlane.xlu0 %5669 }
0x126e   :  { %v5688_v1 = vsub.f32 %v5278_v37, %v5670_v58 }
0x1270   :  { %v5698_v2 = vmul.f32 1.442695, %v5688_v1  ;;  %v6485_v1 = vld [vmem:[#allocation2 + $0x50] sm:$0xff] }
0x1271   :  { %v5673_v61 = vpop.xlane.xlu0 %5672  ;;  %v5676_v5 = vpop.xlane.xlu1 %5675 }
0x1272   :  { %15374 = vpow2.f32 %v5698_v2  ;;  %v5689_v14 = vsub.f32 %v5354_v50, %v5673_v61  ;;  %v5690_v6 = vsub.f32 %v5430_v36, %v5676_v5  ;;  %v6486_v2 = vld [vmem:[#allocation2 + $0x58] sm:$0xff]  ;;  %v13514_v61 = vld [vmem:[%s17590_s4 + $0x1] ss:$0 sm:$0xff] }
0x1274   :  { %v5700_v8 = vmul.f32 1.442695, %v5689_v14  ;;  %v5702_v4 = vmul.f32 1.442695, %v5690_v6 }
0x1275   :  { %v5679_v7 = vpop.xlane.xlu0 %5678  ;;  %v5682_v15 = vpop.xlane.xlu1 %5681 }
0x1276   :  { %15376 = vpow2.f32 %v5700_v8  ;;  %v5691_v17 = vsub.f32 %v5506_v9, %v5679_v7  ;;  %v5692_v18 = vsub.f32 %v5582_v16, %v5682_v15  ;;  %v16587_v8 = vpack.c.bf16 %v6486_v2, %v6485_v1 }
0x1277   :  { %15378 = vpow2.f32 %v5702_v4  ;;  %v4938_v4 = vadd.f32 %v13514_v61, %v16503_v35  ;;  %v4943_v7 = vadd.f32 %v16501_v34, %v13514_v61 }
0x1278   :  { %v5704_v19 = vmul.f32 1.442695, %v5691_v17  ;;  %v5706_v21 = vmul.f32 1.442695, %v5692_v18 }
0x1279   :  { %v5685_v63 = vpop.xlane.xlu0 %5684  ;;  %v5751_v22 = vpop.permute.xlu1 %5750 }
0x127a   :  { %15380 = vpow2.f32 %v5704_v19  ;;  %v5693_v23 = vsub.f32 %v5658_v62, %v5685_v63  ;;  %14503 = vmatpush3.msra.mxu0 %v5751_v22  ;;  %v6389_v19 = vld [vmem:[#allocation5 + $0xa0] sm:$0xff]  ;;  %v6391_v22 = vld [vmem:[#allocation5 + $0xb0] sm:$0xff] }
0x127b   :  { %15382 = vpow2.f32 %v5706_v21  ;;  %14512 = vmatprep.subr.mxu0 %v15634_v3  ;;  %v6390_v21 = vld [vmem:[#allocation5 + $0xa8] sm:$0xff] }
0x127c   :  { %v15375_v24 = vpop.eup %15374  ;;  %v5708_v25 = vmul.f32 1.442695, %v5693_v23  ;;  %v15115_v63 = vpack.c.bf16 %v6390_v21, %v6389_v19  ;;  %v6392_v23 = vld [vmem:[#allocation5 + $0xb8] sm:$0xff] }
0x127d   :  { %v5827_v26 = vpop.permute.xlu0 %5826  ;;  %v5716_v0 = vsel %vm364_vm2, %v15375_v24, 0.0  ;;  %v5903_v42 = vpop.permute.xlu1 %5902 }
0x127e   :  { %15384 = vpow2.f32 %v5708_v25  ;;  %5717 = vadd.xlane.f32.xlu1 %v5716_v0  ;;  %14508 = vmatpush3.msra.mxu1 %v5827_v26 }
0x127f   :  { %14517 = vmatprep.subr.mxu1 %v15634_v3 }
0x1280   :  { %v15377_v27 = vpop.eup %15376 }
0x1281   :  { %v15379_v28 = vpop.eup %15378  ;;  %v5719_v29 = vsel %vm364_vm2, %v15377_v27, 0.0  ;;  %v6055_v37 = vpop.permute.xlu0 %6054 }
0x1282   :  { %5720 = vadd.xlane.f32.xlu0 %v5719_v29  ;;  %v5722_v60 = vsel %vm364_vm2, %v15379_v28, 0.0  ;;  %v5979_v36 = vpop.permute.xlu1 %5978 }
0x1283   :  { %5723 = vadd.xlane.f32.xlu1 %v5722_v60 }
0x1284   :  { %v16537_v32 = vpop.eup %15380 }
0x1285   :  { %v16539_v33 = vpop.eup %15382  ;;  %v5725_v49 = vsel %vm364_vm2, %v16537_v32, 0.0 }
0x1286   :  { %5726 = vadd.xlane.f32.xlu0 %v5725_v49  ;;  %v5728_v38 = vsel %vm364_vm2, %v16539_v33, 0.0 }
0x1287   :  { %5729 = vadd.xlane.f32.xlu1 %v5728_v38 }
0x1288   :  { %v16545_v40 = vpop.eup %15384 }
0x1289   :  { %v5731_v50 = vsel %vm364_vm2, %v16545_v40, 0.0 }
0x128a   :  { %5732 = vadd.xlane.f32.xlu0 %v5731_v50 }
0x1298   :  { %6282 = vrot.lane.b32.xlu1 %v16433_v12, %s15640_s20  ;;  %v6131_v12 = vpop.permute.xlu1 %6130 }
0x12a0   :  { %6206 = vrot.lane.b32.xlu0 %v16435_v10, %s15640_s20 }
0x12b2   :  { %v5715_v39 = vpop.xlane.xlu0 %5714 }
0x12b3   :  { %15386 = vrcp.f32 %v5715_v39 }
0x12bd   :  { %v15387_v59 = vpop.eup %15386 }
0x12be   :  { %v5743_v9 = vmul.f32 %v15387_v59, %v16524_v41 }
0x12c0   :  { %14510 = vmatmul.mubr.msk.f32.vlgmr.msra.gmra.mrb[64].mxu1 %vm364_vm2, %v5743_v9 }
0x12c1   :  { %14518 = vmatpush3.msra.mxu1 %v5979_v36  ;;  %14519 = vmatprep.mubr.msk.f32.mxu1 %vm15635_vm1, %v15634_v3 }
0x12c2   :  { %14527 = vmatprep.subr.mxu1 %v15634_v3 }
0x12f2   :  { %v5712_v43 = vpop.xlane.xlu1 %5711 }
0x12f3   :  { %15388 = vrcp.f32 %v5712_v43 }
0x12fd   :  { %v15389_v10 = vpop.eup %15388 }
0x12fe   :  { %v5742_v45 = vmul.f32 %v15389_v10, %v16528_v30 }
0x1300   :  { %14505 = vmatmul.mubr.msk.f32.vlgmr.msra.gmra.mrb[66].mxu0 %vm364_vm2, %v5742_v45 }
0x1301   :  { %14513 = vmatpush3.msra.mxu0 %v5903_v42  ;;  %14514 = vmatprep.mubr.msk.f32.mxu0 %vm15635_vm1, %v15634_v3 }
0x1302   :  { %14522 = vmatprep.subr.mxu0 %v15634_v3 }
0x130b   :  { %v5718_v46 = vpop.xlane.xlu1 %5717 }
0x130c   :  { %15390 = vrcp.f32 %v5718_v46 }
0x130f   :  { %v5721_v20 = vpop.xlane.xlu0 %5720 }
0x1310   :  { %15392 = vrcp.f32 %v5721_v20  ;;  %v5724_v62 = vpop.xlane.xlu1 %5723 }
0x1311   :  { %15394 = vrcp.f32 %v5724_v62 }
0x1313   :  { %v5727_v16 = vpop.xlane.xlu0 %5726 }
0x1314   :  { %15396 = vrcp.f32 %v5727_v16  ;;  %v5730_v44 = vpop.xlane.xlu1 %5729 }
0x1315   :  { %15398 = vrcp.f32 %v5730_v44 }
0x1316   :  { %v15391_v11 = vpop.eup %15390 }
0x1317   :  { %v5733_v13 = vpop.xlane.xlu0 %5732  ;;  %v5744_v31 = vmul.f32 %v15391_v11, %v15375_v24  ;;  %v15119_v24 = vpack.c.bf16 %v6392_v23, %v6391_v22 }
0x1318   :  { %15400 = vrcp.f32 %v5733_v13  ;;  %v6283_v5 = vpop.permute.xlu1 %6282 }
0x1319   :  { %14515 = vmatmul.mubr.msk.f32.vlgmr.msra.gmra.mrb[68].mxu0 %vm364_vm2, %v5744_v31 }
0x131a   :  { %v15393_v47 = vpop.eup %15392  ;;  %14523 = vmatpush3.msra.mxu0 %v6055_v37  ;;  %14524 = vmatprep.mubr.msk.f32.mxu0 %vm15635_vm1, %v15634_v3 }
0x131b   :  { %v15395_v54 = vpop.eup %15394  ;;  %14532 = vmatprep.subr.mxu0 %v15634_v3  ;;  %v5745_v48 = vmul.f32 %v15393_v47, %v15377_v27  ;;  %v6207_v51 = vpop.permute.xlu0 %6206 }
0x131c   :  { %v5746_v41 = vmul.f32 %v15395_v54, %v15379_v28 }
0x131d   :  { %14520 = vmatmul.mubr.msk.f32.vlgmr.msra.gmra.mrb[66].mxu1 %vm364_vm2, %v5745_v48 }
0x131e   :  { %v15397_v55 = vpop.eup %15396  ;;  %14525 = vmatmul.mubr.msk.f32.vlgmr.msra.gmra.mrb[70].mxu0 %vm364_vm2, %v5746_v41  ;;  %14528 = vmatpush3.msra.mxu1 %v6131_v12 }
0x131f   :  { %v15399_v56 = vpop.eup %15398  ;;  %14533 = vmatpush3.msra.mxu0 %v6207_v51  ;;  %14529 = vmatprep.mubr.msk.f32.mxu1 %vm15635_vm1, %v15634_v3  ;;  %v5747_v30 = vmul.f32 %v15397_v55, %v16537_v32 }
0x1320   :  { %14534 = vmatprep.mubr.msk.f32.mxu0 %vm15635_vm1, %v15634_v3  ;;  %14537 = vmatprep.subr.mxu1 %v15634_v3  ;;  %v5748_v58 = vmul.f32 %v15399_v56, %v16539_v33  ;;  %v13546_v56 = vld [vmem:[%s17590_s4 + $0x5] ss:$0 sm:$0xff] }
0x1321   :  { %14530 = vmatmul.mubr.msk.f32.vlgmr.msra.gmra.mrb[68].mxu1 %vm364_vm2, %v5747_v30  ;;  %15116 = vmatprep.subr.bf16.mxu0 %v15115_v63 }
0x1322   :  { %v15401_v14 = vpop.eup %15400  ;;  %14535 = vmatmul.mubr.msk.f32.vlgmr.msra.gmra.mrb[72].mxu0 %vm364_vm2, %v5748_v58  ;;  %14538 = vmatpush3.msra.mxu1 %v6283_v5 }
0x1323   :  { %14539 = vmatprep.mubr.msk.f32.mxu1 %vm15635_vm1, %v15634_v3  ;;  %15124 = vmatprep.subr.bf16.mxu1 %v16572_v57  ;;  %v5749_v6 = vmul.f32 %v15401_v14, %v16545_v40  ;;  %v16610_v40 = vld [vmem:[%s17588_s2 + $0x2] ss:$0 sm:$0xff] }
0x1324   :  { %15118 = vmatpush3.bf16.msra.mxu0 %v15115_v63 }
0x1325   :  { %14540 = vmatmul.mubr.msk.f32.vlgmr.msra.gmra.mrb[70].mxu1 %vm364_vm2, %v5749_v6  ;;  %15120 = vmatprep.subr.bf16.mxu0 %v15119_v24 }
0x1326   :  { %15126 = vmatpush3.bf16.msra.mxu1 %v16572_v57  ;;  %14561 = vmatprep.mubr.msk.f32.mxu1 %vm71_vm0, %v4938_v4 }
0x1327   :  { %15128 = vmatprep.subr.bf16.mxu1 %v16587_v8 }
0x1328   :  { %15122 = vmatpush3.bf16.msra.mxu0 %v15119_v24 }
0x1329   :  { %15132 = vmatprep.subr.bf16.mxu0 %v16572_v57 }
0x132a   :  { %15130 = vmatpush3.bf16.msra.mxu1 %v16587_v8 }
0x132b   :  { %14575 = vmatprep.subr.mxu1 %v15634_v3 }
0x132d   :  { %14562 = vmatmul.mubr.msk.f32.vlgmr.msra.gmra.mrb[72].mxu1 %vm71_vm0, %v4943_v7 }
0x132e   :  { %14577 = vmatprep.mubr.msk.f32.mxu1 %vm15635_vm1, %v15634_v3 }
0x1393   :  { %v5898_v35 = vpop.f32.mrb[64].mxu1 }
0x1394   :  { %v14511_v15 = vpop.f32.mrb[65].mxu1 }
0x13d3   :  { %v5822_v17 = vpop.f32.mrb[66].mxu0 }
0x13d4   :  { %v14506_v18 = vpop.f32.mrb[67].mxu0 }
0x13ec   :  { %v5974_v34 = vpop.f32.mrb[68].mxu0 }
0x13ed   :  { %6360 = vrot.lane.b32.xlu0 %v5974_v34, %s15632_s24  ;;  %v14516_v25 = vpop.f32.mrb[69].mxu0 }
0x13f0   :  { %v6050_v26 = vpop.f32.mrb[66].mxu1 }
0x13f1   :  { %v6126_v0 = vpop.f32.mrb[70].mxu0  ;;  %6362 = vrot.lane.b32.xlu1 %v6050_v26, %s15632_s24  ;;  %v14521_v27 = vpop.f32.mrb[67].mxu1 }
0x13f2   :  { %6368 = vrot.lane.b32.xlu0 %v6126_v0, %s15641_s21  ;;  %v14526_v28 = vpop.f32.mrb[71].mxu0 }
0x13f4   :  { %v6202_v29 = vpop.f32.mrb[68].mxu1 }
0x13f5   :  { %v6278_v60 = vpop.f32.mrb[72].mxu0  ;;  %6370 = vrot.lane.b32.xlu1 %v6202_v29, %s15641_s21  ;;  %v14531_v32 = vpop.f32.mrb[69].mxu1 }
0x13f6   :  { %6376 = vrot.lane.b32.xlu0 %v6278_v60, %s15642_s22  ;;  %v14536_v33 = vpop.f32.mrb[73].mxu0 }
0x13f8   :  { %v6354_v49 = vpop.f32.mrb[70].mxu1 }
0x13f9   :  { %6378 = vrot.lane.b32.xlu1 %v6354_v49, %s15642_s22  ;;  %v14541_v38 = vpop.f32.mrb[71].mxu1 }
0x1400   :  { %v14563_v50 = vpop.f32.mrb[72].mxu1 }
0x1401   :  { %v6573_v37 = vadd.f32 %v14563_v50, %v16610_v40  ;;  %v6567_v39 = vpop.f32.mrb[73].mxu1 }
0x1402   :  { %v6568_v42 = vadd.f32 %v16610_v40, %v6567_v39 }
0x1403   :  { %6661 = vrot.lane.b32.xlu1 %v6573_v37, %s15636_s1 }
0x1404   :  { %6659 = vrot.lane.b32.xlu0 %v6568_v42, %s15636_s1 }
0x1407   :  { %6665 = vrot.lane.b32.xlu1 %v6573_v37, %s15637_s14 }
0x1408   :  { %6663 = vrot.lane.b32.xlu0 %v6568_v42, %s15637_s14 }
0x140b   :  { %6669 = vrot.lane.b32.xlu1 %v6573_v37, %s15638_s18 }
0x140c   :  { %6667 = vrot.lane.b32.xlu0 %v6568_v42, %s15638_s18 }
0x140f   :  { %6761 = vrot.lane.b32.xlu1 %v6573_v37, %s15639_s19 }
0x1410   :  { %6685 = vrot.lane.b32.xlu0 %v6568_v42, %s15639_s19 }
0x145f   :  { %v6361_v59 = vpop.permute.xlu0 %6360 }
0x1460   :  { %v6382_v12 = vsel %vm364_vm2, %v5822_v17, %v6361_v59 }
0x1463   :  { %v6363_v9 = vpop.permute.xlu1 %6362 }
0x1464   :  { %v6369_v36 = vpop.permute.xlu0 %6368  ;;  %v6383_v20 = vsel %vm364_vm2, %v5898_v35, %v6363_v9 }
0x1465   :  { %v6384_v10 = vsel %vm1693_vm3, %v6382_v12, %v6369_v36 }
0x1467   :  { %v6371_v43 = vpop.permute.xlu1 %6370 }
0x1468   :  { %v6377_v45 = vpop.permute.xlu0 %6376  ;;  %v6385_v62 = vsel %vm1693_vm3, %v6383_v20, %v6371_v43 }
0x1469   :  { %v6386_v46 = vsel %vm1696_vm4, %v6384_v10, %v6377_v45 }
0x146a   :  { %14550 = vmatprep.mubr.msk.f32.mxu0 %vm71_vm0, %v6386_v46 }
0x146b   :  { %v6379_v16 = vpop.permute.xlu1 %6378 }
0x146c   :  { %v6387_v44 = vsel %vm1696_vm4, %v6385_v62, %v6379_v16 }
0x146d   :  { %14551 = vmatmul.mubr.msk.f32.vlgmr.msra.gmra.mrb[74].mxu0 %vm71_vm0, %v6387_v44 }
0x146e   :  { %15134 = vmatpush3.bf16.msra.mxu0 %v16572_v57 }
0x146f   :  { %15136 = vmatprep.subr.bf16.mxu0 %v16587_v8 }
0x1472   :  { %15138 = vmatpush3.bf16.msra.mxu0 %v16587_v8 }
0x1473   :  { %14585 = vmatprep.subr.mxu0 %v15634_v3 }
0x1475   :  { %v6662_v11 = vpop.permute.xlu1 %6661 }
0x1476   :  { %v6660_v13 = vpop.permute.xlu0 %6659  ;;  %6913 = vrot.lane.b32.xlu1 %v6662_v11, %s15639_s19 }
0x1477   :  { %6837 = vrot.lane.b32.xlu0 %v6660_v13, %s15639_s19 }
0x1479   :  { %v6666_v31 = vpop.permute.xlu1 %6665 }
0x147a   :  { %v6664_v47 = vpop.permute.xlu0 %6663  ;;  %7065 = vrot.lane.b32.xlu1 %v6666_v31, %s15639_s19 }
0x147b   :  { %6989 = vrot.lane.b32.xlu0 %v6664_v47, %s15639_s19 }
0x147d   :  { %v6670_v54 = vpop.permute.xlu1 %6669 }
0x147e   :  { %v6668_v48 = vpop.permute.xlu0 %6667  ;;  %7217 = vrot.lane.b32.xlu1 %v6670_v54, %s15639_s19 }
0x147f   :  { %7141 = vrot.lane.b32.xlu0 %v6668_v48, %s15639_s19 }
0x1481   :  { %v6762_v41 = vpop.permute.xlu1 %6761 }
0x1482   :  { %v6686_v51 = vpop.permute.xlu0 %6685 }
0x1483   :  { %14576 = vmatpush3.xpose.msk.msra.mxu1 %vm364_vm2, %v6686_v51 }
0x1484   :  { %14580 = vmatprep.subr.mxu1 %v15634_v3 }
0x1486   :  { %14578 = vmatmul.mubr.msk.f32.vlgmr.msra.gmra.mrb[74].mxu1 %vm364_vm2, %v6568_v42 }
0x1487   :  { %14581 = vmatpush3.xpose.msk.msra.mxu1 %vm364_vm2, %v6762_v41  ;;  %14582 = vmatprep.mubr.msk.f32.mxu1 %vm15635_vm1, %v15634_v3 }
0x1488   :  { %14590 = vmatprep.subr.mxu1 %v15634_v3 }
0x148a   :  { %14583 = vmatmul.mubr.msk.f32.vlgmr.msra.gmra.mrb[76].mxu1 %vm364_vm2, %v6573_v37 }
0x148b   :  { %14592 = vmatprep.mubr.msk.f32.mxu1 %vm15635_vm1, %v15634_v3 }
0x14e8   :  { %v6914_v52 = vpop.permute.xlu1 %6913 }
0x14e9   :  { %14591 = vmatpush3.xpose.msk.msra.mxu1 %vm364_vm2, %v6914_v52  ;;  %v6838_v57 = vpop.permute.xlu0 %6837 }
0x14ea   :  { %14600 = vmatprep.subr.mxu1 %v15634_v3 }
0x14ec   :  { %14593 = vmatmul.mubr.msk.f32.vlgmr.msra.gmra.mrb[78].mxu1 %vm364_vm2, %v6662_v11  ;;  %v7066_v53 = vpop.permute.xlu1 %7065 }
0x14ed   :  { %14601 = vmatpush3.xpose.msk.msra.mxu1 %vm364_vm2, %v7066_v53  ;;  %14602 = vmatprep.mubr.msk.f32.mxu1 %vm15635_vm1, %v15634_v3  ;;  %v6990_v61 = vpop.permute.xlu0 %6989 }
0x14ee   :  { %14610 = vmatprep.subr.mxu1 %v15634_v3 }
0x14f0   :  { %14603 = vmatmul.mubr.msk.f32.vlgmr.msra.gmra.mrb[80].mxu1 %vm364_vm2, %v6666_v31  ;;  %v7218_v55 = vpop.permute.xlu1 %7217 }
0x14f1   :  { %14611 = vmatpush3.xpose.msk.msra.mxu1 %vm364_vm2, %v7218_v55  ;;  %14612 = vmatprep.mubr.msk.f32.mxu1 %vm15635_vm1, %v15634_v3  ;;  %v7142_v5 = vpop.permute.xlu0 %7141 }
0x14f2   :  { %14620 = vmatprep.subr.mxu1 %v15634_v3 }
0x14f4   :  { %14613 = vmatmul.mubr.msk.f32.vlgmr.msra.gmra.mrb[82].mxu1 %vm364_vm2, %v6670_v54 }
0x14f5   :  { %14622 = vmatprep.mubr.msk.f32.mxu1 %vm15635_vm1, %v15634_v3 }
0x1540   :  { %v14552_v30 = vpop.f32.mrb[74].mxu0 }
0x1541   :  { %v6473_v58 = vpop.f32.mrb[75].mxu0  ;;  %v16670_v2 = vadd.f32 %v14552_v30, %v13546_v56 }
0x1542   :  { %v16668_v1 = vadd.f32 %v13546_v56, %v6473_v58 }
0x1544   :  { %14572 = vmatprep.mubr.msk.f32.mxu0 %vm71_vm0, %v16668_v1 }
0x1545   :  { %14573 = vmatmul.mubr.msk.f32.vlgmr.msra.gmra.mrb[76].mxu0 %vm71_vm0, %v16670_v2 }
0x1546   :  { %14586 = vmatpush3.xpose.msk.msra.mxu0 %vm364_vm2, %v6838_v57  ;;  %14587 = vmatprep.mubr.msk.f32.mxu0 %vm15635_vm1, %v15634_v3 }
0x1547   :  { %14595 = vmatprep.subr.mxu0 %v15634_v3 }
0x1549   :  { %14588 = vmatmul.mubr.msk.f32.vlgmr.msra.gmra.mrb[78].mxu0 %vm364_vm2, %v6660_v13 }
0x154a   :  { %14596 = vmatpush3.xpose.msk.msra.mxu0 %vm364_vm2, %v6990_v61  ;;  %14597 = vmatprep.mubr.msk.f32.mxu0 %vm15635_vm1, %v15634_v3 }
0x154b   :  { %14605 = vmatprep.subr.mxu0 %v15634_v3 }
0x154d   :  { %14598 = vmatmul.mubr.msk.f32.vlgmr.msra.gmra.mrb[80].mxu0 %vm364_vm2, %v6664_v47 }
0x154e   :  { %14606 = vmatpush3.xpose.msk.msra.mxu0 %vm364_vm2, %v7142_v5  ;;  %14607 = vmatprep.mubr.msk.f32.mxu0 %vm15635_vm1, %v15634_v3 }
0x154f   :  { %14615 = vmatprep.subr.mxu0 %v15634_v3 }
0x1551   :  { %14608 = vmatmul.mubr.msk.f32.vlgmr.msra.gmra.mrb[82].mxu0 %vm364_vm2, %v6668_v48 }
0x1552   :  { %14617 = vmatprep.mubr.msk.f32.mxu0 %vm15635_vm1, %v15634_v3 }
0x1559   :  { %v6757_v14 = vpop.f32.mrb[74].mxu1 }
0x155a   :  { %v14579_v6 = vpop.f32.mrb[75].mxu1  ;;  %v7293_v8 = vsel %vm364_vm2, %v6757_v14, -inf }
0x155b   :  { %7294 = vmax.xlane.f32.xlu0 %v7293_v8 }
0x155d   :  { %v6833_v4 = vpop.f32.mrb[76].mxu1 }
0x155e   :  { %v14584_v7 = vpop.f32.mrb[77].mxu1  ;;  %v7296_v35 = vsel %vm364_vm2, %v6833_v4, -inf }
0x155f   :  { %7297 = vmax.xlane.f32.xlu1 %v7296_v35 }
0x15bf   :  { %v6985_v15 = vpop.f32.mrb[78].mxu1 }
0x15c0   :  { %v14594_v17 = vpop.f32.mrb[79].mxu1  ;;  %v7302_v18 = vsel %vm364_vm2, %v6985_v15, -inf }
0x15c1   :  { %7303 = vmax.xlane.f32.xlu0 %v7302_v18 }
0x15c3   :  { %v7137_v19 = vpop.f32.mrb[80].mxu1 }
0x15c4   :  { %v14604_v21 = vpop.f32.mrb[81].mxu1  ;;  %v7308_v63 = vsel %vm364_vm2, %v7137_v19, -inf }
0x15c5   :  { %7309 = vmax.xlane.f32.xlu0 %v7308_v63 }
0x15c7   :  { %v7289_v22 = vpop.f32.mrb[82].mxu1 }
0x15c8   :  { %v14614_v23 = vpop.f32.mrb[83].mxu1  ;;  %v7314_v24 = vsel %vm364_vm2, %v7289_v22, -inf }
0x15c9   :  { %7315 = vmax.xlane.f32.xlu0 %v7314_v24 }
0x15e8   :  { %v7295_v50 = vpop.xlane.xlu0 %7294 }
0x15e9   :  { %v7317_v37 = vsub.f32 %v6757_v14, %v7295_v50 }
0x15eb   :  { %v7325_v39 = vmul.f32 1.442695, %v7317_v37 }
0x15ec   :  { %v7298_v42 = vpop.xlane.xlu1 %7297 }
0x15ed   :  { %15402 = vpow2.f32 %v7325_v39  ;;  %v7318_v59 = vsub.f32 %v6833_v4, %v7298_v42 }
0x15ef   :  { %v7327_v36 = vmul.f32 1.442695, %v7318_v59 }
0x15f1   :  { %15404 = vpow2.f32 %v7327_v36 }
0x15f7   :  { %v16715_v9 = vpop.eup %15402 }
0x15f8   :  { %v7341_v12 = vsel %vm364_vm2, %v16715_v9, 0.0 }
0x15fb   :  { %v16719_v43 = vpop.eup %15404 }
0x15fc   :  { %v7344_v10 = vsel %vm364_vm2, %v16719_v43, 0.0 }
0x1618   :  { %v14574_v34 = vpop.f32.mrb[76].mxu0 }
0x1619   :  { %v6654_v25 = vadd.f32 %v14574_v34, %v16610_v40  ;;  %v6648_v26 = vpop.f32.mrb[77].mxu0 }
0x161a   :  { %v6649_v27 = vadd.f32 %v16610_v40, %v6648_v26 }
0x161b   :  { %6679 = vrot.lane.b32.xlu1 %v6654_v25, %s15637_s14  ;;  %6675 = vrot.lane.b32.xlu0 %v6654_v25, %s15636_s1 }
0x161c   :  { %v6909_v0 = vpop.f32.mrb[78].mxu0 }
0x161d   :  { %v14589_v28 = vpop.f32.mrb[79].mxu0  ;;  %v7299_v49 = vsel %vm364_vm2, %v6909_v0, -inf }
0x161f   :  { %6673 = vrot.lane.b32.xlu1 %v6649_v27, %s15636_s1 }
0x1620   :  { %v16703_v29 = vpop.f32.mrb[80].mxu0 }
0x1621   :  { %v14599_v60 = vpop.f32.mrb[81].mxu0  ;;  %v7305_v38 = vsel %vm364_vm2, %v16703_v29, -inf }
0x1623   :  { %6677 = vrot.lane.b32.xlu1 %v6649_v27, %s15637_s14 }
0x1624   :  { %v16706_v32 = vpop.f32.mrb[82].mxu0 }
0x1625   :  { %v14609_v33 = vpop.f32.mrb[83].mxu0  ;;  %v7311_v40 = vsel %vm364_vm2, %v16706_v32, -inf }
0x163a   :  { %7300 = vmax.xlane.f32.xlu0 %v7299_v49 }
0x1647   :  { %7306 = vmax.xlane.f32.xlu1 %v7305_v38 }
0x164b   :  { %7312 = vmax.xlane.f32.xlu1 %v7311_v40 }
0x164e   :  { %v7304_v45 = vpop.xlane.xlu0 %7303 }
0x164f   :  { %v7320_v20 = vsub.f32 %v6985_v15, %v7304_v45 }
0x1650   :  { %6681 = vrot.lane.b32.xlu0 %v6649_v27, %s15638_s18 }
0x1651   :  { %v7331_v16 = vmul.f32 1.442695, %v7320_v20  ;;  %v8116_v20 = vld [vmem:[#allocation2 + $0xd0] sm:$0xff] }
0x1652   :  { %v7310_v46 = vpop.xlane.xlu0 %7309 }
0x1653   :  { %v7322_v44 = vsub.f32 %v7137_v19, %v7310_v46  ;;  %15406 = vpow2.f32 %v7331_v16 }
0x1655   :  { %v7335_v31 = vmul.f32 1.442695, %v7322_v44 }
0x1656   :  { %v7316_v62 = vpop.xlane.xlu0 %7315 }
0x1657   :  { %v7324_v47 = vsub.f32 %v7289_v22, %v7316_v62  ;;  %15408 = vpow2.f32 %v7335_v31  ;;  %v8117_v62 = vld [vmem:[#allocation2 + $0xd8] sm:$0xff] }
0x1659   :  { %v7339_v48 = vmul.f32 1.442695, %v7324_v47 }
0x165b   :  { %15410 = vpow2.f32 %v7339_v48 }
0x165c   :  { %6683 = vrot.lane.b32.xlu1 %v6654_v25, %s15638_s18 }
0x165d   :  { %v16728_v51 = vpop.eup %15406 }
0x165e   :  { %v7350_v41 = vsel %vm364_vm2, %v16728_v51, 0.0 }
0x1661   :  { %v16732_v52 = vpop.eup %15408 }
0x1662   :  { %v7356_v53 = vsel %vm364_vm2, %v16732_v52, 0.0 }
0x1665   :  { %v16736_v55 = vpop.eup %15410 }
0x1666   :  { %v7362_v56 = vsel %vm364_vm2, %v16736_v55, 0.0 }
0x166f   :  { %7342 = vadd.xlane.f32.xlu0 %v7341_v12 }
0x1680   :  { %7345 = vadd.xlane.f32.xlu1 %v7344_v10  ;;  %v8115_v10 = vld [vmem:[#allocation2 + $0xc8] sm:$0xff] }
0x1685   :  { %7457 = vrot.lane.b32.xlu0 %v6654_v25, %s15640_s20 }
0x168d   :  { %v6680_v11 = vpop.permute.xlu1 %6679  ;;  %v6676_v13 = vpop.permute.xlu0 %6675 }
0x1691   :  { %7381 = vrot.lane.b32.xlu1 %v6649_v27, %s15640_s20  ;;  %v6674_v54 = vpop.permute.xlu1 %6673 }
0x1695   :  { %7609 = vrot.lane.b32.xlu1 %v6676_v13, %s15640_s20  ;;  %v6678_v61 = vpop.permute.xlu1 %6677  ;;  %v16786_v13 = vpack.c.bf16 %v8117_v62, %v8116_v20 }
0x1699   :  { %7533 = vrot.lane.b32.xlu1 %v6674_v54, %s15640_s20 }
0x169d   :  { %7761 = vrot.lane.b32.xlu1 %v6680_v11, %s15640_s20 }
0x16a4   :  { %7351 = vadd.xlane.f32.xlu0 %v7350_v41 }
0x16a8   :  { %7357 = vadd.xlane.f32.xlu0 %v7356_v53 }
0x16ac   :  { %7363 = vadd.xlane.f32.xlu0 %v7362_v56 }
0x16c7   :  { %v7301_v30 = vpop.xlane.xlu0 %7300 }
0x16c8   :  { %v7319_v57 = vsub.f32 %v6909_v0, %v7301_v30 }
0x16ca   :  { %v7329_v58 = vmul.f32 1.442695, %v7319_v57 }
0x16cb   :  { %v6682_v63 = vpop.permute.xlu0 %6681 }
0x16cc   :  { %15412 = vpow2.f32 %v7329_v58  ;;  %v8020_v58 = vld [vmem:[#allocation5 + $0x40] sm:$0xff] }
0x16d4   :  { %v7307_v5 = vpop.xlane.xlu1 %7306 }
0x16d5   :  { %v7321_v14 = vsub.f32 %v16703_v29, %v7307_v5 }
0x16d6   :  { %v16741_v6 = vpop.eup %15412 }
0x16d7   :  { %v7333_v8 = vmul.f32 1.442695, %v7321_v14  ;;  %v7347_v4 = vsel %vm364_vm2, %v16741_v6, 0.0 }
0x16d8   :  { %7348 = vadd.xlane.f32.xlu0 %v7347_v4  ;;  %v7313_v7 = vpop.xlane.xlu1 %7312 }
0x16d9   :  { %15414 = vpow2.f32 %v7333_v8  ;;  %v7323_v35 = vsub.f32 %v16706_v32, %v7313_v7  ;;  %v8023_v8 = vld [vmem:[#allocation5 + $0x58] sm:$0xff] }
0x16db   :  { %v7337_v15 = vmul.f32 1.442695, %v7323_v35 }
0x16dc   :  { %v6684_v22 = vpop.permute.xlu1 %6683 }
0x16dd   :  { %15416 = vpow2.f32 %v7337_v15 }
0x16e3   :  { %v16746_v17 = vpop.eup %15414 }
0x16e4   :  { %v7353_v18 = vsel %vm364_vm2, %v16746_v17, 0.0 }
0x16e5   :  { %7354 = vadd.xlane.f32.xlu1 %v7353_v18  ;;  %v16815_v18 = vld [vmem:[%s17588_s2 + $0x6] ss:$0 sm:$0xff] }
0x16e7   :  { %v16750_v19 = vpop.eup %15416 }
0x16e8   :  { %v7359_v21 = vsel %vm364_vm2, %v16750_v19, 0.0 }
0x16e9   :  { %7360 = vadd.xlane.f32.xlu1 %v7359_v21 }
0x16ee   :  { %7685 = vrot.lane.b32.xlu0 %v6678_v61, %s15640_s20  ;;  %v8021_v61 = vld [vmem:[#allocation5 + $0x48] sm:$0xff] }
0x16ef   :  { %v15139_v5 = vpack.c.bf16 %v8021_v61, %v8020_v58 }
0x16f2   :  { %7837 = vrot.lane.b32.xlu0 %v6682_v63, %s15640_s20 }
0x16fa   :  { %7913 = vrot.lane.b32.xlu1 %v6684_v22, %s15640_s20 }
0x16fc   :  { %v7343_v23 = vpop.xlane.xlu0 %7342 }
0x16fd   :  { %15418 = vrcp.f32 %v7343_v23 }
0x1700   :  { %v7458_v24 = vpop.permute.xlu0 %7457 }
0x1701   :  { %14621 = vmatpush3.msra.mxu1 %v7458_v24 }
0x1702   :  { %14630 = vmatprep.subr.mxu1 %v15634_v3 }
0x1707   :  { %v15419_v25 = vpop.eup %15418 }
0x1708   :  { %v7373_v0 = vmul.f32 %v15419_v25, %v16715_v9 }
0x170d   :  { %v7346_v34 = vpop.xlane.xlu1 %7345 }
0x170e   :  { %15420 = vrcp.f32 %v7346_v34 }
0x1711   :  { %v7382_v26 = vpop.permute.xlu1 %7381 }
0x1712   :  { %14616 = vmatpush3.msra.mxu0 %v7382_v26 }
0x1713   :  { %14618 = vmatmul.mubr.msk.f32.vlgmr.msra.gmra.mrb[84].mxu0 %vm364_vm2, %v7373_v0  ;;  %14625 = vmatprep.subr.mxu0 %v15634_v3 }
0x1714   :  { %14627 = vmatprep.mubr.msk.f32.mxu0 %vm15635_vm1, %v15634_v3 }
0x1715   :  { %v7610_v27 = vpop.permute.xlu1 %7609 }
0x1718   :  { %v15421_v28 = vpop.eup %15420 }
0x1719   :  { %v7534_v29 = vpop.permute.xlu1 %7533  ;;  %v7374_v60 = vmul.f32 %v15421_v28, %v16719_v43  ;;  %v8114_v43 = vld [vmem:[#allocation2 + $0xc0] sm:$0xff] }
0x171a   :  { %14626 = vmatpush3.msra.mxu0 %v7534_v29  ;;  %v16783_v16 = vpack.c.bf16 %v8115_v10, %v8114_v43 }
0x171b   :  { %14623 = vmatmul.mubr.msk.f32.vlgmr.msra.gmra.mrb[84].mxu1 %vm364_vm2, %v7374_v60  ;;  %14635 = vmatprep.subr.mxu0 %v15634_v3 }
0x171c   :  { %14631 = vmatpush3.msra.mxu1 %v7610_v27  ;;  %14632 = vmatprep.mubr.msk.f32.mxu1 %vm15635_vm1, %v15634_v3 }
0x171d   :  { %14640 = vmatprep.subr.mxu1 %v15634_v3  ;;  %v7762_v40 = vpop.permute.xlu1 %7761 }
0x1731   :  { %v7352_v32 = vpop.xlane.xlu0 %7351 }
0x1732   :  { %15422 = vrcp.f32 %v7352_v32 }
0x1735   :  { %v7358_v33 = vpop.xlane.xlu0 %7357 }
0x1736   :  { %15424 = vrcp.f32 %v7358_v33 }
0x1739   :  { %v7364_v39 = vpop.xlane.xlu0 %7363 }
0x173c   :  { %v15423_v49 = vpop.eup %15422 }
0x173d   :  { %v7376_v38 = vmul.f32 %v15423_v49, %v16728_v51 }
0x173f   :  { %14633 = vmatmul.mubr.msk.f32.vlgmr.msra.gmra.mrb[86].mxu1 %vm364_vm2, %v7376_v38 }
0x1740   :  { %v15425_v50 = vpop.eup %15424  ;;  %14641 = vmatpush3.msra.mxu1 %v7762_v40  ;;  %14642 = vmatprep.mubr.msk.f32.mxu1 %vm15635_vm1, %v15634_v3 }
0x1741   :  { %v7378_v37 = vmul.f32 %v15425_v50, %v16732_v52  ;;  %14650 = vmatprep.subr.mxu1 %v15634_v3 }
0x1743   :  { %14643 = vmatmul.mubr.msk.f32.vlgmr.msra.gmra.mrb[88].mxu1 %vm364_vm2, %v7378_v37 }
0x1744   :  { %14652 = vmatprep.mubr.msk.f32.mxu1 %vm15635_vm1, %v15634_v3 }
0x1765   :  { %v7349_v42 = vpop.xlane.xlu0 %7348 }
0x1766   :  { %15426 = vrcp.f32 %v7349_v42 }
0x1767   :  { %15428 = vrcp.f32 %v7364_v39 }
0x1769   :  { %v7686_v12 = vpop.permute.xlu0 %7685 }
0x176d   :  { %v7838_v54 = vpop.permute.xlu0 %7837 }
0x1770   :  { %v15427_v59 = vpop.eup %15426 }
0x1771   :  { %v7375_v9 = vmul.f32 %v15427_v59, %v16741_v6  ;;  %v15429_v46 = vpop.eup %15428  ;;  %v8022_v6 = vld [vmem:[#allocation5 + $0x50] sm:$0xff] }
0x1772   :  { %v7355_v36 = vpop.xlane.xlu1 %7354  ;;  %v7380_v11 = vmul.f32 %v15429_v46, %v16736_v55  ;;  %v15143_v4 = vpack.c.bf16 %v8023_v8, %v8022_v6 }
0x1773   :  { %15430 = vrcp.f32 %v7355_v36  ;;  %14628 = vmatmul.mubr.msk.f32.vlgmr.msra.gmra.mrb[86].mxu0 %vm364_vm2, %v7375_v9 }
0x1774   :  { %14636 = vmatpush3.msra.mxu0 %v7686_v12  ;;  %14637 = vmatprep.mubr.msk.f32.mxu0 %vm15635_vm1, %v15634_v3 }
0x1775   :  { %14645 = vmatprep.subr.mxu0 %v15634_v3 }
0x1776   :  { %v7361_v45 = vpop.xlane.xlu1 %7360 }
0x1777   :  { %15432 = vrcp.f32 %v7361_v45  ;;  %v13580_v45 = vld [vmem:[%s17590_s4 + $0x2] ss:$0 sm:$0xff] }
0x177a   :  { %v7914_v44 = vpop.permute.xlu1 %7913 }
0x177b   :  { %14651 = vmatpush3.msra.mxu1 %v7914_v44 }
0x177c   :  { %14653 = vmatmul.mubr.msk.f32.vlgmr.msra.gmra.mrb[90].mxu1 %vm364_vm2, %v7380_v11  ;;  %15148 = vmatprep.subr.bf16.mxu1 %v16783_v16 }
0x177d   :  { %v15431_v31 = vpop.eup %15430  ;;  %15150 = vmatpush3.bf16.msra.mxu1 %v16783_v16  ;;  %14674 = vmatprep.mubr.msk.f32.mxu1 %vm71_vm0, %v16668_v1 }
0x177e   :  { %v7377_v47 = vmul.f32 %v15431_v31, %v16746_v17  ;;  %15152 = vmatprep.subr.bf16.mxu1 %v16786_v13 }
0x1780   :  { %14638 = vmatmul.mubr.msk.f32.vlgmr.msra.gmra.mrb[88].mxu0 %vm364_vm2, %v7377_v47 }
0x1781   :  { %v15433_v48 = vpop.eup %15432  ;;  %14646 = vmatpush3.msra.mxu0 %v7838_v54  ;;  %15154 = vmatpush3.bf16.msra.mxu1 %v16786_v13 }
0x1782   :  { %14647 = vmatprep.mubr.msk.f32.mxu0 %vm15635_vm1, %v15634_v3  ;;  %v7379_v51 = vmul.f32 %v15433_v48, %v16750_v19  ;;  %14688 = vmatprep.subr.mxu1 %v15634_v3 }
0x1783   :  { %15140 = vmatprep.subr.bf16.mxu0 %v15139_v5 }
0x1784   :  { %14648 = vmatmul.mubr.msk.f32.vlgmr.msra.gmra.mrb[90].mxu0 %vm364_vm2, %v7379_v51  ;;  %14675 = vmatmul.mubr.msk.f32.vlgmr.msra.gmra.mrb[92].mxu1 %vm71_vm0, %v16670_v2 }
0x1785   :  { %14690 = vmatprep.mubr.msk.f32.mxu1 %vm15635_vm1, %v15634_v3  ;;  %15142 = vmatpush3.bf16.msra.mxu0 %v15139_v5 }
0x1786   :  { %15144 = vmatprep.subr.bf16.mxu0 %v15143_v4 }
0x1789   :  { %15146 = vmatpush3.bf16.msra.mxu0 %v15143_v4 }
0x178a   :  { %15156 = vmatprep.subr.bf16.mxu0 %v16783_v16 }
0x17e6   :  { %v7453_v1 = vpop.f32.mrb[84].mxu0 }
0x17e7   :  { %v14619_v41 = vpop.f32.mrb[85].mxu0 }
0x17ee   :  { %v7529_v52 = vpop.f32.mrb[84].mxu1 }
0x17ef   :  { %v14624_v53 = vpop.f32.mrb[85].mxu1 }
0x1812   :  { %v7681_v55 = vpop.f32.mrb[86].mxu1 }
0x1813   :  { %7993 = vrot.lane.b32.xlu1 %v7681_v55, %s15632_s24  ;;  %v14634_v56 = vpop.f32.mrb[87].mxu1 }
0x1816   :  { %v7833_v30 = vpop.f32.mrb[88].mxu1 }
0x1817   :  { %8001 = vrot.lane.b32.xlu1 %v7833_v30, %s15641_s21  ;;  %v14644_v57 = vpop.f32.mrb[89].mxu1 }
0x1846   :  { %v7605_v14 = vpop.f32.mrb[86].mxu0 }
0x1847   :  { %7991 = vrot.lane.b32.xlu0 %v7605_v14, %s15632_s24  ;;  %v14629_v2 = vpop.f32.mrb[87].mxu0 }
0x184f   :  { %v7985_v7 = vpop.f32.mrb[90].mxu1 }
0x1850   :  { %8009 = vrot.lane.b32.xlu1 %v7985_v7, %s15642_s22  ;;  %v14654_v35 = vpop.f32.mrb[91].mxu1 }
0x1853   :  { %v7757_v15 = vpop.f32.mrb[88].mxu0 }
0x1854   :  { %7999 = vrot.lane.b32.xlu0 %v7757_v15, %s15641_s21  ;;  %v14639_v17 = vpop.f32.mrb[89].mxu0 }
0x1857   :  { %v7909_v19 = vpop.f32.mrb[90].mxu0  ;;  %v14676_v21 = vpop.f32.mrb[92].mxu1 }
0x1858   :  { %v8198_v63 = vadd.f32 %v14676_v21, %v16815_v18  ;;  %8007 = vrot.lane.b32.xlu0 %v7909_v19, %s15642_s22  ;;  %v14649_v22 = vpop.f32.mrb[91].mxu0  ;;  %v8192_v23 = vpop.f32.mrb[93].mxu1 }
0x1859   :  { %v8193_v24 = vadd.f32 %v16815_v18, %v8192_v23 }
0x185a   :  { %8290 = vrot.lane.b32.xlu1 %v8198_v63, %s15637_s14 }
0x185c   :  { %8286 = vrot.lane.b32.xlu0 %v8198_v63, %s15636_s1 }
0x185e   :  { %8310 = vrot.lane.b32.xlu1 %v8193_v24, %s15639_s19 }
0x1860   :  { %8294 = vrot.lane.b32.xlu0 %v8198_v63, %s15638_s18 }
0x1864   :  { %8386 = vrot.lane.b32.xlu0 %v8198_v63, %s15639_s19 }
0x1885   :  { %v7994_v34 = vpop.permute.xlu1 %7993 }
0x1886   :  { %v8014_v29 = vsel %vm364_vm2, %v7529_v52, %v7994_v34 }
0x1889   :  { %v8002_v26 = vpop.permute.xlu1 %8001 }
0x188a   :  { %v8016_v33 = vsel %vm1693_vm3, %v8014_v29, %v8002_v26 }
0x18b9   :  { %v7992_v25 = vpop.permute.xlu0 %7991 }
0x18ba   :  { %v8013_v28 = vsel %vm364_vm2, %v7453_v1, %v7992_v25 }
0x18c2   :  { %v8010_v27 = vpop.permute.xlu1 %8009 }
0x18c3   :  { %v8018_v38 = vsel %vm1696_vm4, %v8016_v33, %v8010_v27 }
0x18c6   :  { %v8000_v0 = vpop.permute.xlu0 %7999 }
0x18c7   :  { %v8015_v60 = vsel %vm1693_vm3, %v8013_v28, %v8000_v0 }
0x18ca   :  { %v8008_v32 = vpop.permute.xlu0 %8007 }
0x18cb   :  { %v8017_v49 = vsel %vm1696_vm4, %v8015_v60, %v8008_v32 }
0x18cc   :  { %14663 = vmatprep.mubr.msk.f32.mxu0 %vm71_vm0, %v8017_v49  ;;  %v8291_v40 = vpop.permute.xlu1 %8290 }
0x18cd   :  { %14664 = vmatmul.mubr.msk.f32.vlgmr.msra.gmra.mrb[92].mxu0 %vm71_vm0, %v8018_v38  ;;  %8690 = vrot.lane.b32.xlu0 %v8291_v40, %s15639_s19 }
0x18ce   :  { %v8287_v50 = vpop.permute.xlu0 %8286  ;;  %15158 = vmatpush3.bf16.msra.mxu0 %v16783_v16 }
0x18cf   :  { %8538 = vrot.lane.b32.xlu1 %v8287_v50, %s15639_s19  ;;  %15160 = vmatprep.subr.bf16.mxu0 %v16786_v13 }
0x18d0   :  { %v8311_v37 = vpop.permute.xlu1 %8310 }
0x18d1   :  { %8284 = vrot.lane.b32.xlu0 %v8193_v24, %s15636_s1  ;;  %14689 = vmatpush3.xpose.msk.msra.mxu1 %vm364_vm2, %v8311_v37 }
0x18d2   :  { %v8295_v39 = vpop.permute.xlu0 %8294  ;;  %14693 = vmatprep.subr.mxu1 %v15634_v3  ;;  %15162 = vmatpush3.bf16.msra.mxu0 %v16786_v13 }
0x18d3   :  { %8842 = vrot.lane.b32.xlu1 %v8295_v39, %s15639_s19  ;;  %14698 = vmatprep.subr.mxu0 %v15634_v3 }
0x18d4   :  { %14691 = vmatmul.mubr.msk.f32.vlgmr.msra.gmra.mrb[94].mxu1 %vm364_vm2, %v8193_v24 }
0x18d5   :  { %8292 = vrot.lane.b32.xlu0 %v8193_v24, %s15638_s18  ;;  %14695 = vmatprep.mubr.msk.f32.mxu1 %vm15635_vm1, %v15634_v3 }
0x18d6   :  { %v8387_v42 = vpop.permute.xlu0 %8386 }
0x18d7   :  { %8288 = vrot.lane.b32.xlu1 %v8193_v24, %s15637_s14  ;;  %14694 = vmatpush3.xpose.msk.msra.mxu1 %vm364_vm2, %v8387_v42 }
0x18d8   :  { %14703 = vmatprep.subr.mxu1 %v15634_v3 }
0x18da   :  { %14696 = vmatmul.mubr.msk.f32.vlgmr.msra.gmra.mrb[96].mxu1 %vm364_vm2, %v8198_v63 }
0x18db   :  { %14705 = vmatprep.mubr.msk.f32.mxu1 %vm15635_vm1, %v15634_v3 }
0x193f   :  { %v8691_v59 = vpop.permute.xlu0 %8690 }
0x1941   :  { %v8539_v9 = vpop.permute.xlu1 %8538 }
0x1942   :  { %14704 = vmatpush3.xpose.msk.msra.mxu1 %vm364_vm2, %v8539_v9 }
0x1943   :  { %v8285_v36 = vpop.permute.xlu0 %8284  ;;  %14713 = vmatprep.subr.mxu1 %v15634_v3 }
0x1944   :  { %8462 = vrot.lane.b32.xlu1 %v8285_v36, %s15639_s19 }
0x1945   :  { %14706 = vmatmul.mubr.msk.f32.vlgmr.msra.gmra.mrb[98].mxu1 %vm364_vm2, %v8287_v50  ;;  %v8843_v12 = vpop.permute.xlu1 %8842 }
0x1946   :  { %14714 = vmatpush3.xpose.msk.msra.mxu1 %vm364_vm2, %v8691_v59  ;;  %14715 = vmatprep.mubr.msk.f32.mxu1 %vm15635_vm1, %v15634_v3 }
0x1947   :  { %v8293_v43 = vpop.permute.xlu0 %8292  ;;  %14723 = vmatprep.subr.mxu1 %v15634_v3 }
0x1948   :  { %8766 = vrot.lane.b32.xlu1 %v8293_v43, %s15639_s19 }
0x1949   :  { %14716 = vmatmul.mubr.msk.f32.vlgmr.msra.gmra.mrb[100].mxu1 %vm364_vm2, %v8291_v40  ;;  %v8289_v10 = vpop.permute.xlu1 %8288 }
0x194a   :  { %14724 = vmatpush3.xpose.msk.msra.mxu1 %vm364_vm2, %v8843_v12  ;;  %8614 = vrot.lane.b32.xlu0 %v8289_v10, %s15639_s19 }
0x194b   :  { %14725 = vmatprep.mubr.msk.f32.mxu1 %vm15635_vm1, %v15634_v3  ;;  %14733 = vmatprep.subr.mxu1 %v15634_v3 }
0x194d   :  { %14726 = vmatmul.mubr.msk.f32.vlgmr.msra.gmra.mrb[102].mxu1 %vm364_vm2, %v8295_v39 }
0x194e   :  { %14735 = vmatprep.mubr.msk.f32.mxu1 %vm15635_vm1, %v15634_v3 }
0x19a0   :  { %v14665_v46 = vpop.f32.mrb[92].mxu0 }
0x19a1   :  { %v8104_v20 = vpop.f32.mrb[93].mxu0  ;;  %v16876_v16 = vadd.f32 %v14665_v46, %v13580_v45 }
0x19a2   :  { %v16874_v62 = vadd.f32 %v13580_v45, %v8104_v20 }
0x19a4   :  { %14685 = vmatprep.mubr.msk.f32.mxu0 %vm71_vm0, %v16874_v62 }
0x19a5   :  { %14686 = vmatmul.mubr.msk.f32.vlgmr.msra.gmra.mrb[94].mxu0 %vm71_vm0, %v16876_v16 }
0x19a6   :  { %14700 = vmatprep.mubr.msk.f32.mxu0 %vm15635_vm1, %v15634_v3 }
0x19a7   :  { %v16884_v44 = vpop.f32.mrb[94].mxu1 }
0x19a8   :  { %v14692_v11 = vpop.f32.mrb[95].mxu1  ;;  %v8918_v39 = vsel %vm364_vm2, %v16884_v44, -inf }
0x19ad   :  { %v8458_v13 = vpop.f32.mrb[96].mxu1 }
0x19ae   :  { %v14697_v31 = vpop.f32.mrb[97].mxu1  ;;  %v8921_v47 = vsel %vm364_vm2, %v8458_v13, -inf }
0x19af   :  { %8922 = vmax.xlane.f32.xlu0 %v8921_v47 }
0x19b6   :  { %v8463_v54 = vpop.permute.xlu1 %8462 }
0x19b7   :  { %14699 = vmatpush3.xpose.msk.msra.mxu0 %vm364_vm2, %v8463_v54 }
0x19b8   :  { %14708 = vmatprep.subr.mxu0 %v15634_v3 }
0x19ba   :  { %14701 = vmatmul.mubr.msk.f32.vlgmr.msra.gmra.mrb[96].mxu0 %vm364_vm2, %v8285_v36  ;;  %v8767_v51 = vpop.permute.xlu1 %8766 }
0x19bb   :  { %14710 = vmatprep.mubr.msk.f32.mxu0 %vm15635_vm1, %v15634_v3 }
0x19bc   :  { %v8615_v48 = vpop.permute.xlu0 %8614 }
0x19bd   :  { %14709 = vmatpush3.xpose.msk.msra.mxu0 %vm364_vm2, %v8615_v48 }
0x19be   :  { %14718 = vmatprep.subr.mxu0 %v15634_v3 }
0x19c0   :  { %14711 = vmatmul.mubr.msk.f32.vlgmr.msra.gmra.mrb[98].mxu0 %vm364_vm2, %v8289_v10 }
0x19c1   :  { %14719 = vmatpush3.xpose.msk.msra.mxu0 %vm364_vm2, %v8767_v51  ;;  %14720 = vmatprep.mubr.msk.f32.mxu0 %vm15635_vm1, %v15634_v3 }
0x19c2   :  { %14728 = vmatprep.subr.mxu0 %v15634_v3 }
0x19c4   :  { %14721 = vmatmul.mubr.msk.f32.vlgmr.msra.gmra.mrb[100].mxu0 %vm364_vm2, %v8293_v43 }
0x19c5   :  { %14730 = vmatprep.mubr.msk.f32.mxu0 %vm15635_vm1, %v15634_v3 }
0x1a18   :  { %v8610_v1 = vpop.f32.mrb[98].mxu1 }
0x1a19   :  { %v14707_v41 = vpop.f32.mrb[99].mxu1  ;;  %v8927_v52 = vsel %vm364_vm2, %v8610_v1, -inf }
0x1a1a   :  { %8928 = vmax.xlane.f32.xlu1 %v8927_v52 }
0x1a1c   :  { %v8762_v53 = vpop.f32.mrb[100].mxu1 }
0x1a1d   :  { %v14717_v55 = vpop.f32.mrb[101].mxu1  ;;  %v8933_v56 = vsel %vm364_vm2, %v8762_v53, -inf }
0x1a1e   :  { %8934 = vmax.xlane.f32.xlu0 %v8933_v56 }
0x1a20   :  { %v8914_v30 = vpop.f32.mrb[102].mxu1 }
0x1a21   :  { %v14727_v57 = vpop.f32.mrb[103].mxu1  ;;  %v8939_v58 = vsel %vm364_vm2, %v8914_v30, -inf }
0x1a22   :  { %8940 = vmax.xlane.f32.xlu0 %v8939_v58  ;;  %v9739_v57 = vld [vmem:[#allocation2 + $0x60] sm:$0xff]  ;;  %v9740_v58 = vld [vmem:[#allocation2 + $0x68] sm:$0xff] }
0x1a3c   :  { %v8923_v61 = vpop.xlane.xlu0 %8922 }
0x1a3d   :  { %v8943_v5 = vsub.f32 %v8458_v13, %v8923_v61 }
0x1a3f   :  { %v8952_v14 = vmul.f32 1.442695, %v8943_v5  ;;  %v15171_v5 = vpack.c.bf16 %v9740_v58, %v9739_v57 }
0x1a41   :  { %15434 = vpow2.f32 %v8952_v14 }
0x1a4b   :  { %v15435_v2 = vpop.eup %15434 }
0x1a4c   :  { %v8969_v6 = vsel %vm364_vm2, %v15435_v2, 0.0 }
0x1a4d   :  { %8970 = vadd.xlane.f32.xlu1 %v8969_v6  ;;  %v9742_v6 = vld [vmem:[#allocation2 + $0x78] sm:$0xff] }
0x1a78   :  { %v14687_v8 = vpop.f32.mrb[94].mxu0 }
0x1a79   :  { %v8279_v4 = vadd.f32 %v14687_v8, %v16815_v18  ;;  %v8273_v7 = vpop.f32.mrb[95].mxu0 }
0x1a7a   :  { %v8274_v59 = vadd.f32 %v16815_v18, %v8273_v7 }
0x1a7b   :  { %8300 = vrot.lane.b32.xlu1 %v8279_v4, %s15636_s1 }
0x1a7f   :  { %8308 = vrot.lane.b32.xlu1 %v8279_v4, %s15638_s18 }
0x1a8d   :  { %v16909_v35 = vpop.f32.mrb[96].mxu0 }
0x1a8e   :  { %v14702_v15 = vpop.f32.mrb[97].mxu0  ;;  %v8924_v37 = vsel %vm364_vm2, %v16909_v35, -inf }
0x1a93   :  { %v16911_v17 = vpop.f32.mrb[98].mxu0 }
0x1a94   :  { %v14712_v19 = vpop.f32.mrb[99].mxu0  ;;  %v8930_v13 = vsel %vm364_vm2, %v16911_v17, -inf }
0x1a97   :  { %v16913_v21 = vpop.f32.mrb[100].mxu0 }
0x1a98   :  { %v14722_v63 = vpop.f32.mrb[101].mxu0  ;;  %v8936_v31 = vsel %vm364_vm2, %v16913_v21, -inf }
0x1aa7   :  { %v8929_v22 = vpop.xlane.xlu1 %8928 }
0x1aa8   :  { %v8945_v23 = vsub.f32 %v8610_v1, %v8929_v22 }
0x1aaa   :  { %v8956_v24 = vmul.f32 1.442695, %v8945_v23 }
0x1aab   :  { %v8935_v34 = vpop.xlane.xlu0 %8934 }
0x1aac   :  { %15436 = vpow2.f32 %v8956_v24  ;;  %v8947_v25 = vsub.f32 %v8762_v53, %v8935_v34 }
0x1aae   :  { %v8960_v26 = vmul.f32 1.442695, %v8947_v25 }
0x1aaf   :  { %v8941_v0 = vpop.xlane.xlu0 %8940 }
0x1ab0   :  { %15438 = vpow2.f32 %v8960_v26  ;;  %v8949_v27 = vsub.f32 %v8914_v30, %v8941_v0 }
0x1ab2   :  { %v8964_v28 = vmul.f32 1.442695, %v8949_v27 }
0x1ab4   :  { %15440 = vpow2.f32 %v8964_v28 }
0x1ab6   :  { %v15437_v29 = vpop.eup %15436 }
0x1ab7   :  { %v8975_v60 = vsel %vm364_vm2, %v15437_v29, 0.0 }
0x1ab8   :  { %8976 = vadd.xlane.f32.xlu0 %v8975_v60 }
0x1aba   :  { %v16916_v32 = vpop.eup %15438 }
0x1abb   :  { %v8981_v33 = vsel %vm364_vm2, %v16916_v32, 0.0 }
0x1abc   :  { %8982 = vadd.xlane.f32.xlu0 %v8981_v33 }
0x1abe   :  { %v16920_v49 = vpop.eup %15440 }
0x1abf   :  { %v8987_v38 = vsel %vm364_vm2, %v16920_v49, 0.0 }
0x1ac0   :  { %8988 = vadd.xlane.f32.xlu1 %v8987_v38 }
0x1ad2   :  { %8304 = vrot.lane.b32.xlu0 %v8279_v4, %s15637_s14 }
0x1ad6   :  { %9082 = vrot.lane.b32.xlu0 %v8279_v4, %s15640_s20 }
0x1ada   :  { %v8971_v40 = vpop.xlane.xlu1 %8970 }
0x1adb   :  { %15442 = vrcp.f32 %v8971_v40 }
0x1ae5   :  { %v15443_v43 = vpop.eup %15442 }
0x1ae6   :  { %v8999_v45 = vmul.f32 %v15443_v43, %v15435_v2  ;;  %v9741_v2 = vld [vmem:[#allocation2 + $0x70] sm:$0xff] }
0x1ae7   :  { %v15175_v7 = vpack.c.bf16 %v9742_v6, %v9741_v2 }
0x1aed   :  { %v8301_v50 = vpop.permute.xlu1 %8300 }
0x1aee   :  { %9234 = vrot.lane.b32.xlu1 %v8301_v50, %s15640_s20 }
0x1af1   :  { %v8309_v42 = vpop.permute.xlu1 %8308 }
0x1af5   :  { %8925 = vmax.xlane.f32.xlu0 %v8924_v37 }
0x1b12   :  { %8919 = vmax.xlane.f32.xlu1 %v8918_v39 }
0x1b23   :  { %9538 = vrot.lane.b32.xlu1 %v8309_v42, %s15640_s20 }
0x1b27   :  { %8302 = vrot.lane.b32.xlu1 %v8274_v59, %s15637_s14 }
0x1b2b   :  { %8306 = vrot.lane.b32.xlu1 %v8274_v59, %s15638_s18 }
0x1b45   :  { %v8977_v9 = vpop.xlane.xlu0 %8976 }
0x1b46   :  { %15444 = vrcp.f32 %v8977_v9  ;;  %v13618_v9 = vld [vmem:[%s17588_s2 + $0x3] ss:$0 sm:$0xff] }
0x1b49   :  { %v8983_v36 = vpop.xlane.xlu0 %8982 }
0x1b4d   :  { %v8305_v12 = vpop.permute.xlu0 %8304  ;;  %v8989_v18 = vpop.xlane.xlu1 %8988 }
0x1b4e   :  { %9386 = vrot.lane.b32.xlu0 %v8305_v12, %s15640_s20 }
0x1b50   :  { %v15445_v46 = vpop.eup %15444 }
0x1b51   :  { %v9083_v10 = vpop.permute.xlu0 %9082  ;;  %v9001_v11 = vmul.f32 %v15445_v46, %v15437_v29 }
0x1b52   :  { %14734 = vmatpush3.msra.mxu1 %v9083_v10 }
0x1b53   :  { %14736 = vmatmul.mubr.msk.f32.vlgmr.msra.gmra.mrb[104].mxu1 %vm364_vm2, %v8999_v45  ;;  %14743 = vmatprep.subr.mxu1 %v15634_v3 }
0x1b54   :  { %14745 = vmatprep.mubr.msk.f32.mxu1 %vm15635_vm1, %v15634_v3 }
0x1b60   :  { %v9235_v20 = vpop.permute.xlu1 %9234 }
0x1b61   :  { %14744 = vmatpush3.msra.mxu1 %v9235_v20 }
0x1b62   :  { %14746 = vmatmul.mubr.msk.f32.vlgmr.msra.gmra.mrb[106].mxu1 %vm364_vm2, %v9001_v11  ;;  %14753 = vmatprep.subr.mxu1 %v15634_v3 }
0x1b63   :  { %14755 = vmatprep.mubr.msk.f32.mxu1 %vm15635_vm1, %v15634_v3 }
0x1b6d   :  { %8931 = vmax.xlane.f32.xlu0 %v8930_v13 }
0x1b71   :  { %8937 = vmax.xlane.f32.xlu0 %v8936_v31 }
0x1b82   :  { %v8926_v47 = vpop.xlane.xlu0 %8925 }
0x1b83   :  { %v8944_v54 = vsub.f32 %v16909_v35, %v8926_v47 }
0x1b85   :  { %v8954_v48 = vmul.f32 1.442695, %v8944_v54 }
0x1b87   :  { %8298 = vrot.lane.b32.xlu0 %v8274_v59, %s15636_s1  ;;  %15446 = vpow2.f32 %v8954_v48 }
0x1b91   :  { %v16951_v41 = vpop.eup %15446 }
0x1b92   :  { %v8972_v53 = vsel %vm364_vm2, %v16951_v41, 0.0 }
0x1b9f   :  { %v8920_v51 = vpop.xlane.xlu1 %8919 }
0x1ba0   :  { %v8942_v1 = vsub.f32 %v16884_v44, %v8920_v51  ;;  %v9645_v51 = vld [vmem:[#allocation5 + $0xc0] sm:$0xff] }
0x1ba2   :  { %v8950_v52 = vmul.f32 1.442695, %v8942_v1  ;;  %v9646_v1 = vld [vmem:[#allocation5 + $0xc8] sm:$0xff] }
0x1ba3   :  { %v9539_v8 = vpop.permute.xlu1 %9538 }
0x1ba4   :  { %15448 = vpow2.f32 %v8950_v52  ;;  %v15163_v52 = vpack.c.bf16 %v9646_v1, %v9645_v51 }
0x1ba5   :  { %15450 = vrcp.f32 %v8983_v36 }
0x1ba6   :  { %8973 = vadd.xlane.f32.xlu0 %v8972_v53  ;;  %15452 = vrcp.f32 %v8989_v18 }
0x1ba7   :  { %v8303_v25 = vpop.permute.xlu1 %8302 }
0x1bab   :  { %v8307_v26 = vpop.permute.xlu1 %8306 }
0x1bae   :  { %v15449_v55 = vpop.eup %15448 }
0x1baf   :  { %v8966_v56 = vsel %vm364_vm2, %v15449_v55, 0.0  ;;  %v15451_v30 = vpop.eup %15450 }
0x1bb0   :  { %8967 = vadd.xlane.f32.xlu1 %v8966_v56  ;;  %v9003_v44 = vmul.f32 %v15451_v30, %v16916_v32  ;;  %v15453_v14 = vpop.eup %15452 }
0x1bb1   :  { %v9005_v4 = vmul.f32 %v15453_v14, %v16920_v49 }
0x1bc0   :  { %v9387_v61 = vpop.permute.xlu0 %9386 }
0x1bc1   :  { %14754 = vmatpush3.msra.mxu1 %v9387_v61  ;;  %9006 = vrot.lane.b32.xlu1 %v8274_v59, %s15640_s20  ;;  %v9647_v61 = vld [vmem:[#allocation5 + $0xd0] sm:$0xff] }
0x1bc2   :  { %14756 = vmatmul.mubr.msk.f32.vlgmr.msra.gmra.mrb[108].mxu1 %vm364_vm2, %v9003_v44  ;;  %14763 = vmatprep.subr.mxu1 %v15634_v3  ;;  %v9648_v44 = vld [vmem:[#allocation5 + $0xd8] sm:$0xff] }
0x1bc3   :  { %14764 = vmatpush3.msra.mxu1 %v9539_v8  ;;  %14765 = vmatprep.mubr.msk.f32.mxu1 %vm15635_vm1, %v15634_v3 }
0x1bc4   :  { %15172 = vmatprep.subr.bf16.mxu1 %v15171_v5 }
0x1bc6   :  { %14766 = vmatmul.mubr.msk.f32.vlgmr.msra.gmra.mrb[110].mxu1 %vm364_vm2, %v9005_v4 }
0x1bc7   :  { %15174 = vmatpush3.bf16.msra.mxu1 %v15171_v5  ;;  %14787 = vmatprep.mubr.msk.f32.mxu1 %vm71_vm0, %v16874_v62  ;;  %v15167_v5 = vpack.c.bf16 %v9648_v44, %v9647_v61 }
0x1bc8   :  { %15176 = vmatprep.subr.bf16.mxu1 %v15175_v7 }
0x1bcb   :  { %15178 = vmatpush3.bf16.msra.mxu1 %v15175_v7 }
0x1bcc   :  { %14795 = vmatprep.subr.mxu1 %v15634_v3 }
0x1bce   :  { %14788 = vmatmul.mubr.msk.f32.vlgmr.msra.gmra.mrb[112].mxu1 %vm71_vm0, %v16876_v16 }
0x1bcf   :  { %14797 = vmatprep.mubr.msk.f32.mxu1 %vm15635_vm1, %v15634_v3 }
0x1bfa   :  { %v8932_v35 = vpop.xlane.xlu0 %8931 }
0x1bfb   :  { %v8946_v15 = vsub.f32 %v16911_v17, %v8932_v35 }
0x1bfd   :  { %v8958_v19 = vmul.f32 1.442695, %v8946_v15 }
0x1bfe   :  { %v8938_v63 = vpop.xlane.xlu0 %8937 }
0x1bff   :  { %15454 = vpow2.f32 %v8958_v19  ;;  %v8948_v22 = vsub.f32 %v16913_v21, %v8938_v63 }
0x1c01   :  { %v8962_v23 = vmul.f32 1.442695, %v8948_v22 }
0x1c02   :  { %v8299_v17 = vpop.permute.xlu0 %8298 }
0x1c03   :  { %15456 = vpow2.f32 %v8962_v23 }
0x1c09   :  { %v15455_v62 = vpop.eup %15454 }
0x1c0a   :  { %v8978_v24 = vsel %vm364_vm2, %v15455_v62, 0.0 }
0x1c0b   :  { %8979 = vadd.xlane.f32.xlu1 %v8978_v24 }
0x1c0d   :  { %v15457_v34 = vpop.eup %15456 }
0x1c0e   :  { %v8984_v16 = vsel %vm364_vm2, %v15457_v34, 0.0 }
0x1c0f   :  { %8985 = vadd.xlane.f32.xlu0 %v8984_v16 }
0x1c1c   :  { %9310 = vrot.lane.b32.xlu1 %v8303_v25, %s15640_s20 }
0x1c20   :  { %9462 = vrot.lane.b32.xlu1 %v8307_v26, %s15640_s20 }
0x1c25   :  { %9158 = vrot.lane.b32.xlu0 %v8299_v17, %s15640_s20 }
0x1c26   :  { %v16978_v21 = vpop.f32.mrb[104].mxu1 }
0x1c27   :  { %v14737_v0 = vpop.f32.mrb[105].mxu1 }
0x1c33   :  { %v8974_v49 = vpop.xlane.xlu0 %8973 }
0x1c35   :  { %v9306_v27 = vpop.f32.mrb[106].mxu1 }
0x1c36   :  { %v14747_v28 = vpop.f32.mrb[107].mxu1 }
0x1c3d   :  { %v8968_v29 = vpop.xlane.xlu1 %8967 }
0x1c3e   :  { %15458 = vrcp.f32 %v8968_v29 }
0x1c3f   :  { %15460 = vrcp.f32 %v8974_v49 }
0x1c41   :  { %v9007_v60 = vpop.permute.xlu1 %9006 }
0x1c42   :  { %14729 = vmatpush3.msra.mxu0 %v9007_v60 }
0x1c43   :  { %14738 = vmatprep.subr.mxu0 %v15634_v3 }
0x1c48   :  { %v15459_v32 = vpop.eup %15458 }
0x1c49   :  { %v8998_v33 = vmul.f32 %v15459_v32, %v15449_v55  ;;  %v15461_v59 = vpop.eup %15460 }
0x1c4a   :  { %v9000_v43 = vmul.f32 %v15461_v59, %v16951_v41 }
0x1c4b   :  { %14731 = vmatmul.mubr.msk.f32.vlgmr.msra.gmra.mrb[102].mxu0 %vm364_vm2, %v8998_v33 }
0x1c4c   :  { %14740 = vmatprep.mubr.msk.f32.mxu0 %vm15635_vm1, %v15634_v3 }
0x1c95   :  { %v9458_v38 = vpop.f32.mrb[108].mxu1 }
0x1c96   :  { %v14757_v40 = vpop.f32.mrb[109].mxu1 }
0x1c98   :  { %v8980_v50 = vpop.xlane.xlu1 %8979 }
0x1c99   :  { %15462 = vrcp.f32 %v8980_v50  ;;  %v9610_v37 = vpop.f32.mrb[110].mxu1 }
0x1c9a   :  { %v14767_v39 = vpop.f32.mrb[111].mxu1 }
0x1c9c   :  { %v8986_v42 = vpop.xlane.xlu0 %8985  ;;  %v9311_v36 = vpop.permute.xlu1 %9310 }
0x1c9d   :  { %15464 = vrcp.f32 %v8986_v42 }
0x1ca0   :  { %v9159_v12 = vpop.permute.xlu0 %9158  ;;  %v9463_v11 = vpop.permute.xlu1 %9462 }
0x1ca1   :  { %v14789_v10 = vpop.f32.mrb[112].mxu1  ;;  %14739 = vmatpush3.msra.mxu0 %v9159_v12 }
0x1ca2   :  { %v16988_v45 = vadd.f32 %v14789_v10, %v13618_v9  ;;  %v9817_v18 = vpop.f32.mrb[113].mxu1  ;;  %14741 = vmatmul.mubr.msk.f32.vlgmr.msra.gmra.mrb[104].mxu0 %vm364_vm2, %v9000_v43  ;;  %14748 = vmatprep.subr.mxu0 %v15634_v3 }
0x1ca3   :  { %v15463_v46 = vpop.eup %15462  ;;  %14749 = vmatpush3.msra.mxu0 %v9311_v36  ;;  %14750 = vmatprep.mubr.msk.f32.mxu0 %vm15635_vm1, %v15634_v3  ;;  %v17006_v47 = vadd.f32 %v13618_v9, %v9817_v18 }
0x1ca4   :  { %9830 = vrot.lane.b32.xlu0 %v16988_v45, %s15636_s1  ;;  %9834 = vrot.lane.b32.xlu1 %v16988_v45, %s15637_s14  ;;  %v9002_v20 = vmul.f32 %v15463_v46, %v15455_v62 }
0x1ca5   :  { %14758 = vmatprep.subr.mxu0 %v15634_v3 }
0x1ca6   :  { %14751 = vmatmul.mubr.msk.f32.vlgmr.msra.gmra.mrb[106].mxu0 %vm364_vm2, %v9002_v20 }
0x1ca7   :  { %v15465_v13 = vpop.eup %15464  ;;  %14759 = vmatpush3.msra.mxu0 %v9463_v11  ;;  %14760 = vmatprep.mubr.msk.f32.mxu0 %vm15635_vm1, %v15634_v3 }
0x1ca8   :  { %9838 = vrot.lane.b32.xlu0 %v16988_v45, %s15638_s18  ;;  %9916 = vrot.lane.b32.xlu1 %v16988_v45, %s15639_s19  ;;  %v9004_v31 = vmul.f32 %v15465_v13, %v15457_v34 }
0x1ca9   :  { %15164 = vmatprep.subr.bf16.mxu0 %v15163_v52 }
0x1caa   :  { %14761 = vmatmul.mubr.msk.f32.vlgmr.msra.gmra.mrb[108].mxu0 %vm364_vm2, %v9004_v31 }
0x1cab   :  { %15166 = vmatpush3.bf16.msra.mxu0 %v15163_v52 }
0x1cac   :  { %9828 = vrot.lane.b32.xlu1 %v17006_v47, %s15636_s1  ;;  %15168 = vmatprep.subr.bf16.mxu0 %v15167_v5 }
0x1caf   :  { %15170 = vmatpush3.bf16.msra.mxu0 %v15167_v5 }
0x1cb0   :  { %9832 = vrot.lane.b32.xlu1 %v17006_v47, %s15637_s14  ;;  %14790 = vmatprep.subr.mxu0 %v15634_v3 }
0x1cb4   :  { %9836 = vrot.lane.b32.xlu1 %v17006_v47, %s15638_s18 }
0x1cb8   :  { %9618 = vrot.lane.b32.xlu1 %v9306_v27, %s15632_s24 }
0x1cbc   :  { %9626 = vrot.lane.b32.xlu1 %v9458_v38, %s15641_s21 }
0x1cc0   :  { %9634 = vrot.lane.b32.xlu1 %v9610_v37, %s15642_s22 }
0x1d16   :  { %v17018_v54 = vpop.permute.xlu0 %9830  ;;  %v17020_v48 = vpop.permute.xlu1 %9834 }
0x1d17   :  { %10068 = vrot.lane.b32.xlu0 %v17018_v54, %s15639_s19 }
0x1d1a   :  { %v9917_v41 = vpop.permute.xlu1 %9916  ;;  %v17028_v53 = vpop.permute.xlu0 %9838 }
0x1d1b   :  { %10220 = vrot.lane.b32.xlu0 %v17020_v48, %s15639_s19  ;;  %14796 = vmatpush3.xpose.msk.msra.mxu1 %vm364_vm2, %v9917_v41 }
0x1d1c   :  { %14805 = vmatprep.subr.mxu1 %v15634_v3 }
0x1d1e   :  { %14798 = vmatmul.mubr.msk.f32.vlgmr.msra.gmra.mrb[114].mxu1 %vm364_vm2, %v16988_v45  ;;  %v17032_v55 = vpop.permute.xlu1 %9828  ;;  %v9078_v56 = vpop.f32.mrb[102].mxu0 }
0x1d1f   :  { %10372 = vrot.lane.b32.xlu0 %v17028_v53, %s15639_s19  ;;  %9992 = vrot.lane.b32.xlu1 %v17032_v55, %s15639_s19  ;;  %v14732_v30 = vpop.f32.mrb[103].mxu0 }
0x1d20   :  { %14807 = vmatprep.mubr.msk.f32.mxu1 %vm15635_vm1, %v15634_v3 }
0x1d22   :  { %v17040_v57 = vpop.permute.xlu1 %9832 }
0x1d26   :  { %v17042_v58 = vpop.permute.xlu1 %9836 }
0x1d27   :  { %10296 = vrot.lane.b32.xlu1 %v17042_v58, %s15639_s19 }
0x1d2a   :  { %v9619_v63 = vpop.permute.xlu1 %9618 }
0x1d2b   :  { %v9639_v16 = vsel %vm364_vm2, %v16978_v21, %v9619_v63 }
0x1d2e   :  { %v9627_v23 = vpop.permute.xlu1 %9626 }
0x1d2f   :  { %v9641_v17 = vsel %vm1693_vm3, %v9639_v16, %v9627_v23 }
0x1d32   :  { %v9635_v24 = vpop.permute.xlu1 %9634 }
0x1d33   :  { %v9643_v28 = vsel %vm1696_vm4, %v9641_v17, %v9635_v24 }
0x1d75   :  { %v9230_v14 = vpop.f32.mrb[104].mxu0 }
0x1d76   :  { %v14742_v2 = vpop.f32.mrb[105].mxu0  ;;  %9616 = vrot.lane.b32.xlu0 %v9230_v14, %s15632_s24 }
0x1d79   :  { %v9382_v6 = vpop.f32.mrb[106].mxu0 }
0x1d7a   :  { %v14752_v8 = vpop.f32.mrb[107].mxu0  ;;  %9624 = vrot.lane.b32.xlu0 %v9382_v6, %s15641_s21 }
0x1d7d   :  { %v9534_v4 = vpop.f32.mrb[108].mxu0 }
0x1d7e   :  { %v14762_v7 = vpop.f32.mrb[109].mxu0  ;;  %9632 = vrot.lane.b32.xlu0 %v9534_v4, %s15642_s22 }
0x1d82   :  { %9840 = vrot.lane.b32.xlu0 %v17006_v47, %s15639_s19 }
0x1d86   :  { %10144 = vrot.lane.b32.xlu0 %v17040_v57, %s15639_s19 }
0x1d89   :  { %v10069_v35 = vpop.permute.xlu0 %10068 }
0x1d8a   :  { %14806 = vmatpush3.xpose.msk.msra.mxu1 %vm364_vm2, %v10069_v35 }
0x1d8b   :  { %14815 = vmatprep.subr.mxu1 %v15634_v3 }
0x1d8d   :  { %v10221_v15 = vpop.permute.xlu0 %10220  ;;  %14808 = vmatmul.mubr.msk.f32.vlgmr.msra.gmra.mrb[116].mxu1 %vm364_vm2, %v17018_v54 }
0x1d8e   :  { %14816 = vmatpush3.xpose.msk.msra.mxu1 %vm364_vm2, %v10221_v15  ;;  %14817 = vmatprep.mubr.msk.f32.mxu1 %vm15635_vm1, %v15634_v3 }
0x1d8f   :  { %14825 = vmatprep.subr.mxu1 %v15634_v3 }
0x1d91   :  { %v10373_v19 = vpop.permute.xlu0 %10372  ;;  %14818 = vmatmul.mubr.msk.f32.vlgmr.msra.gmra.mrb[118].mxu1 %vm364_vm2, %v17020_v48  ;;  %v9993_v32 = vpop.permute.xlu1 %9992 }
0x1d92   :  { %14826 = vmatpush3.xpose.msk.msra.mxu1 %vm364_vm2, %v10373_v19  ;;  %14827 = vmatprep.mubr.msk.f32.mxu1 %vm15635_vm1, %v15634_v3 }
0x1d93   :  { %14835 = vmatprep.subr.mxu1 %v15634_v3 }
0x1d95   :  { %14828 = vmatmul.mubr.msk.f32.vlgmr.msra.gmra.mrb[120].mxu1 %vm364_vm2, %v17028_v53 }
0x1d96   :  { %14837 = vmatprep.mubr.msk.f32.mxu1 %vm15635_vm1, %v15634_v3 }
0x1d99   :  { %v10297_v49 = vpop.permute.xlu1 %10296 }
0x1de8   :  { %v9617_v22 = vpop.permute.xlu0 %9616 }
0x1de9   :  { %v9638_v34 = vsel %vm364_vm2, %v9078_v56, %v9617_v22 }
0x1dec   :  { %v9625_v62 = vpop.permute.xlu0 %9624 }
0x1ded   :  { %v9640_v25 = vsel %vm1693_vm3, %v9638_v34, %v9625_v62 }
0x1df0   :  { %v9633_v26 = vpop.permute.xlu0 %9632 }
0x1df1   :  { %v9642_v0 = vsel %vm1696_vm4, %v9640_v25, %v9633_v26  ;;  %v17078_v27 = vpop.f32.mrb[114].mxu1 }
0x1df2   :  { %v14799_v29 = vpop.f32.mrb[115].mxu1  ;;  %14776 = vmatprep.mubr.msk.f32.mxu0 %vm71_vm0, %v9642_v0  ;;  %v10451_v60 = vsel %vm364_vm2, %v17078_v27, -inf }
0x1df3   :  { %10452 = vmax.xlane.f32.xlu0 %v10451_v60  ;;  %14777 = vmatmul.mubr.msk.f32.vlgmr.msra.gmra.mrb[110].mxu0 %vm71_vm0, %v9643_v28 }
0x1df4   :  { %v9841_v21 = vpop.permute.xlu0 %9840  ;;  %14792 = vmatprep.mubr.msk.f32.mxu0 %vm15635_vm1, %v15634_v3 }
0x1df5   :  { %14791 = vmatpush3.xpose.msk.msra.mxu0 %vm364_vm2, %v9841_v21 }
0x1df6   :  { %14800 = vmatprep.subr.mxu0 %v15634_v3 }
0x1df8   :  { %14793 = vmatmul.mubr.msk.f32.vlgmr.msra.gmra.mrb[112].mxu0 %vm364_vm2, %v17006_v47  ;;  %v10145_v33 = vpop.permute.xlu0 %10144 }
0x1df9   :  { %14801 = vmatpush3.xpose.msk.msra.mxu0 %vm364_vm2, %v9993_v32  ;;  %14802 = vmatprep.mubr.msk.f32.mxu0 %vm15635_vm1, %v15634_v3 }
0x1dfa   :  { %14810 = vmatprep.subr.mxu0 %v15634_v3 }
0x1dfc   :  { %14803 = vmatmul.mubr.msk.f32.vlgmr.msra.gmra.mrb[114].mxu0 %vm364_vm2, %v17032_v55 }
0x1dfd   :  { %14811 = vmatpush3.xpose.msk.msra.mxu0 %vm364_vm2, %v10145_v33  ;;  %14812 = vmatprep.mubr.msk.f32.mxu0 %vm15635_vm1, %v15634_v3 }
0x1dfe   :  { %14820 = vmatprep.subr.mxu0 %v15634_v3 }
0x1e00   :  { %14813 = vmatmul.mubr.msk.f32.vlgmr.msra.gmra.mrb[116].mxu0 %vm364_vm2, %v17040_v57 }
0x1e01   :  { %14821 = vmatpush3.xpose.msk.msra.mxu0 %vm364_vm2, %v10297_v49  ;;  %14822 = vmatprep.mubr.msk.f32.mxu0 %vm15635_vm1, %v15634_v3 }
0x1e02   :  { %14830 = vmatprep.subr.mxu0 %v15634_v3 }
0x1e04   :  { %14823 = vmatmul.mubr.msk.f32.vlgmr.msra.gmra.mrb[118].mxu0 %vm364_vm2, %v17042_v58 }
0x1e05   :  { %14832 = vmatprep.mubr.msk.f32.mxu0 %vm15635_vm1, %v15634_v3 }
0x1e60   :  { %v10140_v38 = vpop.f32.mrb[116].mxu1 }
0x1e61   :  { %v14809_v40 = vpop.f32.mrb[117].mxu1  ;;  %v10457_v50 = vsel %vm364_vm2, %v10140_v38, -inf }
0x1e62   :  { %10458 = vmax.xlane.f32.xlu1 %v10457_v50 }
0x1e64   :  { %v10292_v37 = vpop.f32.mrb[118].mxu1 }
0x1e65   :  { %v14819_v39 = vpop.f32.mrb[119].mxu1  ;;  %v10463_v42 = vsel %vm364_vm2, %v10292_v37, -inf }
0x1e66   :  { %10464 = vmax.xlane.f32.xlu0 %v10463_v42 }
0x1e68   :  { %v10444_v59 = vpop.f32.mrb[120].mxu1 }
0x1e69   :  { %v14829_v9 = vpop.f32.mrb[121].mxu1  ;;  %v10469_v36 = vsel %vm364_vm2, %v10444_v59, -inf }
0x1e6a   :  { %10470 = vmax.xlane.f32.xlu0 %v10469_v36 }
0x1e80   :  { %v10453_v30 = vpop.xlane.xlu0 %10452 }
0x1e81   :  { %v10473_v14 = vsub.f32 %v17078_v27, %v10453_v30 }
0x1e83   :  { %v10482_v6 = vmul.f32 1.442695, %v10473_v14 }
0x1ec6   :  { %v17114_v12 = vpop.f32.mrb[110].mxu0 }
0x1ec7   :  { %v17116_v43 = vpop.f32.mrb[111].mxu0 }
0x1ecb   :  { %v9912_v10 = vpop.f32.mrb[112].mxu0 }
0x1ecc   :  { %v14794_v18 = vpop.f32.mrb[113].mxu0  ;;  %v10448_v46 = vsel %vm364_vm2, %v9912_v10, -inf }
0x1ecd   :  { %10449 = vmax.xlane.f32.xlu1 %v10448_v46 }
0x1ecf   :  { %v10064_v20 = vpop.f32.mrb[114].mxu0 }
0x1ed0   :  { %v14804_v11 = vpop.f32.mrb[115].mxu0  ;;  %v10454_v13 = vsel %vm364_vm2, %v10064_v20, -inf }
0x1ed1   :  { %10455 = vmax.xlane.f32.xlu0 %v10454_v13  ;;  %v11270_v11 = vld [vmem:[#allocation2 + $0xe8] sm:$0xff] }
0x1ed3   :  { %v10216_v31 = vpop.f32.mrb[116].mxu0 }
0x1ed4   :  { %v14814_v51 = vpop.f32.mrb[117].mxu0  ;;  %v10460_v1 = vsel %vm364_vm2, %v10216_v31, -inf }
0x1ed5   :  { %10461 = vmax.xlane.f32.xlu1 %v10460_v1  ;;  %v11271_v1 = vld [vmem:[#allocation2 + $0xf0] sm:$0xff] }
0x1ed7   :  { %v10368_v41 = vpop.f32.mrb[118].mxu0 }
0x1ed8   :  { %v14824_v52 = vpop.f32.mrb[119].mxu0  ;;  %v10466_v56 = vsel %vm364_vm2, %v10368_v41, -inf }
0x1ed9   :  { %10467 = vmax.xlane.f32.xlu0 %v10466_v56  ;;  %v13614_v52 = vld [vmem:[%s17590_s4 + $0x6] ss:$0 sm:$0xff] }
0x1ee6   :  { %10612 = vrot.lane.b32.xlu1 %v16988_v45, %s15640_s20 }
0x1eef   :  { %v10459_v61 = vpop.xlane.xlu1 %10458 }
0x1ef0   :  { %v10475_v44 = vsub.f32 %v10140_v38, %v10459_v61 }
0x1ef2   :  { %v10486_v5 = vmul.f32 1.442695, %v10475_v44  ;;  %v9730_v44 = vadd.f32 %v13614_v52, %v17116_v43 }
0x1ef3   :  { %v10465_v2 = vpop.xlane.xlu0 %10464 }
0x1ef4   :  { %15466 = vpow2.f32 %v10486_v5  ;;  %v10477_v4 = vsub.f32 %v10292_v37, %v10465_v2  ;;  %v9735_v5 = vadd.f32 %v17114_v12, %v13614_v52 }
0x1ef5   :  { %15468 = vpow2.f32 %v10482_v6 }
0x1ef6   :  { %v10490_v15 = vmul.f32 1.442695, %v10477_v4 }
0x1ef7   :  { %v10471_v8 = vpop.xlane.xlu0 %10470 }
0x1ef8   :  { %v10479_v7 = vsub.f32 %v10444_v59, %v10471_v8 }
0x1efa   :  { %v10494_v35 = vmul.f32 1.442695, %v10479_v7 }
0x1efc   :  { %15470 = vpow2.f32 %v10494_v35 }
0x1efd   :  { %15472 = vpow2.f32 %v10490_v15 }
0x1efe   :  { %v17125_v19 = vpop.eup %15466 }
0x1eff   :  { %v10505_v45 = vsel %vm364_vm2, %v17125_v19, 0.0  ;;  %v15469_v63 = vpop.eup %15468 }
0x1f00   :  { %10506 = vadd.xlane.f32.xlu0 %v10505_v45  ;;  %v10499_v62 = vsel %vm364_vm2, %v15469_v63, 0.0 }
0x1f06   :  { %v17129_v22 = vpop.eup %15470 }
0x1f07   :  { %v10517_v23 = vsel %vm364_vm2, %v17129_v22, 0.0  ;;  %v17134_v24 = vpop.eup %15472 }
0x1f08   :  { %10518 = vadd.xlane.f32.xlu0 %v10517_v23  ;;  %v10511_v34 = vsel %vm364_vm2, %v17134_v24, 0.0 }
0x1f0a   :  { %10500 = vadd.xlane.f32.xlu1 %v10499_v62 }
0x1f0e   :  { %10512 = vadd.xlane.f32.xlu1 %v10511_v34 }
0x1f1e   :  { %10764 = vrot.lane.b32.xlu0 %v17018_v54, %s15640_s20 }
0x1f1f   :  { %10916 = vrot.lane.b32.xlu1 %v17020_v48, %s15640_s20 }
0x1f23   :  { %11068 = vrot.lane.b32.xlu1 %v17028_v53, %s15640_s20 }
0x1f5a   :  { %v10450_v16 = vpop.xlane.xlu1 %10449 }
0x1f5b   :  { %v10472_v25 = vsub.f32 %v9912_v10, %v10450_v16 }
0x1f5d   :  { %v10480_v26 = vmul.f32 1.442695, %v10472_v25 }
0x1f5e   :  { %v10456_v17 = vpop.xlane.xlu0 %10455 }
0x1f5f   :  { %15474 = vpow2.f32 %v10480_v26  ;;  %v10474_v0 = vsub.f32 %v10064_v20, %v10456_v17  ;;  %v11269_v20 = vld [vmem:[#allocation2 + $0xe0] sm:$0xff] }
0x1f61   :  { %v10484_v27 = vmul.f32 1.442695, %v10474_v0 }
0x1f62   :  { %v10462_v28 = vpop.xlane.xlu1 %10461 }
0x1f63   :  { %15476 = vpow2.f32 %v10484_v27  ;;  %v10476_v29 = vsub.f32 %v10216_v31, %v10462_v28  ;;  %v15187_v31 = vpack.c.bf16 %v11270_v11, %v11269_v20  ;;  %v13650_v28 = vld [vmem:[%s17588_s2 + $0x7] ss:$0 sm:$0xff] }
0x1f65   :  { %v10488_v60 = vmul.f32 1.442695, %v10476_v29 }
0x1f66   :  { %v10468_v21 = vpop.xlane.xlu0 %10467  ;;  %v10613_v32 = vpop.permute.xlu1 %10612 }
0x1f67   :  { %15478 = vpow2.f32 %v10488_v60  ;;  %v10478_v54 = vsub.f32 %v10368_v41, %v10468_v21  ;;  %14836 = vmatpush3.msra.mxu1 %v10613_v32  ;;  %v11272_v41 = vld [vmem:[#allocation2 + $0xf8] sm:$0xff] }
0x1f68   :  { %14845 = vmatprep.subr.mxu1 %v15634_v3  ;;  %v15191_v61 = vpack.c.bf16 %v11272_v41, %v11271_v1 }
0x1f69   :  { %v17145_v48 = vpop.eup %15474  ;;  %v10492_v53 = vmul.f32 1.442695, %v10478_v54  ;;  %v11175_v54 = vld [vmem:[#allocation5 + $0x60] sm:$0xff] }
0x1f6a   :  { %v10496_v33 = vsel %vm364_vm2, %v17145_v48, 0.0 }
0x1f6b   :  { %15480 = vpow2.f32 %v10492_v53  ;;  %10497 = vadd.xlane.f32.xlu0 %v10496_v33  ;;  %v11177_v33 = vld [vmem:[#allocation5 + $0x70] sm:$0xff] }
0x1f6d   :  { %v17149_v49 = vpop.eup %15476 }
0x1f6e   :  { %v10502_v38 = vsel %vm364_vm2, %v17149_v49, 0.0 }
0x1f6f   :  { %10503 = vadd.xlane.f32.xlu1 %v10502_v38 }
0x1f71   :  { %v17153_v40 = vpop.eup %15478 }
0x1f72   :  { %v10508_v50 = vsel %vm364_vm2, %v17153_v40, 0.0 }
0x1f73   :  { %10509 = vadd.xlane.f32.xlu0 %v10508_v50 }
0x1f75   :  { %v17157_v37 = vpop.eup %15480 }
0x1f76   :  { %v10514_v39 = vsel %vm364_vm2, %v17157_v37, 0.0 }
0x1f77   :  { %10515 = vadd.xlane.f32.xlu0 %v10514_v39 }
0x1f80   :  { %10536 = vrot.lane.b32.xlu1 %v17006_v47, %s15640_s20 }
0x1f84   :  { %10840 = vrot.lane.b32.xlu1 %v17040_v57, %s15640_s20 }
0x1f88   :  { %10992 = vrot.lane.b32.xlu1 %v17042_v58, %s15640_s20 }
0x1f8d   :  { %10688 = vrot.lane.b32.xlu0 %v17032_v55, %s15640_s20  ;;  %v10507_v42 = vpop.xlane.xlu0 %10506 }
0x1f95   :  { %v10519_v36 = vpop.xlane.xlu0 %10518 }
0x1f97   :  { %v10501_v59 = vpop.xlane.xlu1 %10500 }
0x1f98   :  { %15482 = vrcp.f32 %v10501_v59 }
0x1f99   :  { %15484 = vrcp.f32 %v10507_v42  ;;  %v10765_v46 = vpop.permute.xlu0 %10764 }
0x1f9b   :  { %v10513_v9 = vpop.xlane.xlu1 %10512 }
0x1f9c   :  { %15486 = vrcp.f32 %v10513_v9 }
0x1f9d   :  { %15488 = vrcp.f32 %v10519_v36 }
0x1f9f   :  { %v10917_v57 = vpop.permute.xlu1 %10916 }
0x1fa2   :  { %v15483_v10 = vpop.eup %15482 }
0x1fa3   :  { %v10529_v18 = vmul.f32 %v15483_v10, %v15469_v63  ;;  %v15485_v47 = vpop.eup %15484  ;;  %v11069_v56 = vpop.permute.xlu1 %11068 }
0x1fa4   :  { %v10531_v55 = vmul.f32 %v15485_v47, %v17125_v19 }
0x1fa5   :  { %14838 = vmatmul.mubr.msk.f32.vlgmr.msra.gmra.mrb[122].mxu1 %vm364_vm2, %v10529_v18 }
0x1fa6   :  { %14846 = vmatpush3.msra.mxu1 %v10765_v46  ;;  %14847 = vmatprep.mubr.msk.f32.mxu1 %vm15635_vm1, %v15634_v3  ;;  %v15487_v58 = vpop.eup %15486 }
0x1fa7   :  { %14855 = vmatprep.subr.mxu1 %v15634_v3  ;;  %v10533_v13 = vmul.f32 %v15487_v58, %v17134_v24  ;;  %v15489_v51 = vpop.eup %15488 }
0x1fa8   :  { %v10535_v30 = vmul.f32 %v15489_v51, %v17129_v22 }
0x1fa9   :  { %14848 = vmatmul.mubr.msk.f32.vlgmr.msra.gmra.mrb[124].mxu1 %vm364_vm2, %v10531_v55 }
0x1faa   :  { %14856 = vmatpush3.msra.mxu1 %v10917_v57  ;;  %14857 = vmatprep.mubr.msk.f32.mxu1 %vm15635_vm1, %v15634_v3 }
0x1fab   :  { %14865 = vmatprep.subr.mxu1 %v15634_v3 }
0x1fad   :  { %14858 = vmatmul.mubr.msk.f32.vlgmr.msra.gmra.mrb[126].mxu1 %vm364_vm2, %v10533_v13 }
0x1fae   :  { %14866 = vmatpush3.msra.mxu1 %v11069_v56  ;;  %14867 = vmatprep.mubr.msk.f32.mxu1 %vm15635_vm1, %v15634_v3 }
0x1faf   :  { %15188 = vmatprep.subr.bf16.mxu1 %v15187_v31 }
0x1fb1   :  { %14868 = vmatmul.mubr.msk.f32.vlgmr.msra.gmra.mrb[128].mxu1 %vm364_vm2, %v10535_v30 }
0x1fb2   :  { %15190 = vmatpush3.bf16.msra.mxu1 %v15187_v31  ;;  %14889 = vmatprep.mubr.msk.f32.mxu1 %vm71_vm0, %v9730_v44 }
0x1fb3   :  { %15192 = vmatprep.subr.bf16.mxu1 %v15191_v61 }
0x1fb6   :  { %15194 = vmatpush3.bf16.msra.mxu1 %v15191_v61 }
0x1fb7   :  { %14897 = vmatprep.subr.mxu1 %v15634_v3 }
0x1fb9   :  { %14890 = vmatmul.mubr.msk.f32.vlgmr.msra.gmra.mrb[130].mxu1 %vm71_vm0, %v9735_v5 }
0x1fba   :  { %14899 = vmatprep.mubr.msk.f32.mxu1 %vm15635_vm1, %v15634_v3 }
0x1ff8   :  { %v10498_v14 = vpop.xlane.xlu0 %10497 }
0x1ff9   :  { %15490 = vrcp.f32 %v10498_v14 }
0x1ffc   :  { %v10504_v2 = vpop.xlane.xlu1 %10503 }
0x1ffd   :  { %15492 = vrcp.f32 %v10504_v2 }
0x2000   :  { %v10510_v43 = vpop.xlane.xlu0 %10509  ;;  %v10537_v6 = vpop.permute.xlu1 %10536 }
0x2001   :  { %15494 = vrcp.f32 %v10510_v43  ;;  %14831 = vmatpush3.msra.mxu0 %v10537_v6 }
0x2002   :  { %14840 = vmatprep.subr.mxu0 %v15634_v3 }
0x2003   :  { %v15491_v8 = vpop.eup %15490 }
0x2004   :  { %v10528_v12 = vmul.f32 %v15491_v8, %v17145_v48  ;;  %v10516_v4 = vpop.xlane.xlu0 %10515  ;;  %v10841_v15 = vpop.permute.xlu1 %10840  ;;  %v11176_v48 = vld [vmem:[#allocation5 + $0x68] sm:$0xff] }
0x2005   :  { %15496 = vrcp.f32 %v10516_v4  ;;  %v15179_v53 = vpack.c.bf16 %v11176_v48, %v11175_v54 }
0x2006   :  { %14833 = vmatmul.mubr.msk.f32.vlgmr.msra.gmra.mrb[120].mxu0 %vm364_vm2, %v10528_v12 }
0x2007   :  { %v15493_v7 = vpop.eup %15492  ;;  %14842 = vmatprep.mubr.msk.f32.mxu0 %vm15635_vm1, %v15634_v3 }
0x2008   :  { %v10530_v35 = vmul.f32 %v15493_v7, %v17149_v49  ;;  %v10689_v19 = vpop.permute.xlu0 %10688  ;;  %v10993_v22 = vpop.permute.xlu1 %10992  ;;  %v11178_v49 = vld [vmem:[#allocation5 + $0x78] sm:$0xff] }
0x2009   :  { %14841 = vmatpush3.msra.mxu0 %v10689_v19  ;;  %v15183_v38 = vpack.c.bf16 %v11178_v49, %v11177_v33 }
0x200a   :  { %14843 = vmatmul.mubr.msk.f32.vlgmr.msra.gmra.mrb[122].mxu0 %vm364_vm2, %v10530_v35  ;;  %14850 = vmatprep.subr.mxu0 %v15634_v3 }
0x200b   :  { %v15495_v45 = vpop.eup %15494  ;;  %14851 = vmatpush3.msra.mxu0 %v10841_v15  ;;  %14852 = vmatprep.mubr.msk.f32.mxu0 %vm15635_vm1, %v15634_v3 }
0x200c   :  { %v10532_v63 = vmul.f32 %v15495_v45, %v17153_v40  ;;  %14860 = vmatprep.subr.mxu0 %v15634_v3 }
0x200e   :  { %14853 = vmatmul.mubr.msk.f32.vlgmr.msra.gmra.mrb[124].mxu0 %vm364_vm2, %v10532_v63 }
0x200f   :  { %v15497_v23 = vpop.eup %15496  ;;  %14861 = vmatpush3.msra.mxu0 %v10993_v22  ;;  %14862 = vmatprep.mubr.msk.f32.mxu0 %vm15635_vm1, %v15634_v3 }
0x2010   :  { %v10534_v62 = vmul.f32 %v15497_v23, %v17157_v37  ;;  %15180 = vmatprep.subr.bf16.mxu0 %v15179_v53 }
0x2012   :  { %14863 = vmatmul.mubr.msk.f32.vlgmr.msra.gmra.mrb[126].mxu0 %vm364_vm2, %v10534_v62 }
0x2013   :  { %15182 = vmatpush3.bf16.msra.mxu0 %v15179_v53 }
0x2014   :  { %15184 = vmatprep.subr.bf16.mxu0 %v15183_v38 }
0x2017   :  { %15186 = vmatpush3.bf16.msra.mxu0 %v15183_v38 }
0x2018   :  { %14892 = vmatprep.subr.mxu0 %v15634_v3 }
0x2078   :  { %v10684_v24 = vpop.f32.mrb[122].mxu1 }
0x2079   :  { %v14839_v34 = vpop.f32.mrb[123].mxu1 }
0x207c   :  { %v10836_v16 = vpop.f32.mrb[124].mxu1 }
0x207d   :  { %v14849_v25 = vpop.f32.mrb[125].mxu1 }
0x2080   :  { %v10988_v26 = vpop.f32.mrb[126].mxu1 }
0x2081   :  { %v14859_v17 = vpop.f32.mrb[127].mxu1 }
0x2084   :  { %v11140_v0 = vpop.f32.mrb[128].mxu1 }
0x2085   :  { %v14869_v27 = vpop.f32.mrb[129].mxu1 }
0x208c   :  { %v14891_v29 = vpop.f32.mrb[130].mxu1 }
0x208d   :  { %v17214_v60 = vadd.f32 %v14891_v29, %v13650_v28  ;;  %v11353_v21 = vpop.f32.mrb[131].mxu1 }
0x208e   :  { %v17216_v32 = vadd.f32 %v13650_v28, %v11353_v21 }
0x208f   :  { %11366 = vrot.lane.b32.xlu1 %v17214_v60, %s15636_s1 }
0x2090   :  { %11364 = vrot.lane.b32.xlu0 %v17216_v32, %s15636_s1 }
0x2093   :  { %11370 = vrot.lane.b32.xlu1 %v17214_v60, %s15637_s14 }
0x2094   :  { %11368 = vrot.lane.b32.xlu0 %v17216_v32, %s15637_s14  ;;  %s15644_s14 = smov [#allocation7]  }
0x2097   :  { %11374 = vrot.lane.b32.xlu1 %v17214_v60, %s15638_s18 }
0x2098   :  { %11372 = vrot.lane.b32.xlu0 %v17216_v32, %s15638_s18  ;;  %s13399_s18 = sshll.u32 %s15644_s14, 4  ;;  %s13400_s18 = int_to_ptr.vmem [resolvable:$true] %s13399_s18 }
0x2099   :  { %p15607_p3 = scmp.lt.s32.totalorder %s13400_s18, %s13400_s18 }
0x209b   :  { %11148 = vrot.lane.b32.xlu1 %v10836_v16, %s15632_s24 }
0x209f   :  { %11156 = vrot.lane.b32.xlu1 %v10988_v26, %s15641_s21 }
0x20a3   :  { %11164 = vrot.lane.b32.xlu1 %v11140_v0, %s15642_s22 }
0x20a7   :  { %11452 = vrot.lane.b32.xlu1 %v17214_v60, %s15639_s19 }
0x20d9   :  { %v10608_v40 = vpop.f32.mrb[120].mxu0 }
0x20da   :  { %v14834_v50 = vpop.f32.mrb[121].mxu0 }
0x20dd   :  { %v10760_v37 = vpop.f32.mrb[122].mxu0 }
0x20de   :  { %11146 = vrot.lane.b32.xlu0 %v10760_v37, %s15632_s24  ;;  %v14844_v39 = vpop.f32.mrb[123].mxu0 }
0x20e1   :  { %v10912_v42 = vpop.f32.mrb[124].mxu0 }
0x20e2   :  { %11154 = vrot.lane.b32.xlu0 %v10912_v42, %s15641_s21  ;;  %v14854_v59 = vpop.f32.mrb[125].mxu0 }
0x20e5   :  { %v11064_v9 = vpop.f32.mrb[126].mxu0 }
0x20e6   :  { %11162 = vrot.lane.b32.xlu0 %v11064_v9, %s15642_s22  ;;  %v14864_v36 = vpop.f32.mrb[127].mxu0 }
0x20ea   :  { %11376 = vrot.lane.b32.xlu0 %v17216_v32, %s15639_s19 }
0x2101   :  { %v17241_v10 = vpop.permute.xlu1 %11366 }
0x2102   :  { %v17243_v18 = vpop.permute.xlu0 %11364  ;;  %11604 = vrot.lane.b32.xlu1 %v17241_v10, %s15639_s19 }
0x2103   :  { %11528 = vrot.lane.b32.xlu0 %v17243_v18, %s15639_s19 }
0x2105   :  { %v17249_v47 = vpop.permute.xlu1 %11370 }
0x2106   :  { %v17251_v46 = vpop.permute.xlu0 %11368  ;;  %11756 = vrot.lane.b32.xlu1 %v17249_v47, %s15639_s19 }
0x2107   :  { %11680 = vrot.lane.b32.xlu0 %v17251_v46, %s15639_s19 }
0x2109   :  { %v17257_v55 = vpop.permute.xlu1 %11374 }
0x210a   :  { %v17259_v57 = vpop.permute.xlu0 %11372  ;;  %11908 = vrot.lane.b32.xlu1 %v17257_v55, %s15639_s19 }
0x210b   :  { %11832 = vrot.lane.b32.xlu0 %v17259_v57, %s15639_s19  ;;  %s15602_s19 = scalar_lea.vmem %s13400_s18, 512 }
0x210c   :  { %p15603_p2 = scmp.ne.s32.totalorder %s13400_s18, %s15602_s19  ;;  %p15608_p4 = scmp.lt.s32.totalorder %s15602_s19, %s15602_s19 }
0x210d   :  { %v11149_v58 = vpop.permute.xlu1 %11148 }
0x210e   :  { %v11169_v20 = vsel %vm364_vm2, %v10684_v24, %v11149_v58  ;;  %p15609_p5 = por %p15608_p4, %p15607_p3 }
0x2110   :  { %p15610_p6 = pnand %p15609_p5, %p15603_p2 }
0x2111   :  { %v11157_v11 = vpop.permute.xlu1 %11156 }
0x2112   :  { %v11171_v13 = vsel %vm1693_vm3, %v11169_v20, %v11157_v11 }
0x2115   :  { %v11165_v31 = vpop.permute.xlu1 %11164 }
0x2116   :  { %v11173_v51 = vsel %vm1696_vm4, %v11171_v13, %v11165_v31 }
0x2119   :  { %v11453_v1 = vpop.permute.xlu1 %11452 }
0x211a   :  { %14898 = vmatpush3.xpose.msk.msra.mxu1 %vm364_vm2, %v11453_v1 }
0x211b   :  { %14907 = vmatprep.subr.mxu1 %v15634_v3 }
0x211d   :  { %14900 = vmatmul.mubr.msk.f32.vlgmr.msra.gmra.mrb[132].mxu1 %vm364_vm2, %v17214_v60 }
0x211e   :  { %14909 = vmatprep.mubr.msk.f32.mxu1 %vm15635_vm1, %v15634_v3 }
0x2150   :  { %v11147_v41 = vpop.permute.xlu0 %11146 }
0x2151   :  { %v11168_v56 = vsel %vm364_vm2, %v10608_v40, %v11147_v41 }
0x2154   :  { %v11155_v52 = vpop.permute.xlu0 %11154 }
0x2155   :  { %v11170_v30 = vsel %vm1693_vm3, %v11168_v56, %v11155_v52 }
0x2158   :  { %v11163_v61 = vpop.permute.xlu0 %11162 }
0x2159   :  { %v11172_v44 = vsel %vm1696_vm4, %v11170_v30, %v11163_v61 }
0x215a   :  { %14878 = vmatprep.mubr.msk.f32.mxu0 %vm71_vm0, %v11172_v44 }
0x215b   :  { %14879 = vmatmul.mubr.msk.f32.vlgmr.msra.gmra.mrb[128].mxu0 %vm71_vm0, %v11173_v51 }
0x215c   :  { %v11377_v5 = vpop.permute.xlu0 %11376  ;;  %14894 = vmatprep.mubr.msk.f32.mxu0 %vm15635_vm1, %v15634_v3 }
0x215d   :  { %14893 = vmatpush3.xpose.msk.msra.mxu0 %vm364_vm2, %v11377_v5 }
0x215e   :  { %14902 = vmatprep.subr.mxu0 %v15634_v3 }
0x2160   :  { %14895 = vmatmul.mubr.msk.f32.vlgmr.msra.gmra.mrb[130].mxu0 %vm364_vm2, %v17216_v32 }
0x2161   :  { %14904 = vmatprep.mubr.msk.f32.mxu0 %vm15635_vm1, %v15634_v3 }
0x2174   :  { %v11605_v14 = vpop.permute.xlu1 %11604 }
0x2175   :  { %v11529_v2 = vpop.permute.xlu0 %11528  ;;  %14908 = vmatpush3.xpose.msk.msra.mxu1 %vm364_vm2, %v11605_v14 }
0x2176   :  { %14903 = vmatpush3.xpose.msk.msra.mxu0 %vm364_vm2, %v11529_v2  ;;  %14917 = vmatprep.subr.mxu1 %v15634_v3 }
0x2177   :  { %14912 = vmatprep.subr.mxu0 %v15634_v3 }
0x2178   :  { %14910 = vmatmul.mubr.msk.f32.vlgmr.msra.gmra.mrb[134].mxu1 %vm364_vm2, %v17241_v10  ;;  %v11757_v43 = vpop.permute.xlu1 %11756 }
0x2179   :  { %v11681_v6 = vpop.permute.xlu0 %11680  ;;  %14905 = vmatmul.mubr.msk.f32.vlgmr.msra.gmra.mrb[132].mxu0 %vm364_vm2, %v17243_v18  ;;  %14918 = vmatpush3.xpose.msk.msra.mxu1 %vm364_vm2, %v11757_v43 }
0x217a   :  { %14913 = vmatpush3.xpose.msk.msra.mxu0 %vm364_vm2, %v11681_v6  ;;  %14919 = vmatprep.mubr.msk.f32.mxu1 %vm15635_vm1, %v15634_v3 }
0x217b   :  { %14914 = vmatprep.mubr.msk.f32.mxu0 %vm15635_vm1, %v15634_v3  ;;  %14927 = vmatprep.subr.mxu1 %v15634_v3 }
0x217c   :  { %14920 = vmatmul.mubr.msk.f32.vlgmr.msra.gmra.mrb[136].mxu1 %vm364_vm2, %v17249_v47  ;;  %v11909_v8 = vpop.permute.xlu1 %11908  ;;  %14922 = vmatprep.subr.mxu0 %v15634_v3 }
0x217d   :  { %v11833_v12 = vpop.permute.xlu0 %11832  ;;  %14915 = vmatmul.mubr.msk.f32.vlgmr.msra.gmra.mrb[134].mxu0 %vm364_vm2, %v17251_v46  ;;  %14928 = vmatpush3.xpose.msk.msra.mxu1 %vm364_vm2, %v11909_v8 }
0x217e   :  { %14923 = vmatpush3.xpose.msk.msra.mxu0 %vm364_vm2, %v11833_v12  ;;  %14929 = vmatprep.mubr.msk.f32.mxu1 %vm15635_vm1, %v15634_v3 }
0x217f   :  { %14924 = vmatprep.mubr.msk.f32.mxu0 %vm15635_vm1, %v15634_v3  ;;  %14932 = vmatprep.subr.mxu0 %v15634_v3 }
0x2180   :  { %14930 = vmatmul.mubr.msk.f32.vlgmr.msra.gmra.mrb[138].mxu1 %vm364_vm2, %v17257_v55  ;;  %14937 = vmatprep.subr.mxu1 %v15634_v3 }
0x2181   :  { %14925 = vmatmul.mubr.msk.f32.vlgmr.msra.gmra.mrb[136].mxu0 %vm364_vm2, %v17259_v57  ;;  %14939 = vmatprep.mubr.msk.f32.mxu1 %vm15635_vm1, %v15634_v3 }
0x2182   :  { %14934 = vmatprep.mubr.msk.f32.mxu0 %vm15635_vm1, %v15634_v3 }
0x21f0   :  { %v11524_v4 = vpop.f32.mrb[132].mxu1 }
0x21f1   :  { %v14901_v7 = vpop.f32.mrb[133].mxu1  ;;  %v11987_v35 = vsel %vm364_vm2, %v11524_v4, -inf }
0x21f2   :  { %11988 = vmax.xlane.f32.xlu1 %v11987_v35 }
0x222e   :  { %v17324_v15 = vpop.f32.mrb[128].mxu0 }
0x222f   :  { %v17326_v19 = vpop.f32.mrb[129].mxu0 }
0x2233   :  { %v11448_v45 = vpop.f32.mrb[130].mxu0 }
0x2234   :  { %v14896_v63 = vpop.f32.mrb[131].mxu0  ;;  %v11984_v22 = vsel %vm364_vm2, %v11448_v45, -inf }
0x2235   :  { %11985 = vmax.xlane.f32.xlu0 %v11984_v22 }
0x224b   :  { %v11676_v23 = vpop.f32.mrb[134].mxu1 }
0x224c   :  { %v11600_v62 = vpop.f32.mrb[132].mxu0  ;;  %v14911_v24 = vpop.f32.mrb[135].mxu1  ;;  %v11993_v28 = vsel %vm364_vm2, %v11676_v23, -inf }
0x224d   :  { %v14906_v34 = vpop.f32.mrb[133].mxu0  ;;  %v11990_v16 = vsel %vm364_vm2, %v11600_v62, -inf }
0x224e   :  { %11991 = vmax.xlane.f32.xlu0 %v11990_v16 }
0x224f   :  { %v11828_v25 = vpop.f32.mrb[136].mxu1 }
0x2250   :  { %v11752_v26 = vpop.f32.mrb[134].mxu0  ;;  %v14921_v17 = vpop.f32.mrb[137].mxu1  ;;  %v11999_v33 = vsel %vm364_vm2, %v11828_v25, -inf }
0x2251   :  { %v14916_v0 = vpop.f32.mrb[135].mxu0  ;;  %v11996_v27 = vsel %vm364_vm2, %v11752_v26, -inf }
0x2252   :  { %11997 = vmax.xlane.f32.xlu1 %v11996_v27  ;;  %11994 = vmax.xlane.f32.xlu0 %v11993_v28 }
0x2253   :  { %v11980_v29 = vpop.f32.mrb[138].mxu1 }
0x2254   :  { %v11904_v21 = vpop.f32.mrb[136].mxu0  ;;  %v14931_v54 = vpop.f32.mrb[139].mxu1  ;;  %v12005_v49 = vsel %vm364_vm2, %v11980_v29, -inf }
0x2255   :  { %v14926_v48 = vpop.f32.mrb[137].mxu0  ;;  %v12002_v53 = vsel %vm364_vm2, %v11904_v21, -inf }
0x2256   :  { %12003 = vmax.xlane.f32.xlu1 %v12002_v53  ;;  %12000 = vmax.xlane.f32.xlu0 %v11999_v33 }
0x225a   :  { %12006 = vmax.xlane.f32.xlu0 %v12005_v49 }
0x2267   :  { %12072 = vrot.lane.b32.xlu1 %v17216_v32, %s15640_s20 }
0x226b   :  { %12224 = vrot.lane.b32.xlu1 %v17243_v18, %s15640_s20 }
0x226f   :  { %12300 = vrot.lane.b32.xlu1 %v17241_v10, %s15640_s20 }
0x2270   :  { %12148 = vrot.lane.b32.xlu0 %v17214_v60, %s15640_s20 }
0x2273   :  { %12452 = vrot.lane.b32.xlu1 %v17249_v47, %s15640_s20 }
0x2274   :  { %12376 = vrot.lane.b32.xlu0 %v17251_v46, %s15640_s20 }
0x227f   :  { %v11989_v38 = vpop.xlane.xlu1 %11988 }
0x2280   :  { %v12009_v40 = vsub.f32 %v11524_v4, %v11989_v38 }
0x2282   :  { %v12018_v50 = vmul.f32 1.442695, %v12009_v40 }
0x2284   :  { %15498 = vpow2.f32 %v12018_v50 }
0x228e   :  { %v17347_v32 = vpop.eup %15498 }
0x228f   :  { %v12035_v37 = vsel %vm364_vm2, %v17347_v32, 0.0 }
0x2293   :  { %12036 = vadd.xlane.f32.xlu0 %v12035_v37 }
0x22c2   :  { %v11986_v39 = vpop.xlane.xlu0 %11985 }
0x22c3   :  { %v12008_v42 = vsub.f32 %v11448_v45, %v11986_v39 }
0x22c5   :  { %v12016_v59 = vmul.f32 1.442695, %v12008_v42 }
0x22c7   :  { %15500 = vpow2.f32 %v12016_v59 }
0x22d1   :  { %v17351_v60 = vpop.eup %15500 }
0x22d2   :  { %v12032_v9 = vsel %vm364_vm2, %v17351_v60, 0.0 }
0x22d3   :  { %12033 = vadd.xlane.f32.xlu1 %v12032_v9 }
0x22db   :  { %v11992_v36 = vpop.xlane.xlu0 %11991 }
0x22dc   :  { %v12010_v10 = vsub.f32 %v11600_v62, %v11992_v36 }
0x22de   :  { %v12020_v18 = vmul.f32 1.442695, %v12010_v10 }
0x22df   :  { %v11995_v47 = vpop.xlane.xlu0 %11994  ;;  %v11998_v46 = vpop.xlane.xlu1 %11997 }
0x22e0   :  { %15502 = vpow2.f32 %v12020_v18  ;;  %v12011_v58 = vsub.f32 %v11676_v23, %v11995_v47  ;;  %v12012_v20 = vsub.f32 %v11752_v26, %v11998_v46 }
0x22e2   :  { %v12022_v11 = vmul.f32 1.442695, %v12011_v58  ;;  %v12024_v13 = vmul.f32 1.442695, %v12012_v20  ;;  %v12711_v58 = vld [vmem:[#allocation5 + $0xe0] sm:$0xff]  ;;  %v12712_v20 = vld [vmem:[#allocation5 + $0xe8] sm:$0xff] }
0x22e3   :  { %v12001_v31 = vpop.xlane.xlu0 %12000  ;;  %v12004_v51 = vpop.xlane.xlu1 %12003 }
0x22e4   :  { %15504 = vpow2.f32 %v12022_v11  ;;  %v12013_v1 = vsub.f32 %v11828_v25, %v12001_v31  ;;  %v12014_v41 = vsub.f32 %v11904_v21, %v12004_v51  ;;  %v15195_v11 = vpack.c.bf16 %v12712_v20, %v12711_v58  ;;  %v12714_v31 = vld [vmem:[#allocation5 + $0xf8] sm:$0xff] }
0x22e5   :  { %15506 = vpow2.f32 %v12024_v13  ;;  %v12713_v13 = vld [vmem:[#allocation5 + $0xf0] sm:$0xff] }
0x22e6   :  { %v12026_v52 = vmul.f32 1.442695, %v12013_v1  ;;  %v12028_v56 = vmul.f32 1.442695, %v12014_v41  ;;  %v15199_v51 = vpack.c.bf16 %v12714_v31, %v12713_v13 }
0x22e7   :  { %v12007_v30 = vpop.xlane.xlu0 %12006  ;;  %v12073_v61 = vpop.permute.xlu1 %12072 }
0x22e8   :  { %15508 = vpow2.f32 %v12026_v52  ;;  %v12015_v44 = vsub.f32 %v11980_v29, %v12007_v30  ;;  %14933 = vmatpush3.msra.mxu0 %v12073_v61 }
0x22e9   :  { %15510 = vpow2.f32 %v12028_v56  ;;  %14942 = vmatprep.subr.mxu0 %v15634_v3 }
0x22ea   :  { %v15503_v5 = vpop.eup %15502  ;;  %v12030_v14 = vmul.f32 1.442695, %v12015_v44 }
0x22eb   :  { %v12149_v2 = vpop.permute.xlu0 %12148  ;;  %v12038_v43 = vsel %vm364_vm2, %v15503_v5, 0.0  ;;  %v12225_v34 = vpop.permute.xlu1 %12224 }
0x22ec   :  { %15512 = vpow2.f32 %v12030_v14  ;;  %12039 = vadd.xlane.f32.xlu1 %v12038_v43  ;;  %14938 = vmatpush3.msra.mxu1 %v12149_v2 }
0x22ed   :  { %14947 = vmatprep.subr.mxu1 %v15634_v3 }
0x22ee   :  { %v15505_v6 = vpop.eup %15504 }
0x22ef   :  { %v15507_v8 = vpop.eup %15506  ;;  %v12041_v12 = vsel %vm364_vm2, %v15505_v6, 0.0  ;;  %v12377_v62 = vpop.permute.xlu0 %12376 }
0x22f0   :  { %12042 = vadd.xlane.f32.xlu0 %v12041_v12  ;;  %v12044_v4 = vsel %vm364_vm2, %v15507_v8, 0.0  ;;  %v12301_v26 = vpop.permute.xlu1 %12300  ;;  %v15554_v12 = vld [vmem:[%s17586_s0] sm:$0xff] }
0x22f1   :  { %12045 = vadd.xlane.f32.xlu1 %v12044_v4 }
0x22f2   :  { %v15509_v7 = vpop.eup %15508 }
0x22f3   :  { %v15511_v35 = vpop.eup %15510  ;;  %v12047_v45 = vsel %vm364_vm2, %v15509_v7, 0.0 }
0x22f4   :  { %12048 = vadd.xlane.f32.xlu0 %v12047_v45  ;;  %v12050_v63 = vsel %vm364_vm2, %v15511_v35, 0.0  ;;  %v15555_v45 = vld [vmem:[%s17586_s0 + $0x10] sm:$0xff] }
0x22f5   :  { %12051 = vadd.xlane.f32.xlu1 %v12050_v63 }
0x22f6   :  { %v17362_v22 = vpop.eup %15512 }
0x22f7   :  { %v12053_v23 = vsel %vm364_vm2, %v17362_v22, 0.0 }
0x22f8   :  { %12054 = vadd.xlane.f32.xlu0 %v12053_v23 }
0x2306   :  { %12604 = vrot.lane.b32.xlu1 %v17257_v55, %s15640_s20  ;;  %v12453_v55 = vpop.permute.xlu1 %12452 }
0x230e   :  { %12528 = vrot.lane.b32.xlu0 %v17259_v57, %s15640_s20 }
0x2320   :  { %v12037_v24 = vpop.xlane.xlu0 %12036 }
0x2321   :  { %15514 = vrcp.f32 %v12037_v24 }
0x232b   :  { %v15515_v16 = vpop.eup %15514 }
0x232c   :  { %v12065_v25 = vmul.f32 %v15515_v16, %v17347_v32 }
0x232e   :  { %14940 = vmatmul.mubr.msk.f32.vlgmr.msra.gmra.mrb[140].mxu1 %vm364_vm2, %v12065_v25 }
0x232f   :  { %14948 = vmatpush3.msra.mxu1 %v12301_v26  ;;  %14949 = vmatprep.mubr.msk.f32.mxu1 %vm15635_vm1, %v15634_v3 }
0x2330   :  { %14957 = vmatprep.subr.mxu1 %v15634_v3 }
0x2360   :  { %v12034_v17 = vpop.xlane.xlu1 %12033 }
0x2361   :  { %15516 = vrcp.f32 %v12034_v17 }
0x236b   :  { %v15517_v57 = vpop.eup %15516 }
0x236c   :  { %v12064_v0 = vmul.f32 %v15517_v57, %v17351_v60 }
0x236e   :  { %14935 = vmatmul.mubr.msk.f32.vlgmr.msra.gmra.mrb[138].mxu0 %vm364_vm2, %v12064_v0 }
0x236f   :  { %14943 = vmatpush3.msra.mxu0 %v12225_v34  ;;  %14944 = vmatprep.mubr.msk.f32.mxu0 %vm15635_vm1, %v15634_v3 }
0x2370   :  { %14952 = vmatprep.subr.mxu0 %v15634_v3 }
0x2379   :  { %v12040_v27 = vpop.xlane.xlu1 %12039 }
0x237a   :  { %15518 = vrcp.f32 %v12040_v27 }
0x237d   :  { %v12043_v28 = vpop.xlane.xlu0 %12042 }
0x237e   :  { %15520 = vrcp.f32 %v12043_v28  ;;  %v12046_v29 = vpop.xlane.xlu1 %12045 }
0x237f   :  { %15522 = vrcp.f32 %v12046_v29 }
0x2381   :  { %v12049_v21 = vpop.xlane.xlu0 %12048 }
0x2382   :  { %15524 = vrcp.f32 %v12049_v21  ;;  %v12052_v54 = vpop.xlane.xlu1 %12051 }
0x2383   :  { %15526 = vrcp.f32 %v12052_v54 }
0x2384   :  { %v15519_v48 = vpop.eup %15518 }
0x2385   :  { %v12066_v53 = vmul.f32 %v15519_v48, %v15503_v5  ;;  %v12055_v33 = vpop.xlane.xlu0 %12054 }
0x2386   :  { %15528 = vrcp.f32 %v12055_v33  ;;  %v12605_v60 = vpop.permute.xlu1 %12604 }
0x2387   :  { %14945 = vmatmul.mubr.msk.f32.vlgmr.msra.gmra.mrb[140].mxu0 %vm364_vm2, %v12066_v53 }
0x2388   :  { %v15521_v49 = vpop.eup %15520  ;;  %14953 = vmatpush3.msra.mxu0 %v12377_v62  ;;  %14954 = vmatprep.mubr.msk.f32.mxu0 %vm15635_vm1, %v15634_v3 }
0x2389   :  { %v15523_v38 = vpop.eup %15522  ;;  %v12067_v40 = vmul.f32 %v15521_v49, %v15505_v6  ;;  %14962 = vmatprep.subr.mxu0 %v15634_v3  ;;  %v12529_v32 = vpop.permute.xlu0 %12528  ;;  %v13646_v6 = vld [vmem:[%s17590_s4 + $0x3] ss:$0 sm:$0xff]  ;;  %v13678_v49 = vld [vmem:[%s17590_s4 + $0x7] ss:$0 sm:$0xff] }
0x238a   :  { %v12068_v50 = vmul.f32 %v15523_v38, %v15507_v8  ;;  %v11260_v8 = vadd.f32 %v13646_v6, %v17326_v19 }
0x238b   :  { %14950 = vmatmul.mubr.msk.f32.vlgmr.msra.gmra.mrb[142].mxu1 %vm364_vm2, %v12067_v40 }
0x238c   :  { %v15525_v37 = vpop.eup %15524  ;;  %14955 = vmatmul.mubr.msk.f32.vlgmr.msra.gmra.mrb[142].mxu0 %vm364_vm2, %v12068_v50  ;;  %14958 = vmatpush3.msra.mxu1 %v12453_v55  ;;  %v17410_v4 = vadd.f32 %v15554_v12, %v11260_v8 }
0x238d   :  { %v15527_v39 = vpop.eup %15526  ;;  %v12069_v42 = vmul.f32 %v15525_v37, %v15509_v7  ;;  %14963 = vmatpush3.msra.mxu0 %v12529_v32  ;;  %14959 = vmatprep.mubr.msk.f32.mxu1 %vm15635_vm1, %v15634_v3  ;;  %v11265_v7 = vadd.f32 %v17324_v15, %v13646_v6 }
0x238e   :  { %v12070_v59 = vmul.f32 %v15527_v39, %v15511_v35  ;;  %14964 = vmatprep.mubr.msk.f32.mxu0 %vm15635_vm1, %v15634_v3  ;;  %14967 = vmatprep.subr.mxu1 %v15634_v3  ;;  %v12812_v35 = vsel %vm71_vm0, %v17410_v4, 0.0  ;;  %v15556_v39 = vld [vmem:[%s17586_s0 + $0x8] sm:$0xff] }
0x238f   :  { %14960 = vmatmul.mubr.msk.f32.vlgmr.msra.gmra.mrb[144].mxu1 %vm364_vm2, %v12069_v42  ;;  %15196 = vmatprep.subr.bf16.mxu0 %v15195_v11  ;;  %v17418_v63 = vadd.f32 %v15555_v45, %v11265_v7 }
0x2390   :  { %v15529_v9 = vpop.eup %15528  ;;  %14965 = vmatmul.mubr.msk.f32.vlgmr.msra.gmra.mrb[144].mxu0 %vm364_vm2, %v12070_v59  ;;  %14968 = vmatpush3.msra.mxu1 %v12605_v60 }
0x2391   :  { %v12071_v36 = vmul.f32 %v15529_v9, %v17362_v22  ;;  %14969 = vmatprep.mubr.msk.f32.mxu1 %vm15635_vm1, %v15634_v3  ;;  %15198 = vmatpush3.bf16.msra.mxu0 %v15195_v11  ;;  %v12815_v19 = vsel %vm71_vm0, %v17418_v63, 0.0  ;;  %v15557_v9 = vld [vmem:[%s17586_s0 + $0x18] sm:$0xff] }
0x2392   :  { %15200 = vmatprep.subr.bf16.mxu0 %v15199_v51 }
0x2393   :  { %14970 = vmatmul.mubr.msk.f32.vlgmr.msra.gmra.mrb[146].mxu1 %vm364_vm2, %v12071_v36 }
0x2395   :  { %15202 = vmatpush3.bf16.msra.mxu0 %v15199_v51  ;;  %v12854_v51 = vld [vmem:[%s17592_s6] sm:$0xff] }
0x2401   :  { %v12220_v10 = vpop.f32.mrb[140].mxu1 }
0x2402   :  { %v14941_v18 = vpop.f32.mrb[141].mxu1 }
0x2403   :  { %v13683_v18 = vld [vmem:[%s17591_s5 + $0x2] ss:$0 sm:$0xff] }
0x2441   :  { %v12144_v47 = vpop.f32.mrb[138].mxu0 }
0x2442   :  { %v14936_v46 = vpop.f32.mrb[139].mxu0 }
0x2443   :  { %v13684_v46 = vld [vmem:[%s17591_s5 + $0x3] ss:$0 sm:$0xff] }
0x245a   :  { %v12296_v1 = vpop.f32.mrb[140].mxu0 }
0x245b   :  { %12682 = vrot.lane.b32.xlu0 %v12296_v1, %s15632_s24  ;;  %v14946_v3 = vpop.f32.mrb[141].mxu0  ;;  %v12855_v1 = vld [vmem:[%s17592_s6 + $0x8] sm:$0xff] }
0x245c   :  { %v15203_v3 = vpack.c.bf16 %v12855_v1, %v12854_v51 }
0x245e   :  { %v12372_v41 = vpop.f32.mrb[142].mxu1  ;;  %15204 = vmatprep.subr.bf16.mxu1 %v15203_v3 }
0x245f   :  { %v12448_v52 = vpop.f32.mrb[142].mxu0  ;;  %12684 = vrot.lane.b32.xlu1 %v12372_v41, %s15632_s24  ;;  %v14951_v56 = vpop.f32.mrb[143].mxu1  ;;  %v12856_v41 = vld [vmem:[%s17592_s6 + $0x10] sm:$0xff]  ;;  %15206 = vmatpush3.bf16.msra.mxu1 %v15203_v3 }
0x2460   :  { %12690 = vrot.lane.b32.xlu0 %v12448_v52, %s15641_s21  ;;  %v14956_v30 = vpop.f32.mrb[143].mxu0  ;;  %v12857_v52 = vld [vmem:[%s17592_s6 + $0x18] sm:$0xff] }
0x2461   :  { %v15207_v56 = vpack.c.bf16 %v12857_v52, %v12856_v41 }
0x2462   :  { %v12524_v61 = vpop.f32.mrb[144].mxu1 }
0x2463   :  { %v12600_v44 = vpop.f32.mrb[144].mxu0  ;;  %12692 = vrot.lane.b32.xlu1 %v12524_v61, %s15641_s21  ;;  %v14961_v5 = vpop.f32.mrb[145].mxu1  ;;  %15208 = vmatprep.subr.bf16.mxu1 %v15207_v56 }
0x2464   :  { %12698 = vrot.lane.b32.xlu0 %v12600_v44, %s15642_s22  ;;  %v14966_v14 = vpop.f32.mrb[145].mxu0  ;;  %15210 = vmatpush3.bf16.msra.mxu1 %v15207_v56 }
0x2466   :  { %v12676_v2 = vpop.f32.mrb[146].mxu1 }
0x2467   :  { %12700 = vrot.lane.b32.xlu1 %v12676_v2, %s15642_s22  ;;  %v14971_v43 = vpop.f32.mrb[147].mxu1 }
0x2483   :  { %12813 = vadd.xlane.f32.xlu0 %v12812_v35 }
0x248b   :  { %12816 = vadd.xlane.f32.xlu1 %v12815_v19 }
0x24cd   :  { %v12683_v22 = vpop.permute.xlu0 %12682 }
0x24ce   :  { %v12704_v24 = vsel %vm364_vm2, %v12144_v47, %v12683_v22 }
0x24d1   :  { %v12685_v23 = vpop.permute.xlu1 %12684 }
0x24d2   :  { %v12691_v62 = vpop.permute.xlu0 %12690  ;;  %v12705_v26 = vsel %vm364_vm2, %v12220_v10, %v12685_v23 }
0x24d3   :  { %v12706_v34 = vsel %vm1693_vm3, %v12704_v24, %v12691_v62  ;;  %v13695_v24 = vld [vmem:[%s17592_s6 + $0x20] sm:$0xff] }
0x24d5   :  { %v12693_v15 = vpop.permute.xlu1 %12692 }
0x24d6   :  { %v12699_v16 = vpop.permute.xlu0 %12698  ;;  %v12707_v55 = vsel %vm1693_vm3, %v12705_v26, %v12693_v15  ;;  %v13696_v15 = vld [vmem:[%s17592_s6 + $0x28] sm:$0xff] }
0x24d7   :  { %v12708_v25 = vsel %vm1696_vm4, %v12706_v34, %v12699_v16  ;;  %v15227_v34 = vpack.c.bf16 %v13696_v15, %v13695_v24  ;;  %v13697_v16 = vld [vmem:[%s17592_s6 + $0x30] sm:$0xff] }
0x24d8   :  { %14980 = vmatprep.mubr.msk.f32.mxu0 %vm71_vm0, %v12708_v25  ;;  %v13698_v25 = vld [vmem:[%s17592_s6 + $0x38] sm:$0xff] }
0x24d9   :  { %v12701_v17 = vpop.permute.xlu1 %12700  ;;  %15228 = vmatprep.subr.bf16.mxu1 %v15227_v34  ;;  %v15231_v26 = vpack.c.bf16 %v13698_v25, %v13697_v16 }
0x24da   :  { %v12709_v57 = vsel %vm1696_vm4, %v12707_v55, %v12701_v17  ;;  %v12998_v55 = vld [vmem:[%s17594_s8] sm:$0xff]  ;;  %v12999_v17 = vld [vmem:[%s17594_s8 + $0x8] sm:$0xff] }
0x24db   :  { %14981 = vmatmul.mubr.msk.f32.vlgmr.msra.gmra.mrb[146].mxu0 %vm71_vm0, %v12709_v57 }
0x2510   :  { %v12814_v0 = vpop.xlane.xlu0 %12813 }
0x2511   :  { %v12818_v27 = vmul.f32 0.03125, %v12814_v0  ;;  %v15211_v0 = vpack.c.bf16 %v12999_v17, %v12998_v55 }
0x2513   :  { %v12820_v28 = vsub.f32 %v17410_v4, %v12818_v27  ;;  %15212 = vmatprep.subr.bf16.mxu0 %v15211_v0 }
0x2514   :  { %15214 = vmatpush3.bf16.msra.mxu0 %v15211_v0 }
0x2515   :  { %v12822_v29 = vmul.f32 %v12820_v28, %v12820_v28 }
0x2517   :  { %v12824_v21 = vsel %vm71_vm0, %v12822_v29, 0.0  ;;  %v13000_v29 = vld [vmem:[%s17594_s8 + $0x10] sm:$0xff] }
0x2518   :  { %12825 = vadd.xlane.f32.xlu1 %v12824_v21  ;;  %v12817_v54 = vpop.xlane.xlu1 %12816  ;;  %v13001_v21 = vld [vmem:[%s17594_s8 + $0x18] sm:$0xff] }
0x2519   :  { %v12819_v50 = vmul.f32 0.03125, %v12817_v54 }
0x251b   :  { %v12821_v60 = vsub.f32 %v17418_v63, %v12819_v50  ;;  %v13004_v50 = vld [vmem:[%s17594_s8 + $0x30] sm:$0xff] }
0x251d   :  { %v12823_v11 = vmul.f32 %v12821_v60, %v12821_v60 }
0x251f   :  { %v12827_v31 = vsel %vm71_vm0, %v12823_v11, 0.0  ;;  %v13685_v11 = vld [vmem:[%s17593_s7] ss:$0 sm:$0xff] }
0x25a5   :  { %v12826_v48 = vpop.xlane.xlu1 %12825 }
0x25a6   :  { %v12830_v53 = vmul.f32 0.03125, %v12826_v48  ;;  %v15215_v48 = vpack.c.bf16 %v13001_v21, %v13000_v29 }
0x25a8   :  { %v12832_v33 = vadd.f32 1e-05, %v12830_v53  ;;  %15216 = vmatprep.subr.bf16.mxu0 %v15215_v48 }
0x25a9   :  { %15218 = vmatpush3.bf16.msra.mxu0 %v15215_v48 }
0x25aa   :  { %15530 = vrsqrt.f32 %v12832_v33 }
0x25ae   :  { %v14982_v38 = vpop.f32.mrb[146].mxu0 }
0x25af   :  { %v12795_v40 = vpop.f32.mrb[147].mxu0  ;;  %v12801_v32 = vadd.f32 %v14982_v38, %v13678_v49  ;;  %v13003_v38 = vld [vmem:[%s17594_s8 + $0x28] sm:$0xff] }
0x25b0   :  { %v12796_v37 = vadd.f32 %v13678_v49, %v12795_v40  ;;  %v13002_v49 = vld [vmem:[%s17594_s8 + $0x20] sm:$0xff] }
0x25b1   :  { %v17444_v36 = vadd.f32 %v15557_v9, %v12801_v32  ;;  %v15219_v40 = vpack.c.bf16 %v13003_v38, %v13002_v49  ;;  %v13005_v32 = vld [vmem:[%s17594_s8 + $0x38] sm:$0xff]  ;;  %v13694_v9 = vld [vmem:[%s17591_s5 + $0x7] ss:$0 sm:$0xff]  ;;  %v15643_v49 = vmov -1.0  }
0x25b2   :  { %v17438_v42 = vadd.f32 %v15556_v39, %v12796_v37  ;;  %v15223_v37 = vpack.c.bf16 %v13005_v32, %v13004_v50 }
0x25b3   :  { %v13104_v20 = vsel %vm71_vm0, %v17444_v36, 0.0  ;;  %15220 = vmatprep.subr.bf16.mxu0 %v15219_v40 }
0x25b4   :  { %v15531_v59 = vpop.eup %15530  ;;  %v13101_v10 = vsel %vm71_vm0, %v17438_v42, 0.0  ;;  %15222 = vmatpush3.bf16.msra.mxu0 %v15219_v40 }
0x25b5   :  { %13102 = vadd.xlane.f32.xlu0 %v13101_v10  ;;  %v12836_v47 = vmul.f32 %v15531_v59, %v12820_v28  ;;  %15224 = vmatprep.subr.bf16.mxu0 %v15223_v37  ;;  %v13693_v59 = vld [vmem:[%s17591_s5 + $0x6] ss:$0 sm:$0xff] }
0x25b7   :  { %v12844_v58 = vmul.f32 %v13683_v18, %v12836_v47 }
0x25b8   :  { %15226 = vmatpush3.bf16.msra.mxu0 %v15223_v37 }
0x25b9   :  { %13105 = vadd.xlane.f32.xlu0 %v13104_v20  ;;  %v12852_v13 = vadd.f32 %v13684_v46, %v12844_v58 }
0x25bb   :  { %14991 = vmatprep.mubr.msk.f32.mxu1 %vm71_vm0, %v12852_v13 }
0x25bd   :  { %12828 = vadd.xlane.f32.xlu0 %v12827_v31 }
0x2642   :  { %v13103_v30 = vpop.xlane.xlu0 %13102 }
0x2643   :  { %v13107_v61 = vmul.f32 0.03125, %v13103_v30 }
0x2645   :  { %v13109_v44 = vsub.f32 %v17438_v42, %v13107_v61 }
0x2646   :  { %v13106_v5 = vpop.xlane.xlu0 %13105 }
0x2647   :  { %v13108_v14 = vmul.f32 0.03125, %v13106_v5  ;;  %v13111_v2 = vmul.f32 %v13109_v44, %v13109_v44 }
0x2649   :  { %v13110_v43 = vsub.f32 %v17444_v36, %v13108_v14  ;;  %v13113_v6 = vsel %vm71_vm0, %v13111_v2, 0.0 }
0x264a   :  { %13114 = vadd.xlane.f32.xlu1 %v13113_v6  ;;  %v12829_v8 = vpop.xlane.xlu0 %12828 }
0x264b   :  { %v12831_v12 = vmul.f32 0.03125, %v12829_v8  ;;  %v13112_v7 = vmul.f32 %v13110_v43, %v13110_v43 }
0x264d   :  { %v12833_v35 = vadd.f32 1e-05, %v12831_v12  ;;  %v13116_v45 = vsel %vm71_vm0, %v13112_v7, 0.0 }
0x264e   :  { %13117 = vadd.xlane.f32.xlu0 %v13116_v45 }
0x264f   :  { %15532 = vrsqrt.f32 %v12833_v35 }
0x2659   :  { %v15533_v19 = vpop.eup %15532 }
0x265a   :  { %v12837_v22 = vmul.f32 %v15533_v19, %v12821_v60 }
0x265c   :  { %v12845_v23 = vmul.f32 %v13683_v18, %v12837_v22 }
0x265e   :  { %v12853_v62 = vadd.f32 %v13684_v46, %v12845_v23 }
0x2660   :  { %14992 = vmatmul.mubr.msk.f32.vlgmr.msra.gmra.mrb[148].mxu1 %vm71_vm0, %v12853_v62 }
0x2661   :  { %15230 = vmatpush3.bf16.msra.mxu1 %v15227_v34 }
0x2662   :  { %15232 = vmatprep.subr.bf16.mxu1 %v15231_v26 }
0x2665   :  { %15234 = vmatpush3.bf16.msra.mxu1 %v15231_v26 }
0x26d7   :  { %v13115_v57 = vpop.xlane.xlu1 %13114 }
0x26d8   :  { %v13119_v27 = vmul.f32 0.03125, %v13115_v57 }
0x26da   :  { %v13121_v28 = vadd.f32 1e-05, %v13119_v27 }
0x26db   :  { %v13118_v54 = vpop.xlane.xlu0 %13117 }
0x26dc   :  { %15534 = vrsqrt.f32 %v13121_v28  ;;  %v13120_v53 = vmul.f32 0.03125, %v13118_v54 }
0x26de   :  { %v13122_v33 = vadd.f32 1e-05, %v13120_v53 }
0x26e0   :  { %15536 = vrsqrt.f32 %v13122_v33 }
0x26e6   :  { %v15535_v39 = vpop.eup %15534 }
0x26e7   :  { %v13125_v60 = vmul.f32 %v15535_v39, %v13109_v44 }
0x26e9   :  { %v13133_v10 = vmul.f32 %v13693_v59, %v13125_v60 }
0x26ea   :  { %v15537_v18 = vpop.eup %15536 }
0x26eb   :  { %v13126_v47 = vmul.f32 %v15537_v18, %v13110_v43  ;;  %v13141_v46 = vadd.f32 %v13694_v9, %v13133_v10 }
0x26ed   :  { %v13134_v58 = vmul.f32 %v13693_v59, %v13126_v47  ;;  %15021 = vmatprep.mubr.msk.f32.mxu1 %vm71_vm0, %v13141_v46  ;;  %v13703_v47 = vld [vmem:[%s17594_s8 + $0x40] sm:$0xff]  ;;  %v13704_v46 = vld [vmem:[%s17594_s8 + $0x48] sm:$0xff] }
0x26ef   :  { %v13142_v20 = vadd.f32 %v13694_v9, %v13134_v58  ;;  %v15235_v58 = vpack.c.bf16 %v13704_v46, %v13703_v47 }
0x26f1   :  { %15022 = vmatmul.mubr.msk.f32.vlgmr.msra.gmra.mrb[150].mxu1 %vm71_vm0, %v13142_v20  ;;  %15236 = vmatprep.subr.bf16.mxu1 %v15235_v58  ;;  %v13705_v20 = vld [vmem:[%s17594_s8 + $0x50] sm:$0xff] }
0x26f2   :  { %15238 = vmatpush3.bf16.msra.mxu1 %v15235_v58 }
0x2733   :  { %v14993_v13 = vpop.f32.mrb[148].mxu1 }
0x2734   :  { %v12943_v31 = vadd.f32 %v14993_v13, %v13685_v11  ;;  %v12937_v51 = vpop.f32.mrb[149].mxu1 }
0x2735   :  { %v12938_v1 = vadd.f32 %v13685_v11, %v12937_v51  ;;  %v13706_v11 = vld [vmem:[%s17594_s8 + $0x58] sm:$0xff]  ;;  %v13708_v51 = vld [vmem:[%s17594_s8 + $0x68] sm:$0xff] }
0x2736   :  { %v12949_v3 = vmul.f32 0.70710677, %v12943_v31  ;;  %v12947_v9 = vmul.f32 0.5, %v12943_v31  ;;  %v15239_v13 = vpack.c.bf16 %v13706_v11, %v13705_v20  ;;  %v13707_v31 = vld [vmem:[%s17594_s8 + $0x60] sm:$0xff] }
0x2737   :  { %v12948_v41 = vmul.f32 0.70710677, %v12938_v1  ;;  %v12946_v59 = vmul.f32 0.5, %v12938_v1  ;;  %v15243_v1 = vpack.c.bf16 %v13708_v51, %v13707_v31 }
0x2738   :  { %v12955_v52 = vand.u32 2147483647, %v12949_v3  ;;  %vm12951_vm5 = vcmp.ge.f32.partialorder %v12949_v3, 0.0  ;;  %15240 = vmatprep.subr.bf16.mxu1 %v15239_v13  ;;  %v13709_v3 = vld [vmem:[%s17594_s8 + $0x70] sm:$0xff] }
0x2739   :  { %v12954_v56 = vand.u32 2147483647, %v12948_v41  ;;  %vm12950_vm6 = vcmp.ge.f32.partialorder %v12948_v41, 0.0  ;;  %v12953_v38 = vsel %vm12951_vm5, 1.0, %v15643_v49  ;;  %15242 = vmatpush3.bf16.msra.mxu1 %v15239_v13  ;;  %v13710_v41 = vld [vmem:[%s17594_s8 + $0x78] sm:$0xff] }
0x273a   :  { %v12957_v30 = vmul.f32 0.3275911, %v12955_v52  ;;  %v12981_v14 = vsub.f32 0.0, %v12955_v52  ;;  %v12952_v32 = vsel %vm12950_vm6, 1.0, %v15643_v49  ;;  %15244 = vmatprep.subr.bf16.mxu1 %v15243_v1 }
0x273b   :  { %v12956_v61 = vmul.f32 0.3275911, %v12954_v56  ;;  %v12980_v2 = vsub.f32 0.0, %v12954_v56 }
0x273c   :  { %v12959_v44 = vadd.f32 1.0, %v12957_v30  ;;  %v12983_v6 = vmul.f32 %v12981_v14, %v12955_v52  ;;  %v15247_v52 = vpack.c.bf16 %v13710_v41, %v13709_v3 }
0x273d   :  { %v12958_v5 = vadd.f32 1.0, %v12956_v61  ;;  %v12982_v7 = vmul.f32 %v12980_v2, %v12954_v56  ;;  %15246 = vmatpush3.bf16.msra.mxu1 %v15243_v1  ;;  %v13700_v56 = vld [vmem:[%s17593_s7 + $0x1] ss:$0 sm:$0xff]  ;;  %v13688_v1 = vld [vmem:[%s17595_s9] ss:$0 sm:$0xff] }
0x273e   :  { %15538 = vrcp.f32 %v12959_v44  ;;  %v12986_v19 = vmul.f32 1.442695, %v12983_v6  ;;  %15248 = vmatprep.subr.bf16.mxu1 %v15247_v52 }
0x273f   :  { %15540 = vrcp.f32 %v12958_v5  ;;  %v12984_v62 = vmul.f32 1.442695, %v12982_v7 }
0x2740   :  { %15542 = vpow2.f32 %v12986_v19 }
0x2741   :  { %15544 = vpow2.f32 %v12984_v62  ;;  %15250 = vmatpush3.bf16.msra.mxu1 %v15247_v52 }
0x2748   :  { %v15539_v43 = vpop.eup %15538 }
0x2749   :  { %v15541_v8 = vpop.eup %15540  ;;  %v12963_v12 = vmul.f32 1.0614054, %v15539_v43 }
0x274a   :  { %v12962_v35 = vmul.f32 1.0614054, %v15541_v8  ;;  %v15543_v29 = vpop.eup %15542 }
0x274b   :  { %v12965_v45 = vadd.f32 -1.4531521, %v12963_v12  ;;  %v15545_v54 = vpop.eup %15544 }
0x274c   :  { %v12964_v22 = vadd.f32 -1.4531521, %v12962_v35 }
0x274d   :  { %v12967_v23 = vmul.f32 %v15539_v43, %v12965_v45 }
0x274e   :  { %v12966_v24 = vmul.f32 %v15541_v8, %v12964_v22 }
0x274f   :  { %v12969_v15 = vadd.f32 1.4214138, %v12967_v23 }
0x2750   :  { %v12968_v34 = vadd.f32 1.4214138, %v12966_v24 }
0x2751   :  { %v12971_v16 = vmul.f32 %v15539_v43, %v12969_v15 }
0x2752   :  { %v12970_v25 = vmul.f32 %v15541_v8, %v12968_v34 }
0x2753   :  { %v12973_v26 = vadd.f32 -0.28449672, %v12971_v16 }
0x2754   :  { %v12972_v55 = vadd.f32 -0.28449672, %v12970_v25 }
0x2755   :  { %v12975_v17 = vmul.f32 %v15539_v43, %v12973_v26 }
0x2756   :  { %v12974_v57 = vmul.f32 %v15541_v8, %v12972_v55 }
0x2757   :  { %v12977_v0 = vadd.f32 0.2548296, %v12975_v17 }
0x2758   :  { %v12976_v27 = vadd.f32 0.2548296, %v12974_v57 }
0x2759   :  { %v12979_v28 = vmul.f32 %v15539_v43, %v12977_v0 }
0x275a   :  { %v12978_v21 = vmul.f32 %v15541_v8, %v12976_v27 }
0x275b   :  { %v12989_v48 = vmul.f32 %v15543_v29, %v12979_v28 }
0x275c   :  { %v12988_v53 = vmul.f32 %v15545_v54, %v12978_v21 }
0x275d   :  { %v12991_v33 = vsub.f32 1.0, %v12989_v48 }
0x275e   :  { %v12990_v40 = vsub.f32 1.0, %v12988_v53 }
0x275f   :  { %v12993_v50 = vmul.f32 %v12991_v33, %v12953_v38 }
0x2760   :  { %v12992_v37 = vmul.f32 %v12990_v40, %v12952_v32 }
0x2761   :  { %v12995_v39 = vadd.f32 1.0, %v12993_v50 }
0x2762   :  { %v12994_v60 = vadd.f32 1.0, %v12992_v37 }
0x2763   :  { %v12997_v18 = vmul.f32 %v12995_v39, %v12947_v9 }
0x2764   :  { %v12996_v10 = vmul.f32 %v12994_v60, %v12946_v59 }
0x2766   :  { %15010 = vmatprep.mubr.msk.f32.mxu0 %vm13013_vm7, %v12996_v10 }
0x2767   :  { %15011 = vmatmul.mubr.msk.f32.vlgmr.msra.gmra.mrb[148].mxu0 %vm13013_vm7, %v12997_v18 }
0x27c4   :  { %v15023_v30 = vpop.f32.mrb[150].mxu1 }
0x27c5   :  { %v13234_v61 = vadd.f32 %v15023_v30, %v13700_v56  ;;  %v13228_v44 = vpop.f32.mrb[151].mxu1 }
0x27c6   :  { %v13229_v5 = vadd.f32 %v13700_v56, %v13228_v44 }
0x27c7   :  { %v13240_v14 = vmul.f32 0.70710677, %v13234_v61  ;;  %v13238_v13 = vmul.f32 0.5, %v13234_v61  ;;  %v13712_v61 = vld [vmem:[%s17595_s9 + $0x1] ss:$0 sm:$0xff] }
0x27c8   :  { %v13239_v2 = vmul.f32 0.70710677, %v13229_v5  ;;  %v13237_v20 = vmul.f32 0.5, %v13229_v5 }
0x27c9   :  { %v13246_v43 = vand.u32 2147483647, %v13240_v14  ;;  %vm13242_vm8 = vcmp.ge.f32.partialorder %v13240_v14, 0.0 }
0x27ca   :  { %v13245_v6 = vand.u32 2147483647, %v13239_v2  ;;  %vm13241_vm9 = vcmp.ge.f32.partialorder %v13239_v2, 0.0  ;;  %v13244_v9 = vsel %vm13242_vm8, 1.0, %v15643_v49 }
0x27cb   :  { %v13248_v8 = vmul.f32 0.3275911, %v13246_v43  ;;  %v13272_v45 = vsub.f32 0.0, %v13246_v43  ;;  %v13243_v47 = vsel %vm13241_vm9, 1.0, %v15643_v49 }
0x27cc   :  { %v13247_v12 = vmul.f32 0.3275911, %v13245_v6  ;;  %v13271_v19 = vsub.f32 0.0, %v13245_v6 }
0x27cd   :  { %v13250_v7 = vadd.f32 1.0, %v13248_v8  ;;  %v13274_v23 = vmul.f32 %v13272_v45, %v13246_v43 }
0x27ce   :  { %v13249_v35 = vadd.f32 1.0, %v13247_v12  ;;  %v13273_v15 = vmul.f32 %v13271_v19, %v13245_v6 }
0x27cf   :  { %15546 = vrcp.f32 %v13250_v7  ;;  %v13277_v25 = vmul.f32 1.442695, %v13274_v23 }
0x27d0   :  { %15548 = vrcp.f32 %v13249_v35  ;;  %v13275_v17 = vmul.f32 1.442695, %v13273_v15 }
0x27d1   :  { %15550 = vpow2.f32 %v13277_v25 }
0x27d2   :  { %15552 = vpow2.f32 %v13275_v17 }
0x27d9   :  { %v15547_v22 = vpop.eup %15546 }
0x27da   :  { %v15549_v62 = vpop.eup %15548  ;;  %v13254_v24 = vmul.f32 1.0614054, %v15547_v22 }
0x27db   :  { %v13253_v34 = vmul.f32 1.0614054, %v15549_v62  ;;  %v15551_v50 = vpop.eup %15550 }
0x27dc   :  { %v13256_v16 = vadd.f32 -1.4531521, %v13254_v24  ;;  %v15553_v37 = vpop.eup %15552 }
0x27dd   :  { %v13255_v26 = vadd.f32 -1.4531521, %v13253_v34 }
0x27de   :  { %v13258_v55 = vmul.f32 %v15547_v22, %v13256_v16 }
0x27df   :  { %v13257_v57 = vmul.f32 %v15549_v62, %v13255_v26 }
0x27e0   :  { %v13260_v0 = vadd.f32 1.4214138, %v13258_v55 }
0x27e1   :  { %v13259_v27 = vadd.f32 1.4214138, %v13257_v57 }
0x27e2   :  { %v13262_v28 = vmul.f32 %v15547_v22, %v13260_v0 }
0x27e3   :  { %v13261_v29 = vmul.f32 %v15549_v62, %v13259_v27 }
0x27e4   :  { %v13264_v21 = vadd.f32 -0.28449672, %v13262_v28 }
0x27e5   :  { %v13263_v54 = vadd.f32 -0.28449672, %v13261_v29 }
0x27e6   :  { %v13266_v48 = vmul.f32 %v15547_v22, %v13264_v21 }
0x27e7   :  { %v13265_v53 = vmul.f32 %v15549_v62, %v13263_v54 }
0x27e8   :  { %v13268_v33 = vadd.f32 0.2548296, %v13266_v48 }
0x27e9   :  { %v13267_v38 = vadd.f32 0.2548296, %v13265_v53 }
0x27ea   :  { %v13270_v40 = vmul.f32 %v15547_v22, %v13268_v33 }
0x27eb   :  { %v13269_v32 = vmul.f32 %v15549_v62, %v13267_v38 }
0x27ec   :  { %v13280_v39 = vmul.f32 %v15551_v50, %v13270_v40 }
0x27ed   :  { %v13279_v59 = vmul.f32 %v15553_v37, %v13269_v32 }
0x27ee   :  { %v13282_v60 = vsub.f32 1.0, %v13280_v39 }
0x27ef   :  { %v13281_v10 = vsub.f32 1.0, %v13279_v59 }
0x27f0   :  { %v13284_v18 = vmul.f32 %v13282_v60, %v13244_v9 }
0x27f1   :  { %v13283_v46 = vmul.f32 %v13281_v10, %v13243_v47 }
0x27f2   :  { %v13286_v58 = vadd.f32 1.0, %v13284_v18 }
0x27f3   :  { %v13285_v11 = vadd.f32 1.0, %v13283_v46 }
0x27f4   :  { %v13288_v51 = vmul.f32 %v13286_v58, %v13238_v13 }
0x27f5   :  { %v13287_v31 = vmul.f32 %v13285_v11, %v13237_v20 }
0x27f7   :  { %15040 = vmatprep.mubr.msk.f32.mxu1 %vm13013_vm7, %v13287_v31 }
0x27f8   :  { %15041 = vmatmul.mubr.msk.f32.vlgmr.msra.gmra.mrb[152].mxu1 %vm13013_vm7, %v13288_v51 }
0x283a   :  { %v15012_v3 = vpop.f32.mrb[148].mxu0 }
0x283b   :  { %v13092_v41 = vadd.f32 %v15012_v3, %v13688_v1  ;;  %v13086_v52 = vpop.f32.mrb[149].mxu0 }
0x283c   :  { %v13087_v56 = vadd.f32 %v13688_v1, %v13086_v52 }
0x283d   :  { %v13096_v49 = vadd.f32 %v13092_v41, %v17418_v63 }
0x283e   :  { %v13095_v30 = vadd.f32 %v13087_v56, %v17410_v4 }
0x283f   :  { %13390 = vst.msk [vmem:[#allocation7 + $0x10] sm:$0xff] %vm71_vm0, %v13096_v49 }
0x2840   :  { %13389 = vst.msk [vmem:[#allocation7] sm:$0xff] %vm71_vm0, %v13095_v30 }
0x28cb   :  { %v15042_v44 = vpop.f32.mrb[152].mxu1 }
0x28cc   :  { %v13384_v5 = vadd.f32 %v15042_v44, %v13712_v61  ;;  %v13378_v14 = vpop.f32.mrb[153].mxu1 }
0x28cd   :  { %v13379_v2 = vadd.f32 %v13712_v61, %v13378_v14 }
0x28ce   :  { %v13388_v43 = vadd.f32 %v13384_v5, %v17444_v36 }
0x28cf   :  { %v13387_v63 = vadd.f32 %v13379_v2, %v17438_v42 }
0x28d0   :  { %13393 = vst.msk [vmem:[#allocation7 + $0x18] sm:$0xff] %vm71_vm0, %v13388_v43 }
0x28d1   :  { %13392 = vst.msk [vmem:[#allocation7 + $0x8] sm:$0xff] %vm71_vm0, %v13387_v63 }
0x28d2   :  { %15613 = shalt.err (!%p15610_p6)
}
0x28d3   :  { %s15614_s21 = scalar_lea.hbm %s17596_s10, 512 }
0x28d4   :  { %p15615_p7 = scmp.ne.s32.totalorder %s17596_s10, %s15614_s21  ;;  %p15618_p8 = scmp.lt.u32.totalorder %s15614_s21, %s17596_s10 }
0x28d6   :  { %p15620_p9 = pnand %p15618_p8, %p15615_p7 }
0x28d8   :  { %15623 = shalt.err (!%p15620_p9)
}
0x28d9   :  { %13405 = dma.vmem_to_hbm [thread:$0]  %s13400_s18, 512, %s17596_s10, [#allocation4], %s15631_s23, %s15631_s23, %s15632_s24  }
0x28da   :  { %15628 = dma.done.wait [#allocation4], 512  }
0x28db   :  { %15629 = vsyncadd [#allocation4], 4294966784 }
0x28dc   :  { %13409 = vsyncpa [#allocation3], 1 }
0x28dd   :  { %13410 = vsyncpa [#allocation6], 1 }
0x28de   :  { %13411 = vsyncpa [#allocation4], 1 }

</bundles_post_ra>
